<compile_context>
chip_gen: v7x
topology: tpu7x:2x2x1
jax: 0.10.0
libtpu: 0.0.40
codegen_flags: <defaults>
</compile_context>

<pallas_src>
import functools

import jax
import jax.numpy as jnp
from jax import lax
from jax.experimental import pallas as pl
from jax.experimental.pallas import tpu as pltpu

PAD = 18                        # max dilation; every H tile carries a +/-PAD halo
DILATIONS = (6, 12, 18)
OFF_TAPS = tuple((kh, kw) for kh in range(3) for kw in range(3)
                 if not (kh == 1 and kw == 1))       # 8 off-center taps
LANE = 128                      # lane width
SUB = 16                        # bf16 sublane packing


def _round_up(x, m):
    return (x + m - 1) // m * m


def _aspp_kernel(x_ref, wc_ref, wt_ref, b_ref, o_ref, acc_ref,
                 *, tile_h, w_eff, tile_cin):
    """One (batch*H-tile, Cin-chunk) grid step.

    x_ref  : (1, tile_h + 2*PAD, w_eff + 2*PAD, tile_cin)  bf16  (halo tile)
    wc_ref : (tile_cin, Cout_p)          bf16  merged center tap
    wt_ref : (3, 8, tile_cin, Cout_p)    bf16  off-center composite taps
    b_ref  : (1, 1, Cout_p)              f32   per-batch fused bias (incl. pooling)
    o_ref  : (1, tile_h*w_eff, Cout_p)   f32
    acc_ref: (tile_h*w_eff, Cout_p)      f32   VMEM scratch accumulator
    """
    k = pl.program_id(2)
    hw = tile_h * w_eff

    @pl.when(k == 0)
    def _():
        acc_ref[...] = jnp.zeros_like(acc_ref)

    # Merged center tap (1x1 branch + the 3 dilated-branch centers): 1 matmul.
    xc = x_ref[0, PAD:PAD + tile_h, PAD:PAD + w_eff, :].reshape(hw, tile_cin)
    acc_ref[...] += jnp.dot(xc, wc_ref[...], preferred_element_type=jnp.float32)

    # Off-center taps, one dilation at a time: only that dilation's 3
    # width-shifted slabs are live.  w_eff % 16 == 0 -> the H sub-slices and
    # the (tile_h, w_eff) -> (hw,) reshapes are layout preserving.
    # TODO(synk): a lax.fori_loop(unroll=True) over a (24, tile_cin, Cout_p)
    # weight view with an SMEM (slab, row) table would bound live ranges even
    # more tightly if register pressure ever shows up in the bundle dump.
    for di, d in enumerate(DILATIONS):
        slabs = []
        for s in range(3):                                   # kw = 0, 1, 2
            ws = PAD + (s - 1) * d
            slabs.append(
                x_ref[0, PAD - d:PAD + d + tile_h, ws:ws + w_eff, :])
        for ti, (kh, kw) in enumerate(OFF_TAPS):
            win = slabs[kw][kh * d:kh * d + tile_h].reshape(hw, tile_cin)
            acc_ref[...] += jnp.dot(win, wt_ref[di, ti],
                                    preferred_element_type=jnp.float32)

    @pl.when(k == pl.num_programs(2) - 1)
    def _():
        # Single bias add; lane/sublane-dense store (flattened output slab).
        o_ref[0] = acc_ref[...] + b_ref[0]


def _fold_params(params, x_mean, Cin, Cout, Cin_p, Cout_p):
    """Fold the output 1x1 conv into per-tap composite weights and fold the
    (hoisted) image-pooling branch into a per-batch bias row.  f32 fold math;
    weights cast to bf16 and zero-padded to lane-dense shapes."""
    (w1, b1, w2, b2, w3, b3, w4, b4, w5, b5, wo, bo) = [
        p.astype(jnp.float32) for p in params]
    blk = [wo[i * Cout:(i + 1) * Cout, :] for i in range(5)]     # (Cout, Cout)

    c2 = jnp.einsum('hwio,oc->hwic', w2, blk[1])
    c3 = jnp.einsum('hwio,oc->hwic', w3, blk[2])
    c4 = jnp.einsum('hwio,oc->hwic', w4, blk[3])

    # Shared center tap: 1x1 branch + the three dilated-branch center taps.
    w_center = w1 @ blk[0] + c2[1, 1] + c3[1, 1] + c4[1, 1]      # (Cin, Cout)
    w_taps = jnp.stack(
        [jnp.stack([c[kh, kw] for (kh, kw) in OFF_TAPS], axis=0)
         for c in (c2, c3, c4)], axis=0)                         # (3,8,Cin,Cout)

    # Image-pooling branch (bilinear-from-1x1 == exact broadcast), hoisted:
    # (mean(x) @ w5 + b5) @ blk4 -> per-batch bias row, kept in f32.
    pool = (x_mean @ w5) @ blk[4]                                # (N, Cout)
    b_const = (bo + b1 @ blk[0] + b2 @ blk[1] + b3 @ blk[2]
               + b4 @ blk[3] + b5 @ blk[4])                      # (1, Cout)
    b_all = (b_const + pool)[:, None, :]                         # (N, 1, Cout)

    def pad_io(w):
        pads = [(0, 0)] * (w.ndim - 2) + [(0, Cin_p - Cin), (0, Cout_p - Cout)]
        return jnp.pad(w, pads)

    w_center = pad_io(w_center).astype(jnp.bfloat16)
    w_taps = pad_io(w_taps).astype(jnp.bfloat16)
    b_all = jnp.pad(b_all, ((0, 0), (0, 0), (0, Cout_p - Cout)))  # stays f32
    return w_center, w_taps, b_all


def _build_call(N, nH, nK, tile_h, w_eff, tile_cin, Cout_p,
                single_buffer_weights):
    th_blk = tile_h + 2 * PAD
    wp_eff = w_eff + 2 * PAD
    hw = tile_h * w_eff

    kernel = functools.partial(_aspp_kernel, tile_h=tile_h, w_eff=w_eff,
                               tile_cin=tile_cin)

    def wspec(block_shape, index_map):
        # Grid-invariant (single Cin chunk) weights: single-buffer them so the
        # second pipeline copy doesn't waste VMEM.
        if single_buffer_weights and nK == 1:
            return pl.BlockSpec(block_shape, index_map,
                                pipeline_mode=pl.Buffered(1))
        return pl.BlockSpec(block_shape, index_map)

    in_specs = [
        pl.BlockSpec((1, th_blk, wp_eff, tile_cin),
                     lambda n, h, k: (n * nH + h, 0, 0, k)),
        wspec((tile_cin, Cout_p), lambda n, h, k: (k, 0)),
        wspec((3, 8, tile_cin, Cout_p), lambda n, h, k: (0, 0, k, 0)),
        pl.BlockSpec((1, 1, Cout_p), lambda n, h, k: (n, 0, 0)),
    ]
    out_spec = pl.BlockSpec((1, hw, Cout_p), lambda n, h, k: (n, h, 0))

    # VMEM budget from the real live set: double-buffered input/output blocks,
    # weight blocks (x1 if single-buffered), f32 scratch accumulator and the
    # per-dilation slab temporaries, plus fixed headroom.
    w_bufs = 1 if (single_buffer_weights and nK == 1) else 2
    x_blk = th_blk * wp_eff * tile_cin * 2
    w_blk = 25 * tile_cin * Cout_p * 2
    o_blk = hw * Cout_p * 4
    slab_tmp = 4 * th_blk * w_eff * tile_cin * 2
    vmem = (2 * x_blk + w_bufs * w_blk + 2 * o_blk + o_blk + slab_tmp
            + 2 * Cout_p * 4 + (8 << 20))
    vmem = int(min(vmem, 100 << 20))

    return pl.pallas_call(
        kernel,
        out_shape=jax.ShapeDtypeStruct((N, nH * hw, Cout_p), jnp.float32),
        grid_spec=pltpu.PrefetchScalarGridSpec(
            num_scalar_prefetch=0,
            grid=(N, nH, nK),
            in_specs=in_specs,
            out_specs=out_spec,
            scratch_shapes=[pltpu.VMEM((hw, Cout_p), jnp.float32)],
        ),
        compiler_params=pltpu.CompilerParams(
            dimension_semantics=("parallel", "parallel", "arbitrary"),
            vmem_limit_bytes=vmem),
    )


def aspp_forward(x_nchw, params, *, tile_h=None, tile_cin_max=512):
    """x_nchw: (N, Cin, H, W) float32.  Returns (N, Cout, H, W) float32."""
    N, Cin, H, W = x_nchw.shape
    Cout = params[0].shape[1]
    Cin_p = _round_up(Cin, LANE)
    Cout_p = _round_up(Cout, LANE)

    if tile_h is None:
        # Small images: 8-row tiles (exercises the H-tile axis, minimal pad
        # waste).  Larger images: 16 rows keeps matmul M >= ~1k rows while the
        # halo'd block stays well inside v7x's 64 MiB VMEM.
        tile_h = 8 if H <= 32 else 16
    w_eff = _round_up(W, SUB)          # layout-preserving reshapes & dense stores
    H_eff = _round_up(H, tile_h)
    nH = H_eff // tile_h
    if Cin_p <= tile_cin_max:
        tile_cin = Cin_p
    else:
        tile_cin = LANE
        for cand in range(tile_cin_max // LANE * LANE, LANE - 1, -LANE):
            if Cin_p % cand == 0:
                tile_cin = cand
                break
    nK = Cin_p // tile_cin

    # Pooling branch hoisted to the wrapper (f32 math, true H*W divisor).
    x_mean = jnp.mean(x_nchw.astype(jnp.float32), axis=(2, 3))   # (N, Cin)
    w_center, w_taps, b_all = _fold_params(params, x_mean, Cin, Cout,
                                           Cin_p, Cout_p)

    # NHWC bf16 activations; zero-pad: +PAD halo, H->H_eff, W->w_eff, Cin->Cin_p.
    # The zeros reproduce the convs' `padding=dilation`; extra rows/cols are
    # computed and discarded after the kernel.
    x_nhwc = jnp.transpose(x_nchw, (0, 2, 3, 1)).astype(jnp.bfloat16)
    xp = jnp.pad(x_nhwc, ((0, 0),
                          (PAD, PAD + H_eff - H),
                          (PAD, PAD + w_eff - W),
                          (0, Cin_p - Cin)))

    # Overlap-and-save H tiles: each tile carries its +/-PAD row halo, so plain
    # BlockSpec auto-pipelining works with a small per-step resident set.  The
    # (tile_h+2*PAD)/tile_h HBM duplication is negligible next to the
    # 25-matmul compute.
    # TODO(synk): switch the input to memory_space=pl.ANY + manual halo DMA if
    # the duplicated HBM read traffic ever shows up on a roofline.
    th_blk = tile_h + 2 * PAD
    x_tiles = jnp.stack(
        [xp[:, h * tile_h:h * tile_h + th_blk] for h in range(nH)], axis=1)
    x_tiles = x_tiles.reshape(N * nH, th_blk, w_eff + 2 * PAD, Cin_p)

    args = (x_tiles, w_center, w_taps, b_all)
    try:
        call = _build_call(N, nH, nK, tile_h, w_eff, tile_cin, Cout_p, True)
        out_flat = jax.block_until_ready(call(*args))
    except Exception:
        # pl.Buffered(1) unsupported on this jax version -> default buffering.
        call = _build_call(N, nH, nK, tile_h, w_eff, tile_cin, Cout_p, False)
        out_flat = call(*args)

    out = out_flat.reshape(N, H_eff, w_eff, Cout_p)[:, :H, :W, :Cout]
    return jnp.transpose(out, (0, 3, 1, 2))


def make_params(key, in_channels, out_channels):
    """Deterministic synthetic parameters (shapes follow the nn.Module)."""
    ks = jax.random.split(key, 12)
    s = 0.1

    def rnd(k, shape):
        return (s * jax.random.normal(k, shape)).astype(jnp.float32)

    w1 = rnd(ks[0], (in_channels, out_channels))              # conv1 1x1
    b1 = rnd(ks[1], (1, out_channels))
    w2 = rnd(ks[2], (3, 3, in_channels, out_channels))        # conv2 d=6
    b2 = rnd(ks[3], (1, out_channels))
    w3 = rnd(ks[4], (3, 3, in_channels, out_channels))        # conv3 d=12
    b3 = rnd(ks[5], (1, out_channels))
    w4 = rnd(ks[6], (3, 3, in_channels, out_channels))        # conv4 d=18
    b4 = rnd(ks[7], (1, out_channels))
    w5 = rnd(ks[8], (in_channels, out_channels))               # pooling 1x1
    b5 = rnd(ks[9], (1, out_channels))
    wo = rnd(ks[10], (5 * out_channels, out_channels))         # out 1x1
    bo = rnd(ks[11], (1, out_channels))
    return (w1, b1, w2, b2, w3, b3, w4, b4, w5, b5, wo, bo)


def aspp_reference(x_nchw, params):
    """Pure-JAX f32 reference (mirrors the PyTorch forward) for verification."""
    (w1, b1, w2, b2, w3, b3, w4, b4, w5, b5, wo, bo) = params
    x = jnp.transpose(x_nchw, (0, 2, 3, 1)).astype(jnp.float32)  # NHWC
    dn = ("NHWC", "HWIO", "NHWC")

    def conv1x1(inp, w, b):
        return lax.conv_general_dilated(
            inp, w.reshape(1, 1, w.shape[0], w.shape[1]),
            (1, 1), [(0, 0), (0, 0)], dimension_numbers=dn) + b

    def conv3x3(inp, w, b, d):
        return lax.conv_general_dilated(
            inp, w, (1, 1), [(d, d), (d, d)], rhs_dilation=(d, d),
            dimension_numbers=dn) + b

    y1 = conv1x1(x, w1, b1)
    y2 = conv3x3(x, w2, b2, 6)
    y3 = conv3x3(x, w3, b3, 12)
    y4 = conv3x3(x, w4, b4, 18)
    pooled = jnp.mean(x, axis=(1, 2), keepdims=True)            # (N,1,1,Cin)
    y5 = conv1x1(pooled, w5, b5)                                 # (N,1,1,Cout)
    y5 = jnp.broadcast_to(y5, y4.shape)     # bilinear from 1x1 == broadcast
    cat = jnp.concatenate([y1, y2, y3, y4, y5], axis=-1)
    out = conv1x1(cat, wo, bo)
    return jnp.transpose(out, (0, 3, 1, 2))


if __name__ == "__main__":
    key = jax.random.PRNGKey(0)
    k_x, k_p = jax.random.split(key)

    N, Cin, H, W = 2, 4, 16, 16
    Cout = 8

    x = jax.random.normal(k_x, (N, Cin, H, W), dtype=jnp.float32)
    params = make_params(k_p, Cin, Cout)

    out = aspp_forward(x, params)          # exercises nH=2 H tiles, nK=1
    out = jax.block_until_ready(out)

    ref = aspp_reference(x, params)
    assert out.shape == (N, Cout, H, W), out.shape
    # bf16 activations/weights + (x@A)@B -> x@(A@B) reassociation => relaxed tol
    assert jnp.allclose(out, ref, rtol=2e-2, atol=2e-2), (
        float(jnp.max(jnp.abs(out - ref))))

    print("KERNEL_OK")
</pallas_src>

<mosaic_0001>
module attributes {stable_mosaic.version = 11 : i64} {
  func.func @_aspp_kernel(%arg0: i32, %arg1: i32, %arg2: i32, %arg3: memref<1x44x52x128xbf16, #tpu.memory_space<vmem>>, %arg4: memref<128x128xbf16, #tpu.memory_space<vmem>>, %arg5: memref<3x8x128x128xbf16, #tpu.memory_space<vmem>>, %arg6: memref<1x1x128xf32, #tpu.memory_space<vmem>>, %arg7: memref<1x128x128xf32, #tpu.memory_space<vmem>>, %arg8: memref<128x128xf32, #tpu.memory_space<vmem>>) attributes {dimension_semantics = [#tpu.dimension_semantics<parallel>, #tpu.dimension_semantics<parallel>, #tpu.dimension_semantics<arbitrary>], iteration_bounds = array<i64: 2, 2, 1>, scalar_prefetch = 0 : i64, scratch_operands = 1 : i64, tpu.core_type = #tpu.core_type<tc>, window_params = [{transform_indices = @transform_0, window_bounds = array<i64: 1, 44, 52, 128>}, {pipeline_mode = #tpu.pipeline_mode<synchronous>, transform_indices = @transform_1, window_bounds = array<i64: 128, 128>}, {pipeline_mode = #tpu.pipeline_mode<synchronous>, transform_indices = @transform_2, window_bounds = array<i64: 3, 8, 128, 128>}, {transform_indices = @transform_3, window_bounds = array<i64: 1, 1, 128>}, {transform_indices = @transform_4, window_bounds = array<i64: 1, 128, 128>}]} {
    %c0_i32 = arith.constant 0 : i32
    %0 = arith.cmpi eq, %arg2, %c0_i32 : i32
    %1 = arith.extui %0 : i1 to i32
    %c0_i32_0 = arith.constant 0 : i32
    %2 = arith.cmpi ne, %1, %c0_i32_0 : i32
    scf.if %2 {
      %cst_252 = arith.constant 0.000000e+00 : f32
      %224 = vector.broadcast %cst_252 : f32 to vector<128x128xf32>
      %c0_253 = arith.constant 0 : index
      %c0_254 = arith.constant 0 : index
      %225 = vector.load %arg8[%c0_253, %c0_254] : memref<128x128xf32, #tpu.memory_space<vmem>>, vector<128x128xf32>
      tpu.vector_store %arg8[%c0_253, %c0_254], %224 {strides = array<i32>} : memref<128x128xf32, #tpu.memory_space<vmem>>, vector<128x128xf32>,
    } else {
    }
    %c0 = arith.constant 0 : index
    %c18 = arith.constant 18 : index
    %c18_1 = arith.constant 18 : index
    %c0_2 = arith.constant 0 : index
    %3 = vector.load %arg3[%c0, %c18, %c18_1, %c0_2] : memref<1x44x52x128xbf16, #tpu.memory_space<vmem>>, vector<1x8x16x128xbf16>
    %4 = vector.shape_cast %3 : vector<1x8x16x128xbf16> to vector<8x16x128xbf16>
    %5 = vector.shape_cast %4 : vector<8x16x128xbf16> to vector<128x128xbf16>
    %c0_3 = arith.constant 0 : index
    %c0_4 = arith.constant 0 : index
    %6 = vector.load %arg8[%c0_3, %c0_4] : memref<128x128xf32, #tpu.memory_space<vmem>>, vector<128x128xf32>
    %c0_5 = arith.constant 0 : index
    %c0_6 = arith.constant 0 : index
    %7 = vector.load %arg4[%c0_5, %c0_6] : memref<128x128xbf16, #tpu.memory_space<vmem>>, vector<128x128xbf16>
    %cst = arith.constant dense<0.000000e+00> : vector<128x128xf32>
    %8 = tpu.matmul %5, %7, %cst {dimension_numbers = #tpu.dot_dimension_numbers<[1], [0], [0], [1], [0, 0, 1, 1], [], []>} : vector<128x128xbf16>, vector<128x128xbf16>, vector<128x128xf32> -> vector<128x128xf32>
    %9 = arith.addf %6, %8 : vector<128x128xf32>
    %c0_7 = arith.constant 0 : index
    %c0_8 = arith.constant 0 : index
    %10 = vector.load %arg8[%c0_7, %c0_8] : memref<128x128xf32, #tpu.memory_space<vmem>>, vector<128x128xf32>
    tpu.vector_store %arg8[%c0_7, %c0_8], %9 {strides = array<i32>} : memref<128x128xf32, #tpu.memory_space<vmem>>, vector<128x128xf32>,
    %c0_9 = arith.constant 0 : index
    %c12 = arith.constant 12 : index
    %c12_10 = arith.constant 12 : index
    %c0_11 = arith.constant 0 : index
    %11 = vector.load %arg3[%c0_9, %c12, %c12_10, %c0_11] : memref<1x44x52x128xbf16, #tpu.memory_space<vmem>>, vector<1x20x16x128xbf16>
    %12 = vector.shape_cast %11 : vector<1x20x16x128xbf16> to vector<20x16x128xbf16>
    %c0_12 = arith.constant 0 : index
    %c12_13 = arith.constant 12 : index
    %c18_14 = arith.constant 18 : index
    %c0_15 = arith.constant 0 : index
    %13 = vector.load %arg3[%c0_12, %c12_13, %c18_14, %c0_15] : memref<1x44x52x128xbf16, #tpu.memory_space<vmem>>, vector<1x20x16x128xbf16>
    %14 = vector.shape_cast %13 : vector<1x20x16x128xbf16> to vector<20x16x128xbf16>
    %c0_16 = arith.constant 0 : index
    %c12_17 = arith.constant 12 : index
    %c24 = arith.constant 24 : index
    %c0_18 = arith.constant 0 : index
    %15 = vector.load %arg3[%c0_16, %c12_17, %c24, %c0_18] : memref<1x44x52x128xbf16, #tpu.memory_space<vmem>>, vector<1x20x16x128xbf16>
    %16 = vector.shape_cast %15 : vector<1x20x16x128xbf16> to vector<20x16x128xbf16>
    %17 = vector.extract_strided_slice %12 {offsets = [0, 0, 0], sizes = [8, 16, 128], strides = [1, 1, 1]} : vector<20x16x128xbf16> to vector<8x16x128xbf16>
    %18 = vector.shape_cast %17 : vector<8x16x128xbf16> to vector<128x128xbf16>
    %c0_19 = arith.constant 0 : index
    %c0_20 = arith.constant 0 : index
    %19 = vector.load %arg8[%c0_19, %c0_20] : memref<128x128xf32, #tpu.memory_space<vmem>>, vector<128x128xf32>
    %c0_21 = arith.constant 0 : index
    %c0_22 = arith.constant 0 : index
    %c0_23 = arith.constant 0 : index
    %c0_24 = arith.constant 0 : index
    %20 = vector.load %arg5[%c0_21, %c0_22, %c0_23, %c0_24] : memref<3x8x128x128xbf16, #tpu.memory_space<vmem>>, vector<1x1x128x128xbf16>
    %21 = vector.shape_cast %20 : vector<1x1x128x128xbf16> to vector<128x128xbf16>
    %cst_25 = arith.constant dense<0.000000e+00> : vector<128x128xf32>
    %22 = tpu.matmul %18, %21, %cst_25 {dimension_numbers = #tpu.dot_dimension_numbers<[1], [0], [0], [1], [0, 0, 1, 1], [], []>} : vector<128x128xbf16>, vector<128x128xbf16>, vector<128x128xf32> -> vector<128x128xf32>
    %23 = arith.addf %19, %22 : vector<128x128xf32>
    %c0_26 = arith.constant 0 : index
    %c0_27 = arith.constant 0 : index
    %24 = vector.load %arg8[%c0_26, %c0_27] : memref<128x128xf32, #tpu.memory_space<vmem>>, vector<128x128xf32>
    tpu.vector_store %arg8[%c0_26, %c0_27], %23 {strides = array<i32>} : memref<128x128xf32, #tpu.memory_space<vmem>>, vector<128x128xf32>,
    %25 = vector.extract_strided_slice %14 {offsets = [0, 0, 0], sizes = [8, 16, 128], strides = [1, 1, 1]} : vector<20x16x128xbf16> to vector<8x16x128xbf16>
    %26 = vector.shape_cast %25 : vector<8x16x128xbf16> to vector<128x128xbf16>
    %c0_28 = arith.constant 0 : index
    %c0_29 = arith.constant 0 : index
    %27 = vector.load %arg8[%c0_28, %c0_29] : memref<128x128xf32, #tpu.memory_space<vmem>>, vector<128x128xf32>
    %c0_30 = arith.constant 0 : index
    %c1 = arith.constant 1 : index
    %c0_31 = arith.constant 0 : index
    %c0_32 = arith.constant 0 : index
    %28 = vector.load %arg5[%c0_30, %c1, %c0_31, %c0_32] : memref<3x8x128x128xbf16, #tpu.memory_space<vmem>>, vector<1x1x128x128xbf16>
    %29 = vector.shape_cast %28 : vector<1x1x128x128xbf16> to vector<128x128xbf16>
    %cst_33 = arith.constant dense<0.000000e+00> : vector<128x128xf32>
    %30 = tpu.matmul %26, %29, %cst_33 {dimension_numbers = #tpu.dot_dimension_numbers<[1], [0], [0], [1], [0, 0, 1, 1], [], []>} : vector<128x128xbf16>, vector<128x128xbf16>, vector<128x128xf32> -> vector<128x128xf32>
    %31 = arith.addf %27, %30 : vector<128x128xf32>
    %c0_34 = arith.constant 0 : index
    %c0_35 = arith.constant 0 : index
    %32 = vector.load %arg8[%c0_34, %c0_35] : memref<128x128xf32, #tpu.memory_space<vmem>>, vector<128x128xf32>
    tpu.vector_store %arg8[%c0_34, %c0_35], %31 {strides = array<i32>} : memref<128x128xf32, #tpu.memory_space<vmem>>, vector<128x128xf32>,
    %33 = vector.extract_strided_slice %16 {offsets = [0, 0, 0], sizes = [8, 16, 128], strides = [1, 1, 1]} : vector<20x16x128xbf16> to vector<8x16x128xbf16>
    %34 = vector.shape_cast %33 : vector<8x16x128xbf16> to vector<128x128xbf16>
    %c0_36 = arith.constant 0 : index
    %c0_37 = arith.constant 0 : index
    %35 = vector.load %arg8[%c0_36, %c0_37] : memref<128x128xf32, #tpu.memory_space<vmem>>, vector<128x128xf32>
    %c0_38 = arith.constant 0 : index
    %c2 = arith.constant 2 : index
    %c0_39 = arith.constant 0 : index
    %c0_40 = arith.constant 0 : index
    %36 = vector.load %arg5[%c0_38, %c2, %c0_39, %c0_40] : memref<3x8x128x128xbf16, #tpu.memory_space<vmem>>, vector<1x1x128x128xbf16>
    %37 = vector.shape_cast %36 : vector<1x1x128x128xbf16> to vector<128x128xbf16>
    %cst_41 = arith.constant dense<0.000000e+00> : vector<128x128xf32>
    %38 = tpu.matmul %34, %37, %cst_41 {dimension_numbers = #tpu.dot_dimension_numbers<[1], [0], [0], [1], [0, 0, 1, 1], [], []>} : vector<128x128xbf16>, vector<128x128xbf16>, vector<128x128xf32> -> vector<128x128xf32>
    %39 = arith.addf %35, %38 : vector<128x128xf32>
    %c0_42 = arith.constant 0 : index
    %c0_43 = arith.constant 0 : index
    %40 = vector.load %arg8[%c0_42, %c0_43] : memref<128x128xf32, #tpu.memory_space<vmem>>, vector<128x128xf32>
    tpu.vector_store %arg8[%c0_42, %c0_43], %39 {strides = array<i32>} : memref<128x128xf32, #tpu.memory_space<vmem>>, vector<128x128xf32>,
    %41 = vector.extract_strided_slice %12 {offsets = [6, 0, 0], sizes = [8, 16, 128], strides = [1, 1, 1]} : vector<20x16x128xbf16> to vector<8x16x128xbf16>
    %42 = vector.shape_cast %41 : vector<8x16x128xbf16> to vector<128x128xbf16>
    %c0_44 = arith.constant 0 : index
    %c0_45 = arith.constant 0 : index
    %43 = vector.load %arg8[%c0_44, %c0_45] : memref<128x128xf32, #tpu.memory_space<vmem>>, vector<128x128xf32>
    %c0_46 = arith.constant 0 : index
    %c3 = arith.constant 3 : index
    %c0_47 = arith.constant 0 : index
    %c0_48 = arith.constant 0 : index
    %44 = vector.load %arg5[%c0_46, %c3, %c0_47, %c0_48] : memref<3x8x128x128xbf16, #tpu.memory_space<vmem>>, vector<1x1x128x128xbf16>
    %45 = vector.shape_cast %44 : vector<1x1x128x128xbf16> to vector<128x128xbf16>
    %cst_49 = arith.constant dense<0.000000e+00> : vector<128x128xf32>
    %46 = tpu.matmul %42, %45, %cst_49 {dimension_numbers = #tpu.dot_dimension_numbers<[1], [0], [0], [1], [0, 0, 1, 1], [], []>} : vector<128x128xbf16>, vector<128x128xbf16>, vector<128x128xf32> -> vector<128x128xf32>
    %47 = arith.addf %43, %46 : vector<128x128xf32>
    %c0_50 = arith.constant 0 : index
    %c0_51 = arith.constant 0 : index
    %48 = vector.load %arg8[%c0_50, %c0_51] : memref<128x128xf32, #tpu.memory_space<vmem>>, vector<128x128xf32>
    tpu.vector_store %arg8[%c0_50, %c0_51], %47 {strides = array<i32>} : memref<128x128xf32, #tpu.memory_space<vmem>>, vector<128x128xf32>,
    %49 = vector.extract_strided_slice %16 {offsets = [6, 0, 0], sizes = [8, 16, 128], strides = [1, 1, 1]} : vector<20x16x128xbf16> to vector<8x16x128xbf16>
    %50 = vector.shape_cast %49 : vector<8x16x128xbf16> to vector<128x128xbf16>
    %c0_52 = arith.constant 0 : index
    %c0_53 = arith.constant 0 : index
    %51 = vector.load %arg8[%c0_52, %c0_53] : memref<128x128xf32, #tpu.memory_space<vmem>>, vector<128x128xf32>
    %c0_54 = arith.constant 0 : index
    %c4 = arith.constant 4 : index
    %c0_55 = arith.constant 0 : index
    %c0_56 = arith.constant 0 : index
    %52 = vector.load %arg5[%c0_54, %c4, %c0_55, %c0_56] : memref<3x8x128x128xbf16, #tpu.memory_space<vmem>>, vector<1x1x128x128xbf16>
    %53 = vector.shape_cast %52 : vector<1x1x128x128xbf16> to vector<128x128xbf16>
    %cst_57 = arith.constant dense<0.000000e+00> : vector<128x128xf32>
    %54 = tpu.matmul %50, %53, %cst_57 {dimension_numbers = #tpu.dot_dimension_numbers<[1], [0], [0], [1], [0, 0, 1, 1], [], []>} : vector<128x128xbf16>, vector<128x128xbf16>, vector<128x128xf32> -> vector<128x128xf32>
    %55 = arith.addf %51, %54 : vector<128x128xf32>
    %c0_58 = arith.constant 0 : index
    %c0_59 = arith.constant 0 : index
    %56 = vector.load %arg8[%c0_58, %c0_59] : memref<128x128xf32, #tpu.memory_space<vmem>>, vector<128x128xf32>
    tpu.vector_store %arg8[%c0_58, %c0_59], %55 {strides = array<i32>} : memref<128x128xf32, #tpu.memory_space<vmem>>, vector<128x128xf32>,
    %57 = vector.extract_strided_slice %12 {offsets = [12, 0, 0], sizes = [8, 16, 128], strides = [1, 1, 1]} : vector<20x16x128xbf16> to vector<8x16x128xbf16>
    %58 = vector.shape_cast %57 : vector<8x16x128xbf16> to vector<128x128xbf16>
    %c0_60 = arith.constant 0 : index
    %c0_61 = arith.constant 0 : index
    %59 = vector.load %arg8[%c0_60, %c0_61] : memref<128x128xf32, #tpu.memory_space<vmem>>, vector<128x128xf32>
    %c0_62 = arith.constant 0 : index
    %c5 = arith.constant 5 : index
    %c0_63 = arith.constant 0 : index
    %c0_64 = arith.constant 0 : index
    %60 = vector.load %arg5[%c0_62, %c5, %c0_63, %c0_64] : memref<3x8x128x128xbf16, #tpu.memory_space<vmem>>, vector<1x1x128x128xbf16>
    %61 = vector.shape_cast %60 : vector<1x1x128x128xbf16> to vector<128x128xbf16>
    %cst_65 = arith.constant dense<0.000000e+00> : vector<128x128xf32>
    %62 = tpu.matmul %58, %61, %cst_65 {dimension_numbers = #tpu.dot_dimension_numbers<[1], [0], [0], [1], [0, 0, 1, 1], [], []>} : vector<128x128xbf16>, vector<128x128xbf16>, vector<128x128xf32> -> vector<128x128xf32>
    %63 = arith.addf %59, %62 : vector<128x128xf32>
    %c0_66 = arith.constant 0 : index
    %c0_67 = arith.constant 0 : index
    %64 = vector.load %arg8[%c0_66, %c0_67] : memref<128x128xf32, #tpu.memory_space<vmem>>, vector<128x128xf32>
    tpu.vector_store %arg8[%c0_66, %c0_67], %63 {strides = array<i32>} : memref<128x128xf32, #tpu.memory_space<vmem>>, vector<128x128xf32>,
    %65 = vector.extract_strided_slice %14 {offsets = [12, 0, 0], sizes = [8, 16, 128], strides = [1, 1, 1]} : vector<20x16x128xbf16> to vector<8x16x128xbf16>
    %66 = vector.shape_cast %65 : vector<8x16x128xbf16> to vector<128x128xbf16>
    %c0_68 = arith.constant 0 : index
    %c0_69 = arith.constant 0 : index
    %67 = vector.load %arg8[%c0_68, %c0_69] : memref<128x128xf32, #tpu.memory_space<vmem>>, vector<128x128xf32>
    %c0_70 = arith.constant 0 : index
    %c6 = arith.constant 6 : index
    %c0_71 = arith.constant 0 : index
    %c0_72 = arith.constant 0 : index
    %68 = vector.load %arg5[%c0_70, %c6, %c0_71, %c0_72] : memref<3x8x128x128xbf16, #tpu.memory_space<vmem>>, vector<1x1x128x128xbf16>
    %69 = vector.shape_cast %68 : vector<1x1x128x128xbf16> to vector<128x128xbf16>
    %cst_73 = arith.constant dense<0.000000e+00> : vector<128x128xf32>
    %70 = tpu.matmul %66, %69, %cst_73 {dimension_numbers = #tpu.dot_dimension_numbers<[1], [0], [0], [1], [0, 0, 1, 1], [], []>} : vector<128x128xbf16>, vector<128x128xbf16>, vector<128x128xf32> -> vector<128x128xf32>
    %71 = arith.addf %67, %70 : vector<128x128xf32>
    %c0_74 = arith.constant 0 : index
    %c0_75 = arith.constant 0 : index
    %72 = vector.load %arg8[%c0_74, %c0_75] : memref<128x128xf32, #tpu.memory_space<vmem>>, vector<128x128xf32>
    tpu.vector_store %arg8[%c0_74, %c0_75], %71 {strides = array<i32>} : memref<128x128xf32, #tpu.memory_space<vmem>>, vector<128x128xf32>,
    %73 = vector.extract_strided_slice %16 {offsets = [12, 0, 0], sizes = [8, 16, 128], strides = [1, 1, 1]} : vector<20x16x128xbf16> to vector<8x16x128xbf16>
    %74 = vector.shape_cast %73 : vector<8x16x128xbf16> to vector<128x128xbf16>
    %c0_76 = arith.constant 0 : index
    %c0_77 = arith.constant 0 : index
    %75 = vector.load %arg8[%c0_76, %c0_77] : memref<128x128xf32, #tpu.memory_space<vmem>>, vector<128x128xf32>
    %c0_78 = arith.constant 0 : index
    %c7 = arith.constant 7 : index
    %c0_79 = arith.constant 0 : index
    %c0_80 = arith.constant 0 : index
    %76 = vector.load %arg5[%c0_78, %c7, %c0_79, %c0_80] : memref<3x8x128x128xbf16, #tpu.memory_space<vmem>>, vector<1x1x128x128xbf16>
    %77 = vector.shape_cast %76 : vector<1x1x128x128xbf16> to vector<128x128xbf16>
    %cst_81 = arith.constant dense<0.000000e+00> : vector<128x128xf32>
    %78 = tpu.matmul %74, %77, %cst_81 {dimension_numbers = #tpu.dot_dimension_numbers<[1], [0], [0], [1], [0, 0, 1, 1], [], []>} : vector<128x128xbf16>, vector<128x128xbf16>, vector<128x128xf32> -> vector<128x128xf32>
    %79 = arith.addf %75, %78 : vector<128x128xf32>
    %c0_82 = arith.constant 0 : index
    %c0_83 = arith.constant 0 : index
    %80 = vector.load %arg8[%c0_82, %c0_83] : memref<128x128xf32, #tpu.memory_space<vmem>>, vector<128x128xf32>
    tpu.vector_store %arg8[%c0_82, %c0_83], %79 {strides = array<i32>} : memref<128x128xf32, #tpu.memory_space<vmem>>, vector<128x128xf32>,
    %c0_84 = arith.constant 0 : index
    %c6_85 = arith.constant 6 : index
    %c6_86 = arith.constant 6 : index
    %c0_87 = arith.constant 0 : index
    %81 = vector.load %arg3[%c0_84, %c6_85, %c6_86, %c0_87] : memref<1x44x52x128xbf16, #tpu.memory_space<vmem>>, vector<1x32x16x128xbf16>
    %82 = vector.shape_cast %81 : vector<1x32x16x128xbf16> to vector<32x16x128xbf16>
    %c0_88 = arith.constant 0 : index
    %c6_89 = arith.constant 6 : index
    %c18_90 = arith.constant 18 : index
    %c0_91 = arith.constant 0 : index
    %83 = vector.load %arg3[%c0_88, %c6_89, %c18_90, %c0_91] : memref<1x44x52x128xbf16, #tpu.memory_space<vmem>>, vector<1x32x16x128xbf16>
    %84 = vector.shape_cast %83 : vector<1x32x16x128xbf16> to vector<32x16x128xbf16>
    %c0_92 = arith.constant 0 : index
    %c6_93 = arith.constant 6 : index
    %c30 = arith.constant 30 : index
    %c0_94 = arith.constant 0 : index
    %85 = vector.load %arg3[%c0_92, %c6_93, %c30, %c0_94] : memref<1x44x52x128xbf16, #tpu.memory_space<vmem>>, vector<1x32x16x128xbf16>
    %86 = vector.shape_cast %85 : vector<1x32x16x128xbf16> to vector<32x16x128xbf16>
    %87 = vector.extract_strided_slice %82 {offsets = [0, 0, 0], sizes = [8, 16, 128], strides = [1, 1, 1]} : vector<32x16x128xbf16> to vector<8x16x128xbf16>
    %88 = vector.shape_cast %87 : vector<8x16x128xbf16> to vector<128x128xbf16>
    %c0_95 = arith.constant 0 : index
    %c0_96 = arith.constant 0 : index
    %89 = vector.load %arg8[%c0_95, %c0_96] : memref<128x128xf32, #tpu.memory_space<vmem>>, vector<128x128xf32>
    %c1_97 = arith.constant 1 : index
    %c0_98 = arith.constant 0 : index
    %c0_99 = arith.constant 0 : index
    %c0_100 = arith.constant 0 : index
    %90 = vector.load %arg5[%c1_97, %c0_98, %c0_99, %c0_100] : memref<3x8x128x128xbf16, #tpu.memory_space<vmem>>, vector<1x1x128x128xbf16>
    %91 = vector.shape_cast %90 : vector<1x1x128x128xbf16> to vector<128x128xbf16>
    %cst_101 = arith.constant dense<0.000000e+00> : vector<128x128xf32>
    %92 = tpu.matmul %88, %91, %cst_101 {dimension_numbers = #tpu.dot_dimension_numbers<[1], [0], [0], [1], [0, 0, 1, 1], [], []>} : vector<128x128xbf16>, vector<128x128xbf16>, vector<128x128xf32> -> vector<128x128xf32>
    %93 = arith.addf %89, %92 : vector<128x128xf32>
    %c0_102 = arith.constant 0 : index
    %c0_103 = arith.constant 0 : index
    %94 = vector.load %arg8[%c0_102, %c0_103] : memref<128x128xf32, #tpu.memory_space<vmem>>, vector<128x128xf32>
    tpu.vector_store %arg8[%c0_102, %c0_103], %93 {strides = array<i32>} : memref<128x128xf32, #tpu.memory_space<vmem>>, vector<128x128xf32>,
    %95 = vector.extract_strided_slice %84 {offsets = [0, 0, 0], sizes = [8, 16, 128], strides = [1, 1, 1]} : vector<32x16x128xbf16> to vector<8x16x128xbf16>
    %96 = vector.shape_cast %95 : vector<8x16x128xbf16> to vector<128x128xbf16>
    %c0_104 = arith.constant 0 : index
    %c0_105 = arith.constant 0 : index
    %97 = vector.load %arg8[%c0_104, %c0_105] : memref<128x128xf32, #tpu.memory_space<vmem>>, vector<128x128xf32>
    %c1_106 = arith.constant 1 : index
    %c1_107 = arith.constant 1 : index
    %c0_108 = arith.constant 0 : index
    %c0_109 = arith.constant 0 : index
    %98 = vector.load %arg5[%c1_106, %c1_107, %c0_108, %c0_109] : memref<3x8x128x128xbf16, #tpu.memory_space<vmem>>, vector<1x1x128x128xbf16>
    %99 = vector.shape_cast %98 : vector<1x1x128x128xbf16> to vector<128x128xbf16>
    %cst_110 = arith.constant dense<0.000000e+00> : vector<128x128xf32>
    %100 = tpu.matmul %96, %99, %cst_110 {dimension_numbers = #tpu.dot_dimension_numbers<[1], [0], [0], [1], [0, 0, 1, 1], [], []>} : vector<128x128xbf16>, vector<128x128xbf16>, vector<128x128xf32> -> vector<128x128xf32>
    %101 = arith.addf %97, %100 : vector<128x128xf32>
    %c0_111 = arith.constant 0 : index
    %c0_112 = arith.constant 0 : index
    %102 = vector.load %arg8[%c0_111, %c0_112] : memref<128x128xf32, #tpu.memory_space<vmem>>, vector<128x128xf32>
    tpu.vector_store %arg8[%c0_111, %c0_112], %101 {strides = array<i32>} : memref<128x128xf32, #tpu.memory_space<vmem>>, vector<128x128xf32>,
    %103 = vector.extract_strided_slice %86 {offsets = [0, 0, 0], sizes = [8, 16, 128], strides = [1, 1, 1]} : vector<32x16x128xbf16> to vector<8x16x128xbf16>
    %104 = vector.shape_cast %103 : vector<8x16x128xbf16> to vector<128x128xbf16>
    %c0_113 = arith.constant 0 : index
    %c0_114 = arith.constant 0 : index
    %105 = vector.load %arg8[%c0_113, %c0_114] : memref<128x128xf32, #tpu.memory_space<vmem>>, vector<128x128xf32>
    %c1_115 = arith.constant 1 : index
    %c2_116 = arith.constant 2 : index
    %c0_117 = arith.constant 0 : index
    %c0_118 = arith.constant 0 : index
    %106 = vector.load %arg5[%c1_115, %c2_116, %c0_117, %c0_118] : memref<3x8x128x128xbf16, #tpu.memory_space<vmem>>, vector<1x1x128x128xbf16>
    %107 = vector.shape_cast %106 : vector<1x1x128x128xbf16> to vector<128x128xbf16>
    %cst_119 = arith.constant dense<0.000000e+00> : vector<128x128xf32>
    %108 = tpu.matmul %104, %107, %cst_119 {dimension_numbers = #tpu.dot_dimension_numbers<[1], [0], [0], [1], [0, 0, 1, 1], [], []>} : vector<128x128xbf16>, vector<128x128xbf16>, vector<128x128xf32> -> vector<128x128xf32>
    %109 = arith.addf %105, %108 : vector<128x128xf32>
    %c0_120 = arith.constant 0 : index
    %c0_121 = arith.constant 0 : index
    %110 = vector.load %arg8[%c0_120, %c0_121] : memref<128x128xf32, #tpu.memory_space<vmem>>, vector<128x128xf32>
    tpu.vector_store %arg8[%c0_120, %c0_121], %109 {strides = array<i32>} : memref<128x128xf32, #tpu.memory_space<vmem>>, vector<128x128xf32>,
    %111 = vector.extract_strided_slice %82 {offsets = [12, 0, 0], sizes = [8, 16, 128], strides = [1, 1, 1]} : vector<32x16x128xbf16> to vector<8x16x128xbf16>
    %112 = vector.shape_cast %111 : vector<8x16x128xbf16> to vector<128x128xbf16>
    %c0_122 = arith.constant 0 : index
    %c0_123 = arith.constant 0 : index
    %113 = vector.load %arg8[%c0_122, %c0_123] : memref<128x128xf32, #tpu.memory_space<vmem>>, vector<128x128xf32>
    %c1_124 = arith.constant 1 : index
    %c3_125 = arith.constant 3 : index
    %c0_126 = arith.constant 0 : index
    %c0_127 = arith.constant 0 : index
    %114 = vector.load %arg5[%c1_124, %c3_125, %c0_126, %c0_127] : memref<3x8x128x128xbf16, #tpu.memory_space<vmem>>, vector<1x1x128x128xbf16>
    %115 = vector.shape_cast %114 : vector<1x1x128x128xbf16> to vector<128x128xbf16>
    %cst_128 = arith.constant dense<0.000000e+00> : vector<128x128xf32>
    %116 = tpu.matmul %112, %115, %cst_128 {dimension_numbers = #tpu.dot_dimension_numbers<[1], [0], [0], [1], [0, 0, 1, 1], [], []>} : vector<128x128xbf16>, vector<128x128xbf16>, vector<128x128xf32> -> vector<128x128xf32>
    %117 = arith.addf %113, %116 : vector<128x128xf32>
    %c0_129 = arith.constant 0 : index
    %c0_130 = arith.constant 0 : index
    %118 = vector.load %arg8[%c0_129, %c0_130] : memref<128x128xf32, #tpu.memory_space<vmem>>, vector<128x128xf32>
    tpu.vector_store %arg8[%c0_129, %c0_130], %117 {strides = array<i32>} : memref<128x128xf32, #tpu.memory_space<vmem>>, vector<128x128xf32>,
    %119 = vector.extract_strided_slice %86 {offsets = [12, 0, 0], sizes = [8, 16, 128], strides = [1, 1, 1]} : vector<32x16x128xbf16> to vector<8x16x128xbf16>
    %120 = vector.shape_cast %119 : vector<8x16x128xbf16> to vector<128x128xbf16>
    %c0_131 = arith.constant 0 : index
    %c0_132 = arith.constant 0 : index
    %121 = vector.load %arg8[%c0_131, %c0_132] : memref<128x128xf32, #tpu.memory_space<vmem>>, vector<128x128xf32>
    %c1_133 = arith.constant 1 : index
    %c4_134 = arith.constant 4 : index
    %c0_135 = arith.constant 0 : index
    %c0_136 = arith.constant 0 : index
    %122 = vector.load %arg5[%c1_133, %c4_134, %c0_135, %c0_136] : memref<3x8x128x128xbf16, #tpu.memory_space<vmem>>, vector<1x1x128x128xbf16>
    %123 = vector.shape_cast %122 : vector<1x1x128x128xbf16> to vector<128x128xbf16>
    %cst_137 = arith.constant dense<0.000000e+00> : vector<128x128xf32>
    %124 = tpu.matmul %120, %123, %cst_137 {dimension_numbers = #tpu.dot_dimension_numbers<[1], [0], [0], [1], [0, 0, 1, 1], [], []>} : vector<128x128xbf16>, vector<128x128xbf16>, vector<128x128xf32> -> vector<128x128xf32>
    %125 = arith.addf %121, %124 : vector<128x128xf32>
    %c0_138 = arith.constant 0 : index
    %c0_139 = arith.constant 0 : index
    %126 = vector.load %arg8[%c0_138, %c0_139] : memref<128x128xf32, #tpu.memory_space<vmem>>, vector<128x128xf32>
    tpu.vector_store %arg8[%c0_138, %c0_139], %125 {strides = array<i32>} : memref<128x128xf32, #tpu.memory_space<vmem>>, vector<128x128xf32>,
    %127 = vector.extract_strided_slice %82 {offsets = [24, 0, 0], sizes = [8, 16, 128], strides = [1, 1, 1]} : vector<32x16x128xbf16> to vector<8x16x128xbf16>
    %128 = vector.shape_cast %127 : vector<8x16x128xbf16> to vector<128x128xbf16>
    %c0_140 = arith.constant 0 : index
    %c0_141 = arith.constant 0 : index
    %129 = vector.load %arg8[%c0_140, %c0_141] : memref<128x128xf32, #tpu.memory_space<vmem>>, vector<128x128xf32>
    %c1_142 = arith.constant 1 : index
    %c5_143 = arith.constant 5 : index
    %c0_144 = arith.constant 0 : index
    %c0_145 = arith.constant 0 : index
    %130 = vector.load %arg5[%c1_142, %c5_143, %c0_144, %c0_145] : memref<3x8x128x128xbf16, #tpu.memory_space<vmem>>, vector<1x1x128x128xbf16>
    %131 = vector.shape_cast %130 : vector<1x1x128x128xbf16> to vector<128x128xbf16>
    %cst_146 = arith.constant dense<0.000000e+00> : vector<128x128xf32>
    %132 = tpu.matmul %128, %131, %cst_146 {dimension_numbers = #tpu.dot_dimension_numbers<[1], [0], [0], [1], [0, 0, 1, 1], [], []>} : vector<128x128xbf16>, vector<128x128xbf16>, vector<128x128xf32> -> vector<128x128xf32>
    %133 = arith.addf %129, %132 : vector<128x128xf32>
    %c0_147 = arith.constant 0 : index
    %c0_148 = arith.constant 0 : index
    %134 = vector.load %arg8[%c0_147, %c0_148] : memref<128x128xf32, #tpu.memory_space<vmem>>, vector<128x128xf32>
    tpu.vector_store %arg8[%c0_147, %c0_148], %133 {strides = array<i32>} : memref<128x128xf32, #tpu.memory_space<vmem>>, vector<128x128xf32>,
    %135 = vector.extract_strided_slice %84 {offsets = [24, 0, 0], sizes = [8, 16, 128], strides = [1, 1, 1]} : vector<32x16x128xbf16> to vector<8x16x128xbf16>
    %136 = vector.shape_cast %135 : vector<8x16x128xbf16> to vector<128x128xbf16>
    %c0_149 = arith.constant 0 : index
    %c0_150 = arith.constant 0 : index
    %137 = vector.load %arg8[%c0_149, %c0_150] : memref<128x128xf32, #tpu.memory_space<vmem>>, vector<128x128xf32>
    %c1_151 = arith.constant 1 : index
    %c6_152 = arith.constant 6 : index
    %c0_153 = arith.constant 0 : index
    %c0_154 = arith.constant 0 : index
    %138 = vector.load %arg5[%c1_151, %c6_152, %c0_153, %c0_154] : memref<3x8x128x128xbf16, #tpu.memory_space<vmem>>, vector<1x1x128x128xbf16>
    %139 = vector.shape_cast %138 : vector<1x1x128x128xbf16> to vector<128x128xbf16>
    %cst_155 = arith.constant dense<0.000000e+00> : vector<128x128xf32>
    %140 = tpu.matmul %136, %139, %cst_155 {dimension_numbers = #tpu.dot_dimension_numbers<[1], [0], [0], [1], [0, 0, 1, 1], [], []>} : vector<128x128xbf16>, vector<128x128xbf16>, vector<128x128xf32> -> vector<128x128xf32>
    %141 = arith.addf %137, %140 : vector<128x128xf32>
    %c0_156 = arith.constant 0 : index
    %c0_157 = arith.constant 0 : index
    %142 = vector.load %arg8[%c0_156, %c0_157] : memref<128x128xf32, #tpu.memory_space<vmem>>, vector<128x128xf32>
    tpu.vector_store %arg8[%c0_156, %c0_157], %141 {strides = array<i32>} : memref<128x128xf32, #tpu.memory_space<vmem>>, vector<128x128xf32>,
    %143 = vector.extract_strided_slice %86 {offsets = [24, 0, 0], sizes = [8, 16, 128], strides = [1, 1, 1]} : vector<32x16x128xbf16> to vector<8x16x128xbf16>
    %144 = vector.shape_cast %143 : vector<8x16x128xbf16> to vector<128x128xbf16>
    %c0_158 = arith.constant 0 : index
    %c0_159 = arith.constant 0 : index
    %145 = vector.load %arg8[%c0_158, %c0_159] : memref<128x128xf32, #tpu.memory_space<vmem>>, vector<128x128xf32>
    %c1_160 = arith.constant 1 : index
    %c7_161 = arith.constant 7 : index
    %c0_162 = arith.constant 0 : index
    %c0_163 = arith.constant 0 : index
    %146 = vector.load %arg5[%c1_160, %c7_161, %c0_162, %c0_163] : memref<3x8x128x128xbf16, #tpu.memory_space<vmem>>, vector<1x1x128x128xbf16>
    %147 = vector.shape_cast %146 : vector<1x1x128x128xbf16> to vector<128x128xbf16>
    %cst_164 = arith.constant dense<0.000000e+00> : vector<128x128xf32>
    %148 = tpu.matmul %144, %147, %cst_164 {dimension_numbers = #tpu.dot_dimension_numbers<[1], [0], [0], [1], [0, 0, 1, 1], [], []>} : vector<128x128xbf16>, vector<128x128xbf16>, vector<128x128xf32> -> vector<128x128xf32>
    %149 = arith.addf %145, %148 : vector<128x128xf32>
    %c0_165 = arith.constant 0 : index
    %c0_166 = arith.constant 0 : index
    %150 = vector.load %arg8[%c0_165, %c0_166] : memref<128x128xf32, #tpu.memory_space<vmem>>, vector<128x128xf32>
    tpu.vector_store %arg8[%c0_165, %c0_166], %149 {strides = array<i32>} : memref<128x128xf32, #tpu.memory_space<vmem>>, vector<128x128xf32>,
    %c0_167 = arith.constant 0 : index
    %c0_168 = arith.constant 0 : index
    %c0_169 = arith.constant 0 : index
    %c0_170 = arith.constant 0 : index
    %151 = vector.load %arg3[%c0_167, %c0_168, %c0_169, %c0_170] : memref<1x44x52x128xbf16, #tpu.memory_space<vmem>>, vector<1x44x16x128xbf16>
    %152 = vector.shape_cast %151 : vector<1x44x16x128xbf16> to vector<44x16x128xbf16>
    %c0_171 = arith.constant 0 : index
    %c0_172 = arith.constant 0 : index
    %c18_173 = arith.constant 18 : index
    %c0_174 = arith.constant 0 : index
    %153 = vector.load %arg3[%c0_171, %c0_172, %c18_173, %c0_174] : memref<1x44x52x128xbf16, #tpu.memory_space<vmem>>, vector<1x44x16x128xbf16>
    %154 = vector.shape_cast %153 : vector<1x44x16x128xbf16> to vector<44x16x128xbf16>
    %c0_175 = arith.constant 0 : index
    %c0_176 = arith.constant 0 : index
    %c36 = arith.constant 36 : index
    %c0_177 = arith.constant 0 : index
    %155 = vector.load %arg3[%c0_175, %c0_176, %c36, %c0_177] : memref<1x44x52x128xbf16, #tpu.memory_space<vmem>>, vector<1x44x16x128xbf16>
    %156 = vector.shape_cast %155 : vector<1x44x16x128xbf16> to vector<44x16x128xbf16>
    %157 = vector.extract_strided_slice %152 {offsets = [0, 0, 0], sizes = [8, 16, 128], strides = [1, 1, 1]} : vector<44x16x128xbf16> to vector<8x16x128xbf16>
    %158 = vector.shape_cast %157 : vector<8x16x128xbf16> to vector<128x128xbf16>
    %c0_178 = arith.constant 0 : index
    %c0_179 = arith.constant 0 : index
    %159 = vector.load %arg8[%c0_178, %c0_179] : memref<128x128xf32, #tpu.memory_space<vmem>>, vector<128x128xf32>
    %c2_180 = arith.constant 2 : index
    %c0_181 = arith.constant 0 : index
    %c0_182 = arith.constant 0 : index
    %c0_183 = arith.constant 0 : index
    %160 = vector.load %arg5[%c2_180, %c0_181, %c0_182, %c0_183] : memref<3x8x128x128xbf16, #tpu.memory_space<vmem>>, vector<1x1x128x128xbf16>
    %161 = vector.shape_cast %160 : vector<1x1x128x128xbf16> to vector<128x128xbf16>
    %cst_184 = arith.constant dense<0.000000e+00> : vector<128x128xf32>
    %162 = tpu.matmul %158, %161, %cst_184 {dimension_numbers = #tpu.dot_dimension_numbers<[1], [0], [0], [1], [0, 0, 1, 1], [], []>} : vector<128x128xbf16>, vector<128x128xbf16>, vector<128x128xf32> -> vector<128x128xf32>
    %163 = arith.addf %159, %162 : vector<128x128xf32>
    %c0_185 = arith.constant 0 : index
    %c0_186 = arith.constant 0 : index
    %164 = vector.load %arg8[%c0_185, %c0_186] : memref<128x128xf32, #tpu.memory_space<vmem>>, vector<128x128xf32>
    tpu.vector_store %arg8[%c0_185, %c0_186], %163 {strides = array<i32>} : memref<128x128xf32, #tpu.memory_space<vmem>>, vector<128x128xf32>,
    %165 = vector.extract_strided_slice %154 {offsets = [0, 0, 0], sizes = [8, 16, 128], strides = [1, 1, 1]} : vector<44x16x128xbf16> to vector<8x16x128xbf16>
    %166 = vector.shape_cast %165 : vector<8x16x128xbf16> to vector<128x128xbf16>
    %c0_187 = arith.constant 0 : index
    %c0_188 = arith.constant 0 : index
    %167 = vector.load %arg8[%c0_187, %c0_188] : memref<128x128xf32, #tpu.memory_space<vmem>>, vector<128x128xf32>
    %c2_189 = arith.constant 2 : index
    %c1_190 = arith.constant 1 : index
    %c0_191 = arith.constant 0 : index
    %c0_192 = arith.constant 0 : index
    %168 = vector.load %arg5[%c2_189, %c1_190, %c0_191, %c0_192] : memref<3x8x128x128xbf16, #tpu.memory_space<vmem>>, vector<1x1x128x128xbf16>
    %169 = vector.shape_cast %168 : vector<1x1x128x128xbf16> to vector<128x128xbf16>
    %cst_193 = arith.constant dense<0.000000e+00> : vector<128x128xf32>
    %170 = tpu.matmul %166, %169, %cst_193 {dimension_numbers = #tpu.dot_dimension_numbers<[1], [0], [0], [1], [0, 0, 1, 1], [], []>} : vector<128x128xbf16>, vector<128x128xbf16>, vector<128x128xf32> -> vector<128x128xf32>
    %171 = arith.addf %167, %170 : vector<128x128xf32>
    %c0_194 = arith.constant 0 : index
    %c0_195 = arith.constant 0 : index
    %172 = vector.load %arg8[%c0_194, %c0_195] : memref<128x128xf32, #tpu.memory_space<vmem>>, vector<128x128xf32>
    tpu.vector_store %arg8[%c0_194, %c0_195], %171 {strides = array<i32>} : memref<128x128xf32, #tpu.memory_space<vmem>>, vector<128x128xf32>,
    %173 = vector.extract_strided_slice %156 {offsets = [0, 0, 0], sizes = [8, 16, 128], strides = [1, 1, 1]} : vector<44x16x128xbf16> to vector<8x16x128xbf16>
    %174 = vector.shape_cast %173 : vector<8x16x128xbf16> to vector<128x128xbf16>
    %c0_196 = arith.constant 0 : index
    %c0_197 = arith.constant 0 : index
    %175 = vector.load %arg8[%c0_196, %c0_197] : memref<128x128xf32, #tpu.memory_space<vmem>>, vector<128x128xf32>
    %c2_198 = arith.constant 2 : index
    %c2_199 = arith.constant 2 : index
    %c0_200 = arith.constant 0 : index
    %c0_201 = arith.constant 0 : index
    %176 = vector.load %arg5[%c2_198, %c2_199, %c0_200, %c0_201] : memref<3x8x128x128xbf16, #tpu.memory_space<vmem>>, vector<1x1x128x128xbf16>
    %177 = vector.shape_cast %176 : vector<1x1x128x128xbf16> to vector<128x128xbf16>
    %cst_202 = arith.constant dense<0.000000e+00> : vector<128x128xf32>
    %178 = tpu.matmul %174, %177, %cst_202 {dimension_numbers = #tpu.dot_dimension_numbers<[1], [0], [0], [1], [0, 0, 1, 1], [], []>} : vector<128x128xbf16>, vector<128x128xbf16>, vector<128x128xf32> -> vector<128x128xf32>
    %179 = arith.addf %175, %178 : vector<128x128xf32>
    %c0_203 = arith.constant 0 : index
    %c0_204 = arith.constant 0 : index
    %180 = vector.load %arg8[%c0_203, %c0_204] : memref<128x128xf32, #tpu.memory_space<vmem>>, vector<128x128xf32>
    tpu.vector_store %arg8[%c0_203, %c0_204], %179 {strides = array<i32>} : memref<128x128xf32, #tpu.memory_space<vmem>>, vector<128x128xf32>,
    %181 = vector.extract_strided_slice %152 {offsets = [18, 0, 0], sizes = [8, 16, 128], strides = [1, 1, 1]} : vector<44x16x128xbf16> to vector<8x16x128xbf16>
    %182 = vector.shape_cast %181 : vector<8x16x128xbf16> to vector<128x128xbf16>
    %c0_205 = arith.constant 0 : index
    %c0_206 = arith.constant 0 : index
    %183 = vector.load %arg8[%c0_205, %c0_206] : memref<128x128xf32, #tpu.memory_space<vmem>>, vector<128x128xf32>
    %c2_207 = arith.constant 2 : index
    %c3_208 = arith.constant 3 : index
    %c0_209 = arith.constant 0 : index
    %c0_210 = arith.constant 0 : index
    %184 = vector.load %arg5[%c2_207, %c3_208, %c0_209, %c0_210] : memref<3x8x128x128xbf16, #tpu.memory_space<vmem>>, vector<1x1x128x128xbf16>
    %185 = vector.shape_cast %184 : vector<1x1x128x128xbf16> to vector<128x128xbf16>
    %cst_211 = arith.constant dense<0.000000e+00> : vector<128x128xf32>
    %186 = tpu.matmul %182, %185, %cst_211 {dimension_numbers = #tpu.dot_dimension_numbers<[1], [0], [0], [1], [0, 0, 1, 1], [], []>} : vector<128x128xbf16>, vector<128x128xbf16>, vector<128x128xf32> -> vector<128x128xf32>
    %187 = arith.addf %183, %186 : vector<128x128xf32>
    %c0_212 = arith.constant 0 : index
    %c0_213 = arith.constant 0 : index
    %188 = vector.load %arg8[%c0_212, %c0_213] : memref<128x128xf32, #tpu.memory_space<vmem>>, vector<128x128xf32>
    tpu.vector_store %arg8[%c0_212, %c0_213], %187 {strides = array<i32>} : memref<128x128xf32, #tpu.memory_space<vmem>>, vector<128x128xf32>,
    %189 = vector.extract_strided_slice %156 {offsets = [18, 0, 0], sizes = [8, 16, 128], strides = [1, 1, 1]} : vector<44x16x128xbf16> to vector<8x16x128xbf16>
    %190 = vector.shape_cast %189 : vector<8x16x128xbf16> to vector<128x128xbf16>
    %c0_214 = arith.constant 0 : index
    %c0_215 = arith.constant 0 : index
    %191 = vector.load %arg8[%c0_214, %c0_215] : memref<128x128xf32, #tpu.memory_space<vmem>>, vector<128x128xf32>
    %c2_216 = arith.constant 2 : index
    %c4_217 = arith.constant 4 : index
    %c0_218 = arith.constant 0 : index
    %c0_219 = arith.constant 0 : index
    %192 = vector.load %arg5[%c2_216, %c4_217, %c0_218, %c0_219] : memref<3x8x128x128xbf16, #tpu.memory_space<vmem>>, vector<1x1x128x128xbf16>
    %193 = vector.shape_cast %192 : vector<1x1x128x128xbf16> to vector<128x128xbf16>
    %cst_220 = arith.constant dense<0.000000e+00> : vector<128x128xf32>
    %194 = tpu.matmul %190, %193, %cst_220 {dimension_numbers = #tpu.dot_dimension_numbers<[1], [0], [0], [1], [0, 0, 1, 1], [], []>} : vector<128x128xbf16>, vector<128x128xbf16>, vector<128x128xf32> -> vector<128x128xf32>
    %195 = arith.addf %191, %194 : vector<128x128xf32>
    %c0_221 = arith.constant 0 : index
    %c0_222 = arith.constant 0 : index
    %196 = vector.load %arg8[%c0_221, %c0_222] : memref<128x128xf32, #tpu.memory_space<vmem>>, vector<128x128xf32>
    tpu.vector_store %arg8[%c0_221, %c0_222], %195 {strides = array<i32>} : memref<128x128xf32, #tpu.memory_space<vmem>>, vector<128x128xf32>,
    %197 = vector.extract_strided_slice %152 {offsets = [36, 0, 0], sizes = [8, 16, 128], strides = [1, 1, 1]} : vector<44x16x128xbf16> to vector<8x16x128xbf16>
    %198 = vector.shape_cast %197 : vector<8x16x128xbf16> to vector<128x128xbf16>
    %c0_223 = arith.constant 0 : index
    %c0_224 = arith.constant 0 : index
    %199 = vector.load %arg8[%c0_223, %c0_224] : memref<128x128xf32, #tpu.memory_space<vmem>>, vector<128x128xf32>
    %c2_225 = arith.constant 2 : index
    %c5_226 = arith.constant 5 : index
    %c0_227 = arith.constant 0 : index
    %c0_228 = arith.constant 0 : index
    %200 = vector.load %arg5[%c2_225, %c5_226, %c0_227, %c0_228] : memref<3x8x128x128xbf16, #tpu.memory_space<vmem>>, vector<1x1x128x128xbf16>
    %201 = vector.shape_cast %200 : vector<1x1x128x128xbf16> to vector<128x128xbf16>
    %cst_229 = arith.constant dense<0.000000e+00> : vector<128x128xf32>
    %202 = tpu.matmul %198, %201, %cst_229 {dimension_numbers = #tpu.dot_dimension_numbers<[1], [0], [0], [1], [0, 0, 1, 1], [], []>} : vector<128x128xbf16>, vector<128x128xbf16>, vector<128x128xf32> -> vector<128x128xf32>
    %203 = arith.addf %199, %202 : vector<128x128xf32>
    %c0_230 = arith.constant 0 : index
    %c0_231 = arith.constant 0 : index
    %204 = vector.load %arg8[%c0_230, %c0_231] : memref<128x128xf32, #tpu.memory_space<vmem>>, vector<128x128xf32>
    tpu.vector_store %arg8[%c0_230, %c0_231], %203 {strides = array<i32>} : memref<128x128xf32, #tpu.memory_space<vmem>>, vector<128x128xf32>,
    %205 = vector.extract_strided_slice %154 {offsets = [36, 0, 0], sizes = [8, 16, 128], strides = [1, 1, 1]} : vector<44x16x128xbf16> to vector<8x16x128xbf16>
    %206 = vector.shape_cast %205 : vector<8x16x128xbf16> to vector<128x128xbf16>
    %c0_232 = arith.constant 0 : index
    %c0_233 = arith.constant 0 : index
    %207 = vector.load %arg8[%c0_232, %c0_233] : memref<128x128xf32, #tpu.memory_space<vmem>>, vector<128x128xf32>
    %c2_234 = arith.constant 2 : index
    %c6_235 = arith.constant 6 : index
    %c0_236 = arith.constant 0 : index
    %c0_237 = arith.constant 0 : index
    %208 = vector.load %arg5[%c2_234, %c6_235, %c0_236, %c0_237] : memref<3x8x128x128xbf16, #tpu.memory_space<vmem>>, vector<1x1x128x128xbf16>
    %209 = vector.shape_cast %208 : vector<1x1x128x128xbf16> to vector<128x128xbf16>
    %cst_238 = arith.constant dense<0.000000e+00> : vector<128x128xf32>
    %210 = tpu.matmul %206, %209, %cst_238 {dimension_numbers = #tpu.dot_dimension_numbers<[1], [0], [0], [1], [0, 0, 1, 1], [], []>} : vector<128x128xbf16>, vector<128x128xbf16>, vector<128x128xf32> -> vector<128x128xf32>
    %211 = arith.addf %207, %210 : vector<128x128xf32>
    %c0_239 = arith.constant 0 : index
    %c0_240 = arith.constant 0 : index
    %212 = vector.load %arg8[%c0_239, %c0_240] : memref<128x128xf32, #tpu.memory_space<vmem>>, vector<128x128xf32>
    tpu.vector_store %arg8[%c0_239, %c0_240], %211 {strides = array<i32>} : memref<128x128xf32, #tpu.memory_space<vmem>>, vector<128x128xf32>,
    %213 = vector.extract_strided_slice %156 {offsets = [36, 0, 0], sizes = [8, 16, 128], strides = [1, 1, 1]} : vector<44x16x128xbf16> to vector<8x16x128xbf16>
    %214 = vector.shape_cast %213 : vector<8x16x128xbf16> to vector<128x128xbf16>
    %c0_241 = arith.constant 0 : index
    %c0_242 = arith.constant 0 : index
    %215 = vector.load %arg8[%c0_241, %c0_242] : memref<128x128xf32, #tpu.memory_space<vmem>>, vector<128x128xf32>
    %c2_243 = arith.constant 2 : index
    %c7_244 = arith.constant 7 : index
    %c0_245 = arith.constant 0 : index
    %c0_246 = arith.constant 0 : index
    %216 = vector.load %arg5[%c2_243, %c7_244, %c0_245, %c0_246] : memref<3x8x128x128xbf16, #tpu.memory_space<vmem>>, vector<1x1x128x128xbf16>
    %217 = vector.shape_cast %216 : vector<1x1x128x128xbf16> to vector<128x128xbf16>
    %cst_247 = arith.constant dense<0.000000e+00> : vector<128x128xf32>
    %218 = tpu.matmul %214, %217, %cst_247 {dimension_numbers = #tpu.dot_dimension_numbers<[1], [0], [0], [1], [0, 0, 1, 1], [], []>} : vector<128x128xbf16>, vector<128x128xbf16>, vector<128x128xf32> -> vector<128x128xf32>
    %219 = arith.addf %215, %218 : vector<128x128xf32>
    %c0_248 = arith.constant 0 : index
    %c0_249 = arith.constant 0 : index
    %220 = vector.load %arg8[%c0_248, %c0_249] : memref<128x128xf32, #tpu.memory_space<vmem>>, vector<128x128xf32>
    tpu.vector_store %arg8[%c0_248, %c0_249], %219 {strides = array<i32>} : memref<128x128xf32, #tpu.memory_space<vmem>>, vector<128x128xf32>,
    %c0_i32_250 = arith.constant 0 : i32
    %221 = arith.cmpi eq, %arg2, %c0_i32_250 : i32
    %222 = arith.extui %221 : i1 to i32
    %c0_i32_251 = arith.constant 0 : i32
    %223 = arith.cmpi ne, %222, %c0_i32_251 : i32
    scf.if %223 {
      %c0_252 = arith.constant 0 : index
      %c0_253 = arith.constant 0 : index
      %224 = vector.load %arg8[%c0_252, %c0_253] : memref<128x128xf32, #tpu.memory_space<vmem>>, vector<128x128xf32>
      %c0_254 = arith.constant 0 : index
      %c0_255 = arith.constant 0 : index
      %c0_256 = arith.constant 0 : index
      %225 = vector.load %arg6[%c0_254, %c0_255, %c0_256] : memref<1x1x128xf32, #tpu.memory_space<vmem>>, vector<1x1x128xf32>
      %226 = vector.shape_cast %225 : vector<1x1x128xf32> to vector<1x128xf32>
      %227 = vector.broadcast %226 : vector<1x128xf32> to vector<128x128xf32>
      %228 = arith.addf %224, %227 : vector<128x128xf32>
      %c0_257 = arith.constant 0 : index
      %c0_258 = arith.constant 0 : index
      %c0_259 = arith.constant 0 : index
      %229 = vector.load %arg7[%c0_257, %c0_258, %c0_259] : memref<1x128x128xf32, #tpu.memory_space<vmem>>, vector<1x128x128xf32>
      %230 = vector.shape_cast %229 : vector<1x128x128xf32> to vector<128x128xf32>
      %231 = vector.shape_cast %228 : vector<128x128xf32> to vector<1x128x128xf32>
      tpu.vector_store %arg7[%c0_257, %c0_258, %c0_259], %231 {strides = array<i32>} : memref<1x128x128xf32, #tpu.memory_space<vmem>>, vector<1x128x128xf32>,
    } else {
    }
    return
  }
  func.func @transform_0(%arg0: i32, %arg1: i32, %arg2: i32) -> (i32, i32, i32, i32) {
    %c2_i32 = arith.constant 2 : i32
    %0 = arith.muli %arg0, %c2_i32 : i32
    %1 = arith.addi %0, %arg1 : i32
    %c0_i32 = arith.constant 0 : i32
    %c0_i32_0 = arith.constant 0 : i32
    %c0_i32_1 = arith.constant 0 : i32
    return %1, %c0_i32, %c0_i32_0, %arg2 : i32, i32, i32, i32
  }
  func.func @transform_1(%arg0: i32, %arg1: i32, %arg2: i32) -> (i32, i32) {
    %c0_i32 = arith.constant 0 : i32
    %c0_i32_0 = arith.constant 0 : i32
    return %arg2, %c0_i32 : i32, i32
  }
  func.func @transform_2(%arg0: i32, %arg1: i32, %arg2: i32) -> (i32, i32, i32, i32) {
    %c0_i32 = arith.constant 0 : i32
    %c0_i32_0 = arith.constant 0 : i32
    %c0_i32_1 = arith.constant 0 : i32
    %c0_i32_2 = arith.constant 0 : i32
    return %c0_i32, %c0_i32_0, %arg2, %c0_i32_1 : i32, i32, i32, i32
  }
  func.func @transform_3(%arg0: i32, %arg1: i32, %arg2: i32) -> (i32, i32, i32) {
    %c0_i32 = arith.constant 0 : i32
    %c0_i32_0 = arith.constant 0 : i32
    %c0_i32_1 = arith.constant 0 : i32
    return %arg0, %c0_i32, %c0_i32_0 : i32, i32, i32
  }
  func.func @transform_4(%arg0: i32, %arg1: i32, %arg2: i32) -> (i32, i32, i32) {
    %c0_i32 = arith.constant 0 : i32
    %c0_i32_0 = arith.constant 0 : i32
    return %arg0, %arg1, %c0_i32 : i32, i32, i32
  }
}

module attributes {stable_mosaic.version = 11 : i64} {
  func.func @_aspp_kernel(%arg0: i32, %arg1: i32, %arg2: i32, %arg3: memref<1x44x52x128xbf16, #tpu.memory_space<vmem>>, %arg4: memref<128x128xbf16, #tpu.memory_space<vmem>>, %arg5: memref<3x8x128x128xbf16, #tpu.memory_space<vmem>>, %arg6: memref<1x1x128xf32, #tpu.memory_space<vmem>>, %arg7: memref<1x128x128xf32, #tpu.memory_space<vmem>>, %arg8: memref<128x128xf32, #tpu.memory_space<vmem>>) attributes {dimension_semantics = [#tpu.dimension_semantics<parallel>, #tpu.dimension_semantics<parallel>, #tpu.dimension_semantics<arbitrary>], iteration_bounds = array<i64: 2, 2, 1>, scalar_prefetch = 0 : i64, scratch_operands = 1 : i64, tpu.core_type = #tpu.core_type<tc>, window_params = [{transform_indices = @transform_0, window_bounds = array<i64: 1, 44, 52, 128>}, {transform_indices = @transform_1, window_bounds = array<i64: 128, 128>}, {transform_indices = @transform_2, window_bounds = array<i64: 3, 8, 128, 128>}, {transform_indices = @transform_3, window_bounds = array<i64: 1, 1, 128>}, {transform_indices = @transform_4, window_bounds = array<i64: 1, 128, 128>}]} {
    %c0_i32 = arith.constant 0 : i32
    %0 = arith.cmpi eq, %arg2, %c0_i32 : i32
    %1 = arith.extui %0 : i1 to i32
    %c0_i32_0 = arith.constant 0 : i32
    %2 = arith.cmpi ne, %1, %c0_i32_0 : i32
    scf.if %2 {
      %cst_252 = arith.constant 0.000000e+00 : f32
      %224 = vector.broadcast %cst_252 : f32 to vector<128x128xf32>
      %c0_253 = arith.constant 0 : index
      %c0_254 = arith.constant 0 : index
      %225 = vector.load %arg8[%c0_253, %c0_254] : memref<128x128xf32, #tpu.memory_space<vmem>>, vector<128x128xf32>
      tpu.vector_store %arg8[%c0_253, %c0_254], %224 {strides = array<i32>} : memref<128x128xf32, #tpu.memory_space<vmem>>, vector<128x128xf32>,
    } else {
    }
    %c0 = arith.constant 0 : index
    %c18 = arith.constant 18 : index
    %c18_1 = arith.constant 18 : index
    %c0_2 = arith.constant 0 : index
    %3 = vector.load %arg3[%c0, %c18, %c18_1, %c0_2] : memref<1x44x52x128xbf16, #tpu.memory_space<vmem>>, vector<1x8x16x128xbf16>
    %4 = vector.shape_cast %3 : vector<1x8x16x128xbf16> to vector<8x16x128xbf16>
    %5 = vector.shape_cast %4 : vector<8x16x128xbf16> to vector<128x128xbf16>
    %c0_3 = arith.constant 0 : index
    %c0_4 = arith.constant 0 : index
    %6 = vector.load %arg8[%c0_3, %c0_4] : memref<128x128xf32, #tpu.memory_space<vmem>>, vector<128x128xf32>
    %c0_5 = arith.constant 0 : index
    %c0_6 = arith.constant 0 : index
    %7 = vector.load %arg4[%c0_5, %c0_6] : memref<128x128xbf16, #tpu.memory_space<vmem>>, vector<128x128xbf16>
    %cst = arith.constant dense<0.000000e+00> : vector<128x128xf32>
    %8 = tpu.matmul %5, %7, %cst {dimension_numbers = #tpu.dot_dimension_numbers<[1], [0], [0], [1], [0, 0, 1, 1], [], []>} : vector<128x128xbf16>, vector<128x128xbf16>, vector<128x128xf32> -> vector<128x128xf32>
    %9 = arith.addf %6, %8 : vector<128x128xf32>
    %c0_7 = arith.constant 0 : index
    %c0_8 = arith.constant 0 : index
    %10 = vector.load %arg8[%c0_7, %c0_8] : memref<128x128xf32, #tpu.memory_space<vmem>>, vector<128x128xf32>
    tpu.vector_store %arg8[%c0_7, %c0_8], %9 {strides = array<i32>} : memref<128x128xf32, #tpu.memory_space<vmem>>, vector<128x128xf32>,
    %c0_9 = arith.constant 0 : index
    %c12 = arith.constant 12 : index
    %c12_10 = arith.constant 12 : index
    %c0_11 = arith.constant 0 : index
    %11 = vector.load %arg3[%c0_9, %c12, %c12_10, %c0_11] : memref<1x44x52x128xbf16, #tpu.memory_space<vmem>>, vector<1x20x16x128xbf16>
    %12 = vector.shape_cast %11 : vector<1x20x16x128xbf16> to vector<20x16x128xbf16>
    %c0_12 = arith.constant 0 : index
    %c12_13 = arith.constant 12 : index
    %c18_14 = arith.constant 18 : index
    %c0_15 = arith.constant 0 : index
    %13 = vector.load %arg3[%c0_12, %c12_13, %c18_14, %c0_15] : memref<1x44x52x128xbf16, #tpu.memory_space<vmem>>, vector<1x20x16x128xbf16>
    %14 = vector.shape_cast %13 : vector<1x20x16x128xbf16> to vector<20x16x128xbf16>
    %c0_16 = arith.constant 0 : index
    %c12_17 = arith.constant 12 : index
    %c24 = arith.constant 24 : index
    %c0_18 = arith.constant 0 : index
    %15 = vector.load %arg3[%c0_16, %c12_17, %c24, %c0_18] : memref<1x44x52x128xbf16, #tpu.memory_space<vmem>>, vector<1x20x16x128xbf16>
    %16 = vector.shape_cast %15 : vector<1x20x16x128xbf16> to vector<20x16x128xbf16>
    %17 = vector.extract_strided_slice %12 {offsets = [0, 0, 0], sizes = [8, 16, 128], strides = [1, 1, 1]} : vector<20x16x128xbf16> to vector<8x16x128xbf16>
    %18 = vector.shape_cast %17 : vector<8x16x128xbf16> to vector<128x128xbf16>
    %c0_19 = arith.constant 0 : index
    %c0_20 = arith.constant 0 : index
    %19 = vector.load %arg8[%c0_19, %c0_20] : memref<128x128xf32, #tpu.memory_space<vmem>>, vector<128x128xf32>
    %c0_21 = arith.constant 0 : index
    %c0_22 = arith.constant 0 : index
    %c0_23 = arith.constant 0 : index
    %c0_24 = arith.constant 0 : index
    %20 = vector.load %arg5[%c0_21, %c0_22, %c0_23, %c0_24] : memref<3x8x128x128xbf16, #tpu.memory_space<vmem>>, vector<1x1x128x128xbf16>
    %21 = vector.shape_cast %20 : vector<1x1x128x128xbf16> to vector<128x128xbf16>
    %cst_25 = arith.constant dense<0.000000e+00> : vector<128x128xf32>
    %22 = tpu.matmul %18, %21, %cst_25 {dimension_numbers = #tpu.dot_dimension_numbers<[1], [0], [0], [1], [0, 0, 1, 1], [], []>} : vector<128x128xbf16>, vector<128x128xbf16>, vector<128x128xf32> -> vector<128x128xf32>
    %23 = arith.addf %19, %22 : vector<128x128xf32>
    %c0_26 = arith.constant 0 : index
    %c0_27 = arith.constant 0 : index
    %24 = vector.load %arg8[%c0_26, %c0_27] : memref<128x128xf32, #tpu.memory_space<vmem>>, vector<128x128xf32>
    tpu.vector_store %arg8[%c0_26, %c0_27], %23 {strides = array<i32>} : memref<128x128xf32, #tpu.memory_space<vmem>>, vector<128x128xf32>,
    %25 = vector.extract_strided_slice %14 {offsets = [0, 0, 0], sizes = [8, 16, 128], strides = [1, 1, 1]} : vector<20x16x128xbf16> to vector<8x16x128xbf16>
    %26 = vector.shape_cast %25 : vector<8x16x128xbf16> to vector<128x128xbf16>
    %c0_28 = arith.constant 0 : index
    %c0_29 = arith.constant 0 : index
    %27 = vector.load %arg8[%c0_28, %c0_29] : memref<128x128xf32, #tpu.memory_space<vmem>>, vector<128x128xf32>
    %c0_30 = arith.constant 0 : index
    %c1 = arith.constant 1 : index
    %c0_31 = arith.constant 0 : index
    %c0_32 = arith.constant 0 : index
    %28 = vector.load %arg5[%c0_30, %c1, %c0_31, %c0_32] : memref<3x8x128x128xbf16, #tpu.memory_space<vmem>>, vector<1x1x128x128xbf16>
    %29 = vector.shape_cast %28 : vector<1x1x128x128xbf16> to vector<128x128xbf16>
    %cst_33 = arith.constant dense<0.000000e+00> : vector<128x128xf32>
    %30 = tpu.matmul %26, %29, %cst_33 {dimension_numbers = #tpu.dot_dimension_numbers<[1], [0], [0], [1], [0, 0, 1, 1], [], []>} : vector<128x128xbf16>, vector<128x128xbf16>, vector<128x128xf32> -> vector<128x128xf32>
    %31 = arith.addf %27, %30 : vector<128x128xf32>
    %c0_34 = arith.constant 0 : index
    %c0_35 = arith.constant 0 : index
    %32 = vector.load %arg8[%c0_34, %c0_35] : memref<128x128xf32, #tpu.memory_space<vmem>>, vector<128x128xf32>
    tpu.vector_store %arg8[%c0_34, %c0_35], %31 {strides = array<i32>} : memref<128x128xf32, #tpu.memory_space<vmem>>, vector<128x128xf32>,
    %33 = vector.extract_strided_slice %16 {offsets = [0, 0, 0], sizes = [8, 16, 128], strides = [1, 1, 1]} : vector<20x16x128xbf16> to vector<8x16x128xbf16>
    %34 = vector.shape_cast %33 : vector<8x16x128xbf16> to vector<128x128xbf16>
    %c0_36 = arith.constant 0 : index
    %c0_37 = arith.constant 0 : index
    %35 = vector.load %arg8[%c0_36, %c0_37] : memref<128x128xf32, #tpu.memory_space<vmem>>, vector<128x128xf32>
    %c0_38 = arith.constant 0 : index
    %c2 = arith.constant 2 : index
    %c0_39 = arith.constant 0 : index
    %c0_40 = arith.constant 0 : index
    %36 = vector.load %arg5[%c0_38, %c2, %c0_39, %c0_40] : memref<3x8x128x128xbf16, #tpu.memory_space<vmem>>, vector<1x1x128x128xbf16>
    %37 = vector.shape_cast %36 : vector<1x1x128x128xbf16> to vector<128x128xbf16>
    %cst_41 = arith.constant dense<0.000000e+00> : vector<128x128xf32>
    %38 = tpu.matmul %34, %37, %cst_41 {dimension_numbers = #tpu.dot_dimension_numbers<[1], [0], [0], [1], [0, 0, 1, 1], [], []>} : vector<128x128xbf16>, vector<128x128xbf16>, vector<128x128xf32> -> vector<128x128xf32>
    %39 = arith.addf %35, %38 : vector<128x128xf32>
    %c0_42 = arith.constant 0 : index
    %c0_43 = arith.constant 0 : index
    %40 = vector.load %arg8[%c0_42, %c0_43] : memref<128x128xf32, #tpu.memory_space<vmem>>, vector<128x128xf32>
    tpu.vector_store %arg8[%c0_42, %c0_43], %39 {strides = array<i32>} : memref<128x128xf32, #tpu.memory_space<vmem>>, vector<128x128xf32>,
    %41 = vector.extract_strided_slice %12 {offsets = [6, 0, 0], sizes = [8, 16, 128], strides = [1, 1, 1]} : vector<20x16x128xbf16> to vector<8x16x128xbf16>
    %42 = vector.shape_cast %41 : vector<8x16x128xbf16> to vector<128x128xbf16>
    %c0_44 = arith.constant 0 : index
    %c0_45 = arith.constant 0 : index
    %43 = vector.load %arg8[%c0_44, %c0_45] : memref<128x128xf32, #tpu.memory_space<vmem>>, vector<128x128xf32>
    %c0_46 = arith.constant 0 : index
    %c3 = arith.constant 3 : index
    %c0_47 = arith.constant 0 : index
    %c0_48 = arith.constant 0 : index
    %44 = vector.load %arg5[%c0_46, %c3, %c0_47, %c0_48] : memref<3x8x128x128xbf16, #tpu.memory_space<vmem>>, vector<1x1x128x128xbf16>
    %45 = vector.shape_cast %44 : vector<1x1x128x128xbf16> to vector<128x128xbf16>
    %cst_49 = arith.constant dense<0.000000e+00> : vector<128x128xf32>
    %46 = tpu.matmul %42, %45, %cst_49 {dimension_numbers = #tpu.dot_dimension_numbers<[1], [0], [0], [1], [0, 0, 1, 1], [], []>} : vector<128x128xbf16>, vector<128x128xbf16>, vector<128x128xf32> -> vector<128x128xf32>
    %47 = arith.addf %43, %46 : vector<128x128xf32>
    %c0_50 = arith.constant 0 : index
    %c0_51 = arith.constant 0 : index
    %48 = vector.load %arg8[%c0_50, %c0_51] : memref<128x128xf32, #tpu.memory_space<vmem>>, vector<128x128xf32>
    tpu.vector_store %arg8[%c0_50, %c0_51], %47 {strides = array<i32>} : memref<128x128xf32, #tpu.memory_space<vmem>>, vector<128x128xf32>,
    %49 = vector.extract_strided_slice %16 {offsets = [6, 0, 0], sizes = [8, 16, 128], strides = [1, 1, 1]} : vector<20x16x128xbf16> to vector<8x16x128xbf16>
    %50 = vector.shape_cast %49 : vector<8x16x128xbf16> to vector<128x128xbf16>
    %c0_52 = arith.constant 0 : index
    %c0_53 = arith.constant 0 : index
    %51 = vector.load %arg8[%c0_52, %c0_53] : memref<128x128xf32, #tpu.memory_space<vmem>>, vector<128x128xf32>
    %c0_54 = arith.constant 0 : index
    %c4 = arith.constant 4 : index
    %c0_55 = arith.constant 0 : index
    %c0_56 = arith.constant 0 : index
    %52 = vector.load %arg5[%c0_54, %c4, %c0_55, %c0_56] : memref<3x8x128x128xbf16, #tpu.memory_space<vmem>>, vector<1x1x128x128xbf16>
    %53 = vector.shape_cast %52 : vector<1x1x128x128xbf16> to vector<128x128xbf16>
    %cst_57 = arith.constant dense<0.000000e+00> : vector<128x128xf32>
    %54 = tpu.matmul %50, %53, %cst_57 {dimension_numbers = #tpu.dot_dimension_numbers<[1], [0], [0], [1], [0, 0, 1, 1], [], []>} : vector<128x128xbf16>, vector<128x128xbf16>, vector<128x128xf32> -> vector<128x128xf32>
    %55 = arith.addf %51, %54 : vector<128x128xf32>
    %c0_58 = arith.constant 0 : index
    %c0_59 = arith.constant 0 : index
    %56 = vector.load %arg8[%c0_58, %c0_59] : memref<128x128xf32, #tpu.memory_space<vmem>>, vector<128x128xf32>
    tpu.vector_store %arg8[%c0_58, %c0_59], %55 {strides = array<i32>} : memref<128x128xf32, #tpu.memory_space<vmem>>, vector<128x128xf32>,
    %57 = vector.extract_strided_slice %12 {offsets = [12, 0, 0], sizes = [8, 16, 128], strides = [1, 1, 1]} : vector<20x16x128xbf16> to vector<8x16x128xbf16>
    %58 = vector.shape_cast %57 : vector<8x16x128xbf16> to vector<128x128xbf16>
    %c0_60 = arith.constant 0 : index
    %c0_61 = arith.constant 0 : index
    %59 = vector.load %arg8[%c0_60, %c0_61] : memref<128x128xf32, #tpu.memory_space<vmem>>, vector<128x128xf32>
    %c0_62 = arith.constant 0 : index
    %c5 = arith.constant 5 : index
    %c0_63 = arith.constant 0 : index
    %c0_64 = arith.constant 0 : index
    %60 = vector.load %arg5[%c0_62, %c5, %c0_63, %c0_64] : memref<3x8x128x128xbf16, #tpu.memory_space<vmem>>, vector<1x1x128x128xbf16>
    %61 = vector.shape_cast %60 : vector<1x1x128x128xbf16> to vector<128x128xbf16>
    %cst_65 = arith.constant dense<0.000000e+00> : vector<128x128xf32>
    %62 = tpu.matmul %58, %61, %cst_65 {dimension_numbers = #tpu.dot_dimension_numbers<[1], [0], [0], [1], [0, 0, 1, 1], [], []>} : vector<128x128xbf16>, vector<128x128xbf16>, vector<128x128xf32> -> vector<128x128xf32>
    %63 = arith.addf %59, %62 : vector<128x128xf32>
    %c0_66 = arith.constant 0 : index
    %c0_67 = arith.constant 0 : index
    %64 = vector.load %arg8[%c0_66, %c0_67] : memref<128x128xf32, #tpu.memory_space<vmem>>, vector<128x128xf32>
    tpu.vector_store %arg8[%c0_66, %c0_67], %63 {strides = array<i32>} : memref<128x128xf32, #tpu.memory_space<vmem>>, vector<128x128xf32>,
    %65 = vector.extract_strided_slice %14 {offsets = [12, 0, 0], sizes = [8, 16, 128], strides = [1, 1, 1]} : vector<20x16x128xbf16> to vector<8x16x128xbf16>
    %66 = vector.shape_cast %65 : vector<8x16x128xbf16> to vector<128x128xbf16>
    %c0_68 = arith.constant 0 : index
    %c0_69 = arith.constant 0 : index
    %67 = vector.load %arg8[%c0_68, %c0_69] : memref<128x128xf32, #tpu.memory_space<vmem>>, vector<128x128xf32>
    %c0_70 = arith.constant 0 : index
    %c6 = arith.constant 6 : index
    %c0_71 = arith.constant 0 : index
    %c0_72 = arith.constant 0 : index
    %68 = vector.load %arg5[%c0_70, %c6, %c0_71, %c0_72] : memref<3x8x128x128xbf16, #tpu.memory_space<vmem>>, vector<1x1x128x128xbf16>
    %69 = vector.shape_cast %68 : vector<1x1x128x128xbf16> to vector<128x128xbf16>
    %cst_73 = arith.constant dense<0.000000e+00> : vector<128x128xf32>
    %70 = tpu.matmul %66, %69, %cst_73 {dimension_numbers = #tpu.dot_dimension_numbers<[1], [0], [0], [1], [0, 0, 1, 1], [], []>} : vector<128x128xbf16>, vector<128x128xbf16>, vector<128x128xf32> -> vector<128x128xf32>
    %71 = arith.addf %67, %70 : vector<128x128xf32>
    %c0_74 = arith.constant 0 : index
    %c0_75 = arith.constant 0 : index
    %72 = vector.load %arg8[%c0_74, %c0_75] : memref<128x128xf32, #tpu.memory_space<vmem>>, vector<128x128xf32>
    tpu.vector_store %arg8[%c0_74, %c0_75], %71 {strides = array<i32>} : memref<128x128xf32, #tpu.memory_space<vmem>>, vector<128x128xf32>,
    %73 = vector.extract_strided_slice %16 {offsets = [12, 0, 0], sizes = [8, 16, 128], strides = [1, 1, 1]} : vector<20x16x128xbf16> to vector<8x16x128xbf16>
    %74 = vector.shape_cast %73 : vector<8x16x128xbf16> to vector<128x128xbf16>
    %c0_76 = arith.constant 0 : index
    %c0_77 = arith.constant 0 : index
    %75 = vector.load %arg8[%c0_76, %c0_77] : memref<128x128xf32, #tpu.memory_space<vmem>>, vector<128x128xf32>
    %c0_78 = arith.constant 0 : index
    %c7 = arith.constant 7 : index
    %c0_79 = arith.constant 0 : index
    %c0_80 = arith.constant 0 : index
    %76 = vector.load %arg5[%c0_78, %c7, %c0_79, %c0_80] : memref<3x8x128x128xbf16, #tpu.memory_space<vmem>>, vector<1x1x128x128xbf16>
    %77 = vector.shape_cast %76 : vector<1x1x128x128xbf16> to vector<128x128xbf16>
    %cst_81 = arith.constant dense<0.000000e+00> : vector<128x128xf32>
    %78 = tpu.matmul %74, %77, %cst_81 {dimension_numbers = #tpu.dot_dimension_numbers<[1], [0], [0], [1], [0, 0, 1, 1], [], []>} : vector<128x128xbf16>, vector<128x128xbf16>, vector<128x128xf32> -> vector<128x128xf32>
    %79 = arith.addf %75, %78 : vector<128x128xf32>
    %c0_82 = arith.constant 0 : index
    %c0_83 = arith.constant 0 : index
    %80 = vector.load %arg8[%c0_82, %c0_83] : memref<128x128xf32, #tpu.memory_space<vmem>>, vector<128x128xf32>
    tpu.vector_store %arg8[%c0_82, %c0_83], %79 {strides = array<i32>} : memref<128x128xf32, #tpu.memory_space<vmem>>, vector<128x128xf32>,
    %c0_84 = arith.constant 0 : index
    %c6_85 = arith.constant 6 : index
    %c6_86 = arith.constant 6 : index
    %c0_87 = arith.constant 0 : index
    %81 = vector.load %arg3[%c0_84, %c6_85, %c6_86, %c0_87] : memref<1x44x52x128xbf16, #tpu.memory_space<vmem>>, vector<1x32x16x128xbf16>
    %82 = vector.shape_cast %81 : vector<1x32x16x128xbf16> to vector<32x16x128xbf16>
    %c0_88 = arith.constant 0 : index
    %c6_89 = arith.constant 6 : index
    %c18_90 = arith.constant 18 : index
    %c0_91 = arith.constant 0 : index
    %83 = vector.load %arg3[%c0_88, %c6_89, %c18_90, %c0_91] : memref<1x44x52x128xbf16, #tpu.memory_space<vmem>>, vector<1x32x16x128xbf16>
    %84 = vector.shape_cast %83 : vector<1x32x16x128xbf16> to vector<32x16x128xbf16>
    %c0_92 = arith.constant 0 : index
    %c6_93 = arith.constant 6 : index
    %c30 = arith.constant 30 : index
    %c0_94 = arith.constant 0 : index
    %85 = vector.load %arg3[%c0_92, %c6_93, %c30, %c0_94] : memref<1x44x52x128xbf16, #tpu.memory_space<vmem>>, vector<1x32x16x128xbf16>
    %86 = vector.shape_cast %85 : vector<1x32x16x128xbf16> to vector<32x16x128xbf16>
    %87 = vector.extract_strided_slice %82 {offsets = [0, 0, 0], sizes = [8, 16, 128], strides = [1, 1, 1]} : vector<32x16x128xbf16> to vector<8x16x128xbf16>
    %88 = vector.shape_cast %87 : vector<8x16x128xbf16> to vector<128x128xbf16>
    %c0_95 = arith.constant 0 : index
    %c0_96 = arith.constant 0 : index
    %89 = vector.load %arg8[%c0_95, %c0_96] : memref<128x128xf32, #tpu.memory_space<vmem>>, vector<128x128xf32>
    %c1_97 = arith.constant 1 : index
    %c0_98 = arith.constant 0 : index
    %c0_99 = arith.constant 0 : index
    %c0_100 = arith.constant 0 : index
    %90 = vector.load %arg5[%c1_97, %c0_98, %c0_99, %c0_100] : memref<3x8x128x128xbf16, #tpu.memory_space<vmem>>, vector<1x1x128x128xbf16>
    %91 = vector.shape_cast %90 : vector<1x1x128x128xbf16> to vector<128x128xbf16>
    %cst_101 = arith.constant dense<0.000000e+00> : vector<128x128xf32>
    %92 = tpu.matmul %88, %91, %cst_101 {dimension_numbers = #tpu.dot_dimension_numbers<[1], [0], [0], [1], [0, 0, 1, 1], [], []>} : vector<128x128xbf16>, vector<128x128xbf16>, vector<128x128xf32> -> vector<128x128xf32>
    %93 = arith.addf %89, %92 : vector<128x128xf32>
    %c0_102 = arith.constant 0 : index
    %c0_103 = arith.constant 0 : index
    %94 = vector.load %arg8[%c0_102, %c0_103] : memref<128x128xf32, #tpu.memory_space<vmem>>, vector<128x128xf32>
    tpu.vector_store %arg8[%c0_102, %c0_103], %93 {strides = array<i32>} : memref<128x128xf32, #tpu.memory_space<vmem>>, vector<128x128xf32>,
    %95 = vector.extract_strided_slice %84 {offsets = [0, 0, 0], sizes = [8, 16, 128], strides = [1, 1, 1]} : vector<32x16x128xbf16> to vector<8x16x128xbf16>
    %96 = vector.shape_cast %95 : vector<8x16x128xbf16> to vector<128x128xbf16>
    %c0_104 = arith.constant 0 : index
    %c0_105 = arith.constant 0 : index
    %97 = vector.load %arg8[%c0_104, %c0_105] : memref<128x128xf32, #tpu.memory_space<vmem>>, vector<128x128xf32>
    %c1_106 = arith.constant 1 : index
    %c1_107 = arith.constant 1 : index
    %c0_108 = arith.constant 0 : index
    %c0_109 = arith.constant 0 : index
    %98 = vector.load %arg5[%c1_106, %c1_107, %c0_108, %c0_109] : memref<3x8x128x128xbf16, #tpu.memory_space<vmem>>, vector<1x1x128x128xbf16>
    %99 = vector.shape_cast %98 : vector<1x1x128x128xbf16> to vector<128x128xbf16>
    %cst_110 = arith.constant dense<0.000000e+00> : vector<128x128xf32>
    %100 = tpu.matmul %96, %99, %cst_110 {dimension_numbers = #tpu.dot_dimension_numbers<[1], [0], [0], [1], [0, 0, 1, 1], [], []>} : vector<128x128xbf16>, vector<128x128xbf16>, vector<128x128xf32> -> vector<128x128xf32>
    %101 = arith.addf %97, %100 : vector<128x128xf32>
    %c0_111 = arith.constant 0 : index
    %c0_112 = arith.constant 0 : index
    %102 = vector.load %arg8[%c0_111, %c0_112] : memref<128x128xf32, #tpu.memory_space<vmem>>, vector<128x128xf32>
    tpu.vector_store %arg8[%c0_111, %c0_112], %101 {strides = array<i32>} : memref<128x128xf32, #tpu.memory_space<vmem>>, vector<128x128xf32>,
    %103 = vector.extract_strided_slice %86 {offsets = [0, 0, 0], sizes = [8, 16, 128], strides = [1, 1, 1]} : vector<32x16x128xbf16> to vector<8x16x128xbf16>
    %104 = vector.shape_cast %103 : vector<8x16x128xbf16> to vector<128x128xbf16>
    %c0_113 = arith.constant 0 : index
    %c0_114 = arith.constant 0 : index
    %105 = vector.load %arg8[%c0_113, %c0_114] : memref<128x128xf32, #tpu.memory_space<vmem>>, vector<128x128xf32>
    %c1_115 = arith.constant 1 : index
    %c2_116 = arith.constant 2 : index
    %c0_117 = arith.constant 0 : index
    %c0_118 = arith.constant 0 : index
    %106 = vector.load %arg5[%c1_115, %c2_116, %c0_117, %c0_118] : memref<3x8x128x128xbf16, #tpu.memory_space<vmem>>, vector<1x1x128x128xbf16>
    %107 = vector.shape_cast %106 : vector<1x1x128x128xbf16> to vector<128x128xbf16>
    %cst_119 = arith.constant dense<0.000000e+00> : vector<128x128xf32>
    %108 = tpu.matmul %104, %107, %cst_119 {dimension_numbers = #tpu.dot_dimension_numbers<[1], [0], [0], [1], [0, 0, 1, 1], [], []>} : vector<128x128xbf16>, vector<128x128xbf16>, vector<128x128xf32> -> vector<128x128xf32>
    %109 = arith.addf %105, %108 : vector<128x128xf32>
    %c0_120 = arith.constant 0 : index
    %c0_121 = arith.constant 0 : index
    %110 = vector.load %arg8[%c0_120, %c0_121] : memref<128x128xf32, #tpu.memory_space<vmem>>, vector<128x128xf32>
    tpu.vector_store %arg8[%c0_120, %c0_121], %109 {strides = array<i32>} : memref<128x128xf32, #tpu.memory_space<vmem>>, vector<128x128xf32>,
    %111 = vector.extract_strided_slice %82 {offsets = [12, 0, 0], sizes = [8, 16, 128], strides = [1, 1, 1]} : vector<32x16x128xbf16> to vector<8x16x128xbf16>
    %112 = vector.shape_cast %111 : vector<8x16x128xbf16> to vector<128x128xbf16>
    %c0_122 = arith.constant 0 : index
    %c0_123 = arith.constant 0 : index
    %113 = vector.load %arg8[%c0_122, %c0_123] : memref<128x128xf32, #tpu.memory_space<vmem>>, vector<128x128xf32>
    %c1_124 = arith.constant 1 : index
    %c3_125 = arith.constant 3 : index
    %c0_126 = arith.constant 0 : index
    %c0_127 = arith.constant 0 : index
    %114 = vector.load %arg5[%c1_124, %c3_125, %c0_126, %c0_127] : memref<3x8x128x128xbf16, #tpu.memory_space<vmem>>, vector<1x1x128x128xbf16>
    %115 = vector.shape_cast %114 : vector<1x1x128x128xbf16> to vector<128x128xbf16>
    %cst_128 = arith.constant dense<0.000000e+00> : vector<128x128xf32>
    %116 = tpu.matmul %112, %115, %cst_128 {dimension_numbers = #tpu.dot_dimension_numbers<[1], [0], [0], [1], [0, 0, 1, 1], [], []>} : vector<128x128xbf16>, vector<128x128xbf16>, vector<128x128xf32> -> vector<128x128xf32>
    %117 = arith.addf %113, %116 : vector<128x128xf32>
    %c0_129 = arith.constant 0 : index
    %c0_130 = arith.constant 0 : index
    %118 = vector.load %arg8[%c0_129, %c0_130] : memref<128x128xf32, #tpu.memory_space<vmem>>, vector<128x128xf32>
    tpu.vector_store %arg8[%c0_129, %c0_130], %117 {strides = array<i32>} : memref<128x128xf32, #tpu.memory_space<vmem>>, vector<128x128xf32>,
    %119 = vector.extract_strided_slice %86 {offsets = [12, 0, 0], sizes = [8, 16, 128], strides = [1, 1, 1]} : vector<32x16x128xbf16> to vector<8x16x128xbf16>
    %120 = vector.shape_cast %119 : vector<8x16x128xbf16> to vector<128x128xbf16>
    %c0_131 = arith.constant 0 : index
    %c0_132 = arith.constant 0 : index
    %121 = vector.load %arg8[%c0_131, %c0_132] : memref<128x128xf32, #tpu.memory_space<vmem>>, vector<128x128xf32>
    %c1_133 = arith.constant 1 : index
    %c4_134 = arith.constant 4 : index
    %c0_135 = arith.constant 0 : index
    %c0_136 = arith.constant 0 : index
    %122 = vector.load %arg5[%c1_133, %c4_134, %c0_135, %c0_136] : memref<3x8x128x128xbf16, #tpu.memory_space<vmem>>, vector<1x1x128x128xbf16>
    %123 = vector.shape_cast %122 : vector<1x1x128x128xbf16> to vector<128x128xbf16>
    %cst_137 = arith.constant dense<0.000000e+00> : vector<128x128xf32>
    %124 = tpu.matmul %120, %123, %cst_137 {dimension_numbers = #tpu.dot_dimension_numbers<[1], [0], [0], [1], [0, 0, 1, 1], [], []>} : vector<128x128xbf16>, vector<128x128xbf16>, vector<128x128xf32> -> vector<128x128xf32>
    %125 = arith.addf %121, %124 : vector<128x128xf32>
    %c0_138 = arith.constant 0 : index
    %c0_139 = arith.constant 0 : index
    %126 = vector.load %arg8[%c0_138, %c0_139] : memref<128x128xf32, #tpu.memory_space<vmem>>, vector<128x128xf32>
    tpu.vector_store %arg8[%c0_138, %c0_139], %125 {strides = array<i32>} : memref<128x128xf32, #tpu.memory_space<vmem>>, vector<128x128xf32>,
    %127 = vector.extract_strided_slice %82 {offsets = [24, 0, 0], sizes = [8, 16, 128], strides = [1, 1, 1]} : vector<32x16x128xbf16> to vector<8x16x128xbf16>
    %128 = vector.shape_cast %127 : vector<8x16x128xbf16> to vector<128x128xbf16>
    %c0_140 = arith.constant 0 : index
    %c0_141 = arith.constant 0 : index
    %129 = vector.load %arg8[%c0_140, %c0_141] : memref<128x128xf32, #tpu.memory_space<vmem>>, vector<128x128xf32>
    %c1_142 = arith.constant 1 : index
    %c5_143 = arith.constant 5 : index
    %c0_144 = arith.constant 0 : index
    %c0_145 = arith.constant 0 : index
    %130 = vector.load %arg5[%c1_142, %c5_143, %c0_144, %c0_145] : memref<3x8x128x128xbf16, #tpu.memory_space<vmem>>, vector<1x1x128x128xbf16>
    %131 = vector.shape_cast %130 : vector<1x1x128x128xbf16> to vector<128x128xbf16>
    %cst_146 = arith.constant dense<0.000000e+00> : vector<128x128xf32>
    %132 = tpu.matmul %128, %131, %cst_146 {dimension_numbers = #tpu.dot_dimension_numbers<[1], [0], [0], [1], [0, 0, 1, 1], [], []>} : vector<128x128xbf16>, vector<128x128xbf16>, vector<128x128xf32> -> vector<128x128xf32>
    %133 = arith.addf %129, %132 : vector<128x128xf32>
    %c0_147 = arith.constant 0 : index
    %c0_148 = arith.constant 0 : index
    %134 = vector.load %arg8[%c0_147, %c0_148] : memref<128x128xf32, #tpu.memory_space<vmem>>, vector<128x128xf32>
    tpu.vector_store %arg8[%c0_147, %c0_148], %133 {strides = array<i32>} : memref<128x128xf32, #tpu.memory_space<vmem>>, vector<128x128xf32>,
    %135 = vector.extract_strided_slice %84 {offsets = [24, 0, 0], sizes = [8, 16, 128], strides = [1, 1, 1]} : vector<32x16x128xbf16> to vector<8x16x128xbf16>
    %136 = vector.shape_cast %135 : vector<8x16x128xbf16> to vector<128x128xbf16>
    %c0_149 = arith.constant 0 : index
    %c0_150 = arith.constant 0 : index
    %137 = vector.load %arg8[%c0_149, %c0_150] : memref<128x128xf32, #tpu.memory_space<vmem>>, vector<128x128xf32>
    %c1_151 = arith.constant 1 : index
    %c6_152 = arith.constant 6 : index
    %c0_153 = arith.constant 0 : index
    %c0_154 = arith.constant 0 : index
    %138 = vector.load %arg5[%c1_151, %c6_152, %c0_153, %c0_154] : memref<3x8x128x128xbf16, #tpu.memory_space<vmem>>, vector<1x1x128x128xbf16>
    %139 = vector.shape_cast %138 : vector<1x1x128x128xbf16> to vector<128x128xbf16>
    %cst_155 = arith.constant dense<0.000000e+00> : vector<128x128xf32>
    %140 = tpu.matmul %136, %139, %cst_155 {dimension_numbers = #tpu.dot_dimension_numbers<[1], [0], [0], [1], [0, 0, 1, 1], [], []>} : vector<128x128xbf16>, vector<128x128xbf16>, vector<128x128xf32> -> vector<128x128xf32>
    %141 = arith.addf %137, %140 : vector<128x128xf32>
    %c0_156 = arith.constant 0 : index
    %c0_157 = arith.constant 0 : index
    %142 = vector.load %arg8[%c0_156, %c0_157] : memref<128x128xf32, #tpu.memory_space<vmem>>, vector<128x128xf32>
    tpu.vector_store %arg8[%c0_156, %c0_157], %141 {strides = array<i32>} : memref<128x128xf32, #tpu.memory_space<vmem>>, vector<128x128xf32>,
    %143 = vector.extract_strided_slice %86 {offsets = [24, 0, 0], sizes = [8, 16, 128], strides = [1, 1, 1]} : vector<32x16x128xbf16> to vector<8x16x128xbf16>
    %144 = vector.shape_cast %143 : vector<8x16x128xbf16> to vector<128x128xbf16>
    %c0_158 = arith.constant 0 : index
    %c0_159 = arith.constant 0 : index
    %145 = vector.load %arg8[%c0_158, %c0_159] : memref<128x128xf32, #tpu.memory_space<vmem>>, vector<128x128xf32>
    %c1_160 = arith.constant 1 : index
    %c7_161 = arith.constant 7 : index
    %c0_162 = arith.constant 0 : index
    %c0_163 = arith.constant 0 : index
    %146 = vector.load %arg5[%c1_160, %c7_161, %c0_162, %c0_163] : memref<3x8x128x128xbf16, #tpu.memory_space<vmem>>, vector<1x1x128x128xbf16>
    %147 = vector.shape_cast %146 : vector<1x1x128x128xbf16> to vector<128x128xbf16>
    %cst_164 = arith.constant dense<0.000000e+00> : vector<128x128xf32>
    %148 = tpu.matmul %144, %147, %cst_164 {dimension_numbers = #tpu.dot_dimension_numbers<[1], [0], [0], [1], [0, 0, 1, 1], [], []>} : vector<128x128xbf16>, vector<128x128xbf16>, vector<128x128xf32> -> vector<128x128xf32>
    %149 = arith.addf %145, %148 : vector<128x128xf32>
    %c0_165 = arith.constant 0 : index
    %c0_166 = arith.constant 0 : index
    %150 = vector.load %arg8[%c0_165, %c0_166] : memref<128x128xf32, #tpu.memory_space<vmem>>, vector<128x128xf32>
    tpu.vector_store %arg8[%c0_165, %c0_166], %149 {strides = array<i32>} : memref<128x128xf32, #tpu.memory_space<vmem>>, vector<128x128xf32>,
    %c0_167 = arith.constant 0 : index
    %c0_168 = arith.constant 0 : index
    %c0_169 = arith.constant 0 : index
    %c0_170 = arith.constant 0 : index
    %151 = vector.load %arg3[%c0_167, %c0_168, %c0_169, %c0_170] : memref<1x44x52x128xbf16, #tpu.memory_space<vmem>>, vector<1x44x16x128xbf16>
    %152 = vector.shape_cast %151 : vector<1x44x16x128xbf16> to vector<44x16x128xbf16>
    %c0_171 = arith.constant 0 : index
    %c0_172 = arith.constant 0 : index
    %c18_173 = arith.constant 18 : index
    %c0_174 = arith.constant 0 : index
    %153 = vector.load %arg3[%c0_171, %c0_172, %c18_173, %c0_174] : memref<1x44x52x128xbf16, #tpu.memory_space<vmem>>, vector<1x44x16x128xbf16>
    %154 = vector.shape_cast %153 : vector<1x44x16x128xbf16> to vector<44x16x128xbf16>
    %c0_175 = arith.constant 0 : index
    %c0_176 = arith.constant 0 : index
    %c36 = arith.constant 36 : index
    %c0_177 = arith.constant 0 : index
    %155 = vector.load %arg3[%c0_175, %c0_176, %c36, %c0_177] : memref<1x44x52x128xbf16, #tpu.memory_space<vmem>>, vector<1x44x16x128xbf16>
    %156 = vector.shape_cast %155 : vector<1x44x16x128xbf16> to vector<44x16x128xbf16>
    %157 = vector.extract_strided_slice %152 {offsets = [0, 0, 0], sizes = [8, 16, 128], strides = [1, 1, 1]} : vector<44x16x128xbf16> to vector<8x16x128xbf16>
    %158 = vector.shape_cast %157 : vector<8x16x128xbf16> to vector<128x128xbf16>
    %c0_178 = arith.constant 0 : index
    %c0_179 = arith.constant 0 : index
    %159 = vector.load %arg8[%c0_178, %c0_179] : memref<128x128xf32, #tpu.memory_space<vmem>>, vector<128x128xf32>
    %c2_180 = arith.constant 2 : index
    %c0_181 = arith.constant 0 : index
    %c0_182 = arith.constant 0 : index
    %c0_183 = arith.constant 0 : index
    %160 = vector.load %arg5[%c2_180, %c0_181, %c0_182, %c0_183] : memref<3x8x128x128xbf16, #tpu.memory_space<vmem>>, vector<1x1x128x128xbf16>
    %161 = vector.shape_cast %160 : vector<1x1x128x128xbf16> to vector<128x128xbf16>
    %cst_184 = arith.constant dense<0.000000e+00> : vector<128x128xf32>
    %162 = tpu.matmul %158, %161, %cst_184 {dimension_numbers = #tpu.dot_dimension_numbers<[1], [0], [0], [1], [0, 0, 1, 1], [], []>} : vector<128x128xbf16>, vector<128x128xbf16>, vector<128x128xf32> -> vector<128x128xf32>
    %163 = arith.addf %159, %162 : vector<128x128xf32>
    %c0_185 = arith.constant 0 : index
    %c0_186 = arith.constant 0 : index
    %164 = vector.load %arg8[%c0_185, %c0_186] : memref<128x128xf32, #tpu.memory_space<vmem>>, vector<128x128xf32>
    tpu.vector_store %arg8[%c0_185, %c0_186], %163 {strides = array<i32>} : memref<128x128xf32, #tpu.memory_space<vmem>>, vector<128x128xf32>,
    %165 = vector.extract_strided_slice %154 {offsets = [0, 0, 0], sizes = [8, 16, 128], strides = [1, 1, 1]} : vector<44x16x128xbf16> to vector<8x16x128xbf16>
    %166 = vector.shape_cast %165 : vector<8x16x128xbf16> to vector<128x128xbf16>
    %c0_187 = arith.constant 0 : index
    %c0_188 = arith.constant 0 : index
    %167 = vector.load %arg8[%c0_187, %c0_188] : memref<128x128xf32, #tpu.memory_space<vmem>>, vector<128x128xf32>
    %c2_189 = arith.constant 2 : index
    %c1_190 = arith.constant 1 : index
    %c0_191 = arith.constant 0 : index
    %c0_192 = arith.constant 0 : index
    %168 = vector.load %arg5[%c2_189, %c1_190, %c0_191, %c0_192] : memref<3x8x128x128xbf16, #tpu.memory_space<vmem>>, vector<1x1x128x128xbf16>
    %169 = vector.shape_cast %168 : vector<1x1x128x128xbf16> to vector<128x128xbf16>
    %cst_193 = arith.constant dense<0.000000e+00> : vector<128x128xf32>
    %170 = tpu.matmul %166, %169, %cst_193 {dimension_numbers = #tpu.dot_dimension_numbers<[1], [0], [0], [1], [0, 0, 1, 1], [], []>} : vector<128x128xbf16>, vector<128x128xbf16>, vector<128x128xf32> -> vector<128x128xf32>
    %171 = arith.addf %167, %170 : vector<128x128xf32>
    %c0_194 = arith.constant 0 : index
    %c0_195 = arith.constant 0 : index
    %172 = vector.load %arg8[%c0_194, %c0_195] : memref<128x128xf32, #tpu.memory_space<vmem>>, vector<128x128xf32>
    tpu.vector_store %arg8[%c0_194, %c0_195], %171 {strides = array<i32>} : memref<128x128xf32, #tpu.memory_space<vmem>>, vector<128x128xf32>,
    %173 = vector.extract_strided_slice %156 {offsets = [0, 0, 0], sizes = [8, 16, 128], strides = [1, 1, 1]} : vector<44x16x128xbf16> to vector<8x16x128xbf16>
    %174 = vector.shape_cast %173 : vector<8x16x128xbf16> to vector<128x128xbf16>
    %c0_196 = arith.constant 0 : index
    %c0_197 = arith.constant 0 : index
    %175 = vector.load %arg8[%c0_196, %c0_197] : memref<128x128xf32, #tpu.memory_space<vmem>>, vector<128x128xf32>
    %c2_198 = arith.constant 2 : index
    %c2_199 = arith.constant 2 : index
    %c0_200 = arith.constant 0 : index
    %c0_201 = arith.constant 0 : index
    %176 = vector.load %arg5[%c2_198, %c2_199, %c0_200, %c0_201] : memref<3x8x128x128xbf16, #tpu.memory_space<vmem>>, vector<1x1x128x128xbf16>
    %177 = vector.shape_cast %176 : vector<1x1x128x128xbf16> to vector<128x128xbf16>
    %cst_202 = arith.constant dense<0.000000e+00> : vector<128x128xf32>
    %178 = tpu.matmul %174, %177, %cst_202 {dimension_numbers = #tpu.dot_dimension_numbers<[1], [0], [0], [1], [0, 0, 1, 1], [], []>} : vector<128x128xbf16>, vector<128x128xbf16>, vector<128x128xf32> -> vector<128x128xf32>
    %179 = arith.addf %175, %178 : vector<128x128xf32>
    %c0_203 = arith.constant 0 : index
    %c0_204 = arith.constant 0 : index
    %180 = vector.load %arg8[%c0_203, %c0_204] : memref<128x128xf32, #tpu.memory_space<vmem>>, vector<128x128xf32>
    tpu.vector_store %arg8[%c0_203, %c0_204], %179 {strides = array<i32>} : memref<128x128xf32, #tpu.memory_space<vmem>>, vector<128x128xf32>,
    %181 = vector.extract_strided_slice %152 {offsets = [18, 0, 0], sizes = [8, 16, 128], strides = [1, 1, 1]} : vector<44x16x128xbf16> to vector<8x16x128xbf16>
    %182 = vector.shape_cast %181 : vector<8x16x128xbf16> to vector<128x128xbf16>
    %c0_205 = arith.constant 0 : index
    %c0_206 = arith.constant 0 : index
    %183 = vector.load %arg8[%c0_205, %c0_206] : memref<128x128xf32, #tpu.memory_space<vmem>>, vector<128x128xf32>
    %c2_207 = arith.constant 2 : index
    %c3_208 = arith.constant 3 : index
    %c0_209 = arith.constant 0 : index
    %c0_210 = arith.constant 0 : index
    %184 = vector.load %arg5[%c2_207, %c3_208, %c0_209, %c0_210] : memref<3x8x128x128xbf16, #tpu.memory_space<vmem>>, vector<1x1x128x128xbf16>
    %185 = vector.shape_cast %184 : vector<1x1x128x128xbf16> to vector<128x128xbf16>
    %cst_211 = arith.constant dense<0.000000e+00> : vector<128x128xf32>
    %186 = tpu.matmul %182, %185, %cst_211 {dimension_numbers = #tpu.dot_dimension_numbers<[1], [0], [0], [1], [0, 0, 1, 1], [], []>} : vector<128x128xbf16>, vector<128x128xbf16>, vector<128x128xf32> -> vector<128x128xf32>
    %187 = arith.addf %183, %186 : vector<128x128xf32>
    %c0_212 = arith.constant 0 : index
    %c0_213 = arith.constant 0 : index
    %188 = vector.load %arg8[%c0_212, %c0_213] : memref<128x128xf32, #tpu.memory_space<vmem>>, vector<128x128xf32>
    tpu.vector_store %arg8[%c0_212, %c0_213], %187 {strides = array<i32>} : memref<128x128xf32, #tpu.memory_space<vmem>>, vector<128x128xf32>,
    %189 = vector.extract_strided_slice %156 {offsets = [18, 0, 0], sizes = [8, 16, 128], strides = [1, 1, 1]} : vector<44x16x128xbf16> to vector<8x16x128xbf16>
    %190 = vector.shape_cast %189 : vector<8x16x128xbf16> to vector<128x128xbf16>
    %c0_214 = arith.constant 0 : index
    %c0_215 = arith.constant 0 : index
    %191 = vector.load %arg8[%c0_214, %c0_215] : memref<128x128xf32, #tpu.memory_space<vmem>>, vector<128x128xf32>
    %c2_216 = arith.constant 2 : index
    %c4_217 = arith.constant 4 : index
    %c0_218 = arith.constant 0 : index
    %c0_219 = arith.constant 0 : index
    %192 = vector.load %arg5[%c2_216, %c4_217, %c0_218, %c0_219] : memref<3x8x128x128xbf16, #tpu.memory_space<vmem>>, vector<1x1x128x128xbf16>
    %193 = vector.shape_cast %192 : vector<1x1x128x128xbf16> to vector<128x128xbf16>
    %cst_220 = arith.constant dense<0.000000e+00> : vector<128x128xf32>
    %194 = tpu.matmul %190, %193, %cst_220 {dimension_numbers = #tpu.dot_dimension_numbers<[1], [0], [0], [1], [0, 0, 1, 1], [], []>} : vector<128x128xbf16>, vector<128x128xbf16>, vector<128x128xf32> -> vector<128x128xf32>
    %195 = arith.addf %191, %194 : vector<128x128xf32>
    %c0_221 = arith.constant 0 : index
    %c0_222 = arith.constant 0 : index
    %196 = vector.load %arg8[%c0_221, %c0_222] : memref<128x128xf32, #tpu.memory_space<vmem>>, vector<128x128xf32>
    tpu.vector_store %arg8[%c0_221, %c0_222], %195 {strides = array<i32>} : memref<128x128xf32, #tpu.memory_space<vmem>>, vector<128x128xf32>,
    %197 = vector.extract_strided_slice %152 {offsets = [36, 0, 0], sizes = [8, 16, 128], strides = [1, 1, 1]} : vector<44x16x128xbf16> to vector<8x16x128xbf16>
    %198 = vector.shape_cast %197 : vector<8x16x128xbf16> to vector<128x128xbf16>
    %c0_223 = arith.constant 0 : index
    %c0_224 = arith.constant 0 : index
    %199 = vector.load %arg8[%c0_223, %c0_224] : memref<128x128xf32, #tpu.memory_space<vmem>>, vector<128x128xf32>
    %c2_225 = arith.constant 2 : index
    %c5_226 = arith.constant 5 : index
    %c0_227 = arith.constant 0 : index
    %c0_228 = arith.constant 0 : index
    %200 = vector.load %arg5[%c2_225, %c5_226, %c0_227, %c0_228] : memref<3x8x128x128xbf16, #tpu.memory_space<vmem>>, vector<1x1x128x128xbf16>
    %201 = vector.shape_cast %200 : vector<1x1x128x128xbf16> to vector<128x128xbf16>
    %cst_229 = arith.constant dense<0.000000e+00> : vector<128x128xf32>
    %202 = tpu.matmul %198, %201, %cst_229 {dimension_numbers = #tpu.dot_dimension_numbers<[1], [0], [0], [1], [0, 0, 1, 1], [], []>} : vector<128x128xbf16>, vector<128x128xbf16>, vector<128x128xf32> -> vector<128x128xf32>
    %203 = arith.addf %199, %202 : vector<128x128xf32>
    %c0_230 = arith.constant 0 : index
    %c0_231 = arith.constant 0 : index
    %204 = vector.load %arg8[%c0_230, %c0_231] : memref<128x128xf32, #tpu.memory_space<vmem>>, vector<128x128xf32>
    tpu.vector_store %arg8[%c0_230, %c0_231], %203 {strides = array<i32>} : memref<128x128xf32, #tpu.memory_space<vmem>>, vector<128x128xf32>,
    %205 = vector.extract_strided_slice %154 {offsets = [36, 0, 0], sizes = [8, 16, 128], strides = [1, 1, 1]} : vector<44x16x128xbf16> to vector<8x16x128xbf16>
    %206 = vector.shape_cast %205 : vector<8x16x128xbf16> to vector<128x128xbf16>
    %c0_232 = arith.constant 0 : index
    %c0_233 = arith.constant 0 : index
    %207 = vector.load %arg8[%c0_232, %c0_233] : memref<128x128xf32, #tpu.memory_space<vmem>>, vector<128x128xf32>
    %c2_234 = arith.constant 2 : index
    %c6_235 = arith.constant 6 : index
    %c0_236 = arith.constant 0 : index
    %c0_237 = arith.constant 0 : index
    %208 = vector.load %arg5[%c2_234, %c6_235, %c0_236, %c0_237] : memref<3x8x128x128xbf16, #tpu.memory_space<vmem>>, vector<1x1x128x128xbf16>
    %209 = vector.shape_cast %208 : vector<1x1x128x128xbf16> to vector<128x128xbf16>
    %cst_238 = arith.constant dense<0.000000e+00> : vector<128x128xf32>
    %210 = tpu.matmul %206, %209, %cst_238 {dimension_numbers = #tpu.dot_dimension_numbers<[1], [0], [0], [1], [0, 0, 1, 1], [], []>} : vector<128x128xbf16>, vector<128x128xbf16>, vector<128x128xf32> -> vector<128x128xf32>
    %211 = arith.addf %207, %210 : vector<128x128xf32>
    %c0_239 = arith.constant 0 : index
    %c0_240 = arith.constant 0 : index
    %212 = vector.load %arg8[%c0_239, %c0_240] : memref<128x128xf32, #tpu.memory_space<vmem>>, vector<128x128xf32>
    tpu.vector_store %arg8[%c0_239, %c0_240], %211 {strides = array<i32>} : memref<128x128xf32, #tpu.memory_space<vmem>>, vector<128x128xf32>,
    %213 = vector.extract_strided_slice %156 {offsets = [36, 0, 0], sizes = [8, 16, 128], strides = [1, 1, 1]} : vector<44x16x128xbf16> to vector<8x16x128xbf16>
    %214 = vector.shape_cast %213 : vector<8x16x128xbf16> to vector<128x128xbf16>
    %c0_241 = arith.constant 0 : index
    %c0_242 = arith.constant 0 : index
    %215 = vector.load %arg8[%c0_241, %c0_242] : memref<128x128xf32, #tpu.memory_space<vmem>>, vector<128x128xf32>
    %c2_243 = arith.constant 2 : index
    %c7_244 = arith.constant 7 : index
    %c0_245 = arith.constant 0 : index
    %c0_246 = arith.constant 0 : index
    %216 = vector.load %arg5[%c2_243, %c7_244, %c0_245, %c0_246] : memref<3x8x128x128xbf16, #tpu.memory_space<vmem>>, vector<1x1x128x128xbf16>
    %217 = vector.shape_cast %216 : vector<1x1x128x128xbf16> to vector<128x128xbf16>
    %cst_247 = arith.constant dense<0.000000e+00> : vector<128x128xf32>
    %218 = tpu.matmul %214, %217, %cst_247 {dimension_numbers = #tpu.dot_dimension_numbers<[1], [0], [0], [1], [0, 0, 1, 1], [], []>} : vector<128x128xbf16>, vector<128x128xbf16>, vector<128x128xf32> -> vector<128x128xf32>
    %219 = arith.addf %215, %218 : vector<128x128xf32>
    %c0_248 = arith.constant 0 : index
    %c0_249 = arith.constant 0 : index
    %220 = vector.load %arg8[%c0_248, %c0_249] : memref<128x128xf32, #tpu.memory_space<vmem>>, vector<128x128xf32>
    tpu.vector_store %arg8[%c0_248, %c0_249], %219 {strides = array<i32>} : memref<128x128xf32, #tpu.memory_space<vmem>>, vector<128x128xf32>,
    %c0_i32_250 = arith.constant 0 : i32
    %221 = arith.cmpi eq, %arg2, %c0_i32_250 : i32
    %222 = arith.extui %221 : i1 to i32
    %c0_i32_251 = arith.constant 0 : i32
    %223 = arith.cmpi ne, %222, %c0_i32_251 : i32
    scf.if %223 {
      %c0_252 = arith.constant 0 : index
      %c0_253 = arith.constant 0 : index
      %224 = vector.load %arg8[%c0_252, %c0_253] : memref<128x128xf32, #tpu.memory_space<vmem>>, vector<128x128xf32>
      %c0_254 = arith.constant 0 : index
      %c0_255 = arith.constant 0 : index
      %c0_256 = arith.constant 0 : index
      %225 = vector.load %arg6[%c0_254, %c0_255, %c0_256] : memref<1x1x128xf32, #tpu.memory_space<vmem>>, vector<1x1x128xf32>
      %226 = vector.shape_cast %225 : vector<1x1x128xf32> to vector<1x128xf32>
      %227 = vector.broadcast %226 : vector<1x128xf32> to vector<128x128xf32>
      %228 = arith.addf %224, %227 : vector<128x128xf32>
      %c0_257 = arith.constant 0 : index
      %c0_258 = arith.constant 0 : index
      %c0_259 = arith.constant 0 : index
      %229 = vector.load %arg7[%c0_257, %c0_258, %c0_259] : memref<1x128x128xf32, #tpu.memory_space<vmem>>, vector<1x128x128xf32>
      %230 = vector.shape_cast %229 : vector<1x128x128xf32> to vector<128x128xf32>
      %231 = vector.shape_cast %228 : vector<128x128xf32> to vector<1x128x128xf32>
      tpu.vector_store %arg7[%c0_257, %c0_258, %c0_259], %231 {strides = array<i32>} : memref<1x128x128xf32, #tpu.memory_space<vmem>>, vector<1x128x128xf32>,
    } else {
    }
    return
  }
  func.func @transform_0(%arg0: i32, %arg1: i32, %arg2: i32) -> (i32, i32, i32, i32) {
    %c2_i32 = arith.constant 2 : i32
    %0 = arith.muli %arg0, %c2_i32 : i32
    %1 = arith.addi %0, %arg1 : i32
    %c0_i32 = arith.constant 0 : i32
    %c0_i32_0 = arith.constant 0 : i32
    %c0_i32_1 = arith.constant 0 : i32
    return %1, %c0_i32, %c0_i32_0, %arg2 : i32, i32, i32, i32
  }
  func.func @transform_1(%arg0: i32, %arg1: i32, %arg2: i32) -> (i32, i32) {
    %c0_i32 = arith.constant 0 : i32
    %c0_i32_0 = arith.constant 0 : i32
    return %arg2, %c0_i32 : i32, i32
  }
  func.func @transform_2(%arg0: i32, %arg1: i32, %arg2: i32) -> (i32, i32, i32, i32) {
    %c0_i32 = arith.constant 0 : i32
    %c0_i32_0 = arith.constant 0 : i32
    %c0_i32_1 = arith.constant 0 : i32
    %c0_i32_2 = arith.constant 0 : i32
    return %c0_i32, %c0_i32_0, %arg2, %c0_i32_1 : i32, i32, i32, i32
  }
  func.func @transform_3(%arg0: i32, %arg1: i32, %arg2: i32) -> (i32, i32, i32) {
    %c0_i32 = arith.constant 0 : i32
    %c0_i32_0 = arith.constant 0 : i32
    %c0_i32_1 = arith.constant 0 : i32
    return %arg0, %c0_i32, %c0_i32_0 : i32, i32, i32
  }
  func.func @transform_4(%arg0: i32, %arg1: i32, %arg2: i32) -> (i32, i32, i32) {
    %c0_i32 = arith.constant 0 : i32
    %c0_i32_0 = arith.constant 0 : i32
    return %arg0, %arg1, %c0_i32 : i32, i32, i32
  }
}

</mosaic_0001>

<bundles_post_ra>
// kernel: tpu_custom_call.1
= control target key start
LH: loop header
LB: loop body
LE: loop exit
PB: predicated region body
PF: predicated region fallthrough
CT: control target
= control target key end

     0   :  { %9 = vsyncpa [#allocation4], 0  ;;  %s13957_s0 = inlined_call_operand.vmem [shape: bf16[4,44,52,128], index: 0, kind: input, shape index: {}]   ;;  %s13958_s1 = inlined_call_operand.vmem [shape: bf16[128,128], index: 1, kind: input, shape index: {}]   ;;  %s13959_s2 = inlined_call_operand.vmem [shape: bf16[3,8,128,128], index: 2, kind: input, shape index: {}]   ;;  %s13960_s3 = inlined_call_operand.vmem [shape: f32[2,1,128], index: 3, kind: input, shape index: {}]   ;;  %s13961_s4 = inlined_call_operand.hbm [shape: f32[2,256,128], index: 4, kind: output, shape index: {}]  }
   0x1   :  { %11 = vsyncpa [#allocation4 + $0x1], 0  ;;  %s11933_s15 = smov 0   ;;  %s11935_s16 = smov 0  }
   0x2   :  { %s11937_s17 = smov 0   ;;  %s11939_s18 = smov 0  }
   0x3   :  { %s11941_s19 = smov 0   ;;  %s11943_s20 = smov 0  }
   0x4   :  { %s11945_s21 = smov 0   ;;  %s11947_s22 = smov 0  }
   0x5 LB: > { %s8616_s23 = sadd.s32 4294967295, %s11903_s22   ;;  %s8617_s24 = sadd.s32 4294967294, %s11903_s22   ;;  %s11903_s22 = sphi %s11947_s22, %s17_s22   ;;  %s11899_s21 = sphi %s11945_s21, %s13976_s21   ;;  %s11895_s20 = sphi %s11943_s20, %s13975_s20   ;;  %s11891_s19 = sphi %s11941_s19, %s13974_s19   ;;  %s11887_s18 = sphi %s11939_s18, %s13973_s18   ;;  %s11883_s17 = sphi %s11937_s17, %s13972_s17   ;;  %s11879_s16 = sphi %s11935_s16, %s13971_s16   ;;  %s11875_s15 = sphi %s11933_s15, %s13970_s15  }
   0x6   : > { %s32_s25 = sadd.s32 1, %s11895_s20  ;;  %s36_s26 = sadd.s32 1, %s11899_s21 }
   0x7   : > { %p34_p0 = scmp.ge.s32.totalorder %s32_s25, 2  ;;  %p165_p1 = scmp.ne.s32.totalorder %s11883_s17, %s11879_s16 }
   0x8   : > { %p166_p2 = scmp.eq.s32.totalorder %s8616_s23, 3  ;;  %p171_p5 = scmp.ne.s32.totalorder %s11879_s16, %s11875_s15 }
   0x9   : > { %s13978_s25 = smov (%p34_p0, %s32_s25), 0  ;;  %s13980_s26 = smov (!%p34_p0, %s36_s26), %s11899_s21 }
   0xa   : > { %s151_s27 = ssub.s32 %s11895_s20, %s13978_s25  ;;  %p11984_p3 = por %p166_p2, %p165_p1 }
   0xb   : > { %p38_p4 = scmp.ge.s32.totalorder %s13980_s26, 2  ;;  %p172_p6 = scmp.eq.s32.totalorder %s8617_s24, 3 }
   0xc   : > { %p8624_p7 = scmp.ge.s32.totalorder %s11903_s22, 1  ;;  %p229_p9 = scmp.lt.s32.totalorder %s11903_s22, 5 }
   0xd   : > { %s13982_s26 = smov (%p38_p4, %s13980_s26), 0  ;;  %p11993_p8 = por %p172_p6, %p171_p5 }
   0xe   : > { %s150_s30 = ssub.s32 %s11899_s21, %s13982_s26  ;;  %s155_s5 = sadd.s32 1, %s11883_s17 }
   0xf   : > { %s152_s6 = sor.u32 %s151_s27, %s150_s30  ;;  %p230_p10 = pnand %p8624_p7, %p229_p9 }
  0x10   : > { %p153_p11 = scmp.eq.s32.totalorder %s152_s6, 0  ;;  %v11565_v0 = vld [vmem:[%s13958_s1] sm:$0xff] (!%p230_p10)   ;;  %s8626_s10 = sshll.u32 (!%p230_p10), %s11891_s19, 1  ;;  %v11567_v2 = vld [vmem:[%s13958_s1 + $0x8] sm:$0xff] (!%p230_p10)   ;;  %v11569_v4 = vld [vmem:[%s13958_s1 + $0x10] sm:$0xff] (!%p230_p10)   ;;  %vm371_vm0 = vcmask (!%p230_p10), 1042432  }
  0x11   : > { %233 = sbr.rel (%p230_p10) target bundleno = 683 (0x2ab), region = 36  ;;  %v11566_v1 = vld [vmem:[%s13959_s2 + $0x2c0] sm:$0xff] (!%p230_p10)   ;;  %s274_s13 = sadd.s32 (!%p230_p10), %s11887_s18, %s8626_s10  ;;  %10291 = vmatprep.subr.bf16.mxu1 (!%p230_p10), %v11565_v0  ;;  %v11568_v3 = vld [vmem:[%s13959_s2 + $0x2c8] sm:$0xff] (!%p230_p10)   ;;  %v11570_v5 = vld [vmem:[%s13959_s2 + $0x2d0] sm:$0xff] (!%p230_p10)   ;;  %vm372_vm1 = vcmask (!%p230_p10), 1046532   ;;  %vm3311_vm2 = vcmask (!%p230_p10), 1040384  }
  0x12   : > { %s12002_s7 = scalar_select %p153_p11, %s11883_s17, %s155_s5  }
  0x13   : > { %p275_p12 = scmp.lt.s32.totalorder (!%p230_p10), %s274_s13, 3  ;;  %10675 = vmatprep.subr.bf16.mxu0 (!%p230_p10), %v11566_v1  ;;  %10292 = vmatpush3.bf16.msra.mxu1 (!%p230_p10), %v11565_v0  ;;  %v11571_v6 = vld [vmem:[%s13958_s1 + $0x18] sm:$0xff] (!%p230_p10)   ;;  %v11573_v8 = vld [vmem:[%s13958_s1 + $0x20] sm:$0xff] (!%p230_p10)   ;;  %v11575_v10 = vld [vmem:[%s13958_s1 + $0x28] sm:$0xff] (!%p230_p10)   ;;  %vm3312_vm3 = vcmask (!%p230_p10), 1044484   ;;  %vm828_vm6 = vcmask (!%p230_p10), 1041408  }
  0x14   : > { %10676 = vmatpush3.bf16.msra.mxu0 (!%p230_p10), %v11566_v1  ;;  %10293 = vmatprep.subr.bf16.mxu1 (!%p230_p10), %v11567_v2  ;;  %v11572_v7 = vld [vmem:[%s13959_s2 + $0x2d8] sm:$0xff] (!%p230_p10)   ;;  %v11574_v9 = vld [vmem:[%s13959_s2 + $0x2e0] sm:$0xff] (!%p230_p10)   ;;  %v11576_v14 = vld [vmem:[%s13959_s2 + $0x2e8] sm:$0xff] (!%p230_p10)   ;;  %vm829_vm7 = vcmask (!%p230_p10), 1045508   ;;  %p297_p13 = scmp.lt.s32.totalorder (!%p230_p10), %s11891_s19, 1  ;;  %s270_s27 = sand.u32 (!%p230_p10), 1, %s11879_s16  }
  0x15   : > { %10677 = vmatprep.subr.bf16.mxu0 (!%p230_p10), %v11568_v3  ;;  %vm12050_vm4 = vmor (!%p230_p10), %vm371_vm0, %vm372_vm1  ;;  %v11577_v24 = vld [vmem:[%s13958_s1 + $0x30] sm:$0xff] (!%p230_p10)   ;;  %v11579_v37 = vld [vmem:[%s13958_s1 + $0x38] sm:$0xff] (!%p230_p10)   ;;  %s9886_s10 = sshll.u32 (!%p230_p10), %s11887_s18, 4  ;;  %s9887_s11 = sshll.u32 (!%p230_p10), %s11891_s19, 5 }
  0x16   : > { %vm12059_vm5 = vmor (!%p230_p10), %vm3311_vm2, %vm3312_vm3  ;;  %v11578_v30 = vld [vmem:[%s13959_s2 + $0x2f0] sm:$0xff] (!%p230_p10)   ;;  %v11580_v43 = vld [vmem:[%s13959_s2 + $0x2f8] sm:$0xff] (!%p230_p10)   ;;  %s13870_s12 = sadd.s32 (!%p230_p10), %s9887_s11, %s9886_s10  ;;  %s11905_s5 = smov (!%p230_p10), [#allocation3]  }
  0x17   : > { %10294 = vmatpush3.bf16.msra.mxu1 (!%p230_p10), %v11567_v2  ;;  %v11581_v53 = vld [vmem:[%s13959_s2] sm:$0xff] (!%p230_p10)   ;;  %vm12221_vm8 = vmor (!%p230_p10), %vm828_vm6, %vm829_vm7  ;;  %s9888_s18 = sshll.u32 (!%p230_p10), %s13870_s12, 7 }
  0x18   : > { %s13984_s13 = smov (!%p275_p12, %s274_s13), 3  ;;  %10678 = vmatpush3.bf16.msra.mxu0 %v11568_v3  ;;  %10295 = vmatprep.subr.bf16.mxu1 %v11569_v4  ;;  %v11582_v58 = vld [vmem:[%s13959_s2 + $0x300] sm:$0xff]   ;;  %s13893_s24 = scalar_lea.hbm %s13961_s4, %s9888_s18 }
  0x19   : > { %10679 = vmatprep.subr.bf16.mxu0 %v11570_v5  ;;  %s11491_s14 = smul.u32 1232, %s13984_s13  ;;  %s8625_s13 = sshll.u32 %s270_s27, 7 }
  0x1a   : > { %s13854_s9 = scalar_lea.vmem [#allocation3], %s8625_s13 }
  0x1b   : > { %10296 = vmatpush3.bf16.msra.mxu1 %v11569_v4  ;;  %s12039_s8 = scalar_lea.vmem %s13957_s0, %s11491_s14 }
  0x1c   : > { %10680 = vmatpush3.bf16.msra.mxu0 %v11570_v5  ;;  %10297 = vmatprep.subr.bf16.mxu1 %v11571_v6  ;;  %v8628_v11 = vld [vmem:[%s12039_s8 + $0x200] sm:$0xe]  ;;  %v8629_v12 = vld [vmem:[%s12039_s8 + $0x204] sm:$0xf]  ;;  %v8630_v13 = vld [vmem:[%s12039_s8 + $0x208] sm:$0x1] }
  0x1d   : > { %10681 = vmatprep.subr.bf16.mxu0 %v11572_v7  ;;  %v8652_v16 = vrot.slane %v8628_v11, 9  ;;  %v376_v17 = vrot.slane %v8629_v12, 5  ;;  %v379_v18 = vrot.slane %v8630_v13, 5  ;;  %v9100_v19 = vld [vmem:[%s12039_s8 + $0x1f8] sm:$0x8] }
  0x1e   : > { %v9101_v20 = vld [vmem:[%s12039_s8 + $0x1fc] sm:$0xf]  ;;  %v9102_v21 = vld [vmem:[%s12039_s8 + $0x200] sm:$0x7]  ;;  %v9388_v23 = vrot.slane %v9100_v19, 11 }
  0x1f   : > { %10298 = vmatpush3.bf16.msra.mxu1 %v11571_v6  ;;  %v377_v25 = vsel %vm12050_vm4, %v8652_v16, %v376_v17  ;;  %v378_v26 = vrot.slane %v376_v17, 4  ;;  %v4282_v27 = vrot.slane %v9101_v20, 7  ;;  %v4285_v28 = vrot.slane %v9102_v21, 7  ;;  %v8631_v29 = vld [vmem:[%s12039_s8 + $0x21c] sm:$0xe]  ;;  %v11584_v21 = vld [vmem:[%s13959_s2 + $0x308] sm:$0xff]  }
  0x20   : > { %10682 = vmatpush3.bf16.msra.mxu0 %v11572_v7  ;;  %10299 = vmatprep.subr.bf16.mxu1 %v11573_v8  ;;  %v8632_v31 = vld [vmem:[%s12039_s8 + $0x220] sm:$0xf]  ;;  %v8633_v32 = vld [vmem:[%s12039_s8 + $0x224] sm:$0x1]  ;;  %v8653_v39 = vrot.slane %v8631_v29, 9 }
  0x21   : > { %10683 = vmatprep.subr.bf16.mxu0 %v11574_v9  ;;  %v380_v33 = vsel %vm12050_vm4, %v378_v26, %v379_v18  ;;  %v4283_v34 = vsel %vm12059_vm5, %v9388_v23, %v4282_v27  ;;  %v4284_v35 = vrot.slane %v4282_v27, 4  ;;  %v383_v36 = vrot.slane %v8632_v31, 5  ;;  %v9103_v41 = vld [vmem:[%s12039_s8 + $0x214] sm:$0x8]  ;;  %v9104_v42 = vld [vmem:[%s12039_s8 + $0x218] sm:$0xf] }
  0x22   : > { %v8660_v38 = vcombine.low %v377_v25, %v380_v33  ;;  %v386_v40 = vrot.slane %v8633_v32, 5  ;;  %v9105_v46 = vld [vmem:[%s12039_s8 + $0x21c] sm:$0x7]  ;;  %v9389_v47 = vrot.slane %v9103_v41, 11  ;;  %v4289_v49 = vrot.slane %v9104_v42, 7  ;;  %v11585_v32 = vld [vmem:[%s13959_s2 + $0x10] sm:$0xff]  }
  0x23   : > { %10300 = vmatpush3.bf16.msra.mxu1 %v11573_v8  ;;  %v4286_v44 = vsel %vm12059_vm5, %v4284_v35, %v4285_v28  ;;  %v385_v45 = vrot.slane %v383_v36, 4  ;;  %v4292_v50 = vrot.slane %v9105_v46, 7  ;;  %v384_v51 = vsel %vm12050_vm4, %v8653_v39, %v383_v36  ;;  %v8634_v56 = vld [vmem:[%s12039_s8 + $0x238] sm:$0xe]  ;;  %v8635_v57 = vld [vmem:[%s12039_s8 + $0x23c] sm:$0xf] }
  0x24   : > { %10684 = vmatpush3.bf16.msra.mxu0 %v11574_v9  ;;  %10301 = vmatprep.subr.bf16.mxu1 %v11575_v10  ;;  %v9412_v48 = vcombine.low %v4283_v34, %v4286_v44  ;;  %v4290_v54 = vsel %vm12059_vm5, %v9389_v47, %v4289_v49  ;;  %v4291_v55 = vrot.slane %v4289_v49, 4  ;;  %v8636_v59 = vld [vmem:[%s12039_s8 + $0x240] sm:$0x1]  ;;  %v8654_v60 = vrot.slane %v8634_v56, 9  ;;  %v9106_v62 = vld [vmem:[%s12039_s8 + $0x230] sm:$0x8] }
  0x25   : > { %10685 = vmatprep.subr.bf16.mxu0 %v11576_v14  ;;  %10307 = vmatprep.mubr.bf16.mxu1 %v8660_v38  ;;  %v387_v52 = vsel %vm12050_vm4, %v385_v45, %v386_v40  ;;  %v390_v61 = vrot.slane %v8635_v57, 5  ;;  %v393_v0 = vrot.slane %v8636_v59, 5  ;;  %v9107_v1 = vld [vmem:[%s12039_s8 + $0x234] sm:$0xf]  ;;  %v9108_v2 = vld [vmem:[%s12039_s8 + $0x238] sm:$0x7] }
  0x26   : > { %10691 = vmatprep.mubr.bf16.mxu0 %v9412_v48  ;;  %v4293_v63 = vsel %vm12059_vm5, %v4291_v55, %v4292_v50  ;;  %v9390_v3 = vrot.slane %v9106_v62, 11  ;;  %v8661_v4 = vcombine.low %v384_v51, %v387_v52  ;;  %v4296_v7 = vrot.slane %v9107_v1, 7  ;;  %v8637_v8 = vld [vmem:[%s12039_s8 + $0x254] sm:$0xe]  ;;  %v8638_v9 = vld [vmem:[%s12039_s8 + $0x258] sm:$0xf] }
  0x27   : > { %10302 = vmatpush3.bf16.msra.mxu1 %v11575_v10  ;;  %v9413_v5 = vcombine.low %v4290_v54, %v4293_v63  ;;  %v392_v6 = vrot.slane %v390_v61, 4  ;;  %v11583_v10 = vld [vmem:[%s13959_s2 + $0x8] sm:$0xff]   ;;  %v391_v11 = vsel %vm12050_vm4, %v8654_v60, %v390_v61  ;;  %v4299_v12 = vrot.slane %v9108_v2, 7  ;;  %v8639_v13 = vld [vmem:[%s12039_s8 + $0x25c] sm:$0x1]  ;;  %v11586_v38 = vld [vmem:[%s13959_s2 + $0x310] sm:$0xff]  }
  0x28   : > { %10686 = vmatpush3.bf16.msra.mxu0 %v11576_v14  ;;  %10303 = vmatprep.subr.bf16.mxu1 %v11577_v24  ;;  %v8655_v14 = vrot.slane %v8637_v8, 9  ;;  %v397_v16 = vrot.slane %v8638_v9, 5  ;;  %v4297_v18 = vsel %vm12059_vm5, %v9390_v3, %v4296_v7  ;;  %v4298_v19 = vrot.slane %v4296_v7, 4  ;;  %v9110_v25 = vld [vmem:[%s12039_s8 + $0x250] sm:$0xf]  ;;  %v11587_v52 = vld [vmem:[%s13959_s2 + $0x18] sm:$0xff]  }
  0x29   : > { %10687 = vmatprep.subr.bf16.mxu0 %v11578_v30  ;;  %v394_v17 = vsel %vm12050_vm4, %v392_v6, %v393_v0  ;;  %v400_v20 = vrot.slane %v8639_v13, 5  ;;  %v9111_v28 = vld [vmem:[%s12039_s8 + $0x254] sm:$0x7]  ;;  %v8640_v39 = vld [vmem:[%s12039_s8 + $0x270] sm:$0xe] }
  0x2a   : > { %v399_v23 = vrot.slane %v397_v16, 4  ;;  %v8662_v26 = vcombine.low %v391_v11, %v394_v17  ;;  %v4300_v27 = vsel %vm12059_vm5, %v4298_v19, %v4299_v12  ;;  %v4306_v33 = vrot.slane %v9111_v28, 7  ;;  %v8641_v40 = vld [vmem:[%s12039_s8 + $0x274] sm:$0xf]  ;;  %v8642_v42 = vld [vmem:[%s12039_s8 + $0x278] sm:$0x1] }
  0x2b   : > { %10304 = vmatpush3.bf16.msra.mxu1 %v11577_v24  ;;  %v9109_v24 = vld [vmem:[%s12039_s8 + $0x24c] sm:$0x8]  ;;  %v9414_v31 = vcombine.low %v4297_v18, %v4300_v27  ;;  %v398_v34 = vsel %vm12050_vm4, %v8655_v14, %v397_v16  ;;  %v404_v44 = vrot.slane %v8641_v40, 5  ;;  %v9112_v45 = vld [vmem:[%s12039_s8 + $0x268] sm:$0x8]  ;;  %v407_v48 = vrot.slane %v8642_v42, 5 }
  0x2c   : > { %10688 = vmatpush3.bf16.msra.mxu0 %v11578_v30  ;;  %10305 = vmatprep.subr.bf16.mxu1 %v11579_v37  ;;  %v9391_v29 = vrot.slane %v9109_v24, 11  ;;  %v4303_v30 = vrot.slane %v9110_v25, 7  ;;  %v401_v35 = vsel %vm12050_vm4, %v399_v23, %v400_v20  ;;  %v9113_v49 = vld [vmem:[%s12039_s8 + $0x26c] sm:$0xf]  ;;  %v9114_v50 = vld [vmem:[%s12039_s8 + $0x270] sm:$0x7] }
  0x2d   : > { %10689 = vmatprep.subr.bf16.mxu0 %v11580_v43  ;;  %v8663_v46 = vcombine.low %v398_v34, %v401_v35  ;;  %v9392_v51 = vrot.slane %v9112_v45, 11  ;;  %v406_v54 = vrot.slane %v404_v44, 4  ;;  %v4310_v55 = vrot.slane %v9113_v49, 7  ;;  %v8643_v57 = vld [vmem:[%s12039_s8 + $0x28c] sm:$0xe]  ;;  %v11590_v12 = vld [vmem:[%s13959_s2 + $0x320] sm:$0xff]  }
  0x2e   : > { %v4304_v36 = vsel %vm12059_vm5, %v9391_v29, %v4303_v30  ;;  %v4313_v56 = vrot.slane %v9114_v50, 7  ;;  %v8644_v59 = vld [vmem:[%s12039_s8 + $0x290] sm:$0xf]  ;;  %v8645_v60 = vld [vmem:[%s12039_s8 + $0x294] sm:$0x1]  ;;  %v8657_v61 = vrot.slane %v8643_v57, 9 }
  0x2f   : > { %10306 = vmatpush3.bf16.msra.mxu1 %v11579_v37  ;;  %v4305_v37 = vrot.slane %v4303_v30, 4  ;;  %v408_v62 = vsel %vm12050_vm4, %v406_v54, %v407_v48  ;;  %v4311_v63 = vsel %vm12059_vm5, %v9392_v51, %v4310_v55  ;;  %v4312_v0 = vrot.slane %v4310_v55, 4  ;;  %v9116_v6 = vld [vmem:[%s12039_s8 + $0x288] sm:$0xf]  ;;  %v8647_v24 = vld [vmem:[%s12039_s8 + $0x2ac] sm:$0xf] }
  0x30   : > { %10690 = vmatpush3.bf16.msra.mxu0 %v11580_v43  ;;  %10323 = vmatprep.subr.bf16.mxu1 %v11581_v53  ;;  %v8656_v43 = vrot.slane %v8640_v39, 9  ;;  %v411_v1 = vrot.slane %v8644_v59, 5  ;;  %v414_v3 = vrot.slane %v8645_v60, 5  ;;  %v4317_v14 = vrot.slane %v9116_v6, 7  ;;  %v8646_v23 = vld [vmem:[%s12039_s8 + $0x2a8] sm:$0xe] }
  0x31   : > { %10707 = vmatprep.subr.bf16.mxu0 %v11582_v58  ;;  %v4307_v41 = vsel %vm12059_vm5, %v4305_v37, %v4306_v33  ;;  %v4314_v7 = vsel %vm12059_vm5, %v4312_v0, %v4313_v56  ;;  %v11592_v25 = vld [vmem:[%s13959_s2 + $0x328] sm:$0xff]   ;;  %v8658_v27 = vrot.slane %v8646_v23, 9  ;;  %v418_v28 = vrot.slane %v8647_v24, 5  ;;  %v9118_v29 = vld [vmem:[%s12039_s8 + $0x2a0] sm:$0x8]  ;;  %v11593_v49 = vld [vmem:[%s13959_s2 + $0x30] sm:$0xff]  }
  0x32   : > { %10308 = vmatmul.mubr.bf16.vlgmr.msra.gmra.mrb[0].mxu1 %v8661_v4  ;;  %v9415_v47 = vcombine.low %v4304_v36, %v4307_v41  ;;  %v11589_v4 = vld [vmem:[%s13959_s2 + $0x20] sm:$0xff]   ;;  %v412_v8 = vsel %vm12050_vm4, %v8657_v61, %v411_v1  ;;  %v413_v9 = vrot.slane %v411_v1, 4  ;;  %v9416_v13 = vcombine.low %v4311_v63, %v4314_v7  ;;  %v9120_v33 = vld [vmem:[%s12039_s8 + $0x2a8] sm:$0x7]  ;;  %v8651_v42 = vld [vmem:[%s12039_s8 + $0x2cc] sm:$0x1] }
  0x33   : > { %10692 = vmatmul.mubr.bf16.vlgmr.msra.gmra.mrb[0].mxu0 %v9413_v5  ;;  %10324 = vmatpush3.bf16.msra.mxu1 %v11581_v53  ;;  %v405_v53 = vsel %vm12050_vm4, %v8656_v43, %v404_v44  ;;  %v9115_v5 = vld [vmem:[%s12039_s8 + $0x284] sm:$0x8]  ;;  %v4319_v20 = vrot.slane %v4317_v14, 4  ;;  %v9394_v34 = vrot.slane %v9118_v29, 11  ;;  %v419_v36 = vsel %vm12050_vm4, %v8658_v27, %v418_v28  ;;  %v8650_v40 = vld [vmem:[%s12039_s8 + $0x2c8] sm:$0xf] }
  0x34   : > { %10708 = vmatpush3.bf16.msra.mxu0 %v11582_v58  ;;  %10325 = vmatprep.subr.bf16.mxu1 %v11583_v10  ;;  %v11588_v58 = vld [vmem:[%s13959_s2 + $0x318] sm:$0xff]   ;;  %v8664_v2 = vcombine.low %v405_v53, %v408_v62  ;;  %v9393_v11 = vrot.slane %v9115_v5, 11  ;;  %v415_v17 = vsel %vm12050_vm4, %v413_v9, %v414_v3  ;;  %v420_v37 = vrot.slane %v418_v28, 4  ;;  %v8649_v39 = vld [vmem:[%s12039_s8 + $0x2c4] sm:$0xe]  ;;  %v11594_v55 = vld [vmem:[%s13959_s2 + $0x330] sm:$0xff]  }
  0x35   : > { %10709 = vmatprep.subr.bf16.mxu0 %v11584_v21  ;;  %10311 = vmatprep.mubr.bf16.mxu1 %v8662_v26  ;;  %v8665_v18 = vcombine.low %v412_v8, %v415_v17  ;;  %v8648_v26 = vld [vmem:[%s12039_s8 + $0x2b0] sm:$0x1]  ;;  %v4327_v41 = vrot.slane %v9120_v33, 7  ;;  %v8659_v43 = vrot.slane %v8649_v39, 9  ;;  %v425_v44 = vrot.slane %v8650_v40, 5  ;;  %v11595_v3 = vld [vmem:[%s13959_s2 + $0x38] sm:$0xff]  }
  0x36   : > { %10695 = vmatprep.mubr.bf16.mxu0 %v9414_v31  ;;  %v4318_v19 = vsel %vm12059_vm5, %v9393_v11, %v4317_v14  ;;  %v421_v31 = vrot.slane %v8648_v26, 5  ;;  %v428_v48 = vrot.slane %v8651_v42, 5  ;;  %v9121_v53 = vld [vmem:[%s12039_s8 + $0x2bc] sm:$0x8]  ;;  %v9122_v54 = vld [vmem:[%s12039_s8 + $0x2c0] sm:$0xf] }
  0x37   : > { %10326 = vmatpush3.bf16.msra.mxu1 %v11583_v10  ;;  %v9117_v10 = vld [vmem:[%s12039_s8 + $0x28c] sm:$0x7]  ;;  %v426_v51 = vsel %vm12050_vm4, %v8659_v43, %v425_v44  ;;  %v9123_v57 = vld [vmem:[%s12039_s8 + $0x2c4] sm:$0x7]  ;;  %v4331_v59 = vrot.slane %v9122_v54, 7 }
  0x38   : > { %10710 = vmatpush3.bf16.msra.mxu0 %v11584_v21  ;;  %10327 = vmatprep.subr.bf16.mxu1 %v11585_v32  ;;  %v4320_v16 = vrot.slane %v9117_v10, 7  ;;  %v11591_v21 = vld [vmem:[%s13959_s2 + $0x28] sm:$0xff]   ;;  %v422_v45 = vsel %vm12050_vm4, %v420_v37, %v421_v31  ;;  %v4334_v62 = vrot.slane %v9123_v57, 7  ;;  %v8676_v5 = vld [vmem:[%s12039_s8 + $0x154] sm:$0xc]  ;;  %v11597_v27 = vld [vmem:[%s13959_s2 + $0x40] sm:$0xff]  }
  0x39   : > { %10711 = vmatprep.subr.bf16.mxu0 %v11586_v38  ;;  %v8666_v50 = vcombine.low %v419_v36, %v422_v45  ;;  %v8677_v6 = vld [vmem:[%s12039_s8 + $0x158] sm:$0xf]  ;;  %v8678_v8 = vld [vmem:[%s12039_s8 + $0x15c] sm:$0x3]  ;;  %v8808_v9 = vrot.slane %v8676_v5, 10  ;;  %v11598_v36 = vld [vmem:[%s13959_s2 + $0x340] sm:$0xff]  }
  0x3a   : > { %10312 = vmatmul.mubr.bf16.gmra.mrb[4].mxu1 %v8663_v46  ;;  %v4321_v30 = vsel %vm12059_vm5, %v4319_v20, %v4320_v16  ;;  %v833_v10 = vrot.slane %v8677_v6, 6  ;;  %v9220_v11 = vld [vmem:[%s12039_s8 + $0x204] sm:$0x8]  ;;  %v9221_v14 = vld [vmem:[%s12039_s8 + $0x208] sm:$0xf] }
  0x3b   : > { %10696 = vmatmul.mubr.bf16.gmra.mrb[4].mxu0 %v9415_v47  ;;  %10328 = vmatpush3.bf16.msra.mxu1 %v11585_v32  ;;  %v9119_v32 = vld [vmem:[%s12039_s8 + $0x2a4] sm:$0xf]  ;;  %v9417_v35 = vcombine.low %v4318_v19, %v4321_v30  ;;  %v9222_v16 = vld [vmem:[%s12039_s8 + $0x20c] sm:$0x7]  ;;  %v9428_v17 = vrot.slane %v9220_v11, 11  ;;  %v4604_v20 = vrot.slane %v9221_v14, 7 }
  0x3c   : > { %10712 = vmatpush3.bf16.msra.mxu0 %v11586_v38  ;;  %10329 = vmatprep.subr.bf16.mxu1 %v11587_v52  ;;  %v4324_v38 = vrot.slane %v9119_v32, 7  ;;  %v835_v19 = vrot.slane %v833_v10, 4  ;;  %v8679_v23 = vld [vmem:[%s12039_s8 + $0x170] sm:$0xc]  ;;  %v8680_v24 = vld [vmem:[%s12039_s8 + $0x174] sm:$0xf] }
  0x3d   : > { %10713 = vmatprep.subr.bf16.mxu0 %v11588_v58  ;;  %10315 = vmatprep.mubr.bf16.mxu1 %v8664_v2  ;;  %v4333_v2 = vrot.slane %v4331_v59, 4  ;;  %v8809_v26 = vrot.slane %v8679_v23, 10  ;;  %v4605_v29 = vsel %vm12059_vm5, %v9428_v17, %v4604_v20  ;;  %v4606_v30 = vrot.slane %v4604_v20, 4  ;;  %v9225_v40 = vld [vmem:[%s12039_s8 + $0x228] sm:$0x7]  ;;  %v11602_v20 = vld [vmem:[%s13959_s2 + $0x350] sm:$0xff]  }
  0x3e   : > { %10699 = vmatprep.mubr.bf16.mxu0 %v9416_v13  ;;  %v4325_v46 = vsel %vm12059_vm5, %v9394_v34, %v4324_v38  ;;  %v4326_v47 = vrot.slane %v4324_v38, 4  ;;  %v836_v13 = vrot.slane %v8678_v8, 6  ;;  %v840_v31 = vrot.slane %v8680_v24, 6  ;;  %v9223_v34 = vld [vmem:[%s12039_s8 + $0x220] sm:$0x8] }
  0x3f   : > { %10330 = vmatpush3.bf16.msra.mxu1 %v11587_v52  ;;  %v427_v52 = vrot.slane %v425_v44, 4  ;;  %v4335_v7 = vsel %vm12059_vm5, %v4333_v2, %v4334_v62  ;;  %v4614_v44 = vrot.slane %v9225_v40, 7  ;;  %v8687_v6 = vld [vmem:[%s12039_s8 + $0x1b0] sm:$0x3]  ;;  %v9231_v23 = vld [vmem:[%s12039_s8 + $0x260] sm:$0x7] }
  0x40   : > { %10714 = vmatpush3.bf16.msra.mxu0 %v11588_v58  ;;  %10331 = vmatprep.subr.bf16.mxu1 %v11589_v4  ;;  %v4328_v56 = vsel %vm12059_vm5, %v4326_v47, %v4327_v41  ;;  %v9395_v58 = vrot.slane %v9121_v53, 11  ;;  %v837_v28 = vsel %vm12221_vm8, %v835_v19, %v836_v13  ;;  %v841_v38 = vsel %vm12221_vm8, %v8809_v26, %v840_v31  ;;  %v8684_v53 = vld [vmem:[%s12039_s8 + $0x194] sm:$0x3]  ;;  %v9230_v19 = vld [vmem:[%s12039_s8 + $0x25c] sm:$0xf] }
  0x41   : > { %10715 = vmatprep.subr.bf16.mxu0 %v11590_v12  ;;  %v9418_v60 = vcombine.low %v4325_v46, %v4328_v56  ;;  %v429_v61 = vsel %vm12050_vm4, %v427_v52, %v428_v48  ;;  %v842_v39 = vrot.slane %v840_v31, 4  ;;  %v9429_v41 = vrot.slane %v9223_v34, 11  ;;  %v11600_v52 = vld [vmem:[%s13959_s2 + $0x348] sm:$0xff]   ;;  %v9226_v56 = vld [vmem:[%s12039_s8 + $0x23c] sm:$0x8] }
  0x42   : > { %10316 = vmatmul.mubr.bf16.gmra.mrb[8].mxu1 %v8665_v18  ;;  %v8667_v0 = vcombine.low %v426_v51, %v429_v61  ;;  %v4332_v1 = vsel %vm12059_vm5, %v9395_v58, %v4331_v59  ;;  %v834_v18 = vsel %vm12221_vm8, %v8808_v9, %v833_v10  ;;  %v8683_v51 = vld [vmem:[%s12039_s8 + $0x190] sm:$0xf]  ;;  %v850_v58 = vrot.slane %v8684_v53, 6  ;;  %v9227_v59 = vld [vmem:[%s12039_s8 + $0x240] sm:$0xf] }
  0x43   : > { %10700 = vmatmul.mubr.bf16.gmra.mrb[8].mxu0 %v9417_v35  ;;  %10332 = vmatpush3.bf16.msra.mxu1 %v11589_v4  ;;  %v11596_v4 = vld [vmem:[%s13959_s2 + $0x338] sm:$0xff]   ;;  %v8816_v32 = vcombine.low %v834_v18, %v837_v28  ;;  %v9224_v35 = vld [vmem:[%s12039_s8 + $0x224] sm:$0xf]  ;;  %v9430_v61 = vrot.slane %v9226_v56, 11  ;;  %v4618_v2 = vrot.slane %v9227_v59, 7  ;;  %v11601_v9 = vld [vmem:[%s13959_s2 + $0x50] sm:$0xff]  }
  0x44   : > { %10716 = vmatpush3.bf16.msra.mxu0 %v11590_v12  ;;  %10333 = vmatprep.subr.bf16.mxu1 %v11591_v21  ;;  %v9419_v12 = vcombine.low %v4332_v1, %v4335_v7  ;;  %v4611_v43 = vrot.slane %v9224_v35, 7  ;;  %v857_v13 = vrot.slane %v8687_v6, 6  ;;  %v9229_v18 = vld [vmem:[%s12039_s8 + $0x258] sm:$0x8]  ;;  %v4628_v28 = vrot.slane %v9231_v23, 7 }
  0x45   : > { %10717 = vmatprep.subr.bf16.mxu0 %v11592_v25  ;;  %10319 = vmatprep.mubr.bf16.mxu1 %v8666_v50  ;;  %v8682_v50 = vld [vmem:[%s12039_s8 + $0x18c] sm:$0xc]  ;;  %v4619_v11 = vsel %vm12059_vm5, %v9430_v61, %v4618_v2  ;;  %v9431_v24 = vrot.slane %v9229_v18, 11  ;;  %v8688_v34 = vld [vmem:[%s12039_s8 + $0x1c4] sm:$0xc]  ;;  %v11609_v18 = vld [vmem:[%s13959_s2 + $0x70] sm:$0xff]  }
  0x46   : > { %10703 = vmatprep.mubr.bf16.mxu0 %v9418_v60  ;;  %v4612_v47 = vsel %vm12059_vm5, %v9429_v41, %v4611_v43  ;;  %v4613_v48 = vrot.slane %v4611_v43, 4  ;;  %v8810_v54 = vrot.slane %v8682_v50, 10  ;;  %v9228_v60 = vld [vmem:[%s12039_s8 + $0x244] sm:$0x7]  ;;  %v8689_v35 = vld [vmem:[%s12039_s8 + $0x1c8] sm:$0xf] }
  0x47   : > { %10334 = vmatpush3.bf16.msra.mxu1 %v11591_v21  ;;  %v4607_v21 = vrot.slane %v9222_v16, 7  ;;  %v4621_v5 = vrot.slane %v9228_v60, 7  ;;  %v9232_v40 = vld [vmem:[%s12039_s8 + $0x274] sm:$0x8]  ;;  %v9233_v43 = vld [vmem:[%s12039_s8 + $0x278] sm:$0xf] }
  0x48   : > { %10718 = vmatpush3.bf16.msra.mxu0 %v11592_v25  ;;  %10335 = vmatprep.subr.bf16.mxu1 %v11593_v49  ;;  %v8681_v25 = vld [vmem:[%s12039_s8 + $0x178] sm:$0x3]  ;;  %v4615_v57 = vsel %vm12059_vm5, %v4613_v48, %v4614_v44  ;;  %v9234_v44 = vld [vmem:[%s12039_s8 + $0x27c] sm:$0x7]  ;;  %v4632_v48 = vrot.slane %v9233_v43, 7 }
  0x49   : > { %10719 = vmatprep.subr.bf16.mxu0 %v11594_v55  ;;  %v843_v33 = vrot.slane %v8681_v25, 6  ;;  %v4608_v37 = vsel %vm12059_vm5, %v4606_v30, %v4607_v21  ;;  %v9453_v62 = vcombine.low %v4612_v47, %v4615_v57  ;;  %v4625_v25 = vrot.slane %v9230_v19, 7  ;;  %v8691_v50 = vld [vmem:[%s12039_s8 + $0x1e0] sm:$0xc]  ;;  %v8693_v53 = vld [vmem:[%s12039_s8 + $0x1e8] sm:$0x3] }
  0x4a   : > { %10320 = vmatmul.mubr.bf16.gmra.mrb[12].mxu1 %v8667_v0  ;;  %v9452_v42 = vcombine.low %v4605_v29, %v4608_v37  ;;  %v8690_v37 = vld [vmem:[%s12039_s8 + $0x1cc] sm:$0x3]  ;;  %v871_v61 = vrot.slane %v8693_v53, 6  ;;  %v8696_v19 = vld [vmem:[%s12039_s8 + $0x204] sm:$0x3] }
  0x4b   : > { %10336 = vmatpush3.bf16.msra.mxu1 %v11593_v49  ;;  %10704 = vmatmul.mubr.bf16.gmra.mrb[12].mxu0 %v9419_v12  ;;  %v844_v45 = vsel %vm12221_vm8, %v842_v39, %v843_v33  ;;  %v11599_v49 = vld [vmem:[%s13959_s2 + $0x48] sm:$0xff]   ;;  %v4620_v12 = vrot.slane %v4618_v2, 4  ;;  %v4626_v30 = vsel %vm12059_vm5, %v9431_v24, %v4625_v25  ;;  %v4627_v31 = vrot.slane %v4625_v25, 4  ;;  %v11604_v33 = vld [vmem:[%s13959_s2 + $0x358] sm:$0xff]  }
  0x4c   : > { %10337 = vmatprep.subr.bf16.mxu1 %v11595_v3  ;;  %10720 = vmatpush3.bf16.msra.mxu0 %v11594_v55  ;;  %v8817_v46 = vcombine.low %v841_v38, %v844_v45  ;;  %v847_v55 = vrot.slane %v8683_v51, 6  ;;  %v8812_v38 = vrot.slane %v8688_v34, 10  ;;  %v861_v39 = vrot.slane %v8689_v35, 6  ;;  %v11605_v51 = vld [vmem:[%s13959_s2 + $0x60] sm:$0xff]   ;;  %v9238_v23 = vld [vmem:[%s12039_s8 + $0x2ac] sm:$0x8] }
  0x4d   : > { %10721 = vmatprep.subr.bf16.mxu0 %v11596_v4  ;;  %10339 = vmatprep.mubr.bf16.mxu1 %v8816_v32  ;;  %v4622_v21 = vsel %vm12059_vm5, %v4620_v12, %v4621_v5  ;;  %v11603_v32 = vld [vmem:[%s13959_s2 + $0x58] sm:$0xff]   ;;  %v9432_v45 = vrot.slane %v9232_v40, 11  ;;  %v878_v25 = vrot.slane %v8696_v19, 6 }
  0x4e   : > { %10723 = vmatprep.mubr.bf16.mxu0 %v9452_v42  ;;  %v848_v0 = vsel %vm12221_vm8, %v8810_v54, %v847_v55  ;;  %v849_v1 = vrot.slane %v847_v55, 4  ;;  %v9454_v26 = vcombine.low %v4619_v11, %v4622_v21  ;;  %v864_v42 = vrot.slane %v8690_v37, 6  ;;  %v11606_v55 = vld [vmem:[%s13959_s2 + $0x360] sm:$0xff]   ;;  %v9237_v5 = vld [vmem:[%s12039_s8 + $0x298] sm:$0x7] }
  0x4f   : > { %10338 = vmatpush3.bf16.msra.mxu1 %v11595_v3  ;;  %v8685_v3 = vld [vmem:[%s12039_s8 + $0x1a8] sm:$0xc]  ;;  %v863_v47 = vrot.slane %v861_v39, 4  ;;  %v8813_v54 = vrot.slane %v8691_v50, 10  ;;  %v4633_v57 = vsel %vm12059_vm5, %v9432_v45, %v4632_v48  ;;  %v8698_v34 = vld [vmem:[%s12039_s8 + $0x21c] sm:$0xf] }
  0x50   : > { %10355 = vmatprep.subr.bf16.mxu1 %v11597_v27  ;;  %10722 = vmatpush3.bf16.msra.mxu0 %v11596_v4  ;;  %v8686_v4 = vld [vmem:[%s12039_s8 + $0x1ac] sm:$0xf]  ;;  %v8811_v7 = vrot.slane %v8685_v3, 10  ;;  %v851_v10 = vsel %vm12221_vm8, %v849_v1, %v850_v58  ;;  %v4634_v58 = vrot.slane %v4632_v48, 4  ;;  %v8741_v19 = vld [vmem:[%s12039_s8 + $0x17c] sm:$0x1] }
  0x51   : > { %10739 = vmatprep.subr.bf16.mxu0 %v11598_v36  ;;  %v854_v8 = vrot.slane %v8686_v4, 6  ;;  %v8818_v14 = vcombine.low %v848_v0, %v851_v10  ;;  %v865_v56 = vsel %vm12221_vm8, %v863_v47, %v864_v42  ;;  %v9236_v0 = vld [vmem:[%s12039_s8 + $0x294] sm:$0xf]  ;;  %v11607_v1 = vld [vmem:[%s13959_s2 + $0x68] sm:$0xff]  }
  0x52   : > { %10340 = vmatmul.mubr.bf16.vlgmr.msra.gmra.mrb[0].mxu1 %v8817_v46  ;;  %v862_v46 = vsel %vm12221_vm8, %v8812_v38, %v861_v39  ;;  %v11608_v10 = vld [vmem:[%s13959_s2 + $0x368] sm:$0xff]   ;;  %v882_v38 = vrot.slane %v8698_v34, 6  ;;  %v11610_v39 = vld [vmem:[%s13959_s2 + $0x370] sm:$0xff]  }
  0x53   : > { %10356 = vmatpush3.bf16.msra.mxu1 %v11597_v27  ;;  %10724 = vmatmul.mubr.bf16.vlgmr.msra.gmra.mrb[0].mxu0 %v9453_v62  ;;  %v855_v16 = vsel %vm12221_vm8, %v8811_v7, %v854_v8  ;;  %v856_v17 = vrot.slane %v854_v8, 4  ;;  %v8820_v60 = vcombine.low %v862_v46, %v865_v56  ;;  %v9235_v62 = vld [vmem:[%s12039_s8 + $0x290] sm:$0x8]  ;;  %v4639_v8 = vrot.slane %v9236_v0, 7  ;;  %v9241_v47 = vld [vmem:[%s12039_s8 + $0x2c8] sm:$0x8] }
  0x54   : > { %10357 = vmatprep.subr.bf16.mxu1 %v11599_v49  ;;  %10740 = vmatpush3.bf16.msra.mxu0 %v11598_v36  ;;  %v4629_v36 = vsel %vm12059_vm5, %v4627_v31, %v4628_v28  ;;  %v9433_v6 = vrot.slane %v9235_v62, 11  ;;  %v9434_v28 = vrot.slane %v9238_v23, 11  ;;  %v884_v46 = vrot.slane %v882_v38, 4  ;;  %v9242_v48 = vld [vmem:[%s12039_s8 + $0x2cc] sm:$0xf] }
  0x55   : > { %10741 = vmatprep.subr.bf16.mxu0 %v11600_v52  ;;  %10343 = vmatprep.mubr.bf16.mxu1 %v8818_v14  ;;  %v858_v27 = vsel %vm12221_vm8, %v856_v17, %v857_v13  ;;  %v9455_v41 = vcombine.low %v4626_v30, %v4629_v36  ;;  %v4641_v14 = vrot.slane %v4639_v8, 4  ;;  %v8695_v17 = vld [vmem:[%s12039_s8 + $0x200] sm:$0xf]  ;;  %v4653_v53 = vrot.slane %v9242_v48, 7  ;;  %v8736_v62 = vld [vmem:[%s12039_s8 + $0x158] sm:$0xe] }
  0x56   : > { %v8819_v29 = vcombine.low %v855_v16, %v858_v27  ;;  %10727 = vmatprep.mubr.bf16.mxu0 %v9454_v26  ;;  %v4640_v13 = vsel %vm12059_vm5, %v9433_v6, %v4639_v8  ;;  %v8694_v16 = vld [vmem:[%s12039_s8 + $0x1fc] sm:$0xc]  ;;  %v875_v21 = vrot.slane %v8695_v17, 6  ;;  %v9239_v26 = vld [vmem:[%s12039_s8 + $0x2b0] sm:$0xf]  ;;  %v11614_v17 = vld [vmem:[%s13959_s2 + $0x380] sm:$0xff]  }
  0x57   : > { %10358 = vmatpush3.bf16.msra.mxu1 %v11599_v49  ;;  %v4635_v49 = vrot.slane %v9234_v44, 7  ;;  %v9240_v27 = vld [vmem:[%s12039_s8 + $0x2b4] sm:$0x7]  ;;  %v8699_v36 = vld [vmem:[%s12039_s8 + $0x220] sm:$0x3] }
  0x58   : > { %10359 = vmatprep.subr.bf16.mxu1 %v11601_v9  ;;  %10742 = vmatpush3.bf16.msra.mxu0 %v11600_v52  ;;  %v8692_v52 = vld [vmem:[%s12039_s8 + $0x1e4] sm:$0xf]  ;;  %v877_v31 = vrot.slane %v875_v21, 4  ;;  %v4649_v35 = vrot.slane %v9240_v27, 7  ;;  %v885_v43 = vrot.slane %v8699_v36, 6  ;;  %v1164_v27 = vrot.slane %v8741_v19, 5 }
  0x59   : > { %10743 = vmatprep.subr.bf16.mxu0 %v11602_v20  ;;  %v868_v59 = vrot.slane %v8692_v52, 6  ;;  %v4636_v2 = vsel %vm12059_vm5, %v4634_v58, %v4635_v49  ;;  %v11611_v49 = vld [vmem:[%s13959_s2 + $0x78] sm:$0xff]   ;;  %v9435_v52 = vrot.slane %v9241_v47, 11  ;;  %v9125_v8 = vld [vmem:[%s12039_s8 + $0x34c] sm:$0xf] }
  0x5a   : > { %10344 = vmatmul.mubr.bf16.gmra.mrb[4].mxu1 %v8819_v29  ;;  %v9456_v7 = vcombine.low %v4633_v57, %v4636_v2  ;;  %v879_v40 = vsel %vm12221_vm8, %v877_v31, %v878_v25  ;;  %v11612_v57 = vld [vmem:[%s13959_s2 + $0x378] sm:$0xff]   ;;  %v8738_v2 = vld [vmem:[%s12039_s8 + $0x160] sm:$0x1] }
  0x5b   : > { %10360 = vmatpush3.bf16.msra.mxu1 %v11601_v9  ;;  %10728 = vmatmul.mubr.bf16.gmra.mrb[4].mxu0 %v9455_v41  ;;  %v869_v3 = vsel %vm12221_vm8, %v8813_v54, %v868_v59  ;;  %v870_v4 = vrot.slane %v868_v59, 4  ;;  %v4642_v9 = vrot.slane %v9237_v5, 7  ;;  %v4654_v59 = vsel %vm12059_vm5, %v9435_v52, %v4653_v53  ;;  %v12405_v0 = vld [vmem:[%s12039_s8 + $0x15c] sm:$0xf]  ;;  %v9124_v5 = vld [vmem:[%s12039_s8 + $0x348] sm:$0x8] }
  0x5c   : > { %10361 = vmatprep.subr.bf16.mxu1 %v11603_v32  ;;  %10744 = vmatpush3.bf16.msra.mxu0 %v11602_v20  ;;  %v8814_v20 = vrot.slane %v8694_v16, 10  ;;  %v8739_v16 = vld [vmem:[%s12039_s8 + $0x174] sm:$0xe]  ;;  %v8744_v47 = vld [vmem:[%s12039_s8 + $0x198] sm:$0x1] }
  0x5d   : > { %10745 = vmatprep.subr.bf16.mxu0 %v11604_v33  ;;  %10347 = vmatprep.mubr.bf16.mxu1 %v8820_v60  ;;  %v872_v11 = vsel %vm12221_vm8, %v870_v4, %v871_v61  ;;  %v4643_v24 = vsel %vm12059_vm5, %v4641_v14, %v4642_v9  ;;  %v4655_v60 = vrot.slane %v4653_v53, 4  ;;  %v12401_v61 = vld [vmem:[%s13959_s2 + $0x80] sm:$0xff]   ;;  %v1154_v4 = vrot.slane %v12405_v0, 5  ;;  %v9126_v9 = vld [vmem:[%s12039_s8 + $0x350] sm:$0x7] }
  0x5e   : > { %10731 = vmatprep.mubr.bf16.mxu0 %v9456_v7  ;;  %v8821_v12 = vcombine.low %v869_v3, %v872_v11  ;;  %v9457_v29 = vcombine.low %v4640_v13, %v4643_v24  ;;  %v876_v30 = vsel %vm12221_vm8, %v8814_v20, %v875_v21  ;;  %v8832_v3 = vrot.slane %v8736_v62, 9  ;;  %v9131_v53 = vld [vmem:[%s12039_s8 + $0x384] sm:$0xf]  ;;  %v8745_v62 = vld [vmem:[%s12039_s8 + $0x1ac] sm:$0xe] }
  0x5f   : > { %10362 = vmatpush3.bf16.msra.mxu1 %v11603_v32  ;;  %v4646_v32 = vrot.slane %v9239_v26, 7  ;;  %v12376_v44 = vcombine.low %v876_v30, %v879_v40  ;;  %v1157_v7 = vrot.slane %v8738_v2, 5  ;;  %v4926_v13 = vrot.slane %v9125_v8, 7 }
  0x60   : > { %10363 = vmatprep.subr.bf16.mxu1 %v11605_v51  ;;  %10746 = vmatpush3.bf16.msra.mxu0 %v11604_v33  ;;  %v8697_v33 = vld [vmem:[%s12039_s8 + $0x218] sm:$0xc]  ;;  %v1155_v11 = vsel %vm12050_vm4, %v8832_v3, %v1154_v4  ;;  %v4929_v14 = vrot.slane %v9126_v9, 7  ;;  %v8833_v20 = vrot.slane %v8739_v16, 9  ;;  %v1171_v52 = vrot.slane %v8744_v47, 5  ;;  %v11618_v16 = vld [vmem:[%s13959_s2 + $0x390] sm:$0xff]  }
  0x61   : > { %10747 = vmatprep.subr.bf16.mxu0 %v11606_v55  ;;  %v8815_v37 = vrot.slane %v8697_v33, 10  ;;  %v4647_v41 = vsel %vm12059_vm5, %v9434_v28, %v4646_v32  ;;  %v4648_v42 = vrot.slane %v4646_v32, 4  ;;  %v4928_v24 = vrot.slane %v4926_v13, 4  ;;  %v9127_v28 = vld [vmem:[%s12039_s8 + $0x364] sm:$0x8] }
  0x62   : > { %10348 = vmatmul.mubr.bf16.gmra.mrb[8].mxu1 %v8821_v12  ;;  %v1156_v12 = vrot.slane %v1154_v4, 4  ;;  %v9129_v33 = vld [vmem:[%s12039_s8 + $0x36c] sm:$0x7]  ;;  %v9469_v34 = vrot.slane %v9127_v28, 11  ;;  %v8747_v3 = vld [vmem:[%s12039_s8 + $0x1b4] sm:$0x1] }
  0x63   : > { %10364 = vmatpush3.bf16.msra.mxu1 %v11605_v51  ;;  %10732 = vmatmul.mubr.bf16.gmra.mrb[8].mxu0 %v9457_v29  ;;  %v883_v45 = vsel %vm12221_vm8, %v8815_v37, %v882_v38  ;;  %v4650_v50 = vsel %vm12059_vm5, %v4648_v42, %v4649_v35  ;;  %v9243_v51 = vld [vmem:[%s12039_s8 + $0x2d0] sm:$0x7]  ;;  %v9128_v29 = vld [vmem:[%s12039_s8 + $0x368] sm:$0xf]  ;;  %v4930_v30 = vsel %vm12059_vm5, %v4928_v24, %v4929_v14  ;;  %v4936_v37 = vrot.slane %v9129_v33, 7 }
  0x64   : > { %10365 = vmatprep.subr.bf16.mxu1 %v11607_v1  ;;  %10748 = vmatpush3.bf16.msra.mxu0 %v11606_v55  ;;  %v9458_v54 = vcombine.low %v4647_v41, %v4650_v50  ;;  %v886_v55 = vsel %vm12221_vm8, %v884_v46, %v885_v43  ;;  %v4656_v56 = vrot.slane %v9243_v51, 7  ;;  %v1158_v21 = vsel %vm12050_vm4, %v1156_v12, %v1157_v7  ;;  %v11615_v42 = vld [vmem:[%s13959_s2 + $0x88] sm:$0xff]   ;;  %v8742_v43 = vld [vmem:[%s12039_s8 + $0x190] sm:$0xe]  ;;  %v9130_v50 = vld [vmem:[%s12039_s8 + $0x380] sm:$0x8] }
  0x65   : > { %10749 = vmatprep.subr.bf16.mxu0 %v11608_v10  ;;  %10351 = vmatprep.mubr.bf16.mxu1 %v12376_v44  ;;  %v12394_v58 = vcombine.low %v883_v45, %v886_v55  ;;  %v8856_v26 = vcombine.low %v1155_v11, %v1158_v21  ;;  %v4933_v36 = vrot.slane %v9128_v29, 7  ;;  %v12447_v45 = vld [vmem:[%s12039_s8 + $0x194] sm:$0xf]  ;;  %v11616_v46 = vld [vmem:[%s13959_s2 + $0x388] sm:$0xff]   ;;  %v8834_v48 = vrot.slane %v8742_v43, 9  ;;  %v11619_v29 = vld [vmem:[%s13959_s2 + $0x98] sm:$0xff]  }
  0x66   : > { %10735 = vmatprep.mubr.bf16.mxu0 %v9458_v54  ;;  %v9132_v54 = vld [vmem:[%s12039_s8 + $0x388] sm:$0x7]  ;;  %v9470_v55 = vrot.slane %v9130_v50, 11  ;;  %v8835_v4 = vrot.slane %v8745_v62, 9  ;;  %v1178_v9 = vrot.slane %v8747_v3, 5  ;;  %v11621_v50 = vld [vmem:[%s13959_s2 + $0xa0] sm:$0xff]  }
  0x67   : > { %10366 = vmatpush3.bf16.msra.mxu1 %v11607_v1  ;;  %v4657_v1 = vsel %vm12059_vm5, %v4655_v60, %v4656_v56  ;;  %v4934_v40 = vsel %vm12059_vm5, %v9469_v34, %v4933_v36  ;;  %v4935_v41 = vrot.slane %v4933_v36, 4  ;;  %v4940_v60 = vrot.slane %v9131_v53, 7  ;;  %v9134_v14 = vld [vmem:[%s12039_s8 + $0x3a0] sm:$0xf]  ;;  %v8750_v34 = vld [vmem:[%s12039_s8 + $0x1d0] sm:$0x1] }
  0x68   : > { %10367 = vmatprep.subr.bf16.mxu1 %v11609_v18  ;;  %10750 = vmatpush3.bf16.msra.mxu0 %v11608_v10  ;;  %v9459_v6 = vcombine.low %v4654_v59, %v4657_v1  ;;  %v9468_v10 = vrot.slane %v9124_v5, 11  ;;  %v12464_v1 = vld [vmem:[%s12039_s8 + $0x1b0] sm:$0xf]  ;;  %v4943_v2 = vrot.slane %v9132_v54, 7  ;;  %v4947_v21 = vrot.slane %v9134_v14, 7  ;;  %v11622_v54 = vld [vmem:[%s13959_s2 + $0x3a0] sm:$0xff]  }
  0x69   : > { %10751 = vmatprep.subr.bf16.mxu0 %v11610_v39  ;;  %v4937_v51 = vsel %vm12059_vm5, %v4935_v41, %v4936_v37  ;;  %v1175_v5 = vrot.slane %v12464_v1, 5  ;;  %v4941_v7 = vsel %vm12059_vm5, %v9470_v55, %v4940_v60  ;;  %v4942_v8 = vrot.slane %v4940_v60, 4  ;;  %v9136_v37 = vld [vmem:[%s12039_s8 + $0x3b8] sm:$0x8]  ;;  %v9138_v41 = vld [vmem:[%s12039_s8 + $0x3c0] sm:$0x7] }
  0x6a   : > { %10352 = vmatmul.mubr.bf16.gmra.mrb[12].mxu1 %v12394_v58  ;;  %v4927_v23 = vsel %vm12059_vm5, %v9468_v10, %v4926_v13  ;;  %v9493_v56 = vcombine.low %v4934_v40, %v4937_v51  ;;  %v9133_v13 = vld [vmem:[%s12039_s8 + $0x39c] sm:$0x8]  ;;  %v4949_v28 = vrot.slane %v4947_v21, 4  ;;  %v12513_v51 = vld [vmem:[%s12039_s8 + $0x1e8] sm:$0xf] }
  0x6b   : > { %10368 = vmatpush3.bf16.msra.mxu1 %v11609_v18  ;;  %10736 = vmatmul.mubr.bf16.gmra.mrb[12].mxu0 %v9459_v6  ;;  %v12422_v18 = vld [vmem:[%s12039_s8 + $0x178] sm:$0xf]  ;;  %v9492_v35 = vcombine.low %v4927_v23, %v4930_v30  ;;  %v1176_v11 = vsel %vm12050_vm4, %v8835_v4, %v1175_v5  ;;  %v1177_v12 = vrot.slane %v1175_v5, 4  ;;  %v4944_v19 = vsel %vm12059_vm5, %v4942_v8, %v4943_v2  ;;  %v9137_v40 = vld [vmem:[%s12039_s8 + $0x3bc] sm:$0xf]  ;;  %v11623_v4 = vld [vmem:[%s13959_s2 + $0xa8] sm:$0xff]  }
  0x6c   : > { %10369 = vmatprep.subr.bf16.mxu1 %v11611_v49  ;;  %10752 = vmatpush3.bf16.msra.mxu0 %v11610_v39  ;;  %v1161_v25 = vrot.slane %v12422_v18, 5  ;;  %v9494_v23 = vcombine.low %v4941_v7, %v4944_v19  ;;  %v11620_v30 = vld [vmem:[%s13959_s2 + $0x398] sm:$0xff]   ;;  %v4954_v47 = vrot.slane %v9137_v40, 7  ;;  %v9139_v2 = vld [vmem:[%s12039_s8 + $0x3d4] sm:$0x8] }
  0x6d   : > { %10753 = vmatprep.subr.bf16.mxu0 %v11612_v57  ;;  %10371 = vmatprep.mubr.bf16.mxu1 %v8856_v26  ;;  %v1179_v24 = vsel %vm12050_vm4, %v1177_v12, %v1178_v9  ;;  %v9140_v3 = vld [vmem:[%s12039_s8 + $0x3d8] sm:$0xf]  ;;  %v9141_v7 = vld [vmem:[%s12039_s8 + $0x3dc] sm:$0x7]  ;;  %v9473_v8 = vrot.slane %v9139_v2, 11  ;;  %v11624_v12 = vld [vmem:[%s13959_s2 + $0x3a8] sm:$0xff]  }
  0x6e   : > { %v1162_v31 = vsel %vm12050_vm4, %v8833_v20, %v1161_v25  ;;  %v1163_v32 = vrot.slane %v1161_v25, 4  ;;  %10755 = vmatprep.mubr.bf16.mxu0 %v9492_v35  ;;  %v9135_v20 = vld [vmem:[%s12039_s8 + $0x3a4] sm:$0x7]  ;;  %v8859_v26 = vcombine.low %v1176_v11, %v1179_v24  ;;  %v4964_v11 = vrot.slane %v9141_v7, 7 }
  0x6f   : > { %10370 = vmatpush3.bf16.msra.mxu1 %v11611_v49  ;;  %v1168_v49 = vrot.slane %v12447_v45, 5  ;;  %v4950_v25 = vrot.slane %v9135_v20, 7  ;;  %v8754_v20 = vld [vmem:[%s12039_s8 + $0x200] sm:$0xe]  ;;  %v8759_v40 = vld [vmem:[%s12039_s8 + $0x224] sm:$0x1] }
  0x70   : > { %10387 = vmatprep.subr.bf16.mxu1 %v12401_v61  ;;  %10754 = vmatpush3.bf16.msra.mxu0 %v11612_v57  ;;  %v1165_v38 = vsel %vm12050_vm4, %v1163_v32, %v1164_v27  ;;  %v12497_v32 = vld [vmem:[%s12039_s8 + $0x1cc] sm:$0xf]  ;;  %v8838_v24 = vrot.slane %v8754_v20, 9 }
  0x71   : > { %10771 = vmatprep.subr.bf16.mxu0 %v11614_v17  ;;  %v8857_v39 = vcombine.low %v1162_v31, %v1165_v38  ;;  %v1169_v57 = vsel %vm12050_vm4, %v8834_v48, %v1168_v49  ;;  %v1170_v59 = vrot.slane %v1168_v49, 4  ;;  %v8748_v31 = vld [vmem:[%s12039_s8 + $0x1c8] sm:$0xe]  ;;  %v4951_v33 = vsel %vm12059_vm5, %v4949_v28, %v4950_v25  ;;  %v8751_v49 = vld [vmem:[%s12039_s8 + $0x1e4] sm:$0xe] }
  0x72   : > { %v8836_v35 = vrot.slane %v8748_v31, 9  ;;  %v1182_v36 = vrot.slane %v12497_v32, 5  ;;  %v4957_v48 = vrot.slane %v9138_v41, 7  ;;  %v8837_v53 = vrot.slane %v8751_v49, 9 }
  0x73   : > { %10372 = vmatmul.mubr.bf16.vlgmr.msra.gmra.mrb[0].mxu1 %v8857_v39  ;;  %10756 = vmatmul.mubr.bf16.vlgmr.msra.gmra.mrb[0].mxu0 %v9493_v56  ;;  %v1172_v6 = vsel %vm12050_vm4, %v1170_v59, %v1171_v52  ;;  %v1185_v39 = vrot.slane %v8750_v34, 5  ;;  %v8753_v52 = vld [vmem:[%s12039_s8 + $0x1ec] sm:$0x1]  ;;  %v1189_v59 = vrot.slane %v12513_v51, 5  ;;  %v1206_v49 = vrot.slane %v8759_v40, 5 }
  0x74   : > { %10388 = vmatpush3.bf16.msra.mxu1 %v12401_v61  ;;  %v11617_v61 = vld [vmem:[%s13959_s2 + $0x90] sm:$0xff]   ;;  %10772 = vmatpush3.bf16.msra.mxu0 %v11614_v17  ;;  %v8858_v10 = vcombine.low %v1169_v57, %v1172_v6  ;;  %v9471_v17 = vrot.slane %v9133_v13, 11  ;;  %v1183_v43 = vsel %vm12050_vm4, %v8836_v35, %v1182_v36  ;;  %v4956_v57 = vrot.slane %v4954_v47, 4  ;;  %v8786_v40 = vld [vmem:[%s12039_s8 + $0x198] sm:$0xf] }
  0x75   : > { %10389 = vmatprep.subr.bf16.mxu1 %v11615_v42  ;;  %10773 = vmatprep.subr.bf16.mxu0 %v11616_v46  ;;  %v1192_v62 = vrot.slane %v8753_v52, 5  ;;  %v1191_v6 = vrot.slane %v1189_v59, 4 }
  0x76   : > { %10375 = vmatprep.mubr.bf16.mxu1 %v8858_v10  ;;  %v4948_v27 = vsel %vm12059_vm5, %v9471_v17, %v4947_v21  ;;  %10759 = vmatprep.mubr.bf16.mxu0 %v9494_v23  ;;  %v4958_v5 = vsel %vm12059_vm5, %v4956_v57, %v4957_v48  ;;  %v4961_v10 = vrot.slane %v9140_v3, 7  ;;  %v12543_v17 = vld [vmem:[%s12039_s8 + $0x204] sm:$0xf]  ;;  %v11625_v21 = vld [vmem:[%s13959_s2 + $0xb0] sm:$0xff]   ;;  %v8756_v23 = vld [vmem:[%s12039_s8 + $0x208] sm:$0x1] }
  0x77   : > { %v9495_v38 = vcombine.low %v4948_v27, %v4951_v33  ;;  %v1193_v13 = vsel %vm12050_vm4, %v1191_v6, %v1192_v62  ;;  %v1196_v25 = vrot.slane %v12543_v17, 5  ;;  %v1199_v28 = vrot.slane %v8756_v23, 5 }
  0x78   : > { %10390 = vmatpush3.bf16.msra.mxu1 %v11615_v42  ;;  %10774 = vmatpush3.bf16.msra.mxu0 %v11616_v46  ;;  %v9472_v42 = vrot.slane %v9136_v37, 11  ;;  %v1184_v46 = vrot.slane %v1182_v36, 4  ;;  %v4963_v19 = vrot.slane %v4961_v10, 4  ;;  %v8757_v37 = vld [vmem:[%s12039_s8 + $0x21c] sm:$0xe] }
  0x79   : > { %10391 = vmatprep.subr.bf16.mxu1 %v11617_v61  ;;  %10775 = vmatprep.subr.bf16.mxu0 %v11618_v16  ;;  %v1197_v34 = vsel %vm12050_vm4, %v8838_v24, %v1196_v25  ;;  %v1198_v35 = vrot.slane %v1196_v25, 4  ;;  %v8839_v41 = vrot.slane %v8757_v37, 9  ;;  %v8785_v24 = vld [vmem:[%s12039_s8 + $0x17c] sm:$0xf]  ;;  %v9175_v25 = vld [vmem:[%s12039_s8 + $0x36c] sm:$0xe] }
  0x7a   : > { %v1186_v55 = vsel %vm12050_vm4, %v1184_v46, %v1185_v39  ;;  %v4955_v56 = vsel %vm12059_vm5, %v9472_v42, %v4954_v47  ;;  %v4965_v27 = vsel %vm12059_vm5, %v4963_v19, %v4964_v11  ;;  %v11632_v19 = vld [vmem:[%s13959_s2 + $0x3c0] sm:$0xff]   ;;  %v11633_v37 = vld [vmem:[%s13959_s2 + $0xc8] sm:$0xff]  }
  0x7b   : > { %10376 = vmatmul.mubr.bf16.gmra.mrb[4].mxu1 %v8859_v26  ;;  %10760 = vmatmul.mubr.bf16.gmra.mrb[4].mxu0 %v9495_v38  ;;  %v8860_v60 = vcombine.low %v1183_v43, %v1186_v55  ;;  %v9496_v9 = vcombine.low %v4955_v56, %v4958_v5  ;;  %v9142_v26 = vld [vmem:[%s12039_s8 + $0x3f0] sm:$0x8]  ;;  %v12559_v38 = vld [vmem:[%s12039_s8 + $0x220] sm:$0xf]  ;;  %v1200_v46 = vsel %vm12050_vm4, %v1198_v35, %v1199_v28  ;;  %v11627_v56 = vld [vmem:[%s13959_s2 + $0xb8] sm:$0xff]  }
  0x7c   : > { %10392 = vmatpush3.bf16.msra.mxu1 %v11617_v61  ;;  %10776 = vmatpush3.bf16.msra.mxu0 %v11618_v16  ;;  %v1190_v61 = vsel %vm12050_vm4, %v8837_v53, %v1189_v59  ;;  %v4962_v16 = vsel %vm12059_vm5, %v9473_v8, %v4961_v10  ;;  %v9474_v31 = vrot.slane %v9142_v26, 11  ;;  %v1203_v42 = vrot.slane %v12559_v38, 5  ;;  %v11626_v43 = vld [vmem:[%s13959_s2 + $0x3b0] sm:$0xff]   ;;  %v11628_v5 = vld [vmem:[%s13959_s2 + $0x3b8] sm:$0xff]   ;;  %v11631_v8 = vld [vmem:[%s13959_s2 + $0xc0] sm:$0xff]  }
  0x7d   : > { %10393 = vmatprep.subr.bf16.mxu1 %v11619_v29  ;;  %10777 = vmatprep.subr.bf16.mxu0 %v11620_v30  ;;  %v8861_v14 = vcombine.low %v1190_v61, %v1193_v13  ;;  %v9497_v33 = vcombine.low %v4962_v16, %v4965_v27  ;;  %v9146_v55 = vld [vmem:[%s12039_s8 + $0x410] sm:$0xf]  ;;  %v9147_v59 = vld [vmem:[%s12039_s8 + $0x414] sm:$0x7] }
  0x7e   : > { %10379 = vmatprep.mubr.bf16.mxu1 %v8860_v60  ;;  %10763 = vmatprep.mubr.bf16.mxu0 %v9496_v9  ;;  %v1204_v52 = vsel %vm12050_vm4, %v8839_v41, %v1203_v42  ;;  %v1205_v53 = vrot.slane %v1203_v42, 4  ;;  %v4975_v62 = vrot.slane %v9146_v55, 7  ;;  %v8784_v9 = vld [vmem:[%s12039_s8 + $0x160] sm:$0xf]  ;;  %v9172_v10 = vld [vmem:[%s12039_s8 + $0x350] sm:$0xe]  ;;  %v8890_v42 = vcombine.low %v12447_v45, %v8786_v40 }
  0x7f   : > { %v9173_v13 = vld [vmem:[%s12039_s8 + $0x354] sm:$0xf]  ;;  %v9508_v16 = vrot.slane %v9172_v10, 9  ;;  %v9176_v26 = vld [vmem:[%s12039_s8 + $0x370] sm:$0xf] }
  0x80   : > { %10394 = vmatpush3.bf16.msra.mxu1 %v11619_v29  ;;  %10778 = vmatpush3.bf16.msra.mxu0 %v11620_v30  ;;  %v9143_v29 = vld [vmem:[%s12039_s8 + $0x3f4] sm:$0xf]  ;;  %v9144_v30 = vld [vmem:[%s12039_s8 + $0x3f8] sm:$0x7]  ;;  %v1207_v3 = vsel %vm12050_vm4, %v1205_v53, %v1206_v49  ;;  %v4977_v7 = vrot.slane %v4975_v62, 4 }
  0x81   : > { %10395 = vmatprep.subr.bf16.mxu1 %v11621_v50  ;;  %10779 = vmatprep.subr.bf16.mxu0 %v11622_v54  ;;  %v4968_v36 = vrot.slane %v9143_v29, 7  ;;  %v4971_v39 = vrot.slane %v9144_v30, 7  ;;  %v8863_v61 = vcombine.low %v1204_v52, %v1207_v3  ;;  %v9177_v28 = vld [vmem:[%s12039_s8 + $0x374] sm:$0x1]  ;;  %v9509_v29 = vrot.slane %v9175_v25, 9  ;;  %v11643_v25 = vld [vmem:[%s13959_s2 + $0xe0] sm:$0xff]  }
  0x82   : > { %v5255_v30 = vrot.slane %v9176_v26, 5  ;;  %v8787_v53 = vld [vmem:[%s12039_s8 + $0x1b4] sm:$0xf]  ;;  %v9181_v55 = vld [vmem:[%s12039_s8 + $0x3a4] sm:$0xe] }
  0x83   : > { %10380 = vmatmul.mubr.bf16.gmra.mrb[8].mxu1 %v8861_v14  ;;  %10764 = vmatmul.mubr.bf16.gmra.mrb[8].mxu0 %v9497_v33  ;;  %v4969_v47 = vsel %vm12059_vm5, %v9474_v31, %v4968_v36  ;;  %v4970_v48 = vrot.slane %v4968_v36, 4  ;;  %v9174_v14 = vld [vmem:[%s12039_s8 + $0x358] sm:$0x1]  ;;  %v8889_v31 = vcombine.low %v12422_v18, %v8785_v24  ;;  %v5258_v33 = vrot.slane %v9177_v28, 5  ;;  %v11634_v18 = vld [vmem:[%s13959_s2 + $0x3c8] sm:$0xff]  }
  0x84   : > { %10396 = vmatpush3.bf16.msra.mxu1 %v11621_v50  ;;  %10780 = vmatpush3.bf16.msra.mxu0 %v11622_v54  ;;  %v8862_v50 = vcombine.low %v1197_v34, %v1200_v46  ;;  %v9145_v54 = vld [vmem:[%s12039_s8 + $0x40c] sm:$0x8]  ;;  %v5251_v23 = vrot.slane %v9174_v14, 5  ;;  %v5256_v35 = vsel %vm12050_vm4, %v9509_v29, %v5255_v30  ;;  %v5257_v36 = vrot.slane %v5255_v30, 4  ;;  %v9184_v10 = vld [vmem:[%s12039_s8 + $0x3c0] sm:$0xe] }
  0x85   : > { %10397 = vmatprep.subr.bf16.mxu1 %v11623_v4  ;;  %10781 = vmatprep.subr.bf16.mxu0 %v11624_v12  ;;  %v4972_v57 = vsel %vm12059_vm5, %v4970_v48, %v4971_v39  ;;  %v9475_v60 = vrot.slane %v9145_v54, 11  ;;  %v9179_v46 = vld [vmem:[%s12039_s8 + $0x38c] sm:$0xf]  ;;  %v11637_v54 = vld [vmem:[%s13959_s2 + $0xd0] sm:$0xff]   ;;  %v9512_v14 = vrot.slane %v9184_v10, 9 }
  0x86   : > { %10383 = vmatprep.mubr.bf16.mxu1 %v8862_v50  ;;  %v9498_v2 = vcombine.low %v4969_v47, %v4972_v57  ;;  %v5259_v41 = vsel %vm12050_vm4, %v5257_v36, %v5258_v33  ;;  %v9180_v47 = vld [vmem:[%s12039_s8 + $0x390] sm:$0x1]  ;;  %v5262_v50 = vrot.slane %v9179_v46, 5  ;;  %v9182_v57 = vld [vmem:[%s12039_s8 + $0x3a8] sm:$0xf] }
  0x87   : > { %v4976_v6 = vsel %vm12059_vm5, %v9475_v60, %v4975_v62  ;;  %v9533_v48 = vcombine.low %v5256_v35, %v5259_v41  ;;  %v5265_v52 = vrot.slane %v9180_v47, 5  ;;  %v9511_v60 = vrot.slane %v9181_v55, 9  ;;  %v9187_v26 = vld [vmem:[%s12039_s8 + $0x3dc] sm:$0xe]  ;;  %v9190_v40 = vld [vmem:[%s12039_s8 + $0x3f8] sm:$0xe] }
  0x88   : > { %10398 = vmatpush3.bf16.msra.mxu1 %v11623_v4  ;;  %10782 = vmatpush3.bf16.msra.mxu0 %v11624_v12  ;;  %v4978_v4 = vrot.slane %v9147_v59, 7  ;;  %v8888_v12 = vcombine.low %v12405_v0, %v8784_v9  ;;  %v9183_v59 = vld [vmem:[%s12039_s8 + $0x3ac] sm:$0x1]  ;;  %v5269_v62 = vrot.slane %v9182_v57, 5  ;;  %v8788_v9 = vld [vmem:[%s12039_s8 + $0x1d0] sm:$0xf] }
  0x89   : > { %10399 = vmatprep.subr.bf16.mxu1 %v11625_v21  ;;  %10783 = vmatprep.subr.bf16.mxu0 %v11626_v43  ;;  %v9513_v28 = vrot.slane %v9187_v26, 9  ;;  %v11645_v41 = vld [vmem:[%s13959_s2 + $0xe8] sm:$0xff]   ;;  %v9514_v46 = vrot.slane %v9190_v40, 9  ;;  %v9246_v10 = vld [vmem:[%s12039_s8 + $0x35c] sm:$0x7]  ;;  %v11653_v26 = vld [vmem:[%s13959_s2 + $0x100] sm:$0xff]  }
  0x8a   : > { %10767 = vmatprep.mubr.bf16.mxu0 %v9498_v2  ;;  %v4979_v11 = vsel %vm12059_vm5, %v4977_v7, %v4978_v4  ;;  %v5272_v2 = vrot.slane %v9183_v59, 5  ;;  %v8891_v4 = vcombine.low %v12464_v1, %v8787_v53  ;;  %v5271_v7 = vrot.slane %v5269_v62, 4  ;;  %v9185_v1 = vld [vmem:[%s12039_s8 + $0x3c4] sm:$0xf]  ;;  %v9194_v53 = vld [vmem:[%s12039_s8 + $0x418] sm:$0xf] }
  0x8b   : > { %10384 = vmatmul.mubr.bf16.gmra.mrb[12].mxu1 %v8863_v61  ;;  %v9499_v20 = vcombine.low %v4976_v6, %v4979_v11  ;;  %v5270_v6 = vsel %vm12050_vm4, %v9511_v60, %v5269_v62  ;;  %v5297_v57 = vrot.slane %v9194_v53, 5  ;;  %v11649_v59 = vld [vmem:[%s13959_s2 + $0xf0] sm:$0xff]   ;;  %v8705_v53 = vld [vmem:[%s12039_s8 + $0x258] sm:$0x3] }
  0x8c   : > { %10400 = vmatpush3.bf16.msra.mxu1 %v11625_v21  ;;  %10784 = vmatpush3.bf16.msra.mxu0 %v11626_v43  ;;  %v5248_v21 = vrot.slane %v9173_v13, 5  ;;  %v9178_v43 = vld [vmem:[%s12039_s8 + $0x388] sm:$0xe]  ;;  %v5273_v11 = vsel %vm12050_vm4, %v5271_v7, %v5272_v2  ;;  %v9186_v13 = vld [vmem:[%s12039_s8 + $0x3c8] sm:$0x1] }
  0x8d   : > { %10401 = vmatprep.subr.bf16.mxu1 %v11627_v56  ;;  %10785 = vmatprep.subr.bf16.mxu0 %v11628_v5  ;;  %v9510_v49 = vrot.slane %v9178_v43, 9  ;;  %v9192_v43 = vld [vmem:[%s12039_s8 + $0x400] sm:$0x1]  ;;  %v5299_v2 = vrot.slane %v5297_v57, 4  ;;  %v9252_v40 = vld [vmem:[%s12039_s8 + $0x394] sm:$0x7] }
  0x8e   : > { %10403 = vmatprep.mubr.bf16.mxu1 %v8888_v12  ;;  %10768 = vmatmul.mubr.bf16.gmra.mrb[12].mxu0 %v9499_v20  ;;  %v5249_v0 = vsel %vm12050_vm4, %v9508_v16, %v5248_v21  ;;  %v5250_v27 = vrot.slane %v5248_v21, 4  ;;  %v8892_v12 = vcombine.low %v12497_v32, %v8788_v9  ;;  %v5276_v16 = vrot.slane %v9185_v1, 5  ;;  %v11640_v21 = vld [vmem:[%s13959_s2 + $0x3d8] sm:$0xff]  }
  0x8f   : > { %v5263_v45 = vsel %vm12050_vm4, %v9510_v49, %v5262_v50  ;;  %v9535_v20 = vcombine.low %v5270_v6, %v5273_v11  ;;  %v5293_v49 = vrot.slane %v9192_v43, 5  ;;  %v9244_v6 = vld [vmem:[%s12039_s8 + $0x354] sm:$0x8]  ;;  %v9245_v9 = vld [vmem:[%s12039_s8 + $0x358] sm:$0xf]  ;;  %v5573_v11 = vrot.slane %v9246_v10, 7 }
  0x90   : > { %10402 = vmatpush3.bf16.msra.mxu1 %v11627_v56  ;;  %10786 = vmatpush3.bf16.msra.mxu0 %v11628_v5  ;;  %v5252_v34 = vsel %vm12050_vm4, %v5250_v27, %v5251_v23  ;;  %v5264_v56 = vrot.slane %v5262_v50, 4  ;;  %v11638_v5 = vld [vmem:[%s13959_s2 + $0x3d0] sm:$0xff]   ;;  %v5279_v23 = vrot.slane %v9186_v13, 5  ;;  %v5277_v24 = vsel %vm12050_vm4, %v9512_v14, %v5276_v16  ;;  %v9189_v27 = vld [vmem:[%s12039_s8 + $0x3e4] sm:$0x1] }
  0x91   : > { %10419 = vmatprep.subr.bf16.mxu1 %v11631_v8  ;;  %10803 = vmatprep.subr.bf16.mxu0 %v11632_v19  ;;  %v9532_v39 = vcombine.low %v5249_v0, %v5252_v34  ;;  %v5278_v32 = vrot.slane %v5276_v16, 4  ;;  %v9188_v0 = vld [vmem:[%s12039_s8 + $0x3e0] sm:$0xf]  ;;  %v8791_v50 = vld [vmem:[%s12039_s8 + $0x224] sm:$0xf]  ;;  %v9548_v1 = vrot.slane %v9244_v6, 11 }
  0x92   : > { %v5266_v3 = vsel %vm12050_vm4, %v5264_v56, %v5265_v52  ;;  %v5283_v29 = vrot.slane %v9188_v0, 5  ;;  %v9193_v52 = vld [vmem:[%s12039_s8 + $0x414] sm:$0xe]  ;;  %v9247_v13 = vld [vmem:[%s12039_s8 + $0x370] sm:$0x8] }
  0x93   : > { %10787 = vmatprep.mubr.bf16.mxu0 %v9532_v39  ;;  %10404 = vmatmul.mubr.bf16.vlgmr.msra.gmra.mrb[0].mxu1 %v8889_v31  ;;  %v9534_v61 = vcombine.low %v5263_v45, %v5266_v3  ;;  %v5280_v30 = vsel %vm12050_vm4, %v5278_v32, %v5279_v23  ;;  %v5286_v31 = vrot.slane %v9189_v27, 5  ;;  %v8790_v39 = vld [vmem:[%s12039_s8 + $0x208] sm:$0xf]  ;;  %v9195_v45 = vld [vmem:[%s12039_s8 + $0x41c] sm:$0x1]  ;;  %v9515_v56 = vrot.slane %v9193_v52, 9 }
  0x94   : > { %10420 = vmatpush3.bf16.msra.mxu1 %v11631_v8  ;;  %10407 = vmatprep.mubr.bf16.mxu1 %v8890_v42  ;;  %v11639_v8 = vld [vmem:[%s13959_s2 + $0xd8] sm:$0xff]   ;;  %v9536_v33 = vcombine.low %v5277_v24, %v5280_v30  ;;  %v5284_v35 = vsel %vm12050_vm4, %v9513_v28, %v5283_v29  ;;  %v5285_v36 = vrot.slane %v5283_v29, 4  ;;  %v5300_v60 = vrot.slane %v9195_v45, 5  ;;  %v11650_v3 = vld [vmem:[%s13959_s2 + $0x3f0] sm:$0xff]   ;;  %v11654_v28 = vld [vmem:[%s13959_s2 + $0x400] sm:$0xff]  }
  0x95   : > { %10421 = vmatprep.subr.bf16.mxu1 %v11633_v37  ;;  %v9191_v42 = vld [vmem:[%s12039_s8 + $0x3fc] sm:$0xf]  ;;  %v9248_v14 = vld [vmem:[%s12039_s8 + $0x374] sm:$0xf]  ;;  %v9249_v16 = vld [vmem:[%s12039_s8 + $0x378] sm:$0x7] }
  0x96   : > { %10788 = vmatmul.mubr.bf16.vlgmr.msra.gmra.mrb[0].mxu0 %v9533_v48  ;;  %v5290_v48 = vrot.slane %v9191_v42, 5  ;;  %v5301_v7 = vsel %vm12050_vm4, %v5299_v2, %v5300_v60  ;;  %v5577_v23 = vrot.slane %v9248_v14, 7  ;;  %v11652_v24 = vld [vmem:[%s13959_s2 + $0x3f8] sm:$0xff]   ;;  %v5580_v32 = vrot.slane %v9249_v16, 7  ;;  %v8700_v29 = vld [vmem:[%s12039_s8 + $0x234] sm:$0xc] }
  0x97   : > { %10804 = vmatpush3.bf16.msra.mxu0 %v11632_v19  ;;  %10791 = vmatprep.mubr.bf16.mxu0 %v9534_v61  ;;  %v8789_v19 = vld [vmem:[%s12039_s8 + $0x1ec] sm:$0xf]  ;;  %v5298_v61 = vsel %vm12050_vm4, %v9515_v56, %v5297_v57  ;;  %v8701_v30 = vld [vmem:[%s12039_s8 + $0x238] sm:$0xf]  ;;  %v8704_v52 = vld [vmem:[%s12039_s8 + $0x254] sm:$0xf] }
  0x98   : > { %10805 = vmatprep.subr.bf16.mxu0 %v11634_v18  ;;  %10422 = vmatpush3.bf16.msra.mxu1 %v11633_v37  ;;  %v8893_v34 = vcombine.low %v12513_v51, %v8789_v19  ;;  %v11644_v37 = vld [vmem:[%s13959_s2 + $0x3e0] sm:$0xff]   ;;  %v5287_v51 = vsel %vm12050_vm4, %v5285_v36, %v5286_v31  ;;  %v5292_v55 = vrot.slane %v5290_v48, 4  ;;  %v5579_v0 = vrot.slane %v5577_v23, 4  ;;  %v9250_v36 = vld [vmem:[%s12039_s8 + $0x38c] sm:$0x8]  ;;  %v11657_v60 = vld [vmem:[%s13959_s2 + $0x110] sm:$0xff]  }
  0x99   : > { %10423 = vmatprep.subr.bf16.mxu1 %v11637_v54  ;;  %v9537_v47 = vcombine.low %v5284_v35, %v5287_v51  ;;  %v1720_v35 = vrot.slane %v8701_v30, 6  ;;  %v9550_v51 = vrot.slane %v9250_v36, 11  ;;  %v1727_v56 = vrot.slane %v8704_v52, 6  ;;  %v9254_v2 = vld [vmem:[%s12039_s8 + $0x3ac] sm:$0xf]  ;;  %v11658_v10 = vld [vmem:[%s13959_s2 + $0x410] sm:$0xff]  }
  0x9a   : > { %v5294_v62 = vsel %vm12050_vm4, %v5292_v55, %v5293_v49  ;;  %v5581_v31 = vsel %vm12059_vm5, %v5579_v0, %v5580_v32  ;;  %v8706_v14 = vld [vmem:[%s12039_s8 + $0x26c] sm:$0xc]  ;;  %v8707_v16 = vld [vmem:[%s12039_s8 + $0x270] sm:$0xf]  ;;  %v11660_v32 = vld [vmem:[%s13959_s2 + $0x418] sm:$0xff]  }
  0x9b   : > { %10806 = vmatpush3.bf16.msra.mxu0 %v11634_v18  ;;  %10408 = vmatmul.mubr.bf16.gmra.mrb[4].mxu1 %v8891_v4  ;;  %v12679_v18 = vcombine.low %v12543_v17, %v8790_v39  ;;  %v5291_v17 = vsel %vm12050_vm4, %v9514_v46, %v5290_v48  ;;  %v9251_v39 = vld [vmem:[%s12039_s8 + $0x390] sm:$0xf]  ;;  %v1722_v43 = vrot.slane %v1720_v35, 4  ;;  %v9258_v0 = vld [vmem:[%s12039_s8 + $0x3cc] sm:$0x7] }
  0x9c   : > { %10807 = vmatprep.subr.bf16.mxu0 %v11638_v5  ;;  %10424 = vmatpush3.bf16.msra.mxu1 %v11637_v54  ;;  %v11646_v54 = vld [vmem:[%s13959_s2 + $0x3e8] sm:$0xff]   ;;  %v9538_v4 = vcombine.low %v5291_v17, %v5294_v62  ;;  %v5584_v46 = vrot.slane %v9251_v39, 7  ;;  %v8703_v48 = vld [vmem:[%s12039_s8 + $0x250] sm:$0xc]  ;;  %v11661_v39 = vld [vmem:[%s13959_s2 + $0x120] sm:$0xff]  }
  0x9d   : > { %10425 = vmatprep.subr.bf16.mxu1 %v11639_v8  ;;  %10411 = vmatprep.mubr.bf16.mxu1 %v8892_v12  ;;  %v9539_v12 = vcombine.low %v5298_v61, %v5301_v7  ;;  %v9253_v62 = vld [vmem:[%s12039_s8 + $0x3a8] sm:$0x8]  ;;  %v9255_v61 = vld [vmem:[%s12039_s8 + $0x3b0] sm:$0x7]  ;;  %v9261_v52 = vld [vmem:[%s12039_s8 + $0x3e8] sm:$0x7] }
  0x9e   : > { %10792 = vmatmul.mubr.bf16.gmra.mrb[4].mxu0 %v9535_v20  ;;  %v5585_v55 = vsel %vm12059_vm5, %v9550_v51, %v5584_v46  ;;  %v5586_v45 = vrot.slane %v5584_v46, 4  ;;  %v9551_v6 = vrot.slane %v9253_v62, 11  ;;  %v11663_v62 = vld [vmem:[%s13959_s2 + $0x128] sm:$0xff]  }
  0x9f   : > { %10808 = vmatpush3.bf16.msra.mxu0 %v11638_v5  ;;  %10795 = vmatprep.mubr.bf16.mxu0 %v9536_v33  ;;  %v12702_v5 = vcombine.low %v12559_v38, %v8791_v50  ;;  %v5570_v38 = vrot.slane %v9245_v9, 7  ;;  %v8702_v33 = vld [vmem:[%s12039_s8 + $0x23c] sm:$0x3]  ;;  %v11656_v50 = vld [vmem:[%s13959_s2 + $0x408] sm:$0xff]   ;;  %v5594_v9 = vrot.slane %v9255_v61, 7 }
  0xa0   : > { %10809 = vmatprep.subr.bf16.mxu0 %v11640_v21  ;;  %10426 = vmatpush3.bf16.msra.mxu1 %v11639_v8  ;;  %v11651_v8 = vld [vmem:[%s13959_s2 + $0xf8] sm:$0xff]   ;;  %v8714_v61 = vld [vmem:[%s12039_s8 + $0x2ac] sm:$0x3] }
  0xa1   : > { %10427 = vmatprep.subr.bf16.mxu1 %v11643_v25  ;;  %v5571_v19 = vsel %vm12059_vm5, %v9548_v1, %v5570_v38  ;;  %v5572_v20 = vrot.slane %v5570_v38, 4 }
  0xa3   : > { %10810 = vmatpush3.bf16.msra.mxu0 %v11640_v21  ;;  %10412 = vmatmul.mubr.bf16.gmra.mrb[8].mxu1 %v8893_v34  ;;  %v9549_v21 = vrot.slane %v9247_v13, 11  ;;  %v8904_v34 = vrot.slane %v8700_v29, 10  ;;  %v11659_v13 = vld [vmem:[%s13959_s2 + $0x118] sm:$0xff]  }
  0xa4   : > { %10811 = vmatprep.subr.bf16.mxu0 %v11644_v37  ;;  %10428 = vmatpush3.bf16.msra.mxu1 %v11643_v25  ;;  %v5574_v25 = vsel %vm12059_vm5, %v5572_v20, %v5573_v11  ;;  %v8906_v20 = vrot.slane %v8706_v14, 10 }
  0xa5   : > { %10429 = vmatprep.subr.bf16.mxu1 %v11645_v41  ;;  %10415 = vmatprep.mubr.bf16.mxu1 %v12679_v18  ;;  %v9572_v27 = vcombine.low %v5571_v19, %v5574_v25  ;;  %v1721_v42 = vsel %vm12221_vm8, %v8904_v34, %v1720_v35  ;;  %v8708_v19 = vld [vmem:[%s12039_s8 + $0x274] sm:$0x3]  ;;  %v5601_v34 = vrot.slane %v9258_v0, 7  ;;  %v8711_v35 = vld [vmem:[%s12039_s8 + $0x290] sm:$0x3] }
  0xa6   : > { %10796 = vmatmul.mubr.bf16.gmra.mrb[8].mxu0 %v9537_v47  ;;  %v5587_v47 = vrot.slane %v9252_v40, 7  ;;  %v1737_v25 = vrot.slane %v8708_v19, 6  ;;  %v8715_v19 = vld [vmem:[%s12039_s8 + $0x2c0] sm:$0xc] }
  0xa7   : > { %10812 = vmatpush3.bf16.msra.mxu0 %v11644_v37  ;;  %10799 = vmatprep.mubr.bf16.mxu0 %v9538_v4  ;;  %v1723_v37 = vrot.slane %v8702_v33, 6  ;;  %v1729_v4 = vrot.slane %v1727_v56, 4  ;;  %v8710_v33 = vld [vmem:[%s12039_s8 + $0x28c] sm:$0xf] }
  0xa8   : > { %10813 = vmatprep.subr.bf16.mxu0 %v11646_v54  ;;  %10430 = vmatpush3.bf16.msra.mxu1 %v11645_v41  ;;  %v11655_v41 = vld [vmem:[%s13959_s2 + $0x108] sm:$0xff]  }
  0xa9   : > { %10431 = vmatprep.subr.bf16.mxu1 %v11649_v59  ;;  %v1724_v17 = vsel %vm12221_vm8, %v1722_v43, %v1723_v37  ;;  %v1741_v37 = vrot.slane %v8710_v33, 6 }
  0xaa   : > { %v8926_v57 = vcombine.low %v1721_v42, %v1724_v17  ;;  %v1744_v42 = vrot.slane %v8711_v35, 6 }
  0xab   : > { %10814 = vmatpush3.bf16.msra.mxu0 %v11646_v54  ;;  %10416 = vmatmul.mubr.bf16.gmra.mrb[12].mxu1 %v12702_v5  ;;  %v8905_v54 = vrot.slane %v8703_v48, 10  ;;  %v9259_v48 = vld [vmem:[%s12039_s8 + $0x3e0] sm:$0x8] }
  0xac   : > { %10815 = vmatprep.subr.bf16.mxu0 %v11650_v3  ;;  %10432 = vmatpush3.bf16.msra.mxu1 %v11649_v59  ;;  %v1730_v59 = vrot.slane %v8705_v53, 6  ;;  %v9553_v53 = vrot.slane %v9259_v48, 11  ;;  %v11669_v48 = vld [vmem:[%s12039_s8] sm:$0xff]  }
  0xad   : > { %10433 = vmatprep.subr.bf16.mxu1 %v11651_v8  ;;  %10435 = vmatprep.mubr.bf16.mxu1 %v12376_v44  ;;  %v5578_v44 = vsel %vm12059_vm5, %v9549_v21, %v5577_v23  ;;  %v1734_v21 = vrot.slane %v8707_v16, 6  ;;  %v9256_v23 = vld [vmem:[%s12039_s8 + $0x3c4] sm:$0x8] }
  0xae   : > { %10800 = vmatmul.mubr.bf16.gmra.mrb[12].mxu0 %v9539_v12  ;;  %v9573_v49 = vcombine.low %v5578_v44, %v5581_v31  ;;  %v1731_v1 = vsel %vm12221_vm8, %v1729_v4, %v1730_v59  ;;  %v8709_v31 = vld [vmem:[%s12039_s8 + $0x288] sm:$0xc] }
  0xaf   : > { %10816 = vmatpush3.bf16.msra.mxu0 %v11650_v3  ;;  %10819 = vmatprep.mubr.bf16.mxu0 %v9572_v27  ;;  %v1728_v3 = vsel %vm12221_vm8, %v8905_v54, %v1727_v56  ;;  %v9552_v27 = vrot.slane %v9256_v23, 11  ;;  %v1735_v29 = vsel %vm12221_vm8, %v8906_v20, %v1734_v21  ;;  %v1736_v30 = vrot.slane %v1734_v21, 4  ;;  %v11662_v56 = vld [vmem:[%s13959_s2 + $0x420] sm:$0xff]   ;;  %v11665_v20 = vld [vmem:[%s13959_s2 + $0x130] sm:$0xff]   ;;  %v8717_v23 = vld [vmem:[%s12039_s8 + $0x2c8] sm:$0x3] }
  0xb0   : > { %10817 = vmatprep.subr.bf16.mxu0 %v11652_v24  ;;  %10434 = vmatpush3.bf16.msra.mxu1 %v11651_v8  ;;  %v5591_v8 = vrot.slane %v9254_v2, 7  ;;  %v8927_v38 = vcombine.low %v1728_v3, %v1731_v1  ;;  %v8907_v36 = vrot.slane %v8709_v31, 10  ;;  %v11664_v2 = vld [vmem:[%s13959_s2 + $0x428] sm:$0xff]   ;;  %v9263_v1 = vld [vmem:[%s12039_s8 + $0x400] sm:$0xf]  ;;  %v11667_v31 = vld [vmem:[%s13959_s2 + $0x138] sm:$0xff]  }
  0xb1   : > { %10451 = vmatprep.subr.bf16.mxu1 %v11653_v26  ;;  %v1738_v40 = vsel %vm12221_vm8, %v1736_v30, %v1737_v25  ;;  %v8713_v3 = vld [vmem:[%s12039_s8 + $0x2a8] sm:$0xf]  ;;  %v5612_v14 = vrot.slane %v9263_v1, 7  ;;  %v8716_v21 = vld [vmem:[%s12039_s8 + $0x2c4] sm:$0xf] }
  0xb2   : > { %v5592_v11 = vsel %vm12059_vm5, %v9551_v6, %v5591_v8  ;;  %v5593_v12 = vrot.slane %v5591_v8, 4  ;;  %v8928_v43 = vcombine.low %v1735_v29, %v1738_v40  ;;  %v1742_v46 = vsel %vm12221_vm8, %v8907_v36, %v1741_v37  ;;  %v9262_v8 = vld [vmem:[%s12039_s8 + $0x3fc] sm:$0x8]  ;;  %v9265_v30 = vld [vmem:[%s12039_s8 + $0x418] sm:$0x8] }
  0xb3   : > { %10818 = vmatpush3.bf16.msra.mxu0 %v11652_v24  ;;  %10436 = vmatmul.mubr.bf16.vlgmr.msra.gmra.mrb[0].mxu1 %v12394_v58  ;;  %v5588_v58 = vsel %vm12059_vm5, %v5586_v45, %v5587_v47  ;;  %v1743_v47 = vrot.slane %v1741_v37, 4  ;;  %v5608_v45 = vrot.slane %v9261_v52, 7  ;;  %v5614_v0 = vrot.slane %v5612_v14, 4  ;;  %v9267_v36 = vld [vmem:[%s12039_s8 + $0x420] sm:$0x7] }
  0xb4   : > { %10835 = vmatprep.subr.bf16.mxu0 %v11654_v28  ;;  %10452 = vmatpush3.bf16.msra.mxu1 %v11653_v26  ;;  %v9574_v7 = vcombine.low %v5585_v55, %v5588_v58  ;;  %v5595_v24 = vsel %vm12059_vm5, %v5593_v12, %v5594_v9  ;;  %v9257_v26 = vld [vmem:[%s12039_s8 + $0x3c8] sm:$0xf]  ;;  %v8712_v58 = vld [vmem:[%s12039_s8 + $0x2a4] sm:$0xc]  ;;  %v1758_v29 = vrot.slane %v8717_v23, 6  ;;  %v9555_v37 = vrot.slane %v9265_v30, 11 }
  0xb5   : > { %10453 = vmatprep.subr.bf16.mxu1 %v11655_v41  ;;  %10439 = vmatprep.mubr.bf16.mxu1 %v8926_v57  ;;  %v5598_v44 = vrot.slane %v9257_v26, 7  ;;  %v1745_v55 = vsel %vm12221_vm8, %v1743_v47, %v1744_v42  ;;  %v8908_v6 = vrot.slane %v8712_v58, 10  ;;  %v11668_v47 = vld [vmem:[%s13959_s2 + $0x438] sm:$0xff]  }
  0xb6   : > { %10820 = vmatmul.mubr.bf16.vlgmr.msra.gmra.mrb[0].mxu0 %v9573_v49  ;;  %v9260_v49 = vld [vmem:[%s12039_s8 + $0x3e4] sm:$0xf]  ;;  %v8929_v57 = vcombine.low %v1742_v46, %v1745_v55  ;;  %v11671_v55 = vld [vmem:[%s12039_s8 + $0x1c] sm:$0xff]  }
  0xb7   : > { %10836 = vmatpush3.bf16.msra.mxu0 %v11654_v28  ;;  %10823 = vmatprep.mubr.bf16.mxu0 %v9574_v7  ;;  %v9575_v28 = vcombine.low %v5592_v11, %v5595_v24  ;;  %v5599_v51 = vsel %vm12059_vm5, %v9552_v27, %v5598_v44  ;;  %v5605_v54 = vrot.slane %v9260_v49, 7  ;;  %v1748_v7 = vrot.slane %v8713_v3, 6  ;;  %v11682_v58 = vld [vmem:[%s13959_s2 + $0x458] sm:$0xff]   ;;  %v11686_v3 = vld [vmem:[%s13959_s2 + $0x160] sm:$0xff]  }
  0xb8   : > { %10837 = vmatprep.subr.bf16.mxu0 %v11656_v50  ;;  %10454 = vmatpush3.bf16.msra.mxu1 %v11655_v41  ;;  %v5600_v41 = vrot.slane %v5598_v44, 4  ;;  %v9554_v11 = vrot.slane %v9262_v8, 11  ;;  %v8909_v24 = vrot.slane %v8715_v19, 10  ;;  %v1755_v27 = vrot.slane %v8716_v21, 6  ;;  %v9266_v44 = vld [vmem:[%s12039_s8 + $0x41c] sm:$0xf] }
  0xb9   : > { %10455 = vmatprep.subr.bf16.mxu1 %v11657_v60  ;;  %v5606_v59 = vsel %vm12059_vm5, %v9553_v53, %v5605_v54  ;;  %v1749_v12 = vsel %vm12221_vm8, %v8908_v6, %v1748_v7  ;;  %v5619_v40 = vrot.slane %v9266_v44, 7  ;;  %v11672_v53 = vld [vmem:[%s13959_s2 + $0x440] sm:$0xff]   ;;  %v8800_v6 = vld [vmem:[%s12039_s8 + $0x2b0] sm:$0xf]  ;;  %v11697_v30 = vld [vmem:[%s13959_s2 + $0x178] sm:$0xff]  }
  0xba   : > { %v5613_v26 = vsel %vm12059_vm5, %v9554_v11, %v5612_v14  ;;  %v1757_v35 = vrot.slane %v1755_v27, 4  ;;  %v11687_v8 = vld [vmem:[%s12039_s8 + $0x8c] sm:$0xff]  }
  0xbb   : > { %10838 = vmatpush3.bf16.msra.mxu0 %v11656_v50  ;;  %10440 = vmatmul.mubr.bf16.gmra.mrb[4].mxu1 %v8927_v38  ;;  %v5602_v50 = vsel %vm12059_vm5, %v5600_v41, %v5601_v34  ;;  %v9264_v38 = vld [vmem:[%s12039_s8 + $0x404] sm:$0x7]  ;;  %v1756_v34 = vsel %vm12221_vm8, %v8909_v24, %v1755_v27  ;;  %v5621_v46 = vrot.slane %v5619_v40, 4  ;;  %v11692_v11 = vld [vmem:[%s12039_s8 + $0xa8] sm:$0xff]  }
  0xbc   : > { %10839 = vmatprep.subr.bf16.mxu0 %v11658_v10  ;;  %10456 = vmatpush3.bf16.msra.mxu1 %v11657_v60  ;;  %v9576_v17 = vcombine.low %v5599_v51, %v5602_v50  ;;  %v5607_v60 = vrot.slane %v5605_v54, 4  ;;  %v5615_v16 = vrot.slane %v9264_v38, 7  ;;  %v5622_v51 = vrot.slane %v9267_v36, 7  ;;  %v11670_v50 = vld [vmem:[%s13959_s2 + $0x140] sm:$0xff]   ;;  %v11690_v38 = vld [vmem:[%s13959_s2 + $0x468] sm:$0xff]  }
  0xbd   : > { %10457 = vmatprep.subr.bf16.mxu1 %v11659_v13  ;;  %10443 = vmatprep.mubr.bf16.mxu1 %v8928_v43  ;;  %v1759_v41 = vsel %vm12221_vm8, %v1757_v35, %v1758_v29  ;;  %v5620_v43 = vsel %vm12059_vm5, %v9555_v37, %v5619_v40  ;;  %v11675_v54 = vld [vmem:[%s12039_s8 + $0x23c] sm:$0xff]   ;;  %v12933_v14 = vld [vmem:[%s12039_s8 + $0x2cc] sm:$0x1]  ;;  %v5916_v29 = vld [vmem:[%s12039_s8 + $0x10] sm:$0x1] }
  0xbe   : > { %10824 = vmatmul.mubr.bf16.gmra.mrb[4].mxu0 %v9575_v28  ;;  %v5609_v4 = vsel %vm12059_vm5, %v5607_v60, %v5608_v45  ;;  %v5616_v33 = vsel %vm12059_vm5, %v5614_v0, %v5615_v16  ;;  %v12859_v42 = vcombine.low %v1756_v34, %v1759_v41  ;;  %v5623_v49 = vsel %vm12059_vm5, %v5621_v46, %v5622_v51  ;;  %v11674_v45 = vld [vmem:[%s13959_s2 + $0x448] sm:$0xff]   ;;  %v11683_v60 = vld [vmem:[%s12039_s8 + $0x274] sm:$0xff]   ;;  %v5917_v34 = vld [vmem:[%s12039_s8 + $0x24] sm:$0xe] }
  0xbf   : > { %10840 = vmatpush3.bf16.msra.mxu0 %v11658_v10  ;;  %10827 = vmatprep.mubr.bf16.mxu0 %v9576_v17  ;;  %v9577_v9 = vcombine.low %v5606_v59, %v5609_v4  ;;  %v1751_v10 = vrot.slane %v8714_v61, 6  ;;  %v9579_v52 = vcombine.low %v5620_v43, %v5623_v49  ;;  %v11673_v17 = vld [vmem:[%s13959_s2 + $0x148] sm:$0xff]   ;;  %v11681_v59 = vld [vmem:[%s13959_s2 + $0x158] sm:$0xff]   ;;  %v11685_v4 = vld [vmem:[%s12039_s8 + $0x290] sm:$0xff]   ;;  %v9621_v40 = vrot.slane %v5917_v34, 9 }
  0xc0   : > { %10841 = vmatprep.subr.bf16.mxu0 %v11660_v32  ;;  %10458 = vmatpush3.bf16.msra.mxu1 %v11659_v13  ;;  %v1750_v13 = vrot.slane %v1748_v7, 4  ;;  %v12908_v61 = vld [vmem:[%s12039_s8 + $0x2ac] sm:$0xf]  ;;  %v11688_v7 = vld [vmem:[%s13959_s2 + $0x460] sm:$0xff]   ;;  %v5914_v0 = vld [vmem:[%s12039_s8 + $0x8] sm:$0xe] }
  0xc1   : > { %10459 = vmatprep.subr.bf16.mxu1 %v11661_v39  ;;  %v2558_v1 = vrot.slane %v12908_v61, 5  ;;  %v8801_v16 = vld [vmem:[%s12039_s8 + $0x2cc] sm:$0xf]  ;;  %v9620_v44 = vrot.slane %v5914_v0, 9  ;;  %v5918_v35 = vld [vmem:[%s12039_s8 + $0x28] sm:$0xf] }
  0xc2   : > { %v1752_v25 = vsel %vm12221_vm8, %v1750_v13, %v1751_v10  ;;  %v12919_v10 = vcombine.low %v12908_v61, %v8800_v6  ;;  %v12930_v13 = vld [vmem:[%s12039_s8 + $0x2c8] sm:$0xf]  ;;  %v5915_v27 = vld [vmem:[%s12039_s8 + $0xc] sm:$0xf]  ;;  %v6325_v51 = vrot.slane %v5918_v35, 5  ;;  %v11698_v41 = vld [vmem:[%s13959_s2 + $0x478] sm:$0xff]  }
  0xc3   : > { %10842 = vmatpush3.bf16.msra.mxu0 %v11660_v32  ;;  %10444 = vmatmul.mubr.bf16.gmra.mrb[8].mxu1 %v8929_v57  ;;  %v11666_v32 = vld [vmem:[%s13959_s2 + $0x430] sm:$0xff]   ;;  %v12844_v28 = vcombine.low %v1749_v12, %v1752_v25  ;;  %v11677_v57 = vld [vmem:[%s12039_s8 + $0x258] sm:$0xff]   ;;  %v12927_v12 = vld [vmem:[%s12039_s8 + $0x2c4] sm:$0xe]  ;;  %v12939_v19 = vrot.slane %v2558_v1, 4  ;;  %v2565_v23 = vrot.slane %v12930_v13, 5  ;;  %v12947_v24 = vcombine.low %v12930_v13, %v8801_v16 }
  0xc4   : > { %10843 = vmatprep.subr.bf16.mxu0 %v11662_v56  ;;  %10460 = vmatpush3.bf16.msra.mxu1 %v11661_v39  ;;  %v9578_v39 = vcombine.low %v5613_v26, %v5616_v33  ;;  %v9007_v21 = vrot.slane %v12927_v12, 9  ;;  %v11696_v25 = vld [vmem:[%s13959_s2 + $0x470] sm:$0xff]   ;;  %v11695_v26 = vld [vmem:[%s12039_s8 + $0xc4] sm:$0xff]   ;;  %v6321_v33 = vrot.slane %v5916_v29, 5  ;;  %v5923_v0 = vld [vmem:[%s12039_s8 + $0x5c] sm:$0xe] }
  0xc5   : > { %10461 = vmatprep.subr.bf16.mxu1 %v11663_v62  ;;  %10447 = vmatprep.mubr.bf16.mxu1 %v12844_v28  ;;  %v9623_v35 = vrot.slane %v5923_v0, 9  ;;  %v11709_v0 = vld [vmem:[%s13959_s2 + $0x1a8] sm:$0xff]  }
  0xc6   : > { %10828 = vmatmul.mubr.bf16.gmra.mrb[8].mxu0 %v9577_v9  ;;  %v11689_v9 = vld [vmem:[%s13959_s2 + $0x168] sm:$0xff]  }
  0xc7   : > { %10844 = vmatpush3.bf16.msra.mxu0 %v11662_v56  ;;  %10831 = vmatprep.mubr.bf16.mxu0 %v9578_v39  ;;  %v11678_v56 = vld [vmem:[%s13959_s2 + $0x150] sm:$0xff]   ;;  %v5919_v39 = vld [vmem:[%s12039_s8 + $0x2c] sm:$0x1] }
  0xc8   : > { %10845 = vmatprep.subr.bf16.mxu0 %v11664_v2  ;;  %10462 = vmatpush3.bf16.msra.mxu1 %v11663_v62  ;;  %v11679_v62 = vld [vmem:[%s12039_s8 + $0x54] sm:$0xff]   ;;  %v6328_v43 = vrot.slane %v5919_v39, 5 }
  0xc9   : > { %10463 = vmatprep.subr.bf16.mxu1 %v11665_v20  ;;  %v11704_v39 = vld [vmem:[%s13959_s2 + $0x490] sm:$0xff]  }
  0xcb   : > { %10846 = vmatpush3.bf16.msra.mxu0 %v11664_v2  ;;  %10448 = vmatmul.mubr.bf16.gmra.mrb[12].mxu1 %v12859_v42  ;;  %v11684_v2 = vld [vmem:[%s12039_s8 + $0x70] sm:$0xff]  }
  0xcc   : > { %10847 = vmatprep.subr.bf16.mxu0 %v11666_v32  ;;  %10464 = vmatpush3.bf16.msra.mxu1 %v11665_v20  ;;  %v11694_v20 = vld [vmem:[%s13959_s2 + $0x170] sm:$0xff]  }
  0xcd   : > { %10465 = vmatprep.subr.bf16.mxu1 %v11667_v31  ;;  %10467 = vmatprep.mubr.bf16.mxu1 %v12679_v18  ;;  %v11676_v18 = vld [vmem:[%s12039_s8 + $0x38] sm:$0xff]  }
  0xce   : > { %10832 = vmatmul.mubr.bf16.gmra.mrb[12].mxu0 %v9579_v52  ;;  %v8718_v52 = vld [vmem:[%s12039_s8 + $0x2dc] sm:$0xc] }
  0xcf   : > { %10848 = vmatpush3.bf16.msra.mxu0 %v11666_v32  ;;  %10851 = vmatprep.mubr.bf16.mxu0 %v11669_v48  ;;  %v2568_v32 = vrot.slane %v12933_v14, 5  ;;  %v6327_v48 = vrot.slane %v6325_v51, 4 }
  0xd0   : > { %10849 = vmatprep.subr.bf16.mxu0 %v11668_v47  ;;  %10466 = vmatpush3.bf16.msra.mxu1 %v11667_v31  ;;  %v6318_v31 = vrot.slane %v5915_v27, 5 }
  0xd1   : > { %10483 = vmatprep.subr.bf16.mxu1 %v11670_v50 }
  0xd2   : > { %v6319_v36 = vsel %vm12050_vm4, %v9620_v44, %v6318_v31  ;;  %v6320_v37 = vrot.slane %v6318_v31, 4  ;;  %v11703_v44 = vld [vmem:[%s13959_s2 + $0x190] sm:$0xff]   ;;  %v5924_v31 = vld [vmem:[%s12039_s8 + $0x60] sm:$0xf] }
  0xd3   : > { %10850 = vmatpush3.bf16.msra.mxu0 %v11668_v47  ;;  %10468 = vmatmul.mubr.bf16.vlgmr.msra.gmra.mrb[0].mxu1 %v12702_v5  ;;  %v11680_v5 = vld [vmem:[%s13959_s2 + $0x450] sm:$0xff]   ;;  %v11699_v47 = vld [vmem:[%s13959_s2 + $0x180] sm:$0xff]  }
  0xd4   : > { %10867 = vmatprep.subr.bf16.mxu0 %v11672_v53  ;;  %10484 = vmatpush3.bf16.msra.mxu1 %v11670_v50  ;;  %v6322_v46 = vsel %vm12050_vm4, %v6320_v37, %v6321_v33  ;;  %v11700_v50 = vld [vmem:[%s13959_s2 + $0x480] sm:$0xff]  }
  0xd5   : > { %10471 = vmatprep.mubr.bf16.mxu1 %v11675_v54  ;;  %10485 = vmatprep.subr.bf16.mxu1 %v11673_v17  ;;  %v9644_v49 = vcombine.low %v6319_v36, %v6322_v46  ;;  %v11701_v54 = vld [vmem:[%s13959_s2 + $0x188] sm:$0xff]   ;;  %v5925_v33 = vld [vmem:[%s12039_s8 + $0x64] sm:$0x1]  ;;  %v6339_v36 = vrot.slane %v5924_v31, 5  ;;  %v11705_v46 = vld [vmem:[%s13959_s2 + $0x198] sm:$0xff]  }
  0xd6   : > { %10852 = vmatmul.mubr.bf16.vlgmr.msra.gmra.mrb[0].mxu0 %v11671_v55  ;;  %v8720_v55 = vld [vmem:[%s12039_s8 + $0x2e4] sm:$0x3]  ;;  %v6342_v37 = vrot.slane %v5925_v33, 5 }
  0xd7   : > { %10868 = vmatpush3.bf16.msra.mxu0 %v11672_v53  ;;  %10855 = vmatprep.mubr.bf16.mxu0 %v11676_v18  ;;  %v6329_v53 = vsel %vm12050_vm4, %v6327_v48, %v6328_v43  ;;  %v8970_v18 = vrot.slane %v8718_v52, 10  ;;  %v6341_v43 = vrot.slane %v6339_v36, 4  ;;  %v8725_v48 = vld [vmem:[%s12039_s8 + $0x318] sm:$0xf] }
  0xd8   : > { %10869 = vmatprep.subr.bf16.mxu0 %v11674_v45  ;;  %10486 = vmatpush3.bf16.msra.mxu1 %v11673_v17  ;;  %v8719_v17 = vld [vmem:[%s12039_s8 + $0x2e0] sm:$0xf] }
  0xd9   : > { %10487 = vmatprep.subr.bf16.mxu1 %v11678_v56 }
  0xdb   : > { %10870 = vmatpush3.bf16.msra.mxu0 %v11674_v45  ;;  %10472 = vmatmul.mubr.bf16.gmra.mrb[4].mxu1 %v11677_v57  ;;  %v2260_v45 = vrot.slane %v8719_v17, 6  ;;  %v5920_v57 = vld [vmem:[%s12039_s8 + $0x40] sm:$0xe]  ;;  %v13032_v17 = vrot.slane %v2565_v23, 4 }
  0xdc   : > { %10871 = vmatprep.subr.bf16.mxu0 %v11680_v5  ;;  %10488 = vmatpush3.bf16.msra.mxu1 %v11678_v56  ;;  %v2263_v56 = vrot.slane %v8720_v55, 6 }
  0xdd   : > { %10489 = vmatprep.subr.bf16.mxu1 %v11681_v59  ;;  %10475 = vmatprep.mubr.bf16.mxu1 %v11683_v60  ;;  %v9622_v60 = vrot.slane %v5920_v57, 9  ;;  %v11706_v57 = vld [vmem:[%s13959_s2 + $0x498] sm:$0xff]   ;;  %v2569_v13 = vsel %vm12050_vm4, %v13032_v17, %v2568_v32  ;;  %v11716_v32 = vld [vmem:[%s13959_s2 + $0x4c0] sm:$0xff]  }
  0xde   : > { %10856 = vmatmul.mubr.bf16.gmra.mrb[4].mxu0 %v11679_v62 }
  0xdf   : > { %10872 = vmatpush3.bf16.msra.mxu0 %v11680_v5  ;;  %10859 = vmatprep.mubr.bf16.mxu0 %v11684_v2  ;;  %v5921_v5 = vld [vmem:[%s12039_s8 + $0x44] sm:$0xf]  ;;  %v8721_v2 = vld [vmem:[%s12039_s8 + $0x2f8] sm:$0xc] }
  0xe0   : > { %10873 = vmatprep.subr.bf16.mxu0 %v11682_v58  ;;  %10490 = vmatpush3.bf16.msra.mxu1 %v11681_v59  ;;  %v5922_v59 = vld [vmem:[%s12039_s8 + $0x48] sm:$0x1]  ;;  %v6332_v62 = vrot.slane %v5921_v5, 5 }
  0xe1   : > { %10491 = vmatprep.subr.bf16.mxu1 %v11686_v3  ;;  %v6335_v6 = vrot.slane %v5922_v59, 5 }
  0xe3   : > { %10874 = vmatpush3.bf16.msra.mxu0 %v11682_v58  ;;  %10476 = vmatmul.mubr.bf16.gmra.mrb[8].mxu1 %v11685_v4  ;;  %v2262_v4 = vrot.slane %v2260_v45, 4 }
  0xe4   : > { %10875 = vmatprep.subr.bf16.mxu0 %v11688_v7  ;;  %10492 = vmatpush3.bf16.msra.mxu1 %v11686_v3  ;;  %v2261_v3 = vsel %vm12221_vm8, %v8970_v18, %v2260_v45  ;;  %v5927_v18 = vld [vmem:[%s12039_s8 + $0x7c] sm:$0xf]  ;;  %v5928_v45 = vld [vmem:[%s12039_s8 + $0x80] sm:$0x1] }
  0xe5   : > { %10493 = vmatprep.subr.bf16.mxu1 %v11689_v9  ;;  %10479 = vmatprep.mubr.bf16.mxu1 %v12919_v10 }
  0xe6   : > { %10860 = vmatmul.mubr.bf16.gmra.mrb[8].mxu0 %v11687_v8  ;;  %v8723_v8 = vld [vmem:[%s12039_s8 + $0x300] sm:$0x3] }
  0xe7   : > { %10876 = vmatpush3.bf16.msra.mxu0 %v11688_v7  ;;  %10863 = vmatprep.mubr.bf16.mxu0 %v11692_v11  ;;  %v8722_v7 = vld [vmem:[%s12039_s8 + $0x2fc] sm:$0xf]  ;;  %v8971_v11 = vrot.slane %v8721_v2, 10  ;;  %v8727_v2 = vld [vmem:[%s12039_s8 + $0x330] sm:$0xc] }
  0xe8   : > { %10877 = vmatprep.subr.bf16.mxu0 %v11690_v38  ;;  %10494 = vmatpush3.bf16.msra.mxu1 %v11689_v9  ;;  %v6333_v9 = vsel %vm12050_vm4, %v9622_v60, %v6332_v62  ;;  %v2267_v16 = vrot.slane %v8722_v7, 6  ;;  %v6346_v60 = vrot.slane %v5927_v18, 5 }
  0xe9   : > { %10495 = vmatprep.subr.bf16.mxu1 %v11694_v20 }
  0xea   : > { %v2268_v29 = vsel %vm12221_vm8, %v8971_v11, %v2267_v16  ;;  %v11708_v11 = vld [vmem:[%s13959_s2 + $0x4a0] sm:$0xff]  }
  0xeb   : > { %10878 = vmatpush3.bf16.msra.mxu0 %v11690_v38  ;;  %10480 = vmatmul.mubr.bf16.gmra.mrb[12].mxu1 %v12947_v24  ;;  %v6334_v38 = vrot.slane %v6332_v62, 4  ;;  %v6349_v62 = vrot.slane %v5928_v45, 5 }
  0xec   : > { %10879 = vmatprep.subr.bf16.mxu0 %v11696_v25  ;;  %10496 = vmatpush3.bf16.msra.mxu1 %v11694_v20  ;;  %v11702_v20 = vld [vmem:[%s13959_s2 + $0x488] sm:$0xff]  }
  0xed   : > { %10497 = vmatprep.subr.bf16.mxu1 %v11697_v30  ;;  %10499 = vmatprep.mubr.bf16.mxu1 %v12844_v28  ;;  %v6326_v28 = vsel %vm12050_vm4, %v9621_v40, %v6325_v51  ;;  %v6336_v27 = vsel %vm12050_vm4, %v6334_v38, %v6335_v6  ;;  %v11707_v6 = vld [vmem:[%s13959_s2 + $0x1a0] sm:$0xff]  }
  0xee   : > { %10864 = vmatmul.mubr.bf16.gmra.mrb[12].mxu0 %v11695_v26  ;;  %v9645_v58 = vcombine.low %v6326_v28, %v6329_v53  ;;  %v2270_v26 = vrot.slane %v8723_v8, 6  ;;  %v9646_v34 = vcombine.low %v6333_v9, %v6336_v27  ;;  %v2274_v28 = vrot.slane %v8725_v48, 6  ;;  %v5932_v48 = vld [vmem:[%s12039_s8 + $0xb0] sm:$0xe] }
  0xef   : > { %10880 = vmatpush3.bf16.msra.mxu0 %v11696_v25  ;;  %10883 = vmatprep.mubr.bf16.mxu0 %v9644_v49  ;;  %v2264_v25 = vsel %vm12221_vm8, %v2262_v4, %v2263_v56  ;;  %v8726_v49 = vld [vmem:[%s12039_s8 + $0x31c] sm:$0x3]  ;;  %v8973_v4 = vrot.slane %v8727_v2, 10  ;;  %v6348_v9 = vrot.slane %v6346_v60, 4 }
  0xf0   : > { %10881 = vmatprep.subr.bf16.mxu0 %v11698_v41  ;;  %10498 = vmatpush3.bf16.msra.mxu1 %v11697_v30  ;;  %v2269_v30 = vrot.slane %v2267_v16, 4  ;;  %v2277_v53 = vrot.slane %v8726_v49, 6  ;;  %v2276_v59 = vrot.slane %v2274_v28, 4  ;;  %v11711_v49 = vld [vmem:[%s13959_s2 + $0x1b0] sm:$0xff]  }
  0xf1   : > { %10515 = vmatprep.subr.bf16.mxu1 %v11699_v47 }
  0xf2   : > { %v2271_v40 = vsel %vm12221_vm8, %v2269_v30, %v2270_v26  ;;  %v2278_v7 = vsel %vm12221_vm8, %v2276_v59, %v2277_v53  ;;  %v5930_v26 = vld [vmem:[%s12039_s8 + $0x98] sm:$0xf]  ;;  %v5931_v30 = vld [vmem:[%s12039_s8 + $0x9c] sm:$0x1] }
  0xf3   : > { %10882 = vmatpush3.bf16.msra.mxu0 %v11698_v41  ;;  %10500 = vmatmul.mubr.bf16.vlgmr.msra.gmra.mrb[0].mxu1 %v12859_v42  ;;  %v8992_v42 = vcombine.low %v2261_v3, %v2264_v25  ;;  %v8993_v51 = vcombine.low %v2268_v29, %v2271_v40  ;;  %v6340_v41 = vsel %vm12050_vm4, %v9623_v35, %v6339_v36  ;;  %v8729_v3 = vld [vmem:[%s12039_s8 + $0x338] sm:$0x3]  ;;  %v5929_v25 = vld [vmem:[%s12039_s8 + $0x94] sm:$0xe]  ;;  %v6353_v33 = vrot.slane %v5930_v26, 5  ;;  %v11710_v40 = vld [vmem:[%s13959_s2 + $0x4a8] sm:$0xff]  }
  0xf4   : > { %10899 = vmatprep.subr.bf16.mxu0 %v11700_v50  ;;  %10516 = vmatpush3.bf16.msra.mxu1 %v11699_v47  ;;  %v8724_v47 = vld [vmem:[%s12039_s8 + $0x314] sm:$0xc]  ;;  %v5934_v53 = vld [vmem:[%s12039_s8 + $0xb8] sm:$0x1]  ;;  %v5937_v26 = vld [vmem:[%s12039_s8 + $0xd4] sm:$0x1] }
  0xf5   : > { %10517 = vmatprep.subr.bf16.mxu1 %v11701_v54  ;;  %10503 = vmatprep.mubr.bf16.mxu1 %v8992_v42  ;;  %v8972_v52 = vrot.slane %v8724_v47, 10  ;;  %v6350_v42 = vsel %vm12050_vm4, %v6348_v9, %v6349_v62  ;;  %v6363_v59 = vrot.slane %v5934_v53, 5 }
  0xf6   : > { %10884 = vmatmul.mubr.bf16.vlgmr.msra.gmra.mrb[0].mxu0 %v9645_v58  ;;  %v8728_v58 = vld [vmem:[%s12039_s8 + $0x334] sm:$0xf] }
  0xf7   : > { %10900 = vmatpush3.bf16.msra.mxu0 %v11700_v50  ;;  %10887 = vmatprep.mubr.bf16.mxu0 %v9646_v34  ;;  %v6343_v50 = vsel %vm12050_vm4, %v6341_v43, %v6342_v37  ;;  %v2275_v5 = vsel %vm12221_vm8, %v8972_v52, %v2274_v28  ;;  %v2281_v38 = vrot.slane %v8728_v58, 6  ;;  %v6356_v34 = vrot.slane %v5931_v30, 5  ;;  %v8732_v43 = vld [vmem:[%s12039_s8 + $0x354] sm:$0x3] }
  0xf8   : > { %10901 = vmatprep.subr.bf16.mxu0 %v11702_v20  ;;  %10518 = vmatpush3.bf16.msra.mxu1 %v11701_v54  ;;  %v5926_v54 = vld [vmem:[%s12039_s8 + $0x78] sm:$0xe]  ;;  %v9647_v55 = vcombine.low %v6340_v41, %v6343_v50  ;;  %v8994_v16 = vcombine.low %v2275_v5, %v2278_v7  ;;  %v8731_v41 = vld [vmem:[%s12039_s8 + $0x350] sm:$0xf]  ;;  %v2291_v52 = vrot.slane %v8732_v43, 6  ;;  %v6370_v30 = vrot.slane %v5937_v26, 5 }
  0xf9   : > { %10519 = vmatprep.subr.bf16.mxu1 %v11703_v44  ;;  %v9624_v56 = vrot.slane %v5926_v54, 9  ;;  %v2282_v27 = vsel %vm12221_vm8, %v8973_v4, %v2281_v38  ;;  %v2283_v29 = vrot.slane %v2281_v38, 4  ;;  %v2288_v47 = vrot.slane %v8731_v41, 6  ;;  %v5933_v28 = vld [vmem:[%s12039_s8 + $0xb4] sm:$0xf] }
  0xfa   : > { %v9626_v54 = vrot.slane %v5932_v48, 9  ;;  %v8734_v5 = vld [vmem:[%s12039_s8 + $0x36c] sm:$0xf]  ;;  %v11712_v58 = vld [vmem:[%s13959_s2 + $0x4b0] sm:$0xff]  }
  0xfb   : > { %10902 = vmatpush3.bf16.msra.mxu0 %v11702_v20  ;;  %10504 = vmatmul.mubr.bf16.gmra.mrb[4].mxu1 %v8993_v51  ;;  %v6347_v8 = vsel %vm12050_vm4, %v9624_v56, %v6346_v60  ;;  %v2284_v20 = vrot.slane %v8729_v3, 6  ;;  %v8730_v51 = vld [vmem:[%s12039_s8 + $0x34c] sm:$0xc]  ;;  %v2290_v45 = vrot.slane %v2288_v47, 4  ;;  %v6360_v56 = vrot.slane %v5933_v28, 5 }
  0xfc   : > { %10903 = vmatprep.subr.bf16.mxu0 %v11704_v39  ;;  %10520 = vmatpush3.bf16.msra.mxu1 %v11703_v44  ;;  %v9625_v44 = vrot.slane %v5929_v25, 9  ;;  %v9648_v31 = vcombine.low %v6347_v8, %v6350_v42  ;;  %v8735_v60 = vld [vmem:[%s12039_s8 + $0x370] sm:$0x3]  ;;  %v2295_v2 = vrot.slane %v8734_v5, 6  ;;  %v5962_v43 = vld [vmem:[%s12039_s8 + $0x10] sm:$0xc] }
  0xfd   : > { %10521 = vmatprep.subr.bf16.mxu1 %v11705_v46  ;;  %10507 = vmatprep.mubr.bf16.mxu1 %v8994_v16  ;;  %v2285_v35 = vsel %vm12221_vm8, %v2283_v29, %v2284_v20  ;;  %v2292_v3 = vsel %vm12221_vm8, %v2290_v45, %v2291_v52  ;;  %v6361_v4 = vsel %vm12050_vm4, %v9626_v54, %v6360_v56  ;;  %v2298_v7 = vrot.slane %v8735_v60, 6  ;;  %v5936_v16 = vld [vmem:[%s12039_s8 + $0xd0] sm:$0xf]  ;;  %v11713_v20 = vld [vmem:[%s13959_s2 + $0x1b8] sm:$0xff]   ;;  %v11717_v5 = vld [vmem:[%s13959_s2 + $0x1c8] sm:$0xff]  }
  0xfe   : > { %10888 = vmatmul.mubr.bf16.gmra.mrb[4].mxu0 %v9647_v55  ;;  %v8995_v36 = vcombine.low %v2282_v27, %v2285_v35  ;;  %v6354_v37 = vsel %vm12050_vm4, %v9625_v44, %v6353_v33  ;;  %v2297_v38 = vrot.slane %v2295_v2, 4  ;;  %v11714_v44 = vld [vmem:[%s13959_s2 + $0x4b8] sm:$0xff]   ;;  %v11715_v35 = vld [vmem:[%s13959_s2 + $0x1c0] sm:$0xff]   ;;  %v5966_v28 = vld [vmem:[%s12039_s8 + $0x30] sm:$0xf] }
  0xff   : > { %10904 = vmatpush3.bf16.msra.mxu0 %v11704_v39  ;;  %10891 = vmatprep.mubr.bf16.mxu0 %v9648_v31  ;;  %v6355_v39 = vrot.slane %v6353_v33, 4  ;;  %v6647_v54 = vrot.slane %v5966_v28, 6  ;;  %v11718_v60 = vld [vmem:[%s13959_s2 + $0x4c8] sm:$0xff]  }
 0x100   : > { %10905 = vmatprep.subr.bf16.mxu0 %v11706_v57  ;;  %10522 = vmatpush3.bf16.msra.mxu1 %v11705_v46  ;;  %v8974_v46 = vrot.slane %v8730_v51, 10  ;;  %v2299_v29 = vsel %vm12221_vm8, %v2297_v38, %v2298_v7  ;;  %v5968_v7 = vld [vmem:[%s12039_s8 + $0x48] sm:$0xc] }
 0x101   : > { %10523 = vmatprep.subr.bf16.mxu1 %v11707_v6  ;;  %v6357_v50 = vsel %vm12050_vm4, %v6355_v39, %v6356_v34  ;;  %v2566_v39 = vsel %vm12050_vm4, %v9007_v21, %v2565_v23  ;;  %v5964_v21 = vld [vmem:[%s12039_s8 + $0x18] sm:$0x3]  ;;  %v9660_v23 = vrot.slane %v5962_v43, 10  ;;  %v5973_v43 = vld [vmem:[%s12039_s8 + $0x6c] sm:$0x3] }
 0x102   : > { %v9649_v55 = vcombine.low %v6354_v37, %v6357_v50  ;;  %v2289_v18 = vsel %vm12221_vm8, %v8974_v46, %v2288_v47  ;;  %v8762_v37 = vld [vmem:[%s12039_s8 + $0x2b0] sm:$0x1]  ;;  %v5963_v46 = vld [vmem:[%s12039_s8 + $0x14] sm:$0xf]  ;;  %v5965_v50 = vld [vmem:[%s12039_s8 + $0x2c] sm:$0xc] }
 0x103   : > { %10906 = vmatpush3.bf16.msra.mxu0 %v11706_v57  ;;  %10508 = vmatmul.mubr.bf16.gmra.mrb[8].mxu1 %v8995_v36  ;;  %v8733_v57 = vld [vmem:[%s12039_s8 + $0x368] sm:$0xc]  ;;  %v8996_v8 = vcombine.low %v2289_v18, %v2292_v3  ;;  %v2561_v41 = vrot.slane %v8762_v37, 5  ;;  %v6640_v47 = vrot.slane %v5963_v46, 6  ;;  %v9661_v53 = vrot.slane %v5965_v50, 10  ;;  %v11720_v46 = vld [vmem:[%s13959_s2 + $0x4d0] sm:$0xff]  }
 0x104   : > { %10907 = vmatprep.subr.bf16.mxu0 %v11708_v11  ;;  %10524 = vmatpush3.bf16.msra.mxu1 %v11707_v6  ;;  %v8975_v62 = vrot.slane %v8733_v57, 10  ;;  %v6362_v6 = vrot.slane %v6360_v56, 4  ;;  %v8760_v36 = vld [vmem:[%s12039_s8 + $0x2a8] sm:$0xe]  ;;  %v6649_v57 = vrot.slane %v6647_v54, 4 }
 0x105   : > { %10525 = vmatprep.subr.bf16.mxu1 %v11709_v0  ;;  %10511 = vmatprep.mubr.bf16.mxu1 %v8996_v8  ;;  %v9006_v51 = vrot.slane %v8760_v36, 9  ;;  %v2562_v14 = vsel %vm12050_vm4, %v12939_v19, %v2561_v41  ;;  %v6641_v52 = vsel %vm12221_vm8, %v9660_v23, %v6640_v47  ;;  %v6642_v61 = vrot.slane %v6640_v47, 4  ;;  %v5969_v8 = vld [vmem:[%s12039_s8 + $0x4c] sm:$0xf]  ;;  %v5971_v36 = vld [vmem:[%s12039_s8 + $0x64] sm:$0xc] }
 0x106   : > { %10892 = vmatmul.mubr.bf16.gmra.mrb[8].mxu0 %v9649_v55  ;;  %v2296_v9 = vsel %vm12221_vm8, %v8975_v62, %v2295_v2  ;;  %v6364_v25 = vsel %vm12050_vm4, %v6362_v6, %v6363_v59  ;;  %v9031_v19 = vcombine.low %v2566_v39, %v2569_v13  ;;  %v6648_v56 = vsel %vm12221_vm8, %v9661_v53, %v6647_v54  ;;  %v8766_v59 = vld [vmem:[%s12039_s8 + $0x2e0] sm:$0xe]  ;;  %v13159_v62 = vld [vmem:[%s12039_s8 + $0x2e4] sm:$0xf]  ;;  %v8768_v2 = vld [vmem:[%s12039_s8 + $0x2e8] sm:$0x1] }
 0x107   : > { %10908 = vmatpush3.bf16.msra.mxu0 %v11708_v11  ;;  %v5935_v11 = vld [vmem:[%s12039_s8 + $0xcc] sm:$0xe]  ;;  %v9650_v27 = vcombine.low %v6361_v4, %v6364_v25  ;;  %v8997_v31 = vcombine.low %v2296_v9, %v2299_v29  ;;  %v2559_v48 = vsel %vm12050_vm4, %v9006_v51, %v2558_v1  ;;  %v5967_v1 = vld [vmem:[%s12039_s8 + $0x34] sm:$0x3]  ;;  %v2572_v4 = vrot.slane %v13159_v62, 5  ;;  %v11721_v47 = vld [vmem:[%s13959_s2 + $0x1d8] sm:$0xff]  }
 0x108   : > { %10909 = vmatprep.subr.bf16.mxu0 %v11710_v40  ;;  %10526 = vmatpush3.bf16.msra.mxu1 %v11709_v0  ;;  %v9627_v42 = vrot.slane %v5935_v11, 9  ;;  %v6367_v0 = vrot.slane %v5936_v16, 5  ;;  %v9030_v17 = vcombine.low %v2559_v48, %v2562_v14  ;;  %v6650_v55 = vrot.slane %v5967_v1, 6  ;;  %v11719_v9 = vld [vmem:[%s13959_s2 + $0x1d0] sm:$0xff]   ;;  %v8769_v25 = vld [vmem:[%s12039_s8 + $0x2fc] sm:$0xe] }
 0x109   : > { %10527 = vmatprep.subr.bf16.mxu1 %v11711_v49  ;;  %10895 = vmatprep.mubr.bf16.mxu0 %v9650_v27  ;;  %v2575_v6 = vrot.slane %v8768_v2, 5  ;;  %v5970_v11 = vld [vmem:[%s12039_s8 + $0x50] sm:$0x3]  ;;  %v9662_v16 = vrot.slane %v5968_v7, 10  ;;  %v13175_v27 = vld [vmem:[%s12039_s8 + $0x300] sm:$0xf] }
 0x10a   : > { %v6368_v33 = vsel %vm12050_vm4, %v9627_v42, %v6367_v0  ;;  %v6369_v34 = vrot.slane %v6367_v0, 4  ;;  %v6651_v3 = vsel %vm12221_vm8, %v6649_v57, %v6650_v55  ;;  %v2574_v42 = vrot.slane %v2572_v4, 4  ;;  %v8771_v29 = vld [vmem:[%s12039_s8 + $0x304] sm:$0x1]  ;;  %v5972_v41 = vld [vmem:[%s12039_s8 + $0x68] sm:$0xf] }
 0x10b   : > { %10910 = vmatpush3.bf16.msra.mxu0 %v11710_v40  ;;  %10512 = vmatmul.mubr.bf16.gmra.mrb[12].mxu1 %v8997_v31  ;;  %v9685_v38 = vcombine.low %v6648_v56, %v6651_v3  ;;  %v6657_v0 = vrot.slane %v5970_v11, 6  ;;  %v9009_v31 = vrot.slane %v8769_v25, 9  ;;  %v6664_v23 = vrot.slane %v5973_v43, 6  ;;  %v5974_v54 = vld [vmem:[%s12039_s8 + $0x80] sm:$0xc] }
 0x10c   : > { %10911 = vmatprep.subr.bf16.mxu0 %v11712_v58  ;;  %10528 = vmatpush3.bf16.msra.mxu1 %v11711_v49  ;;  %v6371_v40 = vsel %vm12050_vm4, %v6369_v34, %v6370_v30  ;;  %v6643_v49 = vrot.slane %v5964_v21, 6  ;;  %v2576_v34 = vsel %vm12050_vm4, %v2574_v42, %v2575_v6  ;;  %v6661_v21 = vrot.slane %v5972_v41, 6  ;;  %v11723_v57 = vld [vmem:[%s13959_s2 + $0x1e0] sm:$0xff]   ;;  %v8777_v6 = vld [vmem:[%s12039_s8 + $0x33c] sm:$0x1] }
 0x10d   : > { %10529 = vmatprep.subr.bf16.mxu1 %v11713_v20  ;;  %v9651_v12 = vcombine.low %v6368_v33, %v6371_v40  ;;  %10531 = vmatprep.mubr.bf16.mxu1 %v9030_v17  ;;  %v2579_v33 = vrot.slane %v13175_v27, 5  ;;  %v8772_v17 = vld [vmem:[%s12039_s8 + $0x318] sm:$0xe]  ;;  %v9664_v56 = vrot.slane %v5974_v54, 10  ;;  %v11724_v3 = vld [vmem:[%s13959_s2 + $0x4e0] sm:$0xff]   ;;  %v2596_v25 = vrot.slane %v8777_v6, 5 }
 0x10e   : > { %v6644_v18 = vsel %vm12221_vm8, %v6642_v61, %v6643_v49  ;;  %v6663_v50 = vrot.slane %v6661_v21, 4  ;;  %v8774_v61 = vld [vmem:[%s12039_s8 + $0x320] sm:$0x1]  ;;  %v9010_v1 = vrot.slane %v8772_v17, 9  ;;  %v8778_v41 = vld [vmem:[%s12039_s8 + $0x350] sm:$0xe] }
 0x10f   : > { %10912 = vmatpush3.bf16.msra.mxu0 %v11712_v58  ;;  %v9684_v45 = vcombine.low %v6641_v52, %v6644_v18  ;;  %v9008_v58 = vrot.slane %v8766_v59, 9  ;;  %v2580_v40 = vsel %vm12050_vm4, %v9009_v31, %v2579_v33  ;;  %v2581_v51 = vrot.slane %v2579_v33, 4  ;;  %v13205_v52 = vld [vmem:[%s12039_s8 + $0x31c] sm:$0xf]  ;;  %v5975_v18 = vld [vmem:[%s12039_s8 + $0x84] sm:$0xf] }
 0x110   : > { %10913 = vmatprep.subr.bf16.mxu0 %v11714_v44  ;;  %10896 = vmatmul.mubr.bf16.gmra.mrb[12].mxu0 %v9651_v12  ;;  %v9663_v12 = vrot.slane %v5971_v36, 10  ;;  %v6665_v28 = vsel %vm12221_vm8, %v6663_v50, %v6664_v23  ;;  %v2586_v53 = vrot.slane %v13205_v52, 5  ;;  %v5978_v42 = vld [vmem:[%s12039_s8 + $0xa0] sm:$0xf]  ;;  %v5979_v31 = vld [vmem:[%s12039_s8 + $0xa4] sm:$0x3] }
 0x111   : > { %10530 = vmatpush3.bf16.msra.mxu1 %v11713_v20  ;;  %10915 = vmatprep.mubr.bf16.mxu0 %v9684_v45  ;;  %v6654_v20 = vrot.slane %v5969_v8, 6  ;;  %v2573_v26 = vsel %vm12050_vm4, %v9008_v58, %v2572_v4  ;;  %v5976_v45 = vld [vmem:[%s12039_s8 + $0x88] sm:$0x3]  ;;  %v8775_v58 = vld [vmem:[%s12039_s8 + $0x334] sm:$0xe]  ;;  %v6678_v36 = vrot.slane %v5979_v31, 6 }
 0x112   : > { %10547 = vmatprep.subr.bf16.mxu1 %v11715_v35  ;;  %v9032_v37 = vcombine.low %v2573_v26, %v2576_v34  ;;  %v6662_v49 = vsel %vm12221_vm8, %v9663_v12, %v6661_v21  ;;  %v2588_v59 = vrot.slane %v2586_v53, 4  ;;  %v6671_v2 = vrot.slane %v5976_v45, 6  ;;  %v13224_v4 = vld [vmem:[%s12039_s8 + $0x338] sm:$0xf]  ;;  %v11725_v8 = vld [vmem:[%s13959_s2 + $0x1e8] sm:$0xff]   ;;  %v11734_v31 = vld [vmem:[%s13959_s2 + $0x500] sm:$0xff]  }
 0x113   : > { %10914 = vmatpush3.bf16.msra.mxu0 %v11714_v44  ;;  %v6655_v30 = vsel %vm12221_vm8, %v9662_v16, %v6654_v20  ;;  %v6656_v44 = vrot.slane %v6654_v20, 4  ;;  %v9687_v55 = vcombine.low %v6662_v49, %v6665_v28  ;;  %v9011_v7 = vrot.slane %v8775_v58, 9  ;;  %v5977_v26 = vld [vmem:[%s12039_s8 + $0x9c] sm:$0xc]  ;;  %v13251_v43 = vld [vmem:[%s12039_s8 + $0x354] sm:$0xf] }
 0x114   : > { %10931 = vmatprep.subr.bf16.mxu0 %v11716_v32  ;;  %10532 = vmatmul.mubr.bf16.vlgmr.msra.gmra.mrb[0].mxu1 %v9031_v19  ;;  %v2589_v19 = vrot.slane %v8774_v61, 5  ;;  %v2593_v16 = vrot.slane %v13224_v4, 5  ;;  %v9665_v33 = vrot.slane %v5977_v26, 10  ;;  %v9012_v12 = vrot.slane %v8778_v41, 9  ;;  %v5980_v23 = vld [vmem:[%s12039_s8 + $0xb8] sm:$0xc] }
 0x115   : > { %10548 = vmatpush3.bf16.msra.mxu1 %v11715_v35  ;;  %v2582_v35 = vrot.slane %v8771_v29, 5  ;;  %v6658_v39 = vsel %vm12221_vm8, %v6656_v44, %v6657_v0  ;;  %10535 = vmatprep.mubr.bf16.mxu1 %v9032_v37  ;;  %v11726_v0 = vld [vmem:[%s13959_s2 + $0x4e8] sm:$0xff]   ;;  %v2600_v21 = vrot.slane %v13251_v43, 5  ;;  %v5981_v49 = vld [vmem:[%s12039_s8 + $0xbc] sm:$0xf] }
 0x116   : > { %10549 = vmatprep.subr.bf16.mxu1 %v11717_v5  ;;  %v9686_v13 = vcombine.low %v6655_v30, %v6658_v39  ;;  %v2594_v30 = vsel %vm12050_vm4, %v9011_v7, %v2593_v16  ;;  %v2595_v44 = vrot.slane %v2593_v16, 4  ;;  %v5982_v50 = vld [vmem:[%s12039_s8 + $0xc0] sm:$0x3]  ;;  %v5983_v6 = vld [vmem:[%s12039_s8 + $0xd4] sm:$0xc] }
 0x117   : > { %v2583_v48 = vsel %vm12050_vm4, %v2581_v51, %v2582_v35  ;;  %v6675_v35 = vrot.slane %v5978_v42, 6  ;;  %v2601_v61 = vsel %vm12050_vm4, %v9012_v12, %v2600_v21  ;;  %v2602_v28 = vrot.slane %v2600_v21, 4  ;;  %v5984_v7 = vld [vmem:[%s12039_s8 + $0xd8] sm:$0xf]  ;;  %v8804_v41 = vld [vmem:[%s12039_s8 + $0x320] sm:$0xf] }
 0x118   : > { %10916 = vmatmul.mubr.bf16.vlgmr.msra.gmra.mrb[0].mxu0 %v9685_v38  ;;  %v9033_v14 = vcombine.low %v2580_v40, %v2583_v48  ;;  %v2597_v37 = vsel %vm12050_vm4, %v2595_v44, %v2596_v25  ;;  %v6685_v54 = vrot.slane %v5982_v50, 6  ;;  %v6689_v16 = vrot.slane %v5984_v7, 6  ;;  %v11732_v44 = vld [vmem:[%s13959_s2 + $0x200] sm:$0xff]   ;;  %v11741_v21 = vld [vmem:[%s12039_s8 + $0x24c] sm:$0xff]  }
 0x119   : > { %10932 = vmatpush3.bf16.msra.mxu0 %v11716_v32  ;;  %10550 = vmatpush3.bf16.msra.mxu1 %v11717_v5  ;;  %v11722_v32 = vld [vmem:[%s13959_s2 + $0x4d8] sm:$0xff]   ;;  %v2587_v5 = vsel %vm12050_vm4, %v9010_v1, %v2586_v53  ;;  %v9035_v39 = vcombine.low %v2594_v30, %v2597_v37  ;;  %v6676_v40 = vsel %vm12221_vm8, %v9665_v33, %v6675_v35  ;;  %v6677_v51 = vrot.slane %v6675_v35, 4  ;;  %v8781_v53 = vld [vmem:[%s12039_s8 + $0x36c] sm:$0xe]  ;;  %v8802_v35 = vld [vmem:[%s12039_s8 + $0x2e8] sm:$0xf] }
 0x11a   : > { %10933 = vmatprep.subr.bf16.mxu0 %v11718_v60  ;;  %10551 = vmatprep.subr.bf16.mxu1 %v11719_v9  ;;  %v6682_v1 = vrot.slane %v5981_v49, 6  ;;  %v11731_v30 = vld [vmem:[%s12039_s8 + $0x1f8] sm:$0xff]   ;;  %v9062_v37 = vcombine.low %v13159_v62, %v8802_v35  ;;  %v11740_v62 = vld [vmem:[%s13959_s2 + $0x210] sm:$0xff]   ;;  %v9064_v12 = vcombine.low %v13205_v52, %v8804_v41  ;;  %v11748_v52 = vld [vmem:[%s13959_s2 + $0x220] sm:$0xff]  }
 0x11b   : > { %10919 = vmatprep.mubr.bf16.mxu0 %v9686_v13  ;;  %v8780_v13 = vld [vmem:[%s12039_s8 + $0x358] sm:$0x1]  ;;  %v6679_v48 = vsel %vm12221_vm8, %v6677_v51, %v6678_v36  ;;  %v8803_v51 = vld [vmem:[%s12039_s8 + $0x304] sm:$0xf] }
 0x11c   : > { %10536 = vmatmul.mubr.bf16.gmra.mrb[4].mxu1 %v9033_v14  ;;  %v2603_v14 = vrot.slane %v8780_v13, 5  ;;  %v9689_v17 = vcombine.low %v6676_v40, %v6679_v48  ;;  %v11733_v36 = vld [vmem:[%s12039_s8 + $0x214] sm:$0xff]   ;;  %v11736_v40 = vld [vmem:[%s13959_s2 + $0x508] sm:$0xff]   ;;  %v11750_v49 = vld [vmem:[%s13959_s2 + $0x520] sm:$0xff]  }
 0x11d   : > { %10934 = vmatpush3.bf16.msra.mxu0 %v11718_v60  ;;  %10552 = vmatpush3.bf16.msra.mxu1 %v11719_v9  ;;  %v6668_v60 = vrot.slane %v5975_v18, 6  ;;  %v2590_v9 = vsel %vm12050_vm4, %v2588_v59, %v2589_v19  ;;  %v13270_v19 = vld [vmem:[%s12039_s8 + $0x370] sm:$0xf]  ;;  %v9013_v18 = vrot.slane %v8781_v53, 9  ;;  %v6684_v59 = vrot.slane %v6682_v1, 4  ;;  %v11743_v13 = vld [vmem:[%s13959_s2 + $0x218] sm:$0xff]  }
 0x11e   : > { %10935 = vmatprep.subr.bf16.mxu0 %v11720_v46  ;;  %10553 = vmatprep.subr.bf16.mxu1 %v11721_v47  ;;  %v9034_v20 = vcombine.low %v2587_v5, %v2590_v9  ;;  %v2607_v45 = vrot.slane %v13270_v19, 5  ;;  %v8806_v48 = vld [vmem:[%s12039_s8 + $0x358] sm:$0xf]  ;;  %v11749_v50 = vld [vmem:[%s12039_s8 + $0x284] sm:$0xff]   ;;  %v9077_v53 = vld [vmem:[%s12039_s8 + $0xac] sm:$0xf] }
 0x11f   : > { %v6669_v38 = vsel %vm12221_vm8, %v9664_v56, %v6668_v60  ;;  %v6670_v11 = vrot.slane %v6668_v60, 4  ;;  %v11729_v56 = vld [vmem:[%s13959_s2 + $0x1f8] sm:$0xff]   ;;  %v6686_v9 = vsel %vm12221_vm8, %v6684_v59, %v6685_v54  ;;  %v9078_v54 = vld [vmem:[%s12039_s8 + $0xb0] sm:$0x7] }
 0x120   : > { %10920 = vmatmul.mubr.bf16.gmra.mrb[4].mxu0 %v9687_v55  ;;  %10539 = vmatprep.mubr.bf16.mxu1 %v9034_v20  ;;  %v8783_v55 = vld [vmem:[%s12039_s8 + $0x374] sm:$0x1]  ;;  %v2608_v58 = vsel %vm12050_vm4, %v9013_v18, %v2607_v45  ;;  %v3316_v18 = vrot.slane %v9077_v53, 7  ;;  %v11763_v53 = vld [vmem:[%s13959_s2 + $0x248] sm:$0xff]  }
 0x121   : > { %10936 = vmatpush3.bf16.msra.mxu0 %v11720_v46  ;;  %10554 = vmatpush3.bf16.msra.mxu1 %v11721_v47  ;;  %v6672_v29 = vsel %vm12221_vm8, %v6670_v11, %v6671_v2  ;;  %v11727_v46 = vld [vmem:[%s13959_s2 + $0x1f0] sm:$0xff]   ;;  %v2610_v60 = vrot.slane %v8783_v55, 5  ;;  %v9667_v11 = vrot.slane %v5983_v6, 10 }
 0x122   : > { %10937 = vmatprep.subr.bf16.mxu0 %v11722_v32  ;;  %10555 = vmatprep.subr.bf16.mxu1 %v11723_v57  ;;  %v9688_v34 = vcombine.low %v6669_v38, %v6672_v29  ;;  %v11728_v47 = vld [vmem:[%s13959_s2 + $0x4f0] sm:$0xff]   ;;  %v5985_v38 = vld [vmem:[%s12039_s8 + $0xdc] sm:$0x3]  ;;  %v6691_v29 = vrot.slane %v6689_v16, 4 }
 0x123   : > { %v6692_v26 = vrot.slane %v5985_v38, 6  ;;  %v11756_v59 = vld [vmem:[%s13959_s2 + $0x230] sm:$0xff]  }
 0x124   : > { %10923 = vmatprep.mubr.bf16.mxu0 %v9688_v34  ;;  %10540 = vmatmul.mubr.bf16.gmra.mrb[8].mxu1 %v9035_v39  ;;  %v11735_v39 = vld [vmem:[%s13959_s2 + $0x208] sm:$0xff]   ;;  %v11758_v6 = vld [vmem:[%s13959_s2 + $0x530] sm:$0xff]  }
 0x125   : > { %10938 = vmatpush3.bf16.msra.mxu0 %v11722_v32  ;;  %10556 = vmatpush3.bf16.msra.mxu1 %v11723_v57  ;;  %v9666_v32 = vrot.slane %v5980_v23, 10  ;;  %v2604_v57 = vsel %vm12050_vm4, %v2602_v28, %v2603_v14  ;;  %v6693_v33 = vsel %vm12221_vm8, %v6691_v29, %v6692_v26  ;;  %v11746_v23 = vld [vmem:[%s12039_s8 + $0x268] sm:$0xff]   ;;  %v8807_v28 = vld [vmem:[%s12039_s8 + $0x374] sm:$0xf]  ;;  %v11757_v26 = vld [vmem:[%s12039_s8 + $0x2bc] sm:$0xff]  }
 0x126   : > { %10939 = vmatprep.subr.bf16.mxu0 %v11724_v3  ;;  %10557 = vmatprep.subr.bf16.mxu1 %v11725_v8  ;;  %v9036_v2 = vcombine.low %v2601_v61, %v2604_v57  ;;  %v11754_v61 = vld [vmem:[%s12039_s8 + $0x2a0] sm:$0xff]   ;;  %v5988_v57 = vld [vmem:[%s12039_s8 + $0x210] sm:$0x3] }
 0x127   : > { %v6683_v5 = vsel %vm12221_vm8, %v9666_v32, %v6682_v1  ;;  %v11751_v32 = vld [vmem:[%s13959_s2 + $0x228] sm:$0xff]  }
 0x128   : > { %10924 = vmatmul.mubr.bf16.gmra.mrb[8].mxu0 %v9689_v17  ;;  %10543 = vmatprep.mubr.bf16.mxu1 %v9036_v2  ;;  %v9690_v20 = vcombine.low %v6683_v5, %v6686_v9  ;;  %v9066_v17 = vcombine.low %v13251_v43, %v8806_v48  ;;  %v9076_v1 = vld [vmem:[%s12039_s8 + $0xa8] sm:$0x8]  ;;  %v3319_v43 = vrot.slane %v9078_v54, 7  ;;  %v9081_v9 = vld [vmem:[%s12039_s8 + $0xcc] sm:$0x7] }
 0x129   : > { %10940 = vmatpush3.bf16.msra.mxu0 %v11724_v3  ;;  %10558 = vmatpush3.bf16.msra.mxu1 %v11725_v8  ;;  %v2609_v3 = vrot.slane %v2607_v45, 4  ;;  %v11730_v8 = vld [vmem:[%s13959_s2 + $0x4f8] sm:$0xff]   ;;  %v9268_v55 = vrot.slane %v9076_v1, 11  ;;  %v5986_v45 = vld [vmem:[%s12039_s8 + $0x208] sm:$0xc]  ;;  %v3326_v29 = vrot.slane %v9081_v9, 7 }
 0x12a   : > { %10941 = vmatprep.subr.bf16.mxu0 %v11726_v0  ;;  %10559 = vmatprep.subr.bf16.mxu1 %v11727_v46  ;;  %v9732_v5 = vrot.slane %v5986_v45, 10  ;;  %v9086_v1 = vld [vmem:[%s12039_s8 + $0x100] sm:$0xf] }
 0x12b   : > { %v2611_v25 = vsel %vm12050_vm4, %v2609_v3, %v2610_v60  ;;  %10927 = vmatprep.mubr.bf16.mxu0 %v9690_v20  ;;  %v3318_v60 = vrot.slane %v3316_v18, 4  ;;  %v9079_v3 = vld [vmem:[%s12039_s8 + $0xc4] sm:$0x8]  ;;  %v3317_v7 = vsel %vm12059_vm5, %v9268_v55, %v3316_v18  ;;  %v9087_v55 = vld [vmem:[%s12039_s8 + $0x104] sm:$0x7]  ;;  %v3337_v45 = vrot.slane %v9086_v1, 7 }
 0x12c   : > { %v9037_v42 = vcombine.low %v2608_v58, %v2611_v25  ;;  %v7223_v58 = vrot.slane %v5988_v57, 6  ;;  %v9269_v38 = vrot.slane %v9079_v3, 11  ;;  %v5996_v3 = vld [vmem:[%s12039_s8 + $0x260] sm:$0xf] }
 0x12d   : > { %10942 = vmatpush3.bf16.msra.mxu0 %v11726_v0  ;;  %10560 = vmatpush3.bf16.msra.mxu1 %v11727_v46  ;;  %v6690_v0 = vsel %vm12221_vm8, %v9667_v11, %v6689_v16  ;;  %v9063_v46 = vcombine.low %v13175_v27, %v8803_v51  ;;  %v11744_v27 = vld [vmem:[%s13959_s2 + $0x518] sm:$0xff]   ;;  %v9067_v11 = vcombine.low %v13270_v19, %v8807_v28 }
 0x12e   : > { %10943 = vmatprep.subr.bf16.mxu0 %v11728_v47  ;;  %10561 = vmatprep.subr.bf16.mxu1 %v11729_v56  ;;  %v9691_v34 = vcombine.low %v6690_v0, %v6693_v33  ;;  %v3320_v16 = vsel %vm12059_vm5, %v3318_v60, %v3319_v43  ;;  %v9085_v28 = vld [vmem:[%s12039_s8 + $0xfc] sm:$0x8] }
 0x12f   : > { %10544 = vmatmul.mubr.bf16.gmra.mrb[12].mxu1 %v9037_v42  ;;  %v11759_v42 = vld [vmem:[%s13959_s2 + $0x238] sm:$0xff]   ;;  %v9292_v19 = vcombine.low %v3317_v7, %v3320_v16  ;;  %v9271_v18 = vrot.slane %v9085_v28, 11 }
 0x130   : > { %10563 = vmatprep.mubr.bf16.mxu1 %v12919_v10  ;;  %10928 = vmatmul.mubr.bf16.gmra.mrb[12].mxu0 %v9691_v34  ;;  %v11738_v10 = vld [vmem:[%s12039_s8 + $0x230] sm:$0xff]   ;;  %v5991_v34 = vld [vmem:[%s12039_s8 + $0x22c] sm:$0x3] }
 0x131   : > { %10944 = vmatpush3.bf16.msra.mxu0 %v11728_v47  ;;  %10562 = vmatpush3.bf16.msra.mxu1 %v11729_v56  ;;  %v8805_v47 = vld [vmem:[%s12039_s8 + $0x33c] sm:$0xf]  ;;  %v5987_v56 = vld [vmem:[%s12039_s8 + $0x20c] sm:$0xf]  ;;  %v3338_v7 = vsel %vm12059_vm5, %v9271_v18, %v3337_v45 }
 0x132   : > { %10945 = vmatprep.subr.bf16.mxu0 %v11730_v8  ;;  %10579 = vmatprep.subr.bf16.mxu1 %v11732_v44  ;;  %v9065_v14 = vcombine.low %v13224_v4, %v8805_v47  ;;  %v11752_v4 = vld [vmem:[%s13959_s2 + $0x528] sm:$0xff]   ;;  %v7220_v2 = vrot.slane %v5987_v56, 6 }
 0x133   : > { %10947 = vmatprep.mubr.bf16.mxu0 %v11731_v30  ;;  %v5989_v30 = vld [vmem:[%s12039_s8 + $0x224] sm:$0xc] }
 0x134   : > { %v7222_v20 = vrot.slane %v7220_v2, 4  ;;  %v7221_v0 = vsel %vm12221_vm8, %v9732_v5, %v7220_v2  ;;  %v9733_v35 = vrot.slane %v5989_v30, 10  ;;  %v3340_v5 = vrot.slane %v9087_v55, 7  ;;  %v9088_v30 = vld [vmem:[%s12039_s8 + $0x118] sm:$0x8] }
 0x135   : > { %10946 = vmatpush3.bf16.msra.mxu0 %v11730_v8  ;;  %v9080_v8 = vld [vmem:[%s12039_s8 + $0xc8] sm:$0xf]  ;;  %v3339_v2 = vrot.slane %v3337_v45, 4 }
 0x136   : > { %10963 = vmatprep.subr.bf16.mxu0 %v11734_v31  ;;  %v3323_v25 = vrot.slane %v9080_v8, 7  ;;  %v5997_v8 = vld [vmem:[%s12039_s8 + $0x264] sm:$0x3] }
 0x137   : > { %10564 = vmatmul.mubr.bf16.vlgmr.msra.gmra.mrb[0].mxu1 %v12947_v24  ;;  %v11742_v24 = vld [vmem:[%s13959_s2 + $0x510] sm:$0xff]  }
 0x138   : > { %10580 = vmatpush3.bf16.msra.mxu1 %v11732_v44  ;;  %10567 = vmatprep.mubr.bf16.mxu1 %v9062_v37  ;;  %v5990_v44 = vld [vmem:[%s12039_s8 + $0x228] sm:$0xf]  ;;  %v3325_v33 = vrot.slane %v3323_v25, 4 }
 0x139   : > { %10581 = vmatprep.subr.bf16.mxu1 %v11735_v39  ;;  %10948 = vmatmul.mubr.bf16.vlgmr.msra.gmra.mrb[0].mxu0 %v11733_v36  ;;  %v11760_v36 = vld [vmem:[%s13959_s2 + $0x538] sm:$0xff]   ;;  %v7227_v37 = vrot.slane %v5990_v44, 6 }
 0x13a   : > { %10964 = vmatpush3.bf16.msra.mxu0 %v11734_v31  ;;  %10951 = vmatprep.mubr.bf16.mxu0 %v11738_v10  ;;  %v7224_v31 = vsel %vm12221_vm8, %v7222_v20, %v7223_v58  ;;  %v3324_v10 = vsel %vm12059_vm5, %v9269_v38, %v3323_v25  ;;  %v3327_v51 = vsel %vm12059_vm5, %v3325_v33, %v3326_v29  ;;  %v5995_v58 = vld [vmem:[%s12039_s8 + $0x25c] sm:$0xc]  ;;  %v7241_v38 = vrot.slane %v5996_v3, 6  ;;  %v11766_v29 = vld [vmem:[%s13959_s2 + $0x550] sm:$0xff]   ;;  %v9090_v33 = vld [vmem:[%s12039_s8 + $0x120] sm:$0x7] }
 0x13b   : > { %10965 = vmatprep.subr.bf16.mxu0 %v11736_v40  ;;  %v7229_v41 = vrot.slane %v7227_v37, 4  ;;  %v7228_v47 = vsel %vm12221_vm8, %v9733_v35, %v7227_v37  ;;  %v9735_v9 = vrot.slane %v5995_v58, 10  ;;  %v3341_v20 = vsel %vm12059_vm5, %v3339_v2, %v3340_v5  ;;  %v9089_v44 = vld [vmem:[%s12039_s8 + $0x11c] sm:$0xf]  ;;  %v11771_v2 = vld [vmem:[%s13959_s2 + $0x268] sm:$0xff]  }
 0x13c   : > { %10582 = vmatpush3.bf16.msra.mxu1 %v11735_v39  ;;  %v7230_v39 = vrot.slane %v5991_v34, 6  ;;  %v7244_v25 = vrot.slane %v5997_v8, 6  ;;  %v9272_v34 = vrot.slane %v9088_v30, 11  ;;  %v3344_v35 = vrot.slane %v9089_v44, 7  ;;  %v9094_v58 = vld [vmem:[%s12039_s8 + $0x150] sm:$0x8] }
 0x13d   : > { %10583 = vmatprep.subr.bf16.mxu1 %v11740_v62  ;;  %v3347_v37 = vrot.slane %v9090_v33, 7  ;;  %v9095_v3 = vld [vmem:[%s12039_s8 + $0x154] sm:$0xf]  ;;  %v9097_v44 = vld [vmem:[%s12039_s8 + $0x16c] sm:$0x8] }
 0x13e   : > { %10966 = vmatpush3.bf16.msra.mxu0 %v11736_v40  ;;  %v9756_v40 = vcombine.low %v7221_v0, %v7224_v31  ;;  %v9295_v0 = vcombine.low %v3338_v7, %v3341_v20  ;;  %v9274_v7 = vrot.slane %v9094_v58, 11  ;;  %v3358_v8 = vrot.slane %v9095_v3, 7  ;;  %v6005_v20 = vld [vmem:[%s12039_s8 + $0x2b4] sm:$0xf] }
 0x13f   : > { %10568 = vmatmul.mubr.bf16.gmra.mrb[4].mxu1 %v9063_v46  ;;  %10967 = vmatprep.subr.bf16.mxu0 %v11742_v24  ;;  %v9082_v46 = vld [vmem:[%s12039_s8 + $0xe0] sm:$0x8]  ;;  %v7262_v30 = vrot.slane %v6005_v20, 6  ;;  %v9099_v33 = vld [vmem:[%s12039_s8 + $0x174] sm:$0x7]  ;;  %v11781_v20 = vld [vmem:[%s13959_s2 + $0x288] sm:$0xff]  }
 0x140   : > { %10584 = vmatpush3.bf16.msra.mxu1 %v11740_v62  ;;  %10571 = vmatprep.mubr.bf16.mxu1 %v9064_v12  ;;  %v11761_v62 = vld [vmem:[%s13959_s2 + $0x240] sm:$0xff]   ;;  %v9270_v12 = vrot.slane %v9082_v46, 11 }
 0x141   : > { %10585 = vmatprep.subr.bf16.mxu1 %v11743_v13  ;;  %10952 = vmatmul.mubr.bf16.gmra.mrb[4].mxu0 %v11741_v21 }
 0x142   : > { %10968 = vmatpush3.bf16.msra.mxu0 %v11742_v24  ;;  %10955 = vmatprep.mubr.bf16.mxu0 %v11746_v23  ;;  %v9083_v24 = vld [vmem:[%s12039_s8 + $0xe4] sm:$0xf]  ;;  %v9293_v23 = vcombine.low %v3324_v10, %v3327_v51  ;;  %v11767_v51 = vld [vmem:[%s13959_s2 + $0x258] sm:$0xff]  }
 0x143   : > { %10969 = vmatprep.subr.bf16.mxu0 %v11744_v27  ;;  %v3330_v21 = vrot.slane %v9083_v24, 7 }
 0x144   : > { %10586 = vmatpush3.bf16.msra.mxu1 %v11743_v13  ;;  %v9084_v13 = vld [vmem:[%s12039_s8 + $0xe8] sm:$0x7] }
 0x145   : > { %10587 = vmatprep.subr.bf16.mxu1 %v11748_v52  ;;  %v3333_v48 = vrot.slane %v9084_v13, 7  ;;  %v9091_v13 = vld [vmem:[%s12039_s8 + $0x134] sm:$0x8] }
 0x146   : > { %10970 = vmatpush3.bf16.msra.mxu0 %v11744_v27  ;;  %v5992_v27 = vld [vmem:[%s12039_s8 + $0x240] sm:$0xc] }
 0x147   : > { %10572 = vmatmul.mubr.bf16.gmra.mrb[8].mxu1 %v9065_v14  ;;  %10971 = vmatprep.subr.bf16.mxu0 %v11750_v49  ;;  %v5993_v14 = vld [vmem:[%s12039_s8 + $0x244] sm:$0xf] }
 0x148   : > { %10588 = vmatpush3.bf16.msra.mxu1 %v11748_v52  ;;  %10575 = vmatprep.mubr.bf16.mxu1 %v9066_v17  ;;  %v11762_v52 = vld [vmem:[%s13959_s2 + $0x540] sm:$0xff]   ;;  %v3331_v17 = vsel %vm12059_vm5, %v9270_v12, %v3330_v21 }
 0x149   : > { %10589 = vmatprep.subr.bf16.mxu1 %v11751_v32  ;;  %10956 = vmatmul.mubr.bf16.gmra.mrb[8].mxu0 %v11749_v50  ;;  %v9734_v50 = vrot.slane %v5992_v27, 10  ;;  %v9092_v27 = vld [vmem:[%s12039_s8 + $0x138] sm:$0xf] }
 0x14a   : > { %10972 = vmatpush3.bf16.msra.mxu0 %v11750_v49  ;;  %10959 = vmatprep.mubr.bf16.mxu0 %v11754_v61  ;;  %v5994_v49 = vld [vmem:[%s12039_s8 + $0x248] sm:$0x3]  ;;  %v3332_v61 = vrot.slane %v3330_v21, 4  ;;  %v11768_v21 = vld [vmem:[%s13959_s2 + $0x558] sm:$0xff]  }
 0x14b   : > { %10973 = vmatprep.subr.bf16.mxu0 %v11752_v4  ;;  %v7237_v54 = vrot.slane %v5994_v49, 6  ;;  %v3351_v49 = vrot.slane %v9092_v27, 7 }
 0x14c   : > { %10590 = vmatpush3.bf16.msra.mxu1 %v11751_v32  ;;  %v7231_v32 = vsel %vm12221_vm8, %v7229_v41, %v7230_v39  ;;  %v3334_v43 = vsel %vm12059_vm5, %v3332_v61, %v3333_v48  ;;  %v5999_v39 = vld [vmem:[%s12039_s8 + $0x27c] sm:$0xf]  ;;  %v3346_v41 = vrot.slane %v3344_v35, 4  ;;  %v6001_v61 = vld [vmem:[%s12039_s8 + $0x294] sm:$0xc] }
 0x14d   : > { %10591 = vmatprep.subr.bf16.mxu1 %v11756_v59  ;;  %v9294_v60 = vcombine.low %v3331_v17, %v3334_v43  ;;  %v7248_v46 = vrot.slane %v5999_v39, 6  ;;  %v11769_v17 = vld [vmem:[%s13959_s2 + $0x260] sm:$0xff]   ;;  %v9737_v55 = vrot.slane %v6001_v61, 10  ;;  %v9148_v61 = vld [vmem:[%s12039_s8 + $0xb0] sm:$0xe] }
 0x14e   : > { %10974 = vmatpush3.bf16.msra.mxu0 %v11752_v4  ;;  %v7234_v4 = vrot.slane %v5993_v14, 6 }
 0x14f   : > { %10576 = vmatmul.mubr.bf16.gmra.mrb[12].mxu1 %v9067_v11  ;;  %10975 = vmatprep.subr.bf16.mxu0 %v11758_v6  ;;  %v11764_v11 = vld [vmem:[%s13959_s2 + $0x548] sm:$0xff]   ;;  %v7250_v14 = vrot.slane %v7248_v46, 4 }
 0x150   : > { %10592 = vmatpush3.bf16.msra.mxu1 %v11756_v59  ;;  %10595 = vmatprep.mubr.bf16.mxu1 %v9292_v19  ;;  %v7235_v56 = vsel %vm12221_vm8, %v9734_v50, %v7234_v4  ;;  %v7236_v57 = vrot.slane %v7234_v4, 4  ;;  %v9757_v59 = vcombine.low %v7228_v47, %v7231_v32  ;;  %v7242_v19 = vsel %vm12221_vm8, %v9735_v9, %v7241_v38  ;;  %v6002_v4 = vld [vmem:[%s12039_s8 + $0x298] sm:$0xf]  ;;  %v6004_v9 = vld [vmem:[%s12039_s8 + $0x2b0] sm:$0xc] }
 0x151   : > { %10593 = vmatprep.subr.bf16.mxu1 %v11759_v42  ;;  %10960 = vmatmul.mubr.bf16.gmra.mrb[12].mxu0 %v11757_v26  ;;  %v11765_v26 = vld [vmem:[%s13959_s2 + $0x250] sm:$0xff]   ;;  %v9273_v47 = vrot.slane %v9091_v13, 11  ;;  %v7255_v45 = vrot.slane %v6002_v4, 6 }
 0x152   : > { %10976 = vmatpush3.bf16.msra.mxu0 %v11758_v6  ;;  %10979 = vmatprep.mubr.bf16.mxu0 %v9756_v40  ;;  %v7238_v6 = vsel %vm12221_vm8, %v7236_v57, %v7237_v54  ;;  %v6000_v40 = vld [vmem:[%s12039_s8 + $0x280] sm:$0x3]  ;;  %v6003_v54 = vld [vmem:[%s12039_s8 + $0x29c] sm:$0x3]  ;;  %v9149_v4 = vld [vmem:[%s12039_s8 + $0xb4] sm:$0xf] }
 0x153   : > { %10977 = vmatprep.subr.bf16.mxu0 %v11760_v36  ;;  %v9758_v16 = vcombine.low %v7235_v56, %v7238_v6  ;;  %v7251_v24 = vrot.slane %v6000_v40, 6  ;;  %v3352_v1 = vsel %vm12059_vm5, %v9273_v47, %v3351_v49  ;;  %v7258_v43 = vrot.slane %v6003_v54, 6  ;;  %v11770_v56 = vld [vmem:[%s13959_s2 + $0x560] sm:$0xff]   ;;  %v9096_v6 = vld [vmem:[%s12039_s8 + $0x158] sm:$0x7] }
 0x154   : > { %10594 = vmatpush3.bf16.msra.mxu1 %v11759_v42  ;;  %v7243_v42 = vrot.slane %v7241_v38, 4  ;;  %v7264_v40 = vrot.slane %v7262_v30, 4  ;;  %v3638_v54 = vrot.slane %v9149_v4, 5 }
 0x155   : > { %10611 = vmatprep.subr.bf16.mxu1 %v11761_v62  ;;  %v7252_v28 = vsel %vm12221_vm8, %v7250_v14, %v7251_v24  ;;  %v6008_v24 = vld [vmem:[%s12039_s8 + $0x2d0] sm:$0xf] }
 0x156   : > { %10978 = vmatpush3.bf16.msra.mxu0 %v11760_v36  ;;  %v7245_v31 = vsel %vm12221_vm8, %v7243_v42, %v7244_v25  ;;  %v5998_v36 = vld [vmem:[%s12039_s8 + $0x278] sm:$0xc]  ;;  %v6006_v25 = vld [vmem:[%s12039_s8 + $0x2b8] sm:$0x3]  ;;  %v7269_v27 = vrot.slane %v6008_v24, 6 }
 0x157   : > { %10596 = vmatmul.mubr.bf16.vlgmr.msra.gmra.mrb[0].mxu1 %v9293_v23  ;;  %10995 = vmatprep.subr.bf16.mxu0 %v11762_v52  ;;  %v9736_v10 = vrot.slane %v5998_v36, 10  ;;  %v9759_v12 = vcombine.low %v7242_v19, %v7245_v31  ;;  %v9093_v23 = vld [vmem:[%s12039_s8 + $0x13c] sm:$0x7]  ;;  %v9098_v19 = vld [vmem:[%s12039_s8 + $0x170] sm:$0xf]  ;;  %v7265_v31 = vrot.slane %v6006_v25, 6 }
 0x158   : > { %10612 = vmatpush3.bf16.msra.mxu1 %v11761_v62  ;;  %10599 = vmatprep.mubr.bf16.mxu1 %v9294_v60  ;;  %v3345_v62 = vsel %vm12059_vm5, %v9272_v34, %v3344_v35  ;;  %v3354_v32 = vrot.slane %v9093_v23, 7  ;;  %v7257_v60 = vrot.slane %v7255_v45, 4  ;;  %v9275_v34 = vrot.slane %v9097_v44, 11  ;;  %v11773_v36 = vld [vmem:[%s13959_s2 + $0x270] sm:$0xff]  }
 0x159   : > { %10613 = vmatprep.subr.bf16.mxu1 %v11763_v53  ;;  %10980 = vmatmul.mubr.bf16.vlgmr.msra.gmra.mrb[0].mxu0 %v9757_v59  ;;  %v7249_v48 = vsel %vm12221_vm8, %v9736_v10, %v7248_v46  ;;  %v7256_v59 = vsel %vm12221_vm8, %v9737_v55, %v7255_v45  ;;  %v3365_v35 = vrot.slane %v9098_v19, 7  ;;  %v3368_v10 = vrot.slane %v9099_v33, 7  ;;  %v6007_v46 = vld [vmem:[%s12039_s8 + $0x2cc] sm:$0xc]  ;;  %v11777_v45 = vld [vmem:[%s12039_s8 + $0x3f0] sm:$0xff]  }
 0x15a   : > { %10996 = vmatpush3.bf16.msra.mxu0 %v11762_v52  ;;  %10983 = vmatprep.mubr.bf16.mxu0 %v9758_v16  ;;  %v3348_v52 = vsel %vm12059_vm5, %v3346_v41, %v3347_v37  ;;  %v9760_v18 = vcombine.low %v7249_v48, %v7252_v28  ;;  %v7259_v38 = vsel %vm12221_vm8, %v7257_v60, %v7258_v43  ;;  %v3361_v16 = vrot.slane %v9096_v6, 7  ;;  %v11774_v48 = vld [vmem:[%s13959_s2 + $0x570] sm:$0xff]   ;;  %v9151_v43 = vld [vmem:[%s12039_s8 + $0xcc] sm:$0xe]  ;;  %v11778_v6 = vld [vmem:[%s13959_s2 + $0x280] sm:$0xff]  }
 0x15b   : > { %10997 = vmatprep.subr.bf16.mxu0 %v11764_v11  ;;  %v9296_v50 = vcombine.low %v3345_v62, %v3348_v52  ;;  %v9761_v42 = vcombine.low %v7256_v59, %v7259_v38  ;;  %v3366_v62 = vsel %vm12059_vm5, %v9275_v34, %v3365_v35  ;;  %v3367_v41 = vrot.slane %v3365_v35, 4  ;;  %v9153_v59 = vld [vmem:[%s12039_s8 + $0xd4] sm:$0x1]  ;;  %v11779_v38 = vld [vmem:[%s12039_s8 + $0x40c] sm:$0xff]   ;;  %v9157_v33 = vld [vmem:[%s12039_s8 + $0x104] sm:$0xe] }
 0x15c   : > { %10614 = vmatpush3.bf16.msra.mxu1 %v11763_v53  ;;  %v3353_v53 = vrot.slane %v3351_v49, 4  ;;  %v7266_v13 = vsel %vm12221_vm8, %v7264_v40, %v7265_v31  ;;  %v9309_v60 = vrot.slane %v9151_v43, 9  ;;  %v3648_v58 = vrot.slane %v9153_v59, 5  ;;  %v11783_v31 = vld [vmem:[%s12039_s8 + $0x428] sm:$0xff]   ;;  %v11790_v43 = vld [vmem:[%s13959_s2 + $0x2a0] sm:$0xff]  }
 0x15d   : > { %10615 = vmatprep.subr.bf16.mxu1 %v11765_v26  ;;  %v3369_v47 = vsel %vm12059_vm5, %v3367_v41, %v3368_v10  ;;  %v11791_v59 = vld [vmem:[%s12039_s8 + $0x47c] sm:$0xff]  }
 0x15e   : > { %10998 = vmatpush3.bf16.msra.mxu0 %v11764_v11  ;;  %v3355_v57 = vsel %vm12059_vm5, %v3353_v53, %v3354_v32  ;;  %v11772_v11 = vld [vmem:[%s13959_s2 + $0x568] sm:$0xff]   ;;  %v9299_v14 = vcombine.low %v3366_v62, %v3369_v47  ;;  %v11775_v32 = vld [vmem:[%s13959_s2 + $0x278] sm:$0xff]   ;;  %v9308_v53 = vrot.slane %v9148_v61, 9  ;;  %v11784_v62 = vld [vmem:[%s13959_s2 + $0x290] sm:$0xff]  }
 0x15f   : > { %10600 = vmatmul.mubr.bf16.gmra.mrb[4].mxu1 %v9295_v0  ;;  %10999 = vmatprep.subr.bf16.mxu0 %v11766_v29  ;;  %v9297_v5 = vcombine.low %v3352_v1, %v3355_v57  ;;  %v3359_v0 = vsel %vm12059_vm5, %v9274_v7, %v3358_v8  ;;  %v9150_v1 = vld [vmem:[%s12039_s8 + $0xb8] sm:$0x1]  ;;  %v3640_v57 = vrot.slane %v3638_v54, 4  ;;  %v9163_v61 = vld [vmem:[%s12039_s8 + $0x13c] sm:$0xe] }
 0x160   : > { %10616 = vmatpush3.bf16.msra.mxu1 %v11765_v26  ;;  %10603 = vmatprep.mubr.bf16.mxu1 %v9296_v50  ;;  %v9738_v26 = vrot.slane %v6004_v9, 10  ;;  %v7271_v50 = vrot.slane %v7269_v27, 4  ;;  %v11788_v47 = vld [vmem:[%s13959_s2 + $0x598] sm:$0xff]  }
 0x161   : > { %10617 = vmatprep.subr.bf16.mxu1 %v11767_v51  ;;  %10984 = vmatmul.mubr.bf16.gmra.mrb[4].mxu0 %v9759_v12  ;;  %v6009_v12 = vld [vmem:[%s12039_s8 + $0x2d4] sm:$0x3] }
 0x162   : > { %11000 = vmatpush3.bf16.msra.mxu0 %v11766_v29  ;;  %10987 = vmatprep.mubr.bf16.mxu0 %v9760_v18  ;;  %v3360_v29 = vrot.slane %v3358_v8, 4  ;;  %v7263_v39 = vsel %vm12221_vm8, %v9738_v26, %v7262_v30  ;;  %v7272_v52 = vrot.slane %v6009_v12, 6  ;;  %v3641_v18 = vrot.slane %v9150_v1, 5  ;;  %v11782_v26 = vld [vmem:[%s13959_s2 + $0x588] sm:$0xff]   ;;  %v11786_v12 = vld [vmem:[%s13959_s2 + $0x590] sm:$0xff]  }
 0x163   : > { %11001 = vmatprep.subr.bf16.mxu0 %v11768_v21  ;;  %v9762_v23 = vcombine.low %v7263_v39, %v7266_v13  ;;  %v9311_v39 = vrot.slane %v9157_v33, 9  ;;  %v11785_v13 = vld [vmem:[%s12039_s8 + $0x444] sm:$0xff]   ;;  %v9164_v1 = vld [vmem:[%s12039_s8 + $0x140] sm:$0xf]  ;;  %v11796_v33 = vld [vmem:[%s13959_s2 + $0x2b0] sm:$0xff]  }
 0x164   : > { %10618 = vmatpush3.bf16.msra.mxu1 %v11767_v51  ;;  %v3362_v37 = vsel %vm12059_vm5, %v3360_v29, %v3361_v16  ;;  %v7273_v28 = vsel %vm12221_vm8, %v7271_v50, %v7272_v52  ;;  %v3642_v3 = vsel %vm12050_vm4, %v3640_v57, %v3641_v18  ;;  %v9156_v29 = vld [vmem:[%s12039_s8 + $0xf0] sm:$0x1]  ;;  %v9160_v52 = vld [vmem:[%s12039_s8 + $0x120] sm:$0xe] }
 0x165   : > { %10619 = vmatprep.subr.bf16.mxu1 %v11769_v17  ;;  %v9298_v51 = vcombine.low %v3359_v0, %v3362_v37  ;;  %v9155_v0 = vld [vmem:[%s12039_s8 + $0xec] sm:$0xf]  ;;  %v3655_v19 = vrot.slane %v9156_v29, 5  ;;  %v9171_v29 = vld [vmem:[%s12039_s8 + $0x17c] sm:$0x1] }
 0x166   : > { %11002 = vmatpush3.bf16.msra.mxu0 %v11768_v21  ;;  %v9739_v21 = vrot.slane %v6007_v46, 10  ;;  %v3652_v44 = vrot.slane %v9155_v0, 5  ;;  %v9159_v37 = vld [vmem:[%s12039_s8 + $0x10c] sm:$0x1]  ;;  %v9170_v0 = vld [vmem:[%s12039_s8 + $0x178] sm:$0xf] }
 0x167   : > { %10604 = vmatmul.mubr.bf16.gmra.mrb[8].mxu1 %v9297_v5  ;;  %11003 = vmatprep.subr.bf16.mxu0 %v11770_v56  ;;  %v9152_v5 = vld [vmem:[%s12039_s8 + $0xd0] sm:$0xf]  ;;  %v3662_v10 = vrot.slane %v9159_v37, 5  ;;  %v11797_v37 = vld [vmem:[%s12039_s8 + $0x4b4] sm:$0xff]  }
 0x168   : > { %10620 = vmatpush3.bf16.msra.mxu1 %v11769_v17  ;;  %10607 = vmatprep.mubr.bf16.mxu1 %v9298_v51  ;;  %v7270_v49 = vsel %vm12221_vm8, %v9739_v21, %v7269_v27  ;;  %v11776_v17 = vld [vmem:[%s13959_s2 + $0x578] sm:$0xff]   ;;  %v3654_v35 = vrot.slane %v3652_v44, 4 }
 0x169   : > { %10621 = vmatprep.subr.bf16.mxu1 %v11771_v2  ;;  %10988 = vmatmul.mubr.bf16.gmra.mrb[8].mxu0 %v9761_v42  ;;  %v9763_v55 = vcombine.low %v7270_v49, %v7273_v28  ;;  %v9154_v42 = vld [vmem:[%s12039_s8 + $0xe8] sm:$0xe]  ;;  %v11787_v27 = vld [vmem:[%s13959_s2 + $0x298] sm:$0xff]   ;;  %v9312_v49 = vrot.slane %v9160_v52, 9 }
 0x16a   : > { %11004 = vmatpush3.bf16.msra.mxu0 %v11770_v56  ;;  %10991 = vmatprep.mubr.bf16.mxu0 %v9762_v23  ;;  %v3639_v56 = vsel %vm12050_vm4, %v9308_v53, %v3638_v54  ;;  %v9310_v30 = vrot.slane %v9154_v42, 9  ;;  %v3656_v51 = vsel %vm12050_vm4, %v3654_v35, %v3655_v19  ;;  %v9165_v53 = vld [vmem:[%s12039_s8 + $0x144] sm:$0x1]  ;;  %v9313_v54 = vrot.slane %v9163_v61, 9  ;;  %v9200_v61 = vld [vmem:[%s12039_s8 + $0xd4] sm:$0xf] }
 0x16b   : > { %11005 = vmatprep.subr.bf16.mxu0 %v11772_v11  ;;  %v9332_v7 = vcombine.low %v3639_v56, %v3642_v3  ;;  %v3676_v18 = vrot.slane %v9165_v53, 5  ;;  %v3690_v19 = vrot.slane %v9171_v29, 5  ;;  %v5944_v29 = vld [vmem:[%s12039_s8 + $0x430] sm:$0xe] }
 0x16c   : > { %10622 = vmatpush3.bf16.msra.mxu1 %v11771_v2  ;;  %v3645_v2 = vrot.slane %v9152_v5, 5  ;;  %v3653_v34 = vsel %vm12050_vm4, %v9310_v30, %v3652_v44  ;;  %v3687_v44 = vrot.slane %v9170_v0, 5 }
 0x16d   : > { %10623 = vmatprep.subr.bf16.mxu1 %v11773_v36  ;;  %v9334_v41 = vcombine.low %v3653_v34, %v3656_v51 }
 0x16e   : > { %11006 = vmatpush3.bf16.msra.mxu0 %v11772_v11  ;;  %v3646_v8 = vsel %vm12050_vm4, %v9309_v60, %v3645_v2  ;;  %v3647_v9 = vrot.slane %v3645_v2, 4  ;;  %v11780_v11 = vld [vmem:[%s13959_s2 + $0x580] sm:$0xff]  }
 0x16f   : > { %10608 = vmatmul.mubr.bf16.gmra.mrb[12].mxu1 %v9299_v14  ;;  %11007 = vmatprep.subr.bf16.mxu0 %v11774_v48  ;;  %v9162_v14 = vld [vmem:[%s12039_s8 + $0x128] sm:$0x1]  ;;  %v11792_v60 = vld [vmem:[%s13959_s2 + $0x5a0] sm:$0xff]  }
 0x170   : > { %10624 = vmatpush3.bf16.msra.mxu1 %v11773_v36  ;;  %10627 = vmatprep.mubr.bf16.mxu1 %v9332_v7  ;;  %v3649_v16 = vsel %vm12050_vm4, %v3647_v9, %v3648_v58  ;;  %v9158_v36 = vld [vmem:[%s12039_s8 + $0x108] sm:$0xf]  ;;  %v9166_v7 = vld [vmem:[%s12039_s8 + $0x158] sm:$0xe]  ;;  %v9168_v9 = vld [vmem:[%s12039_s8 + $0x160] sm:$0x1] }
 0x171   : > { %10625 = vmatprep.subr.bf16.mxu1 %v11775_v32  ;;  %10992 = vmatmul.mubr.bf16.gmra.mrb[12].mxu0 %v9763_v55  ;;  %v9333_v25 = vcombine.low %v3646_v8, %v3649_v16  ;;  %v3659_v40 = vrot.slane %v9158_v36, 5  ;;  %v3673_v55 = vrot.slane %v9164_v1, 5  ;;  %v11793_v58 = vld [vmem:[%s13959_s2 + $0x2a8] sm:$0xff]   ;;  %v9167_v8 = vld [vmem:[%s12039_s8 + $0x15c] sm:$0xf]  ;;  %v3683_v16 = vrot.slane %v9168_v9, 5 }
 0x172   : > { %11008 = vmatpush3.bf16.msra.mxu0 %v11774_v48  ;;  %11011 = vmatprep.mubr.bf16.mxu0 %v11777_v45  ;;  %v9161_v48 = vld [vmem:[%s12039_s8 + $0x124] sm:$0xf]  ;;  %v3689_v36 = vrot.slane %v3687_v44, 4  ;;  %v11802_v9 = vld [vmem:[%s13959_s2 + $0x5c8] sm:$0xff]  }
 0x173   : > { %11009 = vmatprep.subr.bf16.mxu0 %v11776_v17  ;;  %v3660_v46 = vsel %vm12050_vm4, %v9311_v39, %v3659_v40  ;;  %v3661_v24 = vrot.slane %v3659_v40, 4  ;;  %v3666_v50 = vrot.slane %v9161_v48, 5  ;;  %v3674_v57 = vsel %vm12050_vm4, %v9313_v54, %v3673_v55  ;;  %v11798_v39 = vld [vmem:[%s13959_s2 + $0x5b0] sm:$0xff]  }
 0x174   : > { %10626 = vmatpush3.bf16.msra.mxu1 %v11775_v32  ;;  %v3669_v32 = vrot.slane %v9162_v14, 5  ;;  %v3675_v5 = vrot.slane %v3673_v55, 4  ;;  %v3691_v40 = vsel %vm12050_vm4, %v3689_v36, %v3690_v19  ;;  %v3967_v55 = vrot.slane %v9200_v61, 7  ;;  %v11804_v61 = vld [vmem:[%s13959_s2 + $0x5d8] sm:$0xff]  }
 0x175   : > { %10643 = vmatprep.subr.bf16.mxu1 %v11778_v6  ;;  %v3663_v21 = vsel %vm12050_vm4, %v3661_v24, %v3662_v10  ;;  %v3667_v4 = vsel %vm12050_vm4, %v9312_v49, %v3666_v50  ;;  %v3668_v28 = vrot.slane %v3666_v50, 4  ;;  %v11799_v10 = vld [vmem:[%s13959_s2 + $0x2b8] sm:$0xff]  }
 0x176   : > { %11010 = vmatpush3.bf16.msra.mxu0 %v11776_v17  ;;  %v9335_v23 = vcombine.low %v3660_v46, %v3663_v21  ;;  %v11789_v17 = vld [vmem:[%s12039_s8 + $0x460] sm:$0xff]   ;;  %v3677_v2 = vsel %vm12050_vm4, %v3675_v5, %v3676_v18  ;;  %v9197_v46 = vld [vmem:[%s12039_s8 + $0xb8] sm:$0xf]  ;;  %v9198_v24 = vld [vmem:[%s12039_s8 + $0xbc] sm:$0x7] }
 0x177   : > { %11027 = vmatprep.subr.bf16.mxu0 %v11780_v11  ;;  %10628 = vmatmul.mubr.bf16.vlgmr.msra.gmra.mrb[0].mxu1 %v9333_v25  ;;  %v3670_v45 = vsel %vm12050_vm4, %v3668_v28, %v3669_v32  ;;  %v9337_v3 = vcombine.low %v3674_v57, %v3677_v2  ;;  %v9169_v25 = vld [vmem:[%s12039_s8 + $0x174] sm:$0xe]  ;;  %v5938_v21 = vld [vmem:[%s12039_s8 + $0x3f8] sm:$0xe]  ;;  %v9199_v32 = vld [vmem:[%s12039_s8 + $0xd0] sm:$0x8] }
 0x178   : > { %10644 = vmatpush3.bf16.msra.mxu1 %v11778_v6  ;;  %10631 = vmatprep.mubr.bf16.mxu1 %v9334_v41  ;;  %v9336_v56 = vcombine.low %v3667_v4, %v3670_v45  ;;  %v11794_v6 = vld [vmem:[%s13959_s2 + $0x5a8] sm:$0xff]   ;;  %v9315_v30 = vrot.slane %v9169_v25, 9  ;;  %v9196_v41 = vld [vmem:[%s12039_s8 + $0xb4] sm:$0x8]  ;;  %v9804_v52 = vrot.slane %v5938_v21, 9  ;;  %v9349_v28 = vrot.slane %v9199_v32, 11 }
 0x179   : > { %11012 = vmatmul.mubr.bf16.vlgmr.msra.gmra.mrb[0].mxu0 %v11779_v38  ;;  %10645 = vmatprep.subr.bf16.mxu1 %v11781_v20  ;;  %v9314_v38 = vrot.slane %v9166_v7, 9  ;;  %v9201_v4 = vld [vmem:[%s12039_s8 + $0xd8] sm:$0x7]  ;;  %v5941_v18 = vld [vmem:[%s12039_s8 + $0x414] sm:$0xe] }
 0x17a   : > { %11028 = vmatpush3.bf16.msra.mxu0 %v11780_v11  ;;  %11015 = vmatprep.mubr.bf16.mxu0 %v11783_v31  ;;  %v3680_v11 = vrot.slane %v9167_v8, 5  ;;  %v3688_v35 = vsel %vm12050_vm4, %v9315_v30, %v3687_v44  ;;  %v5942_v45 = vld [vmem:[%s12039_s8 + $0x418] sm:$0xf]  ;;  %v5943_v57 = vld [vmem:[%s12039_s8 + $0x41c] sm:$0x1]  ;;  %v9805_v5 = vrot.slane %v5941_v18, 9  ;;  %v3968_v2 = vsel %vm12059_vm5, %v9349_v28, %v3967_v55 }
 0x17b   : > { %11029 = vmatprep.subr.bf16.mxu0 %v11782_v26  ;;  %v9339_v51 = vcombine.low %v3688_v35, %v3691_v40  ;;  %v5945_v30 = vld [vmem:[%s12039_s8 + $0x434] sm:$0xf]  ;;  %v9206_v40 = vld [vmem:[%s12039_s8 + $0x10c] sm:$0xf]  ;;  %v5948_v21 = vld [vmem:[%s12039_s8 + $0x450] sm:$0xf] }
 0x17c   : > { %10646 = vmatpush3.bf16.msra.mxu1 %v11781_v20  ;;  %v11795_v20 = vld [vmem:[%s12039_s8 + $0x498] sm:$0xff]   ;;  %v3682_v42 = vrot.slane %v3680_v11, 4  ;;  %v7821_v32 = vrot.slane %v5948_v21, 5  ;;  %v9208_v28 = vld [vmem:[%s12039_s8 + $0x124] sm:$0x8] }
 0x17d   : > { %10647 = vmatprep.subr.bf16.mxu1 %v11784_v62  ;;  %v9210_v18 = vld [vmem:[%s12039_s8 + $0x12c] sm:$0x7] }
 0x17e   : > { %11030 = vmatpush3.bf16.msra.mxu0 %v11782_v26  ;;  %v3681_v26 = vsel %vm12050_vm4, %v9314_v38, %v3680_v11  ;;  %v3684_v31 = vsel %vm12050_vm4, %v3682_v42, %v3683_v16  ;;  %v9202_v11 = vld [vmem:[%s12039_s8 + $0xec] sm:$0x8]  ;;  %v9203_v16 = vld [vmem:[%s12039_s8 + $0xf0] sm:$0xf] }
 0x17f   : > { %11031 = vmatprep.subr.bf16.mxu0 %v11786_v12  ;;  %10632 = vmatmul.mubr.bf16.gmra.mrb[4].mxu1 %v9335_v23  ;;  %v9338_v34 = vcombine.low %v3681_v26, %v3684_v31  ;;  %v5939_v23 = vld [vmem:[%s12039_s8 + $0x3fc] sm:$0xf]  ;;  %v9350_v42 = vrot.slane %v9202_v11, 11  ;;  %v3974_v0 = vrot.slane %v9203_v16, 7  ;;  %v5946_v31 = vld [vmem:[%s12039_s8 + $0x438] sm:$0x1] }
 0x180   : > { %10648 = vmatpush3.bf16.msra.mxu1 %v11784_v62  ;;  %10635 = vmatprep.mubr.bf16.mxu1 %v9336_v56  ;;  %v11800_v62 = vld [vmem:[%s13959_s2 + $0x5b8] sm:$0xff]   ;;  %v7800_v49 = vrot.slane %v5939_v23, 5  ;;  %v3970_v56 = vrot.slane %v9201_v4, 7  ;;  %v9213_v11 = vld [vmem:[%s12039_s8 + $0x148] sm:$0x7] }
 0x181   : > { %11016 = vmatmul.mubr.bf16.gmra.mrb[4].mxu0 %v11785_v13  ;;  %10649 = vmatprep.subr.bf16.mxu1 %v11787_v27  ;;  %v9348_v13 = vrot.slane %v9196_v41, 11  ;;  %v3975_v35 = vsel %vm12059_vm5, %v9350_v42, %v3974_v0  ;;  %v3976_v36 = vrot.slane %v3974_v0, 4  ;;  %v5953_v42 = vld [vmem:[%s12039_s8 + $0x484] sm:$0xe] }
 0x182   : > { %11032 = vmatpush3.bf16.msra.mxu0 %v11786_v12  ;;  %11019 = vmatprep.mubr.bf16.mxu0 %v11789_v17  ;;  %v3960_v12 = vrot.slane %v9197_v46, 7  ;;  %v11801_v17 = vld [vmem:[%s13959_s2 + $0x5c0] sm:$0xff]   ;;  %v7801_v53 = vsel %vm12050_vm4, %v9804_v52, %v7800_v49  ;;  %v7802_v54 = vrot.slane %v7800_v49, 4  ;;  %v3981_v46 = vrot.slane %v9206_v40, 7 }
 0x183   : > { %11033 = vmatprep.subr.bf16.mxu0 %v11788_v47  ;;  %v11805_v0 = vld [vmem:[%s13959_s2 + $0x5e0] sm:$0xff]  }
 0x184   : > { %10650 = vmatpush3.bf16.msra.mxu1 %v11787_v27  ;;  %v3963_v27 = vrot.slane %v9198_v24, 7  ;;  %v3961_v48 = vsel %vm12059_vm5, %v9348_v13, %v3960_v12  ;;  %v3962_v14 = vrot.slane %v3960_v12, 4  ;;  %v5947_v12 = vld [vmem:[%s12039_s8 + $0x44c] sm:$0xe]  ;;  %v3983_v52 = vrot.slane %v3981_v46, 4 }
 0x185   : > { %10651 = vmatprep.subr.bf16.mxu1 %v11790_v43 }
 0x186   : > { %11034 = vmatpush3.bf16.msra.mxu0 %v11788_v47  ;;  %v5940_v47 = vld [vmem:[%s12039_s8 + $0x400] sm:$0x1]  ;;  %v3964_v1 = vsel %vm12059_vm5, %v3962_v14, %v3963_v27  ;;  %v11803_v14 = vld [vmem:[%s13959_s2 + $0x5d0] sm:$0xff]  }
 0x187   : > { %11035 = vmatprep.subr.bf16.mxu0 %v11792_v60  ;;  %10636 = vmatmul.mubr.bf16.gmra.mrb[8].mxu1 %v9337_v3  ;;  %v7803_v50 = vrot.slane %v5940_v47, 5  ;;  %v7810_v3 = vrot.slane %v5943_v57, 5  ;;  %v5950_v57 = vld [vmem:[%s12039_s8 + $0x468] sm:$0xe] }
 0x188   : > { %10652 = vmatpush3.bf16.msra.mxu1 %v11790_v43  ;;  %10639 = vmatprep.mubr.bf16.mxu1 %v9338_v34  ;;  %v9372_v43 = vcombine.low %v3961_v48, %v3964_v1  ;;  %v7814_v34 = vrot.slane %v5945_v30, 5  ;;  %v5949_v48 = vld [vmem:[%s12039_s8 + $0x454] sm:$0x1]  ;;  %v3998_v30 = vrot.slane %v9213_v11, 7 }
 0x189   : > { %11020 = vmatmul.mubr.bf16.gmra.mrb[8].mxu0 %v11791_v59  ;;  %10653 = vmatprep.subr.bf16.mxu1 %v11793_v58  ;;  %v7807_v59 = vrot.slane %v5942_v45, 5  ;;  %v9352_v45 = vrot.slane %v9208_v28, 11 }
 0x18a   : > { %11036 = vmatpush3.bf16.msra.mxu0 %v11792_v60  ;;  %11023 = vmatprep.mubr.bf16.mxu0 %v11795_v20  ;;  %v7804_v60 = vsel %vm12050_vm4, %v7802_v54, %v7803_v50  ;;  %v9204_v20 = vld [vmem:[%s12039_s8 + $0xf4] sm:$0x7]  ;;  %v9807_v50 = vrot.slane %v5947_v12, 9  ;;  %v7823_v54 = vrot.slane %v7821_v32, 4 }
 0x18b   : > { %11037 = vmatprep.subr.bf16.mxu0 %v11794_v6  ;;  %v7808_v7 = vsel %vm12050_vm4, %v9805_v5, %v7807_v59  ;;  %v7809_v8 = vrot.slane %v7807_v59, 4  ;;  %v3977_v19 = vrot.slane %v9204_v20, 7  ;;  %v5951_v5 = vld [vmem:[%s12039_s8 + $0x46c] sm:$0xf] }
 0x18c   : > { %10654 = vmatpush3.bf16.msra.mxu1 %v11793_v58  ;;  %v3969_v58 = vrot.slane %v3967_v55, 4  ;;  %v9209_v55 = vld [vmem:[%s12039_s8 + $0x128] sm:$0xf] }
 0x18d   : > { %10655 = vmatprep.subr.bf16.mxu1 %v11796_v33  ;;  %v7811_v26 = vsel %vm12050_vm4, %v7809_v8, %v7810_v3  ;;  %v3978_v24 = vsel %vm12059_vm5, %v3976_v36, %v3977_v19  ;;  %v9211_v3 = vld [vmem:[%s12039_s8 + $0x140] sm:$0x8]  ;;  %v5955_v19 = vld [vmem:[%s12039_s8 + $0x48c] sm:$0x1] }
 0x18e   : > { %11038 = vmatpush3.bf16.msra.mxu0 %v11794_v6  ;;  %v9828_v6 = vcombine.low %v7801_v53, %v7804_v60  ;;  %v3971_v38 = vsel %vm12059_vm5, %v3969_v58, %v3970_v56  ;;  %v9829_v44 = vcombine.low %v7808_v7, %v7811_v26  ;;  %v9374_v27 = vcombine.low %v3975_v35, %v3978_v24  ;;  %v5952_v60 = vld [vmem:[%s12039_s8 + $0x470] sm:$0x1] }
 0x18f   : > { %11039 = vmatprep.subr.bf16.mxu0 %v11798_v39  ;;  %10640 = vmatmul.mubr.bf16.gmra.mrb[12].mxu1 %v9339_v51  ;;  %v9373_v25 = vcombine.low %v3968_v2, %v3971_v38  ;;  %v7816_v51 = vrot.slane %v7814_v34, 4  ;;  %v7822_v53 = vsel %vm12050_vm4, %v9807_v50, %v7821_v32  ;;  %v3991_v56 = vrot.slane %v9210_v18, 7  ;;  %v9212_v38 = vld [vmem:[%s12039_s8 + $0x144] sm:$0xf]  ;;  %v11807_v18 = vld [vmem:[%s13959_s2 + $0x5f0] sm:$0xff]  }
 0x190   : > { %10656 = vmatpush3.bf16.msra.mxu1 %v11796_v33  ;;  %10659 = vmatprep.mubr.bf16.mxu1 %v9372_v43  ;;  %v9806_v33 = vrot.slane %v5944_v29, 9  ;;  %v3988_v43 = vrot.slane %v9209_v55, 7  ;;  %v9808_v2 = vrot.slane %v5950_v57, 9  ;;  %v7828_v58 = vrot.slane %v5951_v5, 5  ;;  %v5959_v55 = vld [vmem:[%s12039_s8 + $0x4bc] sm:$0xe] }
 0x191   : > { %11024 = vmatmul.mubr.bf16.gmra.mrb[12].mxu0 %v11797_v37  ;;  %10657 = vmatprep.subr.bf16.mxu1 %v11799_v10  ;;  %v7817_v37 = vrot.slane %v5946_v31, 5  ;;  %v3995_v26 = vrot.slane %v9212_v38, 7  ;;  %v9809_v31 = vrot.slane %v5953_v42, 9  ;;  %v7838_v40 = vrot.slane %v5955_v19, 5  ;;  %v5960_v5 = vld [vmem:[%s12039_s8 + $0x4c0] sm:$0xf] }
 0x192   : > { %11040 = vmatpush3.bf16.msra.mxu0 %v11798_v39  ;;  %11043 = vmatprep.mubr.bf16.mxu0 %v9828_v6  ;;  %v9205_v39 = vld [vmem:[%s12039_s8 + $0x108] sm:$0x8]  ;;  %v3989_v7 = vsel %vm12059_vm5, %v9352_v45, %v3988_v43  ;;  %v3990_v8 = vrot.slane %v3988_v43, 4  ;;  %v7829_v16 = vsel %vm12050_vm4, %v9808_v2, %v7828_v58  ;;  %v7830_v20 = vrot.slane %v7828_v58, 4  ;;  %v6011_v42 = vld [vmem:[%s12039_s8 + $0x404] sm:$0xf] }
 0x193   : > { %11041 = vmatprep.subr.bf16.mxu0 %v11800_v62  ;;  %v9351_v41 = vrot.slane %v9205_v39, 11  ;;  %v7818_v23 = vsel %vm12050_vm4, %v7816_v51, %v7817_v37  ;;  %v3997_v36 = vrot.slane %v3995_v26, 4  ;;  %v9811_v2 = vrot.slane %v5959_v55, 9 }
 0x194   : > { %10658 = vmatpush3.bf16.msra.mxu1 %v11799_v10  ;;  %v7815_v10 = vsel %vm12050_vm4, %v9806_v33, %v7814_v34  ;;  %v3992_v29 = vsel %vm12059_vm5, %v3990_v8, %v3991_v56  ;;  %v7849_v58 = vrot.slane %v5960_v5, 5  ;;  %v8122_v22 = vrot.slane %v6011_v42, 6 }
 0x195   : > { %11091 = vmatprep.subr.bf16.mxu1 %v11801_v17  ;;  %v3982_v47 = vsel %vm12059_vm5, %v9351_v41, %v3981_v46  ;;  %v9830_v49 = vcombine.low %v7815_v10, %v7818_v23  ;;  %v9376_v33 = vcombine.low %v3989_v7, %v3992_v29  ;;  %v11806_v10 = vld [vmem:[%s13959_s2 + $0x5e8] sm:$0xff]   ;;  %v3999_v51 = vsel %vm12059_vm5, %v3997_v36, %v3998_v30  ;;  %v9215_v41 = vld [vmem:[%s12039_s8 + $0x160] sm:$0xf]  ;;  %v9216_v46 = vld [vmem:[%s12039_s8 + $0x164] sm:$0x7] }
 0x196   : > { %11042 = vmatpush3.bf16.msra.mxu0 %v11800_v62  ;;  %v9207_v62 = vld [vmem:[%s12039_s8 + $0x110] sm:$0x7]  ;;  %v5957_v23 = vld [vmem:[%s12039_s8 + $0x4a4] sm:$0xf]  ;;  %v7850_v38 = vsel %vm12050_vm4, %v9811_v2, %v7849_v58  ;;  %v7851_v11 = vrot.slane %v7849_v58, 4  ;;  %v8124_v15 = vrot.slane %v8122_v22, 4 }
 0x197   : > { %11059 = vmatprep.subr.bf16.mxu0 %v11801_v17  ;;  %10660 = vmatmul.mubr.bf16.vlgmr.msra.gmra.mrb[0].mxu1 %v9373_v25  ;;  %v3984_v13 = vrot.slane %v9207_v62, 7  ;;  %v9353_v25 = vrot.slane %v9211_v3, 11  ;;  %v9214_v62 = vld [vmem:[%s12039_s8 + $0x15c] sm:$0x8]  ;;  %v6019_v2 = vld [vmem:[%s12039_s8 + $0x454] sm:$0xc] }
 0x198   : > { %11099 = vmatpush3.bf16.msra.mxu1 %v11801_v17  ;;  %10663 = vmatprep.mubr.bf16.mxu1 %v9374_v27  ;;  %v9354_v21 = vrot.slane %v9214_v62, 11  ;;  %v5956_v27 = vld [vmem:[%s12039_s8 + $0x4a0] sm:$0xe]  ;;  %v6015_v62 = vld [vmem:[%s12039_s8 + $0x424] sm:$0x3] }
 0x199   : > { %11044 = vmatmul.mubr.bf16.vlgmr.msra.gmra.mrb[0].mxu0 %v9829_v44  ;;  %11092 = vmatprep.subr.bf16.mxu1 %v11802_v9  ;;  %v3985_v4 = vsel %vm12059_vm5, %v3983_v52, %v3984_v13  ;;  %v5954_v44 = vld [vmem:[%s12039_s8 + $0x488] sm:$0xf]  ;;  %v3996_v35 = vsel %vm12059_vm5, %v9353_v25, %v3995_v26  ;;  %v4005_v52 = vrot.slane %v9216_v46, 7  ;;  %v11808_v26 = vld [vmem:[%s13959_s2 + $0x5f8] sm:$0xff]  }
 0x19a   : > { %11060 = vmatpush3.bf16.msra.mxu0 %v11801_v17  ;;  %v7824_v17 = vrot.slane %v5949_v48, 5  ;;  %11047 = vmatprep.mubr.bf16.mxu0 %v9830_v49  ;;  %v9375_v1 = vcombine.low %v3982_v47, %v3985_v4  ;;  %v7835_v39 = vrot.slane %v5954_v44, 5  ;;  %v9377_v24 = vcombine.low %v3996_v35, %v3999_v51  ;;  %v5958_v48 = vld [vmem:[%s12039_s8 + $0x4a8] sm:$0x1]  ;;  %v6024_v35 = vld [vmem:[%s12039_s8 + $0x478] sm:$0x3] }
 0x19b   : > { %11061 = vmatprep.subr.bf16.mxu0 %v11802_v9  ;;  %v4002_v47 = vrot.slane %v9215_v41, 7  ;;  %v7842_v49 = vrot.slane %v5957_v23, 5  ;;  %v7845_v32 = vrot.slane %v5958_v48, 5  ;;  %v6014_v51 = vld [vmem:[%s12039_s8 + $0x420] sm:$0xf] }
 0x19c   : > { %11100 = vmatpush3.bf16.msra.mxu1 %v11802_v9  ;;  %v7825_v59 = vsel %vm12050_vm4, %v7823_v54, %v7824_v17  ;;  %v7836_v13 = vsel %vm12050_vm4, %v9809_v31, %v7835_v39  ;;  %v7837_v12 = vrot.slane %v7835_v39, 4  ;;  %v9217_v17 = vld [vmem:[%s12039_s8 + $0x178] sm:$0x8]  ;;  %v9219_v54 = vld [vmem:[%s12039_s8 + $0x180] sm:$0x7] }
 0x19d   : > { %11093 = vmatprep.subr.bf16.mxu1 %v11803_v14  ;;  %v9831_v6 = vcombine.low %v7822_v53, %v7825_v59  ;;  %v4003_v28 = vsel %vm12059_vm5, %v9354_v21, %v4002_v47  ;;  %v7844_v45 = vrot.slane %v7842_v49, 4  ;;  %v9355_v43 = vrot.slane %v9217_v17, 11  ;;  %v6022_v31 = vld [vmem:[%s12039_s8 + $0x470] sm:$0xc]  ;;  %v6013_v39 = vld [vmem:[%s12039_s8 + $0x41c] sm:$0xc] }
 0x19e   : > { %11062 = vmatpush3.bf16.msra.mxu0 %v11802_v9  ;;  %v7831_v9 = vrot.slane %v5952_v60, 5  ;;  %v7839_v50 = vsel %vm12050_vm4, %v7837_v12, %v7838_v40  ;;  %v4012_v57 = vrot.slane %v9219_v54, 7  ;;  %v5961_v60 = vld [vmem:[%s12039_s8 + $0x4c4] sm:$0x1]  ;;  %v9848_v36 = vrot.slane %v6022_v31, 10 }
 0x19f   : > { %11063 = vmatprep.subr.bf16.mxu0 %v11803_v14  ;;  %10664 = vmatmul.mubr.bf16.gmra.mrb[4].mxu1 %v9375_v1  ;;  %v9833_v4 = vcombine.low %v7836_v13, %v7839_v50  ;;  %v4004_v1 = vrot.slane %v4002_v47, 4  ;;  %v8129_v13 = vrot.slane %v6014_v51, 6  ;;  %v6025_v12 = vld [vmem:[%s12039_s8 + $0x48c] sm:$0xc]  ;;  %v6026_v23 = vld [vmem:[%s12039_s8 + $0x490] sm:$0xf] }
 0x1a0   : > { %11101 = vmatpush3.bf16.msra.mxu1 %v11803_v14  ;;  %v7832_v34 = vsel %vm12050_vm4, %v7830_v20, %v7831_v9  ;;  %10667 = vmatprep.mubr.bf16.mxu1 %v9376_v33  ;;  %v6010_v20 = vld [vmem:[%s12039_s8 + $0x400] sm:$0xc]  ;;  %v6023_v33 = vld [vmem:[%s12039_s8 + $0x474] sm:$0xf]  ;;  %v6017_v17 = vld [vmem:[%s12039_s8 + $0x43c] sm:$0xf] }
 0x1a1   : > { %11094 = vmatprep.subr.bf16.mxu1 %v11804_v61  ;;  %11048 = vmatmul.mubr.bf16.gmra.mrb[4].mxu0 %v9831_v6  ;;  %v9832_v37 = vcombine.low %v7829_v16, %v7832_v34  ;;  %v4006_v59 = vsel %vm12059_vm5, %v4004_v1, %v4005_v52  ;;  %v7846_v6 = vsel %vm12050_vm4, %v7844_v45, %v7845_v32  ;;  %v7852_v16 = vrot.slane %v5961_v60, 5  ;;  %v6027_v47 = vld [vmem:[%s12039_s8 + $0x494] sm:$0x3]  ;;  %v6016_v32 = vld [vmem:[%s12039_s8 + $0x438] sm:$0xc] }
 0x1a2   : > { %11064 = vmatpush3.bf16.msra.mxu0 %v11803_v14  ;;  %v9810_v14 = vrot.slane %v5956_v27, 9  ;;  %v9378_v3 = vcombine.low %v4003_v28, %v4006_v59  ;;  %v9844_v29 = vrot.slane %v6010_v20, 10  ;;  %v8132_v27 = vrot.slane %v6015_v62, 6  ;;  %v6018_v1 = vld [vmem:[%s12039_s8 + $0x440] sm:$0x3] }
 0x1a3   : > { %11065 = vmatprep.subr.bf16.mxu0 %v11804_v61  ;;  %11051 = vmatprep.mubr.bf16.mxu0 %v9832_v37  ;;  %v7853_v44 = vsel %vm12050_vm4, %v7851_v11, %v7852_v16  ;;  %v8150_v37 = vrot.slane %v6023_v33, 6  ;;  %v9849_v52 = vrot.slane %v6025_v12, 10  ;;  %v8131_v50 = vrot.slane %v8129_v13, 4  ;;  %v6028_v45 = vld [vmem:[%s12039_s8 + $0x4a8] sm:$0xc] }
 0x1a4   : > { %11102 = vmatpush3.bf16.msra.mxu1 %v11804_v61  ;;  %v7843_v53 = vsel %vm12050_vm4, %v9810_v14, %v7842_v49  ;;  %v9835_v34 = vcombine.low %v7850_v38, %v7853_v44  ;;  %v8123_v40 = vsel %vm12221_vm8, %v9844_v29, %v8122_v22  ;;  %v8160_v28 = vrot.slane %v6027_v47, 6  ;;  %v6030_v59 = vld [vmem:[%s12039_s8 + $0x4b0] sm:$0x3]  ;;  %v6021_v38 = vld [vmem:[%s12039_s8 + $0x45c] sm:$0x3] }
 0x1a5   : > { %11095 = vmatprep.subr.bf16.mxu1 %v11805_v0  ;;  %v9834_v9 = vcombine.low %v7843_v53, %v7846_v6  ;;  %v8151_v41 = vsel %vm12221_vm8, %v9848_v36, %v8150_v37  ;;  %v8152_v46 = vrot.slane %v8150_v37, 4  ;;  %v9846_v53 = vrot.slane %v6016_v32, 10  ;;  %v6031_v20 = vld [vmem:[%s12039_s8 + $0x4c4] sm:$0xc]  ;;  %v6032_v29 = vld [vmem:[%s12039_s8 + $0x4c8] sm:$0xf] }
 0x1a6   : > { %11066 = vmatpush3.bf16.msra.mxu0 %v11804_v61  ;;  %v9218_v61 = vld [vmem:[%s12039_s8 + $0x17c] sm:$0xf]  ;;  %v8133_v54 = vsel %vm12221_vm8, %v8131_v50, %v8132_v27  ;;  %v8136_v55 = vrot.slane %v6017_v17, 6  ;;  %v9850_v60 = vrot.slane %v6028_v45, 10  ;;  %v9847_v11 = vrot.slane %v6019_v2, 10 }
 0x1a7   : > { %11067 = vmatprep.subr.bf16.mxu0 %v11805_v0  ;;  %10668 = vmatmul.mubr.bf16.gmra.mrb[8].mxu1 %v9377_v24  ;;  %v4009_v56 = vrot.slane %v9218_v61, 7  ;;  %v9845_v24 = vrot.slane %v6013_v39, 10  ;;  %v8146_v31 = vrot.slane %v6021_v38, 6 }
 0x1a8   : > { %11103 = vmatpush3.bf16.msra.mxu1 %v11805_v0  ;;  %10671 = vmatprep.mubr.bf16.mxu1 %v9378_v3  ;;  %v8137_v58 = vsel %vm12221_vm8, %v9846_v53, %v8136_v55  ;;  %v8138_v3 = vrot.slane %v8136_v55, 4 }
 0x1a9   : > { %11096 = vmatprep.subr.bf16.mxu1 %v11806_v10  ;;  %11052 = vmatmul.mubr.bf16.gmra.mrb[8].mxu0 %v9833_v4  ;;  %v4010_v7 = vsel %vm12059_vm5, %v9355_v43, %v4009_v56  ;;  %v4011_v8 = vrot.slane %v4009_v56, 4  ;;  %v8130_v49 = vsel %vm12221_vm8, %v9845_v24, %v8129_v13  ;;  %v8157_v4 = vrot.slane %v6026_v23, 6  ;;  %v6029_v43 = vld [vmem:[%s12039_s8 + $0x4ac] sm:$0xf] }
 0x1aa   : > { %11068 = vmatpush3.bf16.msra.mxu0 %v11805_v0  ;;  %v6012_v0 = vld [vmem:[%s12039_s8 + $0x408] sm:$0x3]  ;;  %11055 = vmatprep.mubr.bf16.mxu0 %v9834_v9  ;;  %v9869_v56 = vcombine.low %v8130_v49, %v8133_v54  ;;  %v8164_v6 = vrot.slane %v6029_v43, 6 }
 0x1ab   : > { %11069 = vmatprep.subr.bf16.mxu0 %v11806_v10  ;;  %v4013_v25 = vsel %vm12059_vm5, %v4011_v8, %v4012_v57  ;;  %v8125_v19 = vrot.slane %v6012_v0, 6  ;;  %v8158_v57 = vsel %vm12221_vm8, %v9849_v52, %v8157_v4  ;;  %v8159_v5 = vrot.slane %v8157_v4, 4  ;;  %v6020_v8 = vld [vmem:[%s12039_s8 + $0x458] sm:$0xf] }
 0x1ac   : > { %11104 = vmatpush3.bf16.msra.mxu1 %v11806_v10  ;;  %v9379_v30 = vcombine.low %v4010_v7, %v4013_v25  ;;  %v8167_v7 = vrot.slane %v6030_v59, 6  ;;  %v8143_v16 = vrot.slane %v6020_v8, 6  ;;  %v8165_v42 = vsel %vm12221_vm8, %v9850_v60, %v8164_v6 }
 0x1ad   : > { %11097 = vmatprep.subr.bf16.mxu1 %v11807_v18  ;;  %v8126_v21 = vsel %vm12221_vm8, %v8124_v15, %v8125_v19  ;;  %v8161_v9 = vsel %vm12221_vm8, %v8159_v5, %v8160_v28  ;;  %v8166_v0 = vrot.slane %v8164_v6, 4 }
 0x1ae   : > { %11070 = vmatpush3.bf16.msra.mxu0 %v11806_v10  ;;  %v8153_v10 = vrot.slane %v6024_v35, 6  ;;  %v9868_v48 = vcombine.low %v8123_v40, %v8126_v21  ;;  %v9873_v25 = vcombine.low %v8158_v57, %v8161_v9  ;;  %v8144_v22 = vsel %vm12221_vm8, %v9847_v11, %v8143_v16 }
 0x1af   : > { %11071 = vmatprep.subr.bf16.mxu0 %v11807_v18  ;;  %10672 = vmatmul.mubr.bf16.gmra.mrb[12].mxu1 %v9379_v30  ;;  %v6033_v30 = vld [vmem:[%s12039_s8 + $0x4cc] sm:$0x3]  ;;  %v8145_v19 = vrot.slane %v8143_v16, 4  ;;  %v8168_v33 = vsel %vm12221_vm8, %v8166_v0, %v8167_v7  ;;  %v8171_v35 = vrot.slane %v6032_v29, 6  ;;  %s298_s8 = scalar_select %p297_p13, %s11891_s19, 1 }
 0x1b0   : > { %11105 = vmatpush3.bf16.msra.mxu1 %v11807_v18  ;;  %v8154_v14 = vsel %vm12221_vm8, %v8152_v46, %v8153_v10  ;;  %v8174_v36 = vrot.slane %v6033_v30, 6  ;;  %v9874_v37 = vcombine.low %v8165_v42, %v8168_v33  ;;  %s8492_s19 = sshll.u32 %s13854_s9, 4  ;;  %s13895_s19 = int_to_ptr.vmem [resolvable:$true] %s8492_s19 }
 0x1b1   : > { %11056 = vmatmul.mubr.bf16.gmra.mrb[12].mxu0 %v9835_v34  ;;  %11098 = vmatprep.subr.bf16.mxu1 %v11808_v26  ;;  %v9872_v61 = vcombine.low %v8151_v41, %v8154_v14  ;;  %v9851_v34 = vrot.slane %v6031_v20, 10  ;;  %v8147_v39 = vsel %vm12221_vm8, %v8145_v19, %v8146_v31  ;;  %v8173_v15 = vrot.slane %v8171_v35, 4  ;;  %s299_s6 = scalar_lea.vmem %s13960_s3, %s298_s8  ;;  %s13905_s8 = scalar_lea.sflag [#allocation4], %s270_s27 }
 0x1b2   : > { %11072 = vmatpush3.bf16.msra.mxu0 %v11807_v18  ;;  %11075 = vmatprep.mubr.bf16.mxu0 %v9868_v48  ;;  %v8139_v18 = vrot.slane %v6018_v1, 6  ;;  %v9871_v10 = vcombine.low %v8144_v22, %v8147_v39  ;;  %s11809_s30 = scalar_lea.vmem %s13895_s19, 2048 }
 0x1b3   : > { %11073 = vmatprep.subr.bf16.mxu0 %v11808_v26  ;;  %11083 = vmatprep.mubr.bf16.mxu1 %v9872_v61  ;;  %v8172_v40 = vsel %vm12221_vm8, %v9851_v34, %v8171_v35  ;;  %v8175_v51 = vsel %vm12221_vm8, %v8173_v15, %v8174_v36  ;;  %p11810_p0 = scmp.ne.s32.totalorder %s13895_s19, %s11809_s30 }
 0x1b4   : > { %11106 = vmatpush3.bf16.msra.mxu1 %v11808_v26  ;;  %v9875_v62 = vcombine.low %v8172_v40, %v8175_v51 }
 0x1b5   : > { %p11811_p1 = pnand %p11810_p0, %p11984_p3 }
 0x1b6   : > { %11074 = vmatpush3.bf16.msra.mxu0 %v11808_v26  ;;  %v8140_v26 = vsel %vm12221_vm8, %v8138_v3, %v8139_v18 }
 0x1b7   : > { %v9870_v44 = vcombine.low %v8137_v58, %v8140_v26  ;;  %11084 = vmatmul.mubr.bf16.vlgmr.msra.gmra.mrb[16].mxu1 %v9873_v25  ;;  %v13849_v58 = vld [vmem:[%s299_s6] ss:$0 sm:$0xff]  ;;  %p11812_p2 = pneg %p11811_p1  ;;  %s11813_s6 = sshll.u32 %s11905_s5, 4  ;;  %s11814_s6 = int_to_ptr.vmem [resolvable:$false] %s11813_s6 }
 0x1b8   : > { %11087 = vmatprep.mubr.bf16.mxu1 %v9874_v37  ;;  %s11815_s13 = scalar_lea.vmem %s11814_s6, 4096  ;;  %p11816_p4 = scmp.lt.s32.totalorder %s13895_s19, %s11814_s6 }
 0x1b9   : > { %11076 = vmatmul.mubr.bf16.vlgmr.msra.gmra.mrb[0].mxu0 %v9869_v56  ;;  %p11817_p5 = scmp.lt.s32.totalorder %s11815_s13, %s11809_s30 }
 0x1ba   : > { %11079 = vmatprep.mubr.bf16.mxu0 %v9870_v44 }
 0x1bb   : > { %p11818_p6 = por %p11817_p5, %p11816_p4 }
 0x1bd   : > { %p11819_p7 = pnand %p11818_p6, %p11812_p2 }
 0x1bf   : > { %11088 = vmatmul.mubr.bf16.gmra.mrb[20].mxu1 %v9875_v62 }
 0x1c1   : > { %11080 = vmatmul.mubr.bf16.gmra.mrb[4].mxu0 %v9871_v10 }
 0x26a   : > { %v10661_v41 = vpop.f32.mrb[0].mxu1 }
 0x26b   : > { %v4161_v46 = vpop.f32.mrb[1].mxu1 }
 0x26c   : > { %v10662_v24 = vpop.f32.mrb[2].mxu1 }
 0x26d   : > { %v4164_v13 = vpop.f32.mrb[3].mxu1 }
 0x272   : > { %v13831_v12 = vpop.f32.mrb[4].mxu1 }
 0x273   : > { %v13833_v21 = vpop.f32.mrb[5].mxu1 }
 0x274   : > { %v13835_v27 = vpop.f32.mrb[6].mxu1 }
 0x275   : > { %v13837_v23 = vpop.f32.mrb[7].mxu1 }
 0x27a   : > { %v10669_v47 = vpop.f32.mrb[8].mxu1 }
 0x27b   : > { %v4193_v52 = vpop.f32.mrb[9].mxu1 }
 0x27c   : > { %v10670_v63 = vpop.f32.mrb[10].mxu1  ;;  %v11053_v48 = vpop.f32.mrb[8].mxu0 }
 0x27d   : > { %v4196_v14 = vpop.f32.mrb[11].mxu1  ;;  %v11115_v49 = vadd.f32 %v11053_v48, %v10669_v47  ;;  %v8033_v50 = vpop.f32.mrb[9].mxu0 }
 0x27e   : > { %v11117_v32 = vadd.f32 %v8033_v50, %v4193_v52  ;;  %v11054_v17 = vpop.f32.mrb[10].mxu0 }
 0x27f   : > { %v11119_v61 = vadd.f32 %v11054_v17, %v10670_v63  ;;  %v8036_v4 = vpop.f32.mrb[11].mxu0 }
 0x280   : > { %v11121_v28 = vadd.f32 %v8036_v4, %v4196_v14 }
 0x282   : > { %v10673_v1 = vpop.f32.mrb[12].mxu1 }
 0x283   : > { %v4209_v53 = vpop.f32.mrb[13].mxu1 }
 0x284   : > { %v11057_v54 = vpop.f32.mrb[12].mxu0  ;;  %v10674_v55 = vpop.f32.mrb[14].mxu1 }
 0x285   : > { %v11123_v18 = vadd.f32 %v11057_v54, %v10673_v1  ;;  %v8049_v45 = vpop.f32.mrb[13].mxu0  ;;  %v4212_v43 = vpop.f32.mrb[15].mxu1 }
 0x286   : > { %v11125_v56 = vadd.f32 %v8049_v45, %v4209_v53  ;;  %v11058_v57 = vpop.f32.mrb[14].mxu0 }
 0x287   : > { %v11127_v5 = vadd.f32 %v11058_v57, %v10674_v55  ;;  %v8052_v59 = vpop.f32.mrb[15].mxu0 }
 0x288   : > { %v13841_v60 = vadd.f32 %v8052_v59, %v4212_v43 }
 0x28a   : > { %v11085_v6 = vpop.f32.mrb[16].mxu1 }
 0x28b   : > { %v11116_v8 = vadd.f32 %v11115_v49, %v11085_v6  ;;  %v8355_v38 = vpop.f32.mrb[17].mxu1 }
 0x28c   : > { %v11077_v2 = vpop.f32.mrb[0].mxu0  ;;  %v11118_v20 = vadd.f32 %v11117_v32, %v8355_v38  ;;  %v11086_v26 = vpop.f32.mrb[18].mxu1 }
 0x28d   : > { %v11107_v3 = vadd.f32 %v11077_v2, %v10661_v41  ;;  %v8323_v7 = vpop.f32.mrb[1].mxu0  ;;  %v8454_v0 = vadd.f32 %v11116_v8, %v13849_v58  ;;  %v11120_v30 = vadd.f32 %v11119_v61, %v11086_v26  ;;  %v8358_v22 = vpop.f32.mrb[19].mxu1 }
 0x28e   : > { %v11108_v9 = vadd.f32 %v8323_v7, %v4161_v46  ;;  %v11078_v11 = vpop.f32.mrb[2].mxu0  ;;  %v8452_v19 = vadd.f32 %v11118_v20, %v13849_v58  ;;  %v11122_v33 = vadd.f32 %v11121_v28, %v8358_v22 }
 0x28f   : > { %v8446_v16 = vadd.f32 %v11107_v3, %v13849_v58  ;;  %v11109_v25 = vadd.f32 %v11078_v11, %v10662_v24  ;;  %v8326_v42 = vpop.f32.mrb[3].mxu0  ;;  %8470 = vst [vmem:[%s13854_s9 + $0x50] sm:$0xff] %v8454_v0  ;;  %v8455_v34 = vadd.f32 %v11120_v30, %v13849_v58 }
 0x290   : > { %v8444_v29 = vadd.f32 %v11108_v9, %v13849_v58  ;;  %v11110_v44 = vadd.f32 %v8326_v42, %v4164_v13  ;;  %8468 = vst [vmem:[%s13854_s9 + $0x40] sm:$0xff] %v8452_v19  ;;  %v8453_v36 = vadd.f32 %v11122_v33, %v13849_v58 }
 0x291   : > { %8462 = vst [vmem:[%s13854_s9 + $0x10] sm:$0xff] %v8446_v16  ;;  %v8447_v31 = vadd.f32 %v11109_v25, %v13849_v58  ;;  %8471 = vst [vmem:[%s13854_s9 + $0x58] sm:$0xff] %v8455_v34 }
 0x292   : > { %8460 = vst [vmem:[%s13854_s9] sm:$0xff] %v8444_v29  ;;  %v8445_v35 = vadd.f32 %v11110_v44, %v13849_v58  ;;  %8469 = vst [vmem:[%s13854_s9 + $0x48] sm:$0xff] %v8453_v36  ;;  %v11089_v40 = vpop.f32.mrb[20].mxu1 }
 0x293   : > { %8463 = vst [vmem:[%s13854_s9 + $0x18] sm:$0xff] %v8447_v31  ;;  %v11124_v10 = vadd.f32 %v11123_v18, %v11089_v40  ;;  %v8371_v62 = vpop.f32.mrb[21].mxu1 }
 0x294   : > { %8461 = vst [vmem:[%s13854_s9 + $0x8] sm:$0xff] %v8445_v35  ;;  %v11081_v37 = vpop.f32.mrb[4].mxu0  ;;  %v11126_v24 = vadd.f32 %v11125_v56, %v8371_v62  ;;  %v11090_v47 = vpop.f32.mrb[22].mxu1 }
 0x295   : > { %v11111_v39 = vadd.f32 %v11081_v37, %v13831_v12  ;;  %v8339_v15 = vpop.f32.mrb[5].mxu0  ;;  %v8458_v12 = vadd.f32 %v11124_v10, %v13849_v58  ;;  %v8374_v14 = vpop.f32.mrb[23].mxu1 }
 0x296   : > { %v11112_v51 = vadd.f32 %v8339_v15, %v13833_v21  ;;  %v11082_v41 = vpop.f32.mrb[6].mxu0  ;;  %v11128_v21 = vadd.f32 %v11127_v5, %v11090_v47  ;;  %v11130_v50 = vadd.f32 %v13841_v60, %v8374_v14 }
 0x297   : > { %v8450_v46 = vadd.f32 %v11111_v39, %v13849_v58  ;;  %v11113_v13 = vadd.f32 %v11082_v41, %v13835_v27  ;;  %v8342_v52 = vpop.f32.mrb[7].mxu0  ;;  %v8456_v27 = vadd.f32 %v11126_v24, %v13849_v58  ;;  %8474 = vst [vmem:[%s13854_s9 + $0x70] sm:$0xff] %v8458_v12 }
 0x298   : > { %v8448_v63 = vadd.f32 %v11112_v51, %v13849_v58  ;;  %v11114_v48 = vadd.f32 %v8342_v52, %v13837_v23  ;;  %v8459_v32 = vadd.f32 %v11128_v21, %v13849_v58  ;;  %v8457_v23 = vadd.f32 %v11130_v50, %v13849_v58 }
 0x299   : > { %8466 = vst [vmem:[%s13854_s9 + $0x30] sm:$0xff] %v8450_v46  ;;  %v8451_v49 = vadd.f32 %v11113_v13, %v13849_v58  ;;  %8472 = vst [vmem:[%s13854_s9 + $0x60] sm:$0xff] %v8456_v27 }
 0x29a   : > { %8464 = vst [vmem:[%s13854_s9 + $0x20] sm:$0xff] %v8448_v63  ;;  %v8449_v17 = vadd.f32 %v11114_v48, %v13849_v58  ;;  %8475 = vst [vmem:[%s13854_s9 + $0x78] sm:$0xff] %v8459_v32 }
 0x29b   : > { %8467 = vst [vmem:[%s13854_s9 + $0x38] sm:$0xff] %v8451_v49  ;;  %8473 = vst [vmem:[%s13854_s9 + $0x68] sm:$0xff] %v8457_v23 }
 0x29c   : > { %8465 = vst [vmem:[%s13854_s9 + $0x28] sm:$0xff] %v8449_v17 }
 0x29d   : > { %11822 = shalt.err (!%p11819_p7)
}
 0x29e   : > { %s11823_s27 = scalar_lea.hbm %s13893_s24, 2048  ;;  %s11827_s11 = scalar_lea.hbm %s13961_s4, 8192 }
 0x29f   : > { %p11824_p9 = scmp.ne.s32.totalorder %s13893_s24, %s11823_s27  ;;  %p11828_p12 = scmp.lt.u32.totalorder %s13893_s24, %s13961_s4 }
 0x2a0   : > { %p11829_p13 = scmp.lt.u32.totalorder %s11827_s11, %s11823_s27  ;;  %p11831_p1 = scmp.lt.u32.totalorder %s11823_s27, %s13893_s24 }
 0x2a1   : > { %p11825_p10 = pnand %p11824_p9, %p11984_p3 }
 0x2a2   : > { %p11830_p0 = por %p11829_p13, %p11828_p12 }
 0x2a3   : > { %p11826_p11 = pneg %p11825_p10 }
 0x2a4   : > { %p11832_p2 = por %p11831_p1, %p11830_p0 }
 0x2a6   : > { %p11833_p4 = pnand %p11832_p2, %p11826_p11 }
 0x2a8   : > { %11836 = shalt.err (!%p11833_p4)
}
 0x2a9   : > { %s11906_s14 = smov 128   ;;  %s11907_s23 = smov 8  }
 0x2aa   : > { %11492 = dma.vmem_to_hbm [thread:$0]  (%p11984_p3), %s13895_s19, 2048, %s13893_s24, %s13905_s8, %s11906_s14, %s11906_s14, %s11907_s23  }
 0x2ab PF: > { %p11498_p5 = scmp.ge.s32.totalorder %s11903_s22, 2  ;;  %s8507_s30 = sand.u32 1, %s11875_s15  }
 0x2ac   : > { %s8508_s5 = scalar_lea.sflag [#allocation4], %s8507_s30 }
 0x2ad   : > { %p11495_p6 = pnand %p11498_p5, %p11993_p8 }
 0x2af   : > { %11870 = dma.done.wait (!%p11495_p6), %s8508_s5, 2048  }
 0x2b0   : > { %11872 = vsyncadd (!%p11495_p6), %s8508_s5, 4294965248  ;;  %s17_s22 = sadd.s32 1, %s11903_s22   ;;  %s13970_s15 = smov %s11879_s16 }
 0x2b1   : > { %p14_p7 = scmp.ge.s32.totalorder %s17_s22, 6   ;;  %s13971_s16 = smov %s11883_s17 }
 0x2b2   : > { %s13972_s17 = smov %s12002_s7  ;;  %s13973_s18 = smov %s11895_s20 }
 0x2b3   : > { %s13974_s19 = smov %s11899_s21  ;;  %s13975_s20 = smov %s13978_s25 }
 0x2b4   : > { %s13976_s21 = smov %s13982_s26  ;;  %16 = sbr.rel (!%p14_p7) target bundleno = 5 (0x5), region = 114 }
 0x2bb   :  { %8513 = vsyncpa [#allocation4], 1 }
 0x2bc   :  { %8515 = vsyncpa [#allocation4 + $0x1], 1 }

// kernel: tpu_custom_call.1
= control target key start
LH: loop header
LB: loop body
LE: loop exit
PB: predicated region body
PF: predicated region fallthrough
CT: control target
= control target key end

     0   :  { %9 = vsyncpa [#allocation4], 0  ;;  %s13957_s0 = inlined_call_operand.vmem [shape: bf16[4,44,52,128], index: 0, kind: input, shape index: {}]   ;;  %s13958_s1 = inlined_call_operand.vmem [shape: bf16[128,128], index: 1, kind: input, shape index: {}]   ;;  %s13959_s2 = inlined_call_operand.vmem [shape: bf16[3,8,128,128], index: 2, kind: input, shape index: {}]   ;;  %s13960_s3 = inlined_call_operand.vmem [shape: f32[2,1,128], index: 3, kind: input, shape index: {}]   ;;  %s13961_s4 = inlined_call_operand.hbm [shape: f32[2,256,128], index: 4, kind: output, shape index: {}]  }
   0x1   :  { %11 = vsyncpa [#allocation4 + $0x1], 0  ;;  %s11933_s15 = smov 0   ;;  %s11935_s16 = smov 0  }
   0x2   :  { %s11937_s17 = smov 0   ;;  %s11939_s18 = smov 0  }
   0x3   :  { %s11941_s19 = smov 0   ;;  %s11943_s20 = smov 0  }
   0x4   :  { %s11945_s21 = smov 0   ;;  %s11947_s22 = smov 0  }
   0x5 LB: > { %s8616_s23 = sadd.s32 4294967295, %s11903_s22   ;;  %s8617_s24 = sadd.s32 4294967294, %s11903_s22   ;;  %s11903_s22 = sphi %s11947_s22, %s17_s22   ;;  %s11899_s21 = sphi %s11945_s21, %s13976_s21   ;;  %s11895_s20 = sphi %s11943_s20, %s13975_s20   ;;  %s11891_s19 = sphi %s11941_s19, %s13974_s19   ;;  %s11887_s18 = sphi %s11939_s18, %s13973_s18   ;;  %s11883_s17 = sphi %s11937_s17, %s13972_s17   ;;  %s11879_s16 = sphi %s11935_s16, %s13971_s16   ;;  %s11875_s15 = sphi %s11933_s15, %s13970_s15  }
   0x6   : > { %s32_s25 = sadd.s32 1, %s11895_s20  ;;  %s36_s26 = sadd.s32 1, %s11899_s21 }
   0x7   : > { %p34_p0 = scmp.ge.s32.totalorder %s32_s25, 2  ;;  %p165_p1 = scmp.ne.s32.totalorder %s11883_s17, %s11879_s16 }
   0x8   : > { %p166_p2 = scmp.eq.s32.totalorder %s8616_s23, 3  ;;  %p171_p5 = scmp.ne.s32.totalorder %s11879_s16, %s11875_s15 }
   0x9   : > { %s13978_s25 = smov (%p34_p0, %s32_s25), 0  ;;  %s13980_s26 = smov (!%p34_p0, %s36_s26), %s11899_s21 }
   0xa   : > { %s151_s27 = ssub.s32 %s11895_s20, %s13978_s25  ;;  %p11984_p3 = por %p166_p2, %p165_p1 }
   0xb   : > { %p38_p4 = scmp.ge.s32.totalorder %s13980_s26, 2  ;;  %p172_p6 = scmp.eq.s32.totalorder %s8617_s24, 3 }
   0xc   : > { %p8624_p7 = scmp.ge.s32.totalorder %s11903_s22, 1  ;;  %p229_p9 = scmp.lt.s32.totalorder %s11903_s22, 5 }
   0xd   : > { %s13982_s26 = smov (%p38_p4, %s13980_s26), 0  ;;  %p11993_p8 = por %p172_p6, %p171_p5 }
   0xe   : > { %s150_s30 = ssub.s32 %s11899_s21, %s13982_s26  ;;  %s155_s5 = sadd.s32 1, %s11883_s17 }
   0xf   : > { %s152_s6 = sor.u32 %s151_s27, %s150_s30  ;;  %p230_p10 = pnand %p8624_p7, %p229_p9 }
  0x10   : > { %p153_p11 = scmp.eq.s32.totalorder %s152_s6, 0  ;;  %v11565_v0 = vld [vmem:[%s13958_s1] sm:$0xff] (!%p230_p10)   ;;  %s8626_s10 = sshll.u32 (!%p230_p10), %s11891_s19, 1  ;;  %v11567_v2 = vld [vmem:[%s13958_s1 + $0x8] sm:$0xff] (!%p230_p10)   ;;  %v11569_v4 = vld [vmem:[%s13958_s1 + $0x10] sm:$0xff] (!%p230_p10)   ;;  %vm371_vm0 = vcmask (!%p230_p10), 1042432  }
  0x11   : > { %233 = sbr.rel (%p230_p10) target bundleno = 683 (0x2ab), region = 36  ;;  %v11566_v1 = vld [vmem:[%s13959_s2 + $0x2c0] sm:$0xff] (!%p230_p10)   ;;  %s274_s13 = sadd.s32 (!%p230_p10), %s11887_s18, %s8626_s10  ;;  %10291 = vmatprep.subr.bf16.mxu1 (!%p230_p10), %v11565_v0  ;;  %v11568_v3 = vld [vmem:[%s13959_s2 + $0x2c8] sm:$0xff] (!%p230_p10)   ;;  %v11570_v5 = vld [vmem:[%s13959_s2 + $0x2d0] sm:$0xff] (!%p230_p10)   ;;  %vm372_vm1 = vcmask (!%p230_p10), 1046532   ;;  %vm3311_vm2 = vcmask (!%p230_p10), 1040384  }
  0x12   : > { %s12002_s7 = scalar_select %p153_p11, %s11883_s17, %s155_s5  }
  0x13   : > { %p275_p12 = scmp.lt.s32.totalorder (!%p230_p10), %s274_s13, 3  ;;  %10675 = vmatprep.subr.bf16.mxu0 (!%p230_p10), %v11566_v1  ;;  %10292 = vmatpush3.bf16.msra.mxu1 (!%p230_p10), %v11565_v0  ;;  %v11571_v6 = vld [vmem:[%s13958_s1 + $0x18] sm:$0xff] (!%p230_p10)   ;;  %v11573_v8 = vld [vmem:[%s13958_s1 + $0x20] sm:$0xff] (!%p230_p10)   ;;  %v11575_v10 = vld [vmem:[%s13958_s1 + $0x28] sm:$0xff] (!%p230_p10)   ;;  %vm3312_vm3 = vcmask (!%p230_p10), 1044484   ;;  %vm828_vm6 = vcmask (!%p230_p10), 1041408  }
  0x14   : > { %10676 = vmatpush3.bf16.msra.mxu0 (!%p230_p10), %v11566_v1  ;;  %10293 = vmatprep.subr.bf16.mxu1 (!%p230_p10), %v11567_v2  ;;  %v11572_v7 = vld [vmem:[%s13959_s2 + $0x2d8] sm:$0xff] (!%p230_p10)   ;;  %v11574_v9 = vld [vmem:[%s13959_s2 + $0x2e0] sm:$0xff] (!%p230_p10)   ;;  %v11576_v14 = vld [vmem:[%s13959_s2 + $0x2e8] sm:$0xff] (!%p230_p10)   ;;  %vm829_vm7 = vcmask (!%p230_p10), 1045508   ;;  %p297_p13 = scmp.lt.s32.totalorder (!%p230_p10), %s11891_s19, 1  ;;  %s270_s27 = sand.u32 (!%p230_p10), 1, %s11879_s16  }
  0x15   : > { %10677 = vmatprep.subr.bf16.mxu0 (!%p230_p10), %v11568_v3  ;;  %vm12050_vm4 = vmor (!%p230_p10), %vm371_vm0, %vm372_vm1  ;;  %v11577_v24 = vld [vmem:[%s13958_s1 + $0x30] sm:$0xff] (!%p230_p10)   ;;  %v11579_v37 = vld [vmem:[%s13958_s1 + $0x38] sm:$0xff] (!%p230_p10)   ;;  %s9886_s10 = sshll.u32 (!%p230_p10), %s11887_s18, 4  ;;  %s9887_s11 = sshll.u32 (!%p230_p10), %s11891_s19, 5 }
  0x16   : > { %vm12059_vm5 = vmor (!%p230_p10), %vm3311_vm2, %vm3312_vm3  ;;  %v11578_v30 = vld [vmem:[%s13959_s2 + $0x2f0] sm:$0xff] (!%p230_p10)   ;;  %v11580_v43 = vld [vmem:[%s13959_s2 + $0x2f8] sm:$0xff] (!%p230_p10)   ;;  %s13870_s12 = sadd.s32 (!%p230_p10), %s9887_s11, %s9886_s10  ;;  %s11905_s5 = smov (!%p230_p10), [#allocation3]  }
  0x17   : > { %10294 = vmatpush3.bf16.msra.mxu1 (!%p230_p10), %v11567_v2  ;;  %v11581_v53 = vld [vmem:[%s13959_s2] sm:$0xff] (!%p230_p10)   ;;  %vm12221_vm8 = vmor (!%p230_p10), %vm828_vm6, %vm829_vm7  ;;  %s9888_s18 = sshll.u32 (!%p230_p10), %s13870_s12, 7 }
  0x18   : > { %s13984_s13 = smov (!%p275_p12, %s274_s13), 3  ;;  %10678 = vmatpush3.bf16.msra.mxu0 %v11568_v3  ;;  %10295 = vmatprep.subr.bf16.mxu1 %v11569_v4  ;;  %v11582_v58 = vld [vmem:[%s13959_s2 + $0x300] sm:$0xff]   ;;  %s13893_s24 = scalar_lea.hbm %s13961_s4, %s9888_s18 }
  0x19   : > { %10679 = vmatprep.subr.bf16.mxu0 %v11570_v5  ;;  %s11491_s14 = smul.u32 1232, %s13984_s13  ;;  %s8625_s13 = sshll.u32 %s270_s27, 7 }
  0x1a   : > { %s13854_s9 = scalar_lea.vmem [#allocation3], %s8625_s13 }
  0x1b   : > { %10296 = vmatpush3.bf16.msra.mxu1 %v11569_v4  ;;  %s12039_s8 = scalar_lea.vmem %s13957_s0, %s11491_s14 }
  0x1c   : > { %10680 = vmatpush3.bf16.msra.mxu0 %v11570_v5  ;;  %10297 = vmatprep.subr.bf16.mxu1 %v11571_v6  ;;  %v8628_v11 = vld [vmem:[%s12039_s8 + $0x200] sm:$0xe]  ;;  %v8629_v12 = vld [vmem:[%s12039_s8 + $0x204] sm:$0xf]  ;;  %v8630_v13 = vld [vmem:[%s12039_s8 + $0x208] sm:$0x1] }
  0x1d   : > { %10681 = vmatprep.subr.bf16.mxu0 %v11572_v7  ;;  %v8652_v16 = vrot.slane %v8628_v11, 9  ;;  %v376_v17 = vrot.slane %v8629_v12, 5  ;;  %v379_v18 = vrot.slane %v8630_v13, 5  ;;  %v9100_v19 = vld [vmem:[%s12039_s8 + $0x1f8] sm:$0x8] }
  0x1e   : > { %v9101_v20 = vld [vmem:[%s12039_s8 + $0x1fc] sm:$0xf]  ;;  %v9102_v21 = vld [vmem:[%s12039_s8 + $0x200] sm:$0x7]  ;;  %v9388_v23 = vrot.slane %v9100_v19, 11 }
  0x1f   : > { %10298 = vmatpush3.bf16.msra.mxu1 %v11571_v6  ;;  %v377_v25 = vsel %vm12050_vm4, %v8652_v16, %v376_v17  ;;  %v378_v26 = vrot.slane %v376_v17, 4  ;;  %v4282_v27 = vrot.slane %v9101_v20, 7  ;;  %v4285_v28 = vrot.slane %v9102_v21, 7  ;;  %v8631_v29 = vld [vmem:[%s12039_s8 + $0x21c] sm:$0xe]  ;;  %v11584_v21 = vld [vmem:[%s13959_s2 + $0x308] sm:$0xff]  }
  0x20   : > { %10682 = vmatpush3.bf16.msra.mxu0 %v11572_v7  ;;  %10299 = vmatprep.subr.bf16.mxu1 %v11573_v8  ;;  %v8632_v31 = vld [vmem:[%s12039_s8 + $0x220] sm:$0xf]  ;;  %v8633_v32 = vld [vmem:[%s12039_s8 + $0x224] sm:$0x1]  ;;  %v8653_v39 = vrot.slane %v8631_v29, 9 }
  0x21   : > { %10683 = vmatprep.subr.bf16.mxu0 %v11574_v9  ;;  %v380_v33 = vsel %vm12050_vm4, %v378_v26, %v379_v18  ;;  %v4283_v34 = vsel %vm12059_vm5, %v9388_v23, %v4282_v27  ;;  %v4284_v35 = vrot.slane %v4282_v27, 4  ;;  %v383_v36 = vrot.slane %v8632_v31, 5  ;;  %v9103_v41 = vld [vmem:[%s12039_s8 + $0x214] sm:$0x8]  ;;  %v9104_v42 = vld [vmem:[%s12039_s8 + $0x218] sm:$0xf] }
  0x22   : > { %v8660_v38 = vcombine.low %v377_v25, %v380_v33  ;;  %v386_v40 = vrot.slane %v8633_v32, 5  ;;  %v9105_v46 = vld [vmem:[%s12039_s8 + $0x21c] sm:$0x7]  ;;  %v9389_v47 = vrot.slane %v9103_v41, 11  ;;  %v4289_v49 = vrot.slane %v9104_v42, 7  ;;  %v11585_v32 = vld [vmem:[%s13959_s2 + $0x10] sm:$0xff]  }
  0x23   : > { %10300 = vmatpush3.bf16.msra.mxu1 %v11573_v8  ;;  %v4286_v44 = vsel %vm12059_vm5, %v4284_v35, %v4285_v28  ;;  %v385_v45 = vrot.slane %v383_v36, 4  ;;  %v4292_v50 = vrot.slane %v9105_v46, 7  ;;  %v384_v51 = vsel %vm12050_vm4, %v8653_v39, %v383_v36  ;;  %v8634_v56 = vld [vmem:[%s12039_s8 + $0x238] sm:$0xe]  ;;  %v8635_v57 = vld [vmem:[%s12039_s8 + $0x23c] sm:$0xf] }
  0x24   : > { %10684 = vmatpush3.bf16.msra.mxu0 %v11574_v9  ;;  %10301 = vmatprep.subr.bf16.mxu1 %v11575_v10  ;;  %v9412_v48 = vcombine.low %v4283_v34, %v4286_v44  ;;  %v4290_v54 = vsel %vm12059_vm5, %v9389_v47, %v4289_v49  ;;  %v4291_v55 = vrot.slane %v4289_v49, 4  ;;  %v8636_v59 = vld [vmem:[%s12039_s8 + $0x240] sm:$0x1]  ;;  %v8654_v60 = vrot.slane %v8634_v56, 9  ;;  %v9106_v62 = vld [vmem:[%s12039_s8 + $0x230] sm:$0x8] }
  0x25   : > { %10685 = vmatprep.subr.bf16.mxu0 %v11576_v14  ;;  %10307 = vmatprep.mubr.bf16.mxu1 %v8660_v38  ;;  %v387_v52 = vsel %vm12050_vm4, %v385_v45, %v386_v40  ;;  %v390_v61 = vrot.slane %v8635_v57, 5  ;;  %v393_v0 = vrot.slane %v8636_v59, 5  ;;  %v9107_v1 = vld [vmem:[%s12039_s8 + $0x234] sm:$0xf]  ;;  %v9108_v2 = vld [vmem:[%s12039_s8 + $0x238] sm:$0x7] }
  0x26   : > { %10691 = vmatprep.mubr.bf16.mxu0 %v9412_v48  ;;  %v4293_v63 = vsel %vm12059_vm5, %v4291_v55, %v4292_v50  ;;  %v9390_v3 = vrot.slane %v9106_v62, 11  ;;  %v8661_v4 = vcombine.low %v384_v51, %v387_v52  ;;  %v4296_v7 = vrot.slane %v9107_v1, 7  ;;  %v8637_v8 = vld [vmem:[%s12039_s8 + $0x254] sm:$0xe]  ;;  %v8638_v9 = vld [vmem:[%s12039_s8 + $0x258] sm:$0xf] }
  0x27   : > { %10302 = vmatpush3.bf16.msra.mxu1 %v11575_v10  ;;  %v9413_v5 = vcombine.low %v4290_v54, %v4293_v63  ;;  %v392_v6 = vrot.slane %v390_v61, 4  ;;  %v11583_v10 = vld [vmem:[%s13959_s2 + $0x8] sm:$0xff]   ;;  %v391_v11 = vsel %vm12050_vm4, %v8654_v60, %v390_v61  ;;  %v4299_v12 = vrot.slane %v9108_v2, 7  ;;  %v8639_v13 = vld [vmem:[%s12039_s8 + $0x25c] sm:$0x1]  ;;  %v11586_v38 = vld [vmem:[%s13959_s2 + $0x310] sm:$0xff]  }
  0x28   : > { %10686 = vmatpush3.bf16.msra.mxu0 %v11576_v14  ;;  %10303 = vmatprep.subr.bf16.mxu1 %v11577_v24  ;;  %v8655_v14 = vrot.slane %v8637_v8, 9  ;;  %v397_v16 = vrot.slane %v8638_v9, 5  ;;  %v4297_v18 = vsel %vm12059_vm5, %v9390_v3, %v4296_v7  ;;  %v4298_v19 = vrot.slane %v4296_v7, 4  ;;  %v9110_v25 = vld [vmem:[%s12039_s8 + $0x250] sm:$0xf]  ;;  %v11587_v52 = vld [vmem:[%s13959_s2 + $0x18] sm:$0xff]  }
  0x29   : > { %10687 = vmatprep.subr.bf16.mxu0 %v11578_v30  ;;  %v394_v17 = vsel %vm12050_vm4, %v392_v6, %v393_v0  ;;  %v400_v20 = vrot.slane %v8639_v13, 5  ;;  %v9111_v28 = vld [vmem:[%s12039_s8 + $0x254] sm:$0x7]  ;;  %v8640_v39 = vld [vmem:[%s12039_s8 + $0x270] sm:$0xe] }
  0x2a   : > { %v399_v23 = vrot.slane %v397_v16, 4  ;;  %v8662_v26 = vcombine.low %v391_v11, %v394_v17  ;;  %v4300_v27 = vsel %vm12059_vm5, %v4298_v19, %v4299_v12  ;;  %v4306_v33 = vrot.slane %v9111_v28, 7  ;;  %v8641_v40 = vld [vmem:[%s12039_s8 + $0x274] sm:$0xf]  ;;  %v8642_v42 = vld [vmem:[%s12039_s8 + $0x278] sm:$0x1] }
  0x2b   : > { %10304 = vmatpush3.bf16.msra.mxu1 %v11577_v24  ;;  %v9109_v24 = vld [vmem:[%s12039_s8 + $0x24c] sm:$0x8]  ;;  %v9414_v31 = vcombine.low %v4297_v18, %v4300_v27  ;;  %v398_v34 = vsel %vm12050_vm4, %v8655_v14, %v397_v16  ;;  %v404_v44 = vrot.slane %v8641_v40, 5  ;;  %v9112_v45 = vld [vmem:[%s12039_s8 + $0x268] sm:$0x8]  ;;  %v407_v48 = vrot.slane %v8642_v42, 5 }
  0x2c   : > { %10688 = vmatpush3.bf16.msra.mxu0 %v11578_v30  ;;  %10305 = vmatprep.subr.bf16.mxu1 %v11579_v37  ;;  %v9391_v29 = vrot.slane %v9109_v24, 11  ;;  %v4303_v30 = vrot.slane %v9110_v25, 7  ;;  %v401_v35 = vsel %vm12050_vm4, %v399_v23, %v400_v20  ;;  %v9113_v49 = vld [vmem:[%s12039_s8 + $0x26c] sm:$0xf]  ;;  %v9114_v50 = vld [vmem:[%s12039_s8 + $0x270] sm:$0x7] }
  0x2d   : > { %10689 = vmatprep.subr.bf16.mxu0 %v11580_v43  ;;  %v8663_v46 = vcombine.low %v398_v34, %v401_v35  ;;  %v9392_v51 = vrot.slane %v9112_v45, 11  ;;  %v406_v54 = vrot.slane %v404_v44, 4  ;;  %v4310_v55 = vrot.slane %v9113_v49, 7  ;;  %v8643_v57 = vld [vmem:[%s12039_s8 + $0x28c] sm:$0xe]  ;;  %v11590_v12 = vld [vmem:[%s13959_s2 + $0x320] sm:$0xff]  }
  0x2e   : > { %v4304_v36 = vsel %vm12059_vm5, %v9391_v29, %v4303_v30  ;;  %v4313_v56 = vrot.slane %v9114_v50, 7  ;;  %v8644_v59 = vld [vmem:[%s12039_s8 + $0x290] sm:$0xf]  ;;  %v8645_v60 = vld [vmem:[%s12039_s8 + $0x294] sm:$0x1]  ;;  %v8657_v61 = vrot.slane %v8643_v57, 9 }
  0x2f   : > { %10306 = vmatpush3.bf16.msra.mxu1 %v11579_v37  ;;  %v4305_v37 = vrot.slane %v4303_v30, 4  ;;  %v408_v62 = vsel %vm12050_vm4, %v406_v54, %v407_v48  ;;  %v4311_v63 = vsel %vm12059_vm5, %v9392_v51, %v4310_v55  ;;  %v4312_v0 = vrot.slane %v4310_v55, 4  ;;  %v9116_v6 = vld [vmem:[%s12039_s8 + $0x288] sm:$0xf]  ;;  %v8647_v24 = vld [vmem:[%s12039_s8 + $0x2ac] sm:$0xf] }
  0x30   : > { %10690 = vmatpush3.bf16.msra.mxu0 %v11580_v43  ;;  %10323 = vmatprep.subr.bf16.mxu1 %v11581_v53  ;;  %v8656_v43 = vrot.slane %v8640_v39, 9  ;;  %v411_v1 = vrot.slane %v8644_v59, 5  ;;  %v414_v3 = vrot.slane %v8645_v60, 5  ;;  %v4317_v14 = vrot.slane %v9116_v6, 7  ;;  %v8646_v23 = vld [vmem:[%s12039_s8 + $0x2a8] sm:$0xe] }
  0x31   : > { %10707 = vmatprep.subr.bf16.mxu0 %v11582_v58  ;;  %v4307_v41 = vsel %vm12059_vm5, %v4305_v37, %v4306_v33  ;;  %v4314_v7 = vsel %vm12059_vm5, %v4312_v0, %v4313_v56  ;;  %v11592_v25 = vld [vmem:[%s13959_s2 + $0x328] sm:$0xff]   ;;  %v8658_v27 = vrot.slane %v8646_v23, 9  ;;  %v418_v28 = vrot.slane %v8647_v24, 5  ;;  %v9118_v29 = vld [vmem:[%s12039_s8 + $0x2a0] sm:$0x8]  ;;  %v11593_v49 = vld [vmem:[%s13959_s2 + $0x30] sm:$0xff]  }
  0x32   : > { %10308 = vmatmul.mubr.bf16.vlgmr.msra.gmra.mrb[0].mxu1 %v8661_v4  ;;  %v9415_v47 = vcombine.low %v4304_v36, %v4307_v41  ;;  %v11589_v4 = vld [vmem:[%s13959_s2 + $0x20] sm:$0xff]   ;;  %v412_v8 = vsel %vm12050_vm4, %v8657_v61, %v411_v1  ;;  %v413_v9 = vrot.slane %v411_v1, 4  ;;  %v9416_v13 = vcombine.low %v4311_v63, %v4314_v7  ;;  %v9120_v33 = vld [vmem:[%s12039_s8 + $0x2a8] sm:$0x7]  ;;  %v8651_v42 = vld [vmem:[%s12039_s8 + $0x2cc] sm:$0x1] }
  0x33   : > { %10692 = vmatmul.mubr.bf16.vlgmr.msra.gmra.mrb[0].mxu0 %v9413_v5  ;;  %10324 = vmatpush3.bf16.msra.mxu1 %v11581_v53  ;;  %v405_v53 = vsel %vm12050_vm4, %v8656_v43, %v404_v44  ;;  %v9115_v5 = vld [vmem:[%s12039_s8 + $0x284] sm:$0x8]  ;;  %v4319_v20 = vrot.slane %v4317_v14, 4  ;;  %v9394_v34 = vrot.slane %v9118_v29, 11  ;;  %v419_v36 = vsel %vm12050_vm4, %v8658_v27, %v418_v28  ;;  %v8650_v40 = vld [vmem:[%s12039_s8 + $0x2c8] sm:$0xf] }
  0x34   : > { %10708 = vmatpush3.bf16.msra.mxu0 %v11582_v58  ;;  %10325 = vmatprep.subr.bf16.mxu1 %v11583_v10  ;;  %v11588_v58 = vld [vmem:[%s13959_s2 + $0x318] sm:$0xff]   ;;  %v8664_v2 = vcombine.low %v405_v53, %v408_v62  ;;  %v9393_v11 = vrot.slane %v9115_v5, 11  ;;  %v415_v17 = vsel %vm12050_vm4, %v413_v9, %v414_v3  ;;  %v420_v37 = vrot.slane %v418_v28, 4  ;;  %v8649_v39 = vld [vmem:[%s12039_s8 + $0x2c4] sm:$0xe]  ;;  %v11594_v55 = vld [vmem:[%s13959_s2 + $0x330] sm:$0xff]  }
  0x35   : > { %10709 = vmatprep.subr.bf16.mxu0 %v11584_v21  ;;  %10311 = vmatprep.mubr.bf16.mxu1 %v8662_v26  ;;  %v8665_v18 = vcombine.low %v412_v8, %v415_v17  ;;  %v8648_v26 = vld [vmem:[%s12039_s8 + $0x2b0] sm:$0x1]  ;;  %v4327_v41 = vrot.slane %v9120_v33, 7  ;;  %v8659_v43 = vrot.slane %v8649_v39, 9  ;;  %v425_v44 = vrot.slane %v8650_v40, 5  ;;  %v11595_v3 = vld [vmem:[%s13959_s2 + $0x38] sm:$0xff]  }
  0x36   : > { %10695 = vmatprep.mubr.bf16.mxu0 %v9414_v31  ;;  %v4318_v19 = vsel %vm12059_vm5, %v9393_v11, %v4317_v14  ;;  %v421_v31 = vrot.slane %v8648_v26, 5  ;;  %v428_v48 = vrot.slane %v8651_v42, 5  ;;  %v9121_v53 = vld [vmem:[%s12039_s8 + $0x2bc] sm:$0x8]  ;;  %v9122_v54 = vld [vmem:[%s12039_s8 + $0x2c0] sm:$0xf] }
  0x37   : > { %10326 = vmatpush3.bf16.msra.mxu1 %v11583_v10  ;;  %v9117_v10 = vld [vmem:[%s12039_s8 + $0x28c] sm:$0x7]  ;;  %v426_v51 = vsel %vm12050_vm4, %v8659_v43, %v425_v44  ;;  %v9123_v57 = vld [vmem:[%s12039_s8 + $0x2c4] sm:$0x7]  ;;  %v4331_v59 = vrot.slane %v9122_v54, 7 }
  0x38   : > { %10710 = vmatpush3.bf16.msra.mxu0 %v11584_v21  ;;  %10327 = vmatprep.subr.bf16.mxu1 %v11585_v32  ;;  %v4320_v16 = vrot.slane %v9117_v10, 7  ;;  %v11591_v21 = vld [vmem:[%s13959_s2 + $0x28] sm:$0xff]   ;;  %v422_v45 = vsel %vm12050_vm4, %v420_v37, %v421_v31  ;;  %v4334_v62 = vrot.slane %v9123_v57, 7  ;;  %v8676_v5 = vld [vmem:[%s12039_s8 + $0x154] sm:$0xc]  ;;  %v11597_v27 = vld [vmem:[%s13959_s2 + $0x40] sm:$0xff]  }
  0x39   : > { %10711 = vmatprep.subr.bf16.mxu0 %v11586_v38  ;;  %v8666_v50 = vcombine.low %v419_v36, %v422_v45  ;;  %v8677_v6 = vld [vmem:[%s12039_s8 + $0x158] sm:$0xf]  ;;  %v8678_v8 = vld [vmem:[%s12039_s8 + $0x15c] sm:$0x3]  ;;  %v8808_v9 = vrot.slane %v8676_v5, 10  ;;  %v11598_v36 = vld [vmem:[%s13959_s2 + $0x340] sm:$0xff]  }
  0x3a   : > { %10312 = vmatmul.mubr.bf16.gmra.mrb[4].mxu1 %v8663_v46  ;;  %v4321_v30 = vsel %vm12059_vm5, %v4319_v20, %v4320_v16  ;;  %v833_v10 = vrot.slane %v8677_v6, 6  ;;  %v9220_v11 = vld [vmem:[%s12039_s8 + $0x204] sm:$0x8]  ;;  %v9221_v14 = vld [vmem:[%s12039_s8 + $0x208] sm:$0xf] }
  0x3b   : > { %10696 = vmatmul.mubr.bf16.gmra.mrb[4].mxu0 %v9415_v47  ;;  %10328 = vmatpush3.bf16.msra.mxu1 %v11585_v32  ;;  %v9119_v32 = vld [vmem:[%s12039_s8 + $0x2a4] sm:$0xf]  ;;  %v9417_v35 = vcombine.low %v4318_v19, %v4321_v30  ;;  %v9222_v16 = vld [vmem:[%s12039_s8 + $0x20c] sm:$0x7]  ;;  %v9428_v17 = vrot.slane %v9220_v11, 11  ;;  %v4604_v20 = vrot.slane %v9221_v14, 7 }
  0x3c   : > { %10712 = vmatpush3.bf16.msra.mxu0 %v11586_v38  ;;  %10329 = vmatprep.subr.bf16.mxu1 %v11587_v52  ;;  %v4324_v38 = vrot.slane %v9119_v32, 7  ;;  %v835_v19 = vrot.slane %v833_v10, 4  ;;  %v8679_v23 = vld [vmem:[%s12039_s8 + $0x170] sm:$0xc]  ;;  %v8680_v24 = vld [vmem:[%s12039_s8 + $0x174] sm:$0xf] }
  0x3d   : > { %10713 = vmatprep.subr.bf16.mxu0 %v11588_v58  ;;  %10315 = vmatprep.mubr.bf16.mxu1 %v8664_v2  ;;  %v4333_v2 = vrot.slane %v4331_v59, 4  ;;  %v8809_v26 = vrot.slane %v8679_v23, 10  ;;  %v4605_v29 = vsel %vm12059_vm5, %v9428_v17, %v4604_v20  ;;  %v4606_v30 = vrot.slane %v4604_v20, 4  ;;  %v9225_v40 = vld [vmem:[%s12039_s8 + $0x228] sm:$0x7]  ;;  %v11602_v20 = vld [vmem:[%s13959_s2 + $0x350] sm:$0xff]  }
  0x3e   : > { %10699 = vmatprep.mubr.bf16.mxu0 %v9416_v13  ;;  %v4325_v46 = vsel %vm12059_vm5, %v9394_v34, %v4324_v38  ;;  %v4326_v47 = vrot.slane %v4324_v38, 4  ;;  %v836_v13 = vrot.slane %v8678_v8, 6  ;;  %v840_v31 = vrot.slane %v8680_v24, 6  ;;  %v9223_v34 = vld [vmem:[%s12039_s8 + $0x220] sm:$0x8] }
  0x3f   : > { %10330 = vmatpush3.bf16.msra.mxu1 %v11587_v52  ;;  %v427_v52 = vrot.slane %v425_v44, 4  ;;  %v4335_v7 = vsel %vm12059_vm5, %v4333_v2, %v4334_v62  ;;  %v4614_v44 = vrot.slane %v9225_v40, 7  ;;  %v8687_v6 = vld [vmem:[%s12039_s8 + $0x1b0] sm:$0x3]  ;;  %v9231_v23 = vld [vmem:[%s12039_s8 + $0x260] sm:$0x7] }
  0x40   : > { %10714 = vmatpush3.bf16.msra.mxu0 %v11588_v58  ;;  %10331 = vmatprep.subr.bf16.mxu1 %v11589_v4  ;;  %v4328_v56 = vsel %vm12059_vm5, %v4326_v47, %v4327_v41  ;;  %v9395_v58 = vrot.slane %v9121_v53, 11  ;;  %v837_v28 = vsel %vm12221_vm8, %v835_v19, %v836_v13  ;;  %v841_v38 = vsel %vm12221_vm8, %v8809_v26, %v840_v31  ;;  %v8684_v53 = vld [vmem:[%s12039_s8 + $0x194] sm:$0x3]  ;;  %v9230_v19 = vld [vmem:[%s12039_s8 + $0x25c] sm:$0xf] }
  0x41   : > { %10715 = vmatprep.subr.bf16.mxu0 %v11590_v12  ;;  %v9418_v60 = vcombine.low %v4325_v46, %v4328_v56  ;;  %v429_v61 = vsel %vm12050_vm4, %v427_v52, %v428_v48  ;;  %v842_v39 = vrot.slane %v840_v31, 4  ;;  %v9429_v41 = vrot.slane %v9223_v34, 11  ;;  %v11600_v52 = vld [vmem:[%s13959_s2 + $0x348] sm:$0xff]   ;;  %v9226_v56 = vld [vmem:[%s12039_s8 + $0x23c] sm:$0x8] }
  0x42   : > { %10316 = vmatmul.mubr.bf16.gmra.mrb[8].mxu1 %v8665_v18  ;;  %v8667_v0 = vcombine.low %v426_v51, %v429_v61  ;;  %v4332_v1 = vsel %vm12059_vm5, %v9395_v58, %v4331_v59  ;;  %v834_v18 = vsel %vm12221_vm8, %v8808_v9, %v833_v10  ;;  %v8683_v51 = vld [vmem:[%s12039_s8 + $0x190] sm:$0xf]  ;;  %v850_v58 = vrot.slane %v8684_v53, 6  ;;  %v9227_v59 = vld [vmem:[%s12039_s8 + $0x240] sm:$0xf] }
  0x43   : > { %10700 = vmatmul.mubr.bf16.gmra.mrb[8].mxu0 %v9417_v35  ;;  %10332 = vmatpush3.bf16.msra.mxu1 %v11589_v4  ;;  %v11596_v4 = vld [vmem:[%s13959_s2 + $0x338] sm:$0xff]   ;;  %v8816_v32 = vcombine.low %v834_v18, %v837_v28  ;;  %v9224_v35 = vld [vmem:[%s12039_s8 + $0x224] sm:$0xf]  ;;  %v9430_v61 = vrot.slane %v9226_v56, 11  ;;  %v4618_v2 = vrot.slane %v9227_v59, 7  ;;  %v11601_v9 = vld [vmem:[%s13959_s2 + $0x50] sm:$0xff]  }
  0x44   : > { %10716 = vmatpush3.bf16.msra.mxu0 %v11590_v12  ;;  %10333 = vmatprep.subr.bf16.mxu1 %v11591_v21  ;;  %v9419_v12 = vcombine.low %v4332_v1, %v4335_v7  ;;  %v4611_v43 = vrot.slane %v9224_v35, 7  ;;  %v857_v13 = vrot.slane %v8687_v6, 6  ;;  %v9229_v18 = vld [vmem:[%s12039_s8 + $0x258] sm:$0x8]  ;;  %v4628_v28 = vrot.slane %v9231_v23, 7 }
  0x45   : > { %10717 = vmatprep.subr.bf16.mxu0 %v11592_v25  ;;  %10319 = vmatprep.mubr.bf16.mxu1 %v8666_v50  ;;  %v8682_v50 = vld [vmem:[%s12039_s8 + $0x18c] sm:$0xc]  ;;  %v4619_v11 = vsel %vm12059_vm5, %v9430_v61, %v4618_v2  ;;  %v9431_v24 = vrot.slane %v9229_v18, 11  ;;  %v8688_v34 = vld [vmem:[%s12039_s8 + $0x1c4] sm:$0xc]  ;;  %v11609_v18 = vld [vmem:[%s13959_s2 + $0x70] sm:$0xff]  }
  0x46   : > { %10703 = vmatprep.mubr.bf16.mxu0 %v9418_v60  ;;  %v4612_v47 = vsel %vm12059_vm5, %v9429_v41, %v4611_v43  ;;  %v4613_v48 = vrot.slane %v4611_v43, 4  ;;  %v8810_v54 = vrot.slane %v8682_v50, 10  ;;  %v9228_v60 = vld [vmem:[%s12039_s8 + $0x244] sm:$0x7]  ;;  %v8689_v35 = vld [vmem:[%s12039_s8 + $0x1c8] sm:$0xf] }
  0x47   : > { %10334 = vmatpush3.bf16.msra.mxu1 %v11591_v21  ;;  %v4607_v21 = vrot.slane %v9222_v16, 7  ;;  %v4621_v5 = vrot.slane %v9228_v60, 7  ;;  %v9232_v40 = vld [vmem:[%s12039_s8 + $0x274] sm:$0x8]  ;;  %v9233_v43 = vld [vmem:[%s12039_s8 + $0x278] sm:$0xf] }
  0x48   : > { %10718 = vmatpush3.bf16.msra.mxu0 %v11592_v25  ;;  %10335 = vmatprep.subr.bf16.mxu1 %v11593_v49  ;;  %v8681_v25 = vld [vmem:[%s12039_s8 + $0x178] sm:$0x3]  ;;  %v4615_v57 = vsel %vm12059_vm5, %v4613_v48, %v4614_v44  ;;  %v9234_v44 = vld [vmem:[%s12039_s8 + $0x27c] sm:$0x7]  ;;  %v4632_v48 = vrot.slane %v9233_v43, 7 }
  0x49   : > { %10719 = vmatprep.subr.bf16.mxu0 %v11594_v55  ;;  %v843_v33 = vrot.slane %v8681_v25, 6  ;;  %v4608_v37 = vsel %vm12059_vm5, %v4606_v30, %v4607_v21  ;;  %v9453_v62 = vcombine.low %v4612_v47, %v4615_v57  ;;  %v4625_v25 = vrot.slane %v9230_v19, 7  ;;  %v8691_v50 = vld [vmem:[%s12039_s8 + $0x1e0] sm:$0xc]  ;;  %v8693_v53 = vld [vmem:[%s12039_s8 + $0x1e8] sm:$0x3] }
  0x4a   : > { %10320 = vmatmul.mubr.bf16.gmra.mrb[12].mxu1 %v8667_v0  ;;  %v9452_v42 = vcombine.low %v4605_v29, %v4608_v37  ;;  %v8690_v37 = vld [vmem:[%s12039_s8 + $0x1cc] sm:$0x3]  ;;  %v871_v61 = vrot.slane %v8693_v53, 6  ;;  %v8696_v19 = vld [vmem:[%s12039_s8 + $0x204] sm:$0x3] }
  0x4b   : > { %10336 = vmatpush3.bf16.msra.mxu1 %v11593_v49  ;;  %10704 = vmatmul.mubr.bf16.gmra.mrb[12].mxu0 %v9419_v12  ;;  %v844_v45 = vsel %vm12221_vm8, %v842_v39, %v843_v33  ;;  %v11599_v49 = vld [vmem:[%s13959_s2 + $0x48] sm:$0xff]   ;;  %v4620_v12 = vrot.slane %v4618_v2, 4  ;;  %v4626_v30 = vsel %vm12059_vm5, %v9431_v24, %v4625_v25  ;;  %v4627_v31 = vrot.slane %v4625_v25, 4  ;;  %v11604_v33 = vld [vmem:[%s13959_s2 + $0x358] sm:$0xff]  }
  0x4c   : > { %10337 = vmatprep.subr.bf16.mxu1 %v11595_v3  ;;  %10720 = vmatpush3.bf16.msra.mxu0 %v11594_v55  ;;  %v8817_v46 = vcombine.low %v841_v38, %v844_v45  ;;  %v847_v55 = vrot.slane %v8683_v51, 6  ;;  %v8812_v38 = vrot.slane %v8688_v34, 10  ;;  %v861_v39 = vrot.slane %v8689_v35, 6  ;;  %v11605_v51 = vld [vmem:[%s13959_s2 + $0x60] sm:$0xff]   ;;  %v9238_v23 = vld [vmem:[%s12039_s8 + $0x2ac] sm:$0x8] }
  0x4d   : > { %10721 = vmatprep.subr.bf16.mxu0 %v11596_v4  ;;  %10339 = vmatprep.mubr.bf16.mxu1 %v8816_v32  ;;  %v4622_v21 = vsel %vm12059_vm5, %v4620_v12, %v4621_v5  ;;  %v11603_v32 = vld [vmem:[%s13959_s2 + $0x58] sm:$0xff]   ;;  %v9432_v45 = vrot.slane %v9232_v40, 11  ;;  %v878_v25 = vrot.slane %v8696_v19, 6 }
  0x4e   : > { %10723 = vmatprep.mubr.bf16.mxu0 %v9452_v42  ;;  %v848_v0 = vsel %vm12221_vm8, %v8810_v54, %v847_v55  ;;  %v849_v1 = vrot.slane %v847_v55, 4  ;;  %v9454_v26 = vcombine.low %v4619_v11, %v4622_v21  ;;  %v864_v42 = vrot.slane %v8690_v37, 6  ;;  %v11606_v55 = vld [vmem:[%s13959_s2 + $0x360] sm:$0xff]   ;;  %v9237_v5 = vld [vmem:[%s12039_s8 + $0x298] sm:$0x7] }
  0x4f   : > { %10338 = vmatpush3.bf16.msra.mxu1 %v11595_v3  ;;  %v8685_v3 = vld [vmem:[%s12039_s8 + $0x1a8] sm:$0xc]  ;;  %v863_v47 = vrot.slane %v861_v39, 4  ;;  %v8813_v54 = vrot.slane %v8691_v50, 10  ;;  %v4633_v57 = vsel %vm12059_vm5, %v9432_v45, %v4632_v48  ;;  %v8698_v34 = vld [vmem:[%s12039_s8 + $0x21c] sm:$0xf] }
  0x50   : > { %10355 = vmatprep.subr.bf16.mxu1 %v11597_v27  ;;  %10722 = vmatpush3.bf16.msra.mxu0 %v11596_v4  ;;  %v8686_v4 = vld [vmem:[%s12039_s8 + $0x1ac] sm:$0xf]  ;;  %v8811_v7 = vrot.slane %v8685_v3, 10  ;;  %v851_v10 = vsel %vm12221_vm8, %v849_v1, %v850_v58  ;;  %v4634_v58 = vrot.slane %v4632_v48, 4  ;;  %v8741_v19 = vld [vmem:[%s12039_s8 + $0x17c] sm:$0x1] }
  0x51   : > { %10739 = vmatprep.subr.bf16.mxu0 %v11598_v36  ;;  %v854_v8 = vrot.slane %v8686_v4, 6  ;;  %v8818_v14 = vcombine.low %v848_v0, %v851_v10  ;;  %v865_v56 = vsel %vm12221_vm8, %v863_v47, %v864_v42  ;;  %v9236_v0 = vld [vmem:[%s12039_s8 + $0x294] sm:$0xf]  ;;  %v11607_v1 = vld [vmem:[%s13959_s2 + $0x68] sm:$0xff]  }
  0x52   : > { %10340 = vmatmul.mubr.bf16.vlgmr.msra.gmra.mrb[0].mxu1 %v8817_v46  ;;  %v862_v46 = vsel %vm12221_vm8, %v8812_v38, %v861_v39  ;;  %v11608_v10 = vld [vmem:[%s13959_s2 + $0x368] sm:$0xff]   ;;  %v882_v38 = vrot.slane %v8698_v34, 6  ;;  %v11610_v39 = vld [vmem:[%s13959_s2 + $0x370] sm:$0xff]  }
  0x53   : > { %10356 = vmatpush3.bf16.msra.mxu1 %v11597_v27  ;;  %10724 = vmatmul.mubr.bf16.vlgmr.msra.gmra.mrb[0].mxu0 %v9453_v62  ;;  %v855_v16 = vsel %vm12221_vm8, %v8811_v7, %v854_v8  ;;  %v856_v17 = vrot.slane %v854_v8, 4  ;;  %v8820_v60 = vcombine.low %v862_v46, %v865_v56  ;;  %v9235_v62 = vld [vmem:[%s12039_s8 + $0x290] sm:$0x8]  ;;  %v4639_v8 = vrot.slane %v9236_v0, 7  ;;  %v9241_v47 = vld [vmem:[%s12039_s8 + $0x2c8] sm:$0x8] }
  0x54   : > { %10357 = vmatprep.subr.bf16.mxu1 %v11599_v49  ;;  %10740 = vmatpush3.bf16.msra.mxu0 %v11598_v36  ;;  %v4629_v36 = vsel %vm12059_vm5, %v4627_v31, %v4628_v28  ;;  %v9433_v6 = vrot.slane %v9235_v62, 11  ;;  %v9434_v28 = vrot.slane %v9238_v23, 11  ;;  %v884_v46 = vrot.slane %v882_v38, 4  ;;  %v9242_v48 = vld [vmem:[%s12039_s8 + $0x2cc] sm:$0xf] }
  0x55   : > { %10741 = vmatprep.subr.bf16.mxu0 %v11600_v52  ;;  %10343 = vmatprep.mubr.bf16.mxu1 %v8818_v14  ;;  %v858_v27 = vsel %vm12221_vm8, %v856_v17, %v857_v13  ;;  %v9455_v41 = vcombine.low %v4626_v30, %v4629_v36  ;;  %v4641_v14 = vrot.slane %v4639_v8, 4  ;;  %v8695_v17 = vld [vmem:[%s12039_s8 + $0x200] sm:$0xf]  ;;  %v4653_v53 = vrot.slane %v9242_v48, 7  ;;  %v8736_v62 = vld [vmem:[%s12039_s8 + $0x158] sm:$0xe] }
  0x56   : > { %v8819_v29 = vcombine.low %v855_v16, %v858_v27  ;;  %10727 = vmatprep.mubr.bf16.mxu0 %v9454_v26  ;;  %v4640_v13 = vsel %vm12059_vm5, %v9433_v6, %v4639_v8  ;;  %v8694_v16 = vld [vmem:[%s12039_s8 + $0x1fc] sm:$0xc]  ;;  %v875_v21 = vrot.slane %v8695_v17, 6  ;;  %v9239_v26 = vld [vmem:[%s12039_s8 + $0x2b0] sm:$0xf]  ;;  %v11614_v17 = vld [vmem:[%s13959_s2 + $0x380] sm:$0xff]  }
  0x57   : > { %10358 = vmatpush3.bf16.msra.mxu1 %v11599_v49  ;;  %v4635_v49 = vrot.slane %v9234_v44, 7  ;;  %v9240_v27 = vld [vmem:[%s12039_s8 + $0x2b4] sm:$0x7]  ;;  %v8699_v36 = vld [vmem:[%s12039_s8 + $0x220] sm:$0x3] }
  0x58   : > { %10359 = vmatprep.subr.bf16.mxu1 %v11601_v9  ;;  %10742 = vmatpush3.bf16.msra.mxu0 %v11600_v52  ;;  %v8692_v52 = vld [vmem:[%s12039_s8 + $0x1e4] sm:$0xf]  ;;  %v877_v31 = vrot.slane %v875_v21, 4  ;;  %v4649_v35 = vrot.slane %v9240_v27, 7  ;;  %v885_v43 = vrot.slane %v8699_v36, 6  ;;  %v1164_v27 = vrot.slane %v8741_v19, 5 }
  0x59   : > { %10743 = vmatprep.subr.bf16.mxu0 %v11602_v20  ;;  %v868_v59 = vrot.slane %v8692_v52, 6  ;;  %v4636_v2 = vsel %vm12059_vm5, %v4634_v58, %v4635_v49  ;;  %v11611_v49 = vld [vmem:[%s13959_s2 + $0x78] sm:$0xff]   ;;  %v9435_v52 = vrot.slane %v9241_v47, 11  ;;  %v9125_v8 = vld [vmem:[%s12039_s8 + $0x34c] sm:$0xf] }
  0x5a   : > { %10344 = vmatmul.mubr.bf16.gmra.mrb[4].mxu1 %v8819_v29  ;;  %v9456_v7 = vcombine.low %v4633_v57, %v4636_v2  ;;  %v879_v40 = vsel %vm12221_vm8, %v877_v31, %v878_v25  ;;  %v11612_v57 = vld [vmem:[%s13959_s2 + $0x378] sm:$0xff]   ;;  %v8738_v2 = vld [vmem:[%s12039_s8 + $0x160] sm:$0x1] }
  0x5b   : > { %10360 = vmatpush3.bf16.msra.mxu1 %v11601_v9  ;;  %10728 = vmatmul.mubr.bf16.gmra.mrb[4].mxu0 %v9455_v41  ;;  %v869_v3 = vsel %vm12221_vm8, %v8813_v54, %v868_v59  ;;  %v870_v4 = vrot.slane %v868_v59, 4  ;;  %v4642_v9 = vrot.slane %v9237_v5, 7  ;;  %v4654_v59 = vsel %vm12059_vm5, %v9435_v52, %v4653_v53  ;;  %v12405_v0 = vld [vmem:[%s12039_s8 + $0x15c] sm:$0xf]  ;;  %v9124_v5 = vld [vmem:[%s12039_s8 + $0x348] sm:$0x8] }
  0x5c   : > { %10361 = vmatprep.subr.bf16.mxu1 %v11603_v32  ;;  %10744 = vmatpush3.bf16.msra.mxu0 %v11602_v20  ;;  %v8814_v20 = vrot.slane %v8694_v16, 10  ;;  %v8739_v16 = vld [vmem:[%s12039_s8 + $0x174] sm:$0xe]  ;;  %v8744_v47 = vld [vmem:[%s12039_s8 + $0x198] sm:$0x1] }
  0x5d   : > { %10745 = vmatprep.subr.bf16.mxu0 %v11604_v33  ;;  %10347 = vmatprep.mubr.bf16.mxu1 %v8820_v60  ;;  %v872_v11 = vsel %vm12221_vm8, %v870_v4, %v871_v61  ;;  %v4643_v24 = vsel %vm12059_vm5, %v4641_v14, %v4642_v9  ;;  %v4655_v60 = vrot.slane %v4653_v53, 4  ;;  %v12401_v61 = vld [vmem:[%s13959_s2 + $0x80] sm:$0xff]   ;;  %v1154_v4 = vrot.slane %v12405_v0, 5  ;;  %v9126_v9 = vld [vmem:[%s12039_s8 + $0x350] sm:$0x7] }
  0x5e   : > { %10731 = vmatprep.mubr.bf16.mxu0 %v9456_v7  ;;  %v8821_v12 = vcombine.low %v869_v3, %v872_v11  ;;  %v9457_v29 = vcombine.low %v4640_v13, %v4643_v24  ;;  %v876_v30 = vsel %vm12221_vm8, %v8814_v20, %v875_v21  ;;  %v8832_v3 = vrot.slane %v8736_v62, 9  ;;  %v9131_v53 = vld [vmem:[%s12039_s8 + $0x384] sm:$0xf]  ;;  %v8745_v62 = vld [vmem:[%s12039_s8 + $0x1ac] sm:$0xe] }
  0x5f   : > { %10362 = vmatpush3.bf16.msra.mxu1 %v11603_v32  ;;  %v4646_v32 = vrot.slane %v9239_v26, 7  ;;  %v12376_v44 = vcombine.low %v876_v30, %v879_v40  ;;  %v1157_v7 = vrot.slane %v8738_v2, 5  ;;  %v4926_v13 = vrot.slane %v9125_v8, 7 }
  0x60   : > { %10363 = vmatprep.subr.bf16.mxu1 %v11605_v51  ;;  %10746 = vmatpush3.bf16.msra.mxu0 %v11604_v33  ;;  %v8697_v33 = vld [vmem:[%s12039_s8 + $0x218] sm:$0xc]  ;;  %v1155_v11 = vsel %vm12050_vm4, %v8832_v3, %v1154_v4  ;;  %v4929_v14 = vrot.slane %v9126_v9, 7  ;;  %v8833_v20 = vrot.slane %v8739_v16, 9  ;;  %v1171_v52 = vrot.slane %v8744_v47, 5  ;;  %v11618_v16 = vld [vmem:[%s13959_s2 + $0x390] sm:$0xff]  }
  0x61   : > { %10747 = vmatprep.subr.bf16.mxu0 %v11606_v55  ;;  %v8815_v37 = vrot.slane %v8697_v33, 10  ;;  %v4647_v41 = vsel %vm12059_vm5, %v9434_v28, %v4646_v32  ;;  %v4648_v42 = vrot.slane %v4646_v32, 4  ;;  %v4928_v24 = vrot.slane %v4926_v13, 4  ;;  %v9127_v28 = vld [vmem:[%s12039_s8 + $0x364] sm:$0x8] }
  0x62   : > { %10348 = vmatmul.mubr.bf16.gmra.mrb[8].mxu1 %v8821_v12  ;;  %v1156_v12 = vrot.slane %v1154_v4, 4  ;;  %v9129_v33 = vld [vmem:[%s12039_s8 + $0x36c] sm:$0x7]  ;;  %v9469_v34 = vrot.slane %v9127_v28, 11  ;;  %v8747_v3 = vld [vmem:[%s12039_s8 + $0x1b4] sm:$0x1] }
  0x63   : > { %10364 = vmatpush3.bf16.msra.mxu1 %v11605_v51  ;;  %10732 = vmatmul.mubr.bf16.gmra.mrb[8].mxu0 %v9457_v29  ;;  %v883_v45 = vsel %vm12221_vm8, %v8815_v37, %v882_v38  ;;  %v4650_v50 = vsel %vm12059_vm5, %v4648_v42, %v4649_v35  ;;  %v9243_v51 = vld [vmem:[%s12039_s8 + $0x2d0] sm:$0x7]  ;;  %v9128_v29 = vld [vmem:[%s12039_s8 + $0x368] sm:$0xf]  ;;  %v4930_v30 = vsel %vm12059_vm5, %v4928_v24, %v4929_v14  ;;  %v4936_v37 = vrot.slane %v9129_v33, 7 }
  0x64   : > { %10365 = vmatprep.subr.bf16.mxu1 %v11607_v1  ;;  %10748 = vmatpush3.bf16.msra.mxu0 %v11606_v55  ;;  %v9458_v54 = vcombine.low %v4647_v41, %v4650_v50  ;;  %v886_v55 = vsel %vm12221_vm8, %v884_v46, %v885_v43  ;;  %v4656_v56 = vrot.slane %v9243_v51, 7  ;;  %v1158_v21 = vsel %vm12050_vm4, %v1156_v12, %v1157_v7  ;;  %v11615_v42 = vld [vmem:[%s13959_s2 + $0x88] sm:$0xff]   ;;  %v8742_v43 = vld [vmem:[%s12039_s8 + $0x190] sm:$0xe]  ;;  %v9130_v50 = vld [vmem:[%s12039_s8 + $0x380] sm:$0x8] }
  0x65   : > { %10749 = vmatprep.subr.bf16.mxu0 %v11608_v10  ;;  %10351 = vmatprep.mubr.bf16.mxu1 %v12376_v44  ;;  %v12394_v58 = vcombine.low %v883_v45, %v886_v55  ;;  %v8856_v26 = vcombine.low %v1155_v11, %v1158_v21  ;;  %v4933_v36 = vrot.slane %v9128_v29, 7  ;;  %v12447_v45 = vld [vmem:[%s12039_s8 + $0x194] sm:$0xf]  ;;  %v11616_v46 = vld [vmem:[%s13959_s2 + $0x388] sm:$0xff]   ;;  %v8834_v48 = vrot.slane %v8742_v43, 9  ;;  %v11619_v29 = vld [vmem:[%s13959_s2 + $0x98] sm:$0xff]  }
  0x66   : > { %10735 = vmatprep.mubr.bf16.mxu0 %v9458_v54  ;;  %v9132_v54 = vld [vmem:[%s12039_s8 + $0x388] sm:$0x7]  ;;  %v9470_v55 = vrot.slane %v9130_v50, 11  ;;  %v8835_v4 = vrot.slane %v8745_v62, 9  ;;  %v1178_v9 = vrot.slane %v8747_v3, 5  ;;  %v11621_v50 = vld [vmem:[%s13959_s2 + $0xa0] sm:$0xff]  }
  0x67   : > { %10366 = vmatpush3.bf16.msra.mxu1 %v11607_v1  ;;  %v4657_v1 = vsel %vm12059_vm5, %v4655_v60, %v4656_v56  ;;  %v4934_v40 = vsel %vm12059_vm5, %v9469_v34, %v4933_v36  ;;  %v4935_v41 = vrot.slane %v4933_v36, 4  ;;  %v4940_v60 = vrot.slane %v9131_v53, 7  ;;  %v9134_v14 = vld [vmem:[%s12039_s8 + $0x3a0] sm:$0xf]  ;;  %v8750_v34 = vld [vmem:[%s12039_s8 + $0x1d0] sm:$0x1] }
  0x68   : > { %10367 = vmatprep.subr.bf16.mxu1 %v11609_v18  ;;  %10750 = vmatpush3.bf16.msra.mxu0 %v11608_v10  ;;  %v9459_v6 = vcombine.low %v4654_v59, %v4657_v1  ;;  %v9468_v10 = vrot.slane %v9124_v5, 11  ;;  %v12464_v1 = vld [vmem:[%s12039_s8 + $0x1b0] sm:$0xf]  ;;  %v4943_v2 = vrot.slane %v9132_v54, 7  ;;  %v4947_v21 = vrot.slane %v9134_v14, 7  ;;  %v11622_v54 = vld [vmem:[%s13959_s2 + $0x3a0] sm:$0xff]  }
  0x69   : > { %10751 = vmatprep.subr.bf16.mxu0 %v11610_v39  ;;  %v4937_v51 = vsel %vm12059_vm5, %v4935_v41, %v4936_v37  ;;  %v1175_v5 = vrot.slane %v12464_v1, 5  ;;  %v4941_v7 = vsel %vm12059_vm5, %v9470_v55, %v4940_v60  ;;  %v4942_v8 = vrot.slane %v4940_v60, 4  ;;  %v9136_v37 = vld [vmem:[%s12039_s8 + $0x3b8] sm:$0x8]  ;;  %v9138_v41 = vld [vmem:[%s12039_s8 + $0x3c0] sm:$0x7] }
  0x6a   : > { %10352 = vmatmul.mubr.bf16.gmra.mrb[12].mxu1 %v12394_v58  ;;  %v4927_v23 = vsel %vm12059_vm5, %v9468_v10, %v4926_v13  ;;  %v9493_v56 = vcombine.low %v4934_v40, %v4937_v51  ;;  %v9133_v13 = vld [vmem:[%s12039_s8 + $0x39c] sm:$0x8]  ;;  %v4949_v28 = vrot.slane %v4947_v21, 4  ;;  %v12513_v51 = vld [vmem:[%s12039_s8 + $0x1e8] sm:$0xf] }
  0x6b   : > { %10368 = vmatpush3.bf16.msra.mxu1 %v11609_v18  ;;  %10736 = vmatmul.mubr.bf16.gmra.mrb[12].mxu0 %v9459_v6  ;;  %v12422_v18 = vld [vmem:[%s12039_s8 + $0x178] sm:$0xf]  ;;  %v9492_v35 = vcombine.low %v4927_v23, %v4930_v30  ;;  %v1176_v11 = vsel %vm12050_vm4, %v8835_v4, %v1175_v5  ;;  %v1177_v12 = vrot.slane %v1175_v5, 4  ;;  %v4944_v19 = vsel %vm12059_vm5, %v4942_v8, %v4943_v2  ;;  %v9137_v40 = vld [vmem:[%s12039_s8 + $0x3bc] sm:$0xf]  ;;  %v11623_v4 = vld [vmem:[%s13959_s2 + $0xa8] sm:$0xff]  }
  0x6c   : > { %10369 = vmatprep.subr.bf16.mxu1 %v11611_v49  ;;  %10752 = vmatpush3.bf16.msra.mxu0 %v11610_v39  ;;  %v1161_v25 = vrot.slane %v12422_v18, 5  ;;  %v9494_v23 = vcombine.low %v4941_v7, %v4944_v19  ;;  %v11620_v30 = vld [vmem:[%s13959_s2 + $0x398] sm:$0xff]   ;;  %v4954_v47 = vrot.slane %v9137_v40, 7  ;;  %v9139_v2 = vld [vmem:[%s12039_s8 + $0x3d4] sm:$0x8] }
  0x6d   : > { %10753 = vmatprep.subr.bf16.mxu0 %v11612_v57  ;;  %10371 = vmatprep.mubr.bf16.mxu1 %v8856_v26  ;;  %v1179_v24 = vsel %vm12050_vm4, %v1177_v12, %v1178_v9  ;;  %v9140_v3 = vld [vmem:[%s12039_s8 + $0x3d8] sm:$0xf]  ;;  %v9141_v7 = vld [vmem:[%s12039_s8 + $0x3dc] sm:$0x7]  ;;  %v9473_v8 = vrot.slane %v9139_v2, 11  ;;  %v11624_v12 = vld [vmem:[%s13959_s2 + $0x3a8] sm:$0xff]  }
  0x6e   : > { %v1162_v31 = vsel %vm12050_vm4, %v8833_v20, %v1161_v25  ;;  %v1163_v32 = vrot.slane %v1161_v25, 4  ;;  %10755 = vmatprep.mubr.bf16.mxu0 %v9492_v35  ;;  %v9135_v20 = vld [vmem:[%s12039_s8 + $0x3a4] sm:$0x7]  ;;  %v8859_v26 = vcombine.low %v1176_v11, %v1179_v24  ;;  %v4964_v11 = vrot.slane %v9141_v7, 7 }
  0x6f   : > { %10370 = vmatpush3.bf16.msra.mxu1 %v11611_v49  ;;  %v1168_v49 = vrot.slane %v12447_v45, 5  ;;  %v4950_v25 = vrot.slane %v9135_v20, 7  ;;  %v8754_v20 = vld [vmem:[%s12039_s8 + $0x200] sm:$0xe]  ;;  %v8759_v40 = vld [vmem:[%s12039_s8 + $0x224] sm:$0x1] }
  0x70   : > { %10387 = vmatprep.subr.bf16.mxu1 %v12401_v61  ;;  %10754 = vmatpush3.bf16.msra.mxu0 %v11612_v57  ;;  %v1165_v38 = vsel %vm12050_vm4, %v1163_v32, %v1164_v27  ;;  %v12497_v32 = vld [vmem:[%s12039_s8 + $0x1cc] sm:$0xf]  ;;  %v8838_v24 = vrot.slane %v8754_v20, 9 }
  0x71   : > { %10771 = vmatprep.subr.bf16.mxu0 %v11614_v17  ;;  %v8857_v39 = vcombine.low %v1162_v31, %v1165_v38  ;;  %v1169_v57 = vsel %vm12050_vm4, %v8834_v48, %v1168_v49  ;;  %v1170_v59 = vrot.slane %v1168_v49, 4  ;;  %v8748_v31 = vld [vmem:[%s12039_s8 + $0x1c8] sm:$0xe]  ;;  %v4951_v33 = vsel %vm12059_vm5, %v4949_v28, %v4950_v25  ;;  %v8751_v49 = vld [vmem:[%s12039_s8 + $0x1e4] sm:$0xe] }
  0x72   : > { %v8836_v35 = vrot.slane %v8748_v31, 9  ;;  %v1182_v36 = vrot.slane %v12497_v32, 5  ;;  %v4957_v48 = vrot.slane %v9138_v41, 7  ;;  %v8837_v53 = vrot.slane %v8751_v49, 9 }
  0x73   : > { %10372 = vmatmul.mubr.bf16.vlgmr.msra.gmra.mrb[0].mxu1 %v8857_v39  ;;  %10756 = vmatmul.mubr.bf16.vlgmr.msra.gmra.mrb[0].mxu0 %v9493_v56  ;;  %v1172_v6 = vsel %vm12050_vm4, %v1170_v59, %v1171_v52  ;;  %v1185_v39 = vrot.slane %v8750_v34, 5  ;;  %v8753_v52 = vld [vmem:[%s12039_s8 + $0x1ec] sm:$0x1]  ;;  %v1189_v59 = vrot.slane %v12513_v51, 5  ;;  %v1206_v49 = vrot.slane %v8759_v40, 5 }
  0x74   : > { %10388 = vmatpush3.bf16.msra.mxu1 %v12401_v61  ;;  %v11617_v61 = vld [vmem:[%s13959_s2 + $0x90] sm:$0xff]   ;;  %10772 = vmatpush3.bf16.msra.mxu0 %v11614_v17  ;;  %v8858_v10 = vcombine.low %v1169_v57, %v1172_v6  ;;  %v9471_v17 = vrot.slane %v9133_v13, 11  ;;  %v1183_v43 = vsel %vm12050_vm4, %v8836_v35, %v1182_v36  ;;  %v4956_v57 = vrot.slane %v4954_v47, 4  ;;  %v8786_v40 = vld [vmem:[%s12039_s8 + $0x198] sm:$0xf] }
  0x75   : > { %10389 = vmatprep.subr.bf16.mxu1 %v11615_v42  ;;  %10773 = vmatprep.subr.bf16.mxu0 %v11616_v46  ;;  %v1192_v62 = vrot.slane %v8753_v52, 5  ;;  %v1191_v6 = vrot.slane %v1189_v59, 4 }
  0x76   : > { %10375 = vmatprep.mubr.bf16.mxu1 %v8858_v10  ;;  %v4948_v27 = vsel %vm12059_vm5, %v9471_v17, %v4947_v21  ;;  %10759 = vmatprep.mubr.bf16.mxu0 %v9494_v23  ;;  %v4958_v5 = vsel %vm12059_vm5, %v4956_v57, %v4957_v48  ;;  %v4961_v10 = vrot.slane %v9140_v3, 7  ;;  %v12543_v17 = vld [vmem:[%s12039_s8 + $0x204] sm:$0xf]  ;;  %v11625_v21 = vld [vmem:[%s13959_s2 + $0xb0] sm:$0xff]   ;;  %v8756_v23 = vld [vmem:[%s12039_s8 + $0x208] sm:$0x1] }
  0x77   : > { %v9495_v38 = vcombine.low %v4948_v27, %v4951_v33  ;;  %v1193_v13 = vsel %vm12050_vm4, %v1191_v6, %v1192_v62  ;;  %v1196_v25 = vrot.slane %v12543_v17, 5  ;;  %v1199_v28 = vrot.slane %v8756_v23, 5 }
  0x78   : > { %10390 = vmatpush3.bf16.msra.mxu1 %v11615_v42  ;;  %10774 = vmatpush3.bf16.msra.mxu0 %v11616_v46  ;;  %v9472_v42 = vrot.slane %v9136_v37, 11  ;;  %v1184_v46 = vrot.slane %v1182_v36, 4  ;;  %v4963_v19 = vrot.slane %v4961_v10, 4  ;;  %v8757_v37 = vld [vmem:[%s12039_s8 + $0x21c] sm:$0xe] }
  0x79   : > { %10391 = vmatprep.subr.bf16.mxu1 %v11617_v61  ;;  %10775 = vmatprep.subr.bf16.mxu0 %v11618_v16  ;;  %v1197_v34 = vsel %vm12050_vm4, %v8838_v24, %v1196_v25  ;;  %v1198_v35 = vrot.slane %v1196_v25, 4  ;;  %v8839_v41 = vrot.slane %v8757_v37, 9  ;;  %v8785_v24 = vld [vmem:[%s12039_s8 + $0x17c] sm:$0xf]  ;;  %v9175_v25 = vld [vmem:[%s12039_s8 + $0x36c] sm:$0xe] }
  0x7a   : > { %v1186_v55 = vsel %vm12050_vm4, %v1184_v46, %v1185_v39  ;;  %v4955_v56 = vsel %vm12059_vm5, %v9472_v42, %v4954_v47  ;;  %v4965_v27 = vsel %vm12059_vm5, %v4963_v19, %v4964_v11  ;;  %v11632_v19 = vld [vmem:[%s13959_s2 + $0x3c0] sm:$0xff]   ;;  %v11633_v37 = vld [vmem:[%s13959_s2 + $0xc8] sm:$0xff]  }
  0x7b   : > { %10376 = vmatmul.mubr.bf16.gmra.mrb[4].mxu1 %v8859_v26  ;;  %10760 = vmatmul.mubr.bf16.gmra.mrb[4].mxu0 %v9495_v38  ;;  %v8860_v60 = vcombine.low %v1183_v43, %v1186_v55  ;;  %v9496_v9 = vcombine.low %v4955_v56, %v4958_v5  ;;  %v9142_v26 = vld [vmem:[%s12039_s8 + $0x3f0] sm:$0x8]  ;;  %v12559_v38 = vld [vmem:[%s12039_s8 + $0x220] sm:$0xf]  ;;  %v1200_v46 = vsel %vm12050_vm4, %v1198_v35, %v1199_v28  ;;  %v11627_v56 = vld [vmem:[%s13959_s2 + $0xb8] sm:$0xff]  }
  0x7c   : > { %10392 = vmatpush3.bf16.msra.mxu1 %v11617_v61  ;;  %10776 = vmatpush3.bf16.msra.mxu0 %v11618_v16  ;;  %v1190_v61 = vsel %vm12050_vm4, %v8837_v53, %v1189_v59  ;;  %v4962_v16 = vsel %vm12059_vm5, %v9473_v8, %v4961_v10  ;;  %v9474_v31 = vrot.slane %v9142_v26, 11  ;;  %v1203_v42 = vrot.slane %v12559_v38, 5  ;;  %v11626_v43 = vld [vmem:[%s13959_s2 + $0x3b0] sm:$0xff]   ;;  %v11628_v5 = vld [vmem:[%s13959_s2 + $0x3b8] sm:$0xff]   ;;  %v11631_v8 = vld [vmem:[%s13959_s2 + $0xc0] sm:$0xff]  }
  0x7d   : > { %10393 = vmatprep.subr.bf16.mxu1 %v11619_v29  ;;  %10777 = vmatprep.subr.bf16.mxu0 %v11620_v30  ;;  %v8861_v14 = vcombine.low %v1190_v61, %v1193_v13  ;;  %v9497_v33 = vcombine.low %v4962_v16, %v4965_v27  ;;  %v9146_v55 = vld [vmem:[%s12039_s8 + $0x410] sm:$0xf]  ;;  %v9147_v59 = vld [vmem:[%s12039_s8 + $0x414] sm:$0x7] }
  0x7e   : > { %10379 = vmatprep.mubr.bf16.mxu1 %v8860_v60  ;;  %10763 = vmatprep.mubr.bf16.mxu0 %v9496_v9  ;;  %v1204_v52 = vsel %vm12050_vm4, %v8839_v41, %v1203_v42  ;;  %v1205_v53 = vrot.slane %v1203_v42, 4  ;;  %v4975_v62 = vrot.slane %v9146_v55, 7  ;;  %v8784_v9 = vld [vmem:[%s12039_s8 + $0x160] sm:$0xf]  ;;  %v9172_v10 = vld [vmem:[%s12039_s8 + $0x350] sm:$0xe]  ;;  %v8890_v42 = vcombine.low %v12447_v45, %v8786_v40 }
  0x7f   : > { %v9173_v13 = vld [vmem:[%s12039_s8 + $0x354] sm:$0xf]  ;;  %v9508_v16 = vrot.slane %v9172_v10, 9  ;;  %v9176_v26 = vld [vmem:[%s12039_s8 + $0x370] sm:$0xf] }
  0x80   : > { %10394 = vmatpush3.bf16.msra.mxu1 %v11619_v29  ;;  %10778 = vmatpush3.bf16.msra.mxu0 %v11620_v30  ;;  %v9143_v29 = vld [vmem:[%s12039_s8 + $0x3f4] sm:$0xf]  ;;  %v9144_v30 = vld [vmem:[%s12039_s8 + $0x3f8] sm:$0x7]  ;;  %v1207_v3 = vsel %vm12050_vm4, %v1205_v53, %v1206_v49  ;;  %v4977_v7 = vrot.slane %v4975_v62, 4 }
  0x81   : > { %10395 = vmatprep.subr.bf16.mxu1 %v11621_v50  ;;  %10779 = vmatprep.subr.bf16.mxu0 %v11622_v54  ;;  %v4968_v36 = vrot.slane %v9143_v29, 7  ;;  %v4971_v39 = vrot.slane %v9144_v30, 7  ;;  %v8863_v61 = vcombine.low %v1204_v52, %v1207_v3  ;;  %v9177_v28 = vld [vmem:[%s12039_s8 + $0x374] sm:$0x1]  ;;  %v9509_v29 = vrot.slane %v9175_v25, 9  ;;  %v11643_v25 = vld [vmem:[%s13959_s2 + $0xe0] sm:$0xff]  }
  0x82   : > { %v5255_v30 = vrot.slane %v9176_v26, 5  ;;  %v8787_v53 = vld [vmem:[%s12039_s8 + $0x1b4] sm:$0xf]  ;;  %v9181_v55 = vld [vmem:[%s12039_s8 + $0x3a4] sm:$0xe] }
  0x83   : > { %10380 = vmatmul.mubr.bf16.gmra.mrb[8].mxu1 %v8861_v14  ;;  %10764 = vmatmul.mubr.bf16.gmra.mrb[8].mxu0 %v9497_v33  ;;  %v4969_v47 = vsel %vm12059_vm5, %v9474_v31, %v4968_v36  ;;  %v4970_v48 = vrot.slane %v4968_v36, 4  ;;  %v9174_v14 = vld [vmem:[%s12039_s8 + $0x358] sm:$0x1]  ;;  %v8889_v31 = vcombine.low %v12422_v18, %v8785_v24  ;;  %v5258_v33 = vrot.slane %v9177_v28, 5  ;;  %v11634_v18 = vld [vmem:[%s13959_s2 + $0x3c8] sm:$0xff]  }
  0x84   : > { %10396 = vmatpush3.bf16.msra.mxu1 %v11621_v50  ;;  %10780 = vmatpush3.bf16.msra.mxu0 %v11622_v54  ;;  %v8862_v50 = vcombine.low %v1197_v34, %v1200_v46  ;;  %v9145_v54 = vld [vmem:[%s12039_s8 + $0x40c] sm:$0x8]  ;;  %v5251_v23 = vrot.slane %v9174_v14, 5  ;;  %v5256_v35 = vsel %vm12050_vm4, %v9509_v29, %v5255_v30  ;;  %v5257_v36 = vrot.slane %v5255_v30, 4  ;;  %v9184_v10 = vld [vmem:[%s12039_s8 + $0x3c0] sm:$0xe] }
  0x85   : > { %10397 = vmatprep.subr.bf16.mxu1 %v11623_v4  ;;  %10781 = vmatprep.subr.bf16.mxu0 %v11624_v12  ;;  %v4972_v57 = vsel %vm12059_vm5, %v4970_v48, %v4971_v39  ;;  %v9475_v60 = vrot.slane %v9145_v54, 11  ;;  %v9179_v46 = vld [vmem:[%s12039_s8 + $0x38c] sm:$0xf]  ;;  %v11637_v54 = vld [vmem:[%s13959_s2 + $0xd0] sm:$0xff]   ;;  %v9512_v14 = vrot.slane %v9184_v10, 9 }
  0x86   : > { %10383 = vmatprep.mubr.bf16.mxu1 %v8862_v50  ;;  %v9498_v2 = vcombine.low %v4969_v47, %v4972_v57  ;;  %v5259_v41 = vsel %vm12050_vm4, %v5257_v36, %v5258_v33  ;;  %v9180_v47 = vld [vmem:[%s12039_s8 + $0x390] sm:$0x1]  ;;  %v5262_v50 = vrot.slane %v9179_v46, 5  ;;  %v9182_v57 = vld [vmem:[%s12039_s8 + $0x3a8] sm:$0xf] }
  0x87   : > { %v4976_v6 = vsel %vm12059_vm5, %v9475_v60, %v4975_v62  ;;  %v9533_v48 = vcombine.low %v5256_v35, %v5259_v41  ;;  %v5265_v52 = vrot.slane %v9180_v47, 5  ;;  %v9511_v60 = vrot.slane %v9181_v55, 9  ;;  %v9187_v26 = vld [vmem:[%s12039_s8 + $0x3dc] sm:$0xe]  ;;  %v9190_v40 = vld [vmem:[%s12039_s8 + $0x3f8] sm:$0xe] }
  0x88   : > { %10398 = vmatpush3.bf16.msra.mxu1 %v11623_v4  ;;  %10782 = vmatpush3.bf16.msra.mxu0 %v11624_v12  ;;  %v4978_v4 = vrot.slane %v9147_v59, 7  ;;  %v8888_v12 = vcombine.low %v12405_v0, %v8784_v9  ;;  %v9183_v59 = vld [vmem:[%s12039_s8 + $0x3ac] sm:$0x1]  ;;  %v5269_v62 = vrot.slane %v9182_v57, 5  ;;  %v8788_v9 = vld [vmem:[%s12039_s8 + $0x1d0] sm:$0xf] }
  0x89   : > { %10399 = vmatprep.subr.bf16.mxu1 %v11625_v21  ;;  %10783 = vmatprep.subr.bf16.mxu0 %v11626_v43  ;;  %v9513_v28 = vrot.slane %v9187_v26, 9  ;;  %v11645_v41 = vld [vmem:[%s13959_s2 + $0xe8] sm:$0xff]   ;;  %v9514_v46 = vrot.slane %v9190_v40, 9  ;;  %v9246_v10 = vld [vmem:[%s12039_s8 + $0x35c] sm:$0x7]  ;;  %v11653_v26 = vld [vmem:[%s13959_s2 + $0x100] sm:$0xff]  }
  0x8a   : > { %10767 = vmatprep.mubr.bf16.mxu0 %v9498_v2  ;;  %v4979_v11 = vsel %vm12059_vm5, %v4977_v7, %v4978_v4  ;;  %v5272_v2 = vrot.slane %v9183_v59, 5  ;;  %v8891_v4 = vcombine.low %v12464_v1, %v8787_v53  ;;  %v5271_v7 = vrot.slane %v5269_v62, 4  ;;  %v9185_v1 = vld [vmem:[%s12039_s8 + $0x3c4] sm:$0xf]  ;;  %v9194_v53 = vld [vmem:[%s12039_s8 + $0x418] sm:$0xf] }
  0x8b   : > { %10384 = vmatmul.mubr.bf16.gmra.mrb[12].mxu1 %v8863_v61  ;;  %v9499_v20 = vcombine.low %v4976_v6, %v4979_v11  ;;  %v5270_v6 = vsel %vm12050_vm4, %v9511_v60, %v5269_v62  ;;  %v5297_v57 = vrot.slane %v9194_v53, 5  ;;  %v11649_v59 = vld [vmem:[%s13959_s2 + $0xf0] sm:$0xff]   ;;  %v8705_v53 = vld [vmem:[%s12039_s8 + $0x258] sm:$0x3] }
  0x8c   : > { %10400 = vmatpush3.bf16.msra.mxu1 %v11625_v21  ;;  %10784 = vmatpush3.bf16.msra.mxu0 %v11626_v43  ;;  %v5248_v21 = vrot.slane %v9173_v13, 5  ;;  %v9178_v43 = vld [vmem:[%s12039_s8 + $0x388] sm:$0xe]  ;;  %v5273_v11 = vsel %vm12050_vm4, %v5271_v7, %v5272_v2  ;;  %v9186_v13 = vld [vmem:[%s12039_s8 + $0x3c8] sm:$0x1] }
  0x8d   : > { %10401 = vmatprep.subr.bf16.mxu1 %v11627_v56  ;;  %10785 = vmatprep.subr.bf16.mxu0 %v11628_v5  ;;  %v9510_v49 = vrot.slane %v9178_v43, 9  ;;  %v9192_v43 = vld [vmem:[%s12039_s8 + $0x400] sm:$0x1]  ;;  %v5299_v2 = vrot.slane %v5297_v57, 4  ;;  %v9252_v40 = vld [vmem:[%s12039_s8 + $0x394] sm:$0x7] }
  0x8e   : > { %10403 = vmatprep.mubr.bf16.mxu1 %v8888_v12  ;;  %10768 = vmatmul.mubr.bf16.gmra.mrb[12].mxu0 %v9499_v20  ;;  %v5249_v0 = vsel %vm12050_vm4, %v9508_v16, %v5248_v21  ;;  %v5250_v27 = vrot.slane %v5248_v21, 4  ;;  %v8892_v12 = vcombine.low %v12497_v32, %v8788_v9  ;;  %v5276_v16 = vrot.slane %v9185_v1, 5  ;;  %v11640_v21 = vld [vmem:[%s13959_s2 + $0x3d8] sm:$0xff]  }
  0x8f   : > { %v5263_v45 = vsel %vm12050_vm4, %v9510_v49, %v5262_v50  ;;  %v9535_v20 = vcombine.low %v5270_v6, %v5273_v11  ;;  %v5293_v49 = vrot.slane %v9192_v43, 5  ;;  %v9244_v6 = vld [vmem:[%s12039_s8 + $0x354] sm:$0x8]  ;;  %v9245_v9 = vld [vmem:[%s12039_s8 + $0x358] sm:$0xf]  ;;  %v5573_v11 = vrot.slane %v9246_v10, 7 }
  0x90   : > { %10402 = vmatpush3.bf16.msra.mxu1 %v11627_v56  ;;  %10786 = vmatpush3.bf16.msra.mxu0 %v11628_v5  ;;  %v5252_v34 = vsel %vm12050_vm4, %v5250_v27, %v5251_v23  ;;  %v5264_v56 = vrot.slane %v5262_v50, 4  ;;  %v11638_v5 = vld [vmem:[%s13959_s2 + $0x3d0] sm:$0xff]   ;;  %v5279_v23 = vrot.slane %v9186_v13, 5  ;;  %v5277_v24 = vsel %vm12050_vm4, %v9512_v14, %v5276_v16  ;;  %v9189_v27 = vld [vmem:[%s12039_s8 + $0x3e4] sm:$0x1] }
  0x91   : > { %10419 = vmatprep.subr.bf16.mxu1 %v11631_v8  ;;  %10803 = vmatprep.subr.bf16.mxu0 %v11632_v19  ;;  %v9532_v39 = vcombine.low %v5249_v0, %v5252_v34  ;;  %v5278_v32 = vrot.slane %v5276_v16, 4  ;;  %v9188_v0 = vld [vmem:[%s12039_s8 + $0x3e0] sm:$0xf]  ;;  %v8791_v50 = vld [vmem:[%s12039_s8 + $0x224] sm:$0xf]  ;;  %v9548_v1 = vrot.slane %v9244_v6, 11 }
  0x92   : > { %v5266_v3 = vsel %vm12050_vm4, %v5264_v56, %v5265_v52  ;;  %v5283_v29 = vrot.slane %v9188_v0, 5  ;;  %v9193_v52 = vld [vmem:[%s12039_s8 + $0x414] sm:$0xe]  ;;  %v9247_v13 = vld [vmem:[%s12039_s8 + $0x370] sm:$0x8] }
  0x93   : > { %10787 = vmatprep.mubr.bf16.mxu0 %v9532_v39  ;;  %10404 = vmatmul.mubr.bf16.vlgmr.msra.gmra.mrb[0].mxu1 %v8889_v31  ;;  %v9534_v61 = vcombine.low %v5263_v45, %v5266_v3  ;;  %v5280_v30 = vsel %vm12050_vm4, %v5278_v32, %v5279_v23  ;;  %v5286_v31 = vrot.slane %v9189_v27, 5  ;;  %v8790_v39 = vld [vmem:[%s12039_s8 + $0x208] sm:$0xf]  ;;  %v9195_v45 = vld [vmem:[%s12039_s8 + $0x41c] sm:$0x1]  ;;  %v9515_v56 = vrot.slane %v9193_v52, 9 }
  0x94   : > { %10420 = vmatpush3.bf16.msra.mxu1 %v11631_v8  ;;  %10407 = vmatprep.mubr.bf16.mxu1 %v8890_v42  ;;  %v11639_v8 = vld [vmem:[%s13959_s2 + $0xd8] sm:$0xff]   ;;  %v9536_v33 = vcombine.low %v5277_v24, %v5280_v30  ;;  %v5284_v35 = vsel %vm12050_vm4, %v9513_v28, %v5283_v29  ;;  %v5285_v36 = vrot.slane %v5283_v29, 4  ;;  %v5300_v60 = vrot.slane %v9195_v45, 5  ;;  %v11650_v3 = vld [vmem:[%s13959_s2 + $0x3f0] sm:$0xff]   ;;  %v11654_v28 = vld [vmem:[%s13959_s2 + $0x400] sm:$0xff]  }
  0x95   : > { %10421 = vmatprep.subr.bf16.mxu1 %v11633_v37  ;;  %v9191_v42 = vld [vmem:[%s12039_s8 + $0x3fc] sm:$0xf]  ;;  %v9248_v14 = vld [vmem:[%s12039_s8 + $0x374] sm:$0xf]  ;;  %v9249_v16 = vld [vmem:[%s12039_s8 + $0x378] sm:$0x7] }
  0x96   : > { %10788 = vmatmul.mubr.bf16.vlgmr.msra.gmra.mrb[0].mxu0 %v9533_v48  ;;  %v5290_v48 = vrot.slane %v9191_v42, 5  ;;  %v5301_v7 = vsel %vm12050_vm4, %v5299_v2, %v5300_v60  ;;  %v5577_v23 = vrot.slane %v9248_v14, 7  ;;  %v11652_v24 = vld [vmem:[%s13959_s2 + $0x3f8] sm:$0xff]   ;;  %v5580_v32 = vrot.slane %v9249_v16, 7  ;;  %v8700_v29 = vld [vmem:[%s12039_s8 + $0x234] sm:$0xc] }
  0x97   : > { %10804 = vmatpush3.bf16.msra.mxu0 %v11632_v19  ;;  %10791 = vmatprep.mubr.bf16.mxu0 %v9534_v61  ;;  %v8789_v19 = vld [vmem:[%s12039_s8 + $0x1ec] sm:$0xf]  ;;  %v5298_v61 = vsel %vm12050_vm4, %v9515_v56, %v5297_v57  ;;  %v8701_v30 = vld [vmem:[%s12039_s8 + $0x238] sm:$0xf]  ;;  %v8704_v52 = vld [vmem:[%s12039_s8 + $0x254] sm:$0xf] }
  0x98   : > { %10805 = vmatprep.subr.bf16.mxu0 %v11634_v18  ;;  %10422 = vmatpush3.bf16.msra.mxu1 %v11633_v37  ;;  %v8893_v34 = vcombine.low %v12513_v51, %v8789_v19  ;;  %v11644_v37 = vld [vmem:[%s13959_s2 + $0x3e0] sm:$0xff]   ;;  %v5287_v51 = vsel %vm12050_vm4, %v5285_v36, %v5286_v31  ;;  %v5292_v55 = vrot.slane %v5290_v48, 4  ;;  %v5579_v0 = vrot.slane %v5577_v23, 4  ;;  %v9250_v36 = vld [vmem:[%s12039_s8 + $0x38c] sm:$0x8]  ;;  %v11657_v60 = vld [vmem:[%s13959_s2 + $0x110] sm:$0xff]  }
  0x99   : > { %10423 = vmatprep.subr.bf16.mxu1 %v11637_v54  ;;  %v9537_v47 = vcombine.low %v5284_v35, %v5287_v51  ;;  %v1720_v35 = vrot.slane %v8701_v30, 6  ;;  %v9550_v51 = vrot.slane %v9250_v36, 11  ;;  %v1727_v56 = vrot.slane %v8704_v52, 6  ;;  %v9254_v2 = vld [vmem:[%s12039_s8 + $0x3ac] sm:$0xf]  ;;  %v11658_v10 = vld [vmem:[%s13959_s2 + $0x410] sm:$0xff]  }
  0x9a   : > { %v5294_v62 = vsel %vm12050_vm4, %v5292_v55, %v5293_v49  ;;  %v5581_v31 = vsel %vm12059_vm5, %v5579_v0, %v5580_v32  ;;  %v8706_v14 = vld [vmem:[%s12039_s8 + $0x26c] sm:$0xc]  ;;  %v8707_v16 = vld [vmem:[%s12039_s8 + $0x270] sm:$0xf]  ;;  %v11660_v32 = vld [vmem:[%s13959_s2 + $0x418] sm:$0xff]  }
  0x9b   : > { %10806 = vmatpush3.bf16.msra.mxu0 %v11634_v18  ;;  %10408 = vmatmul.mubr.bf16.gmra.mrb[4].mxu1 %v8891_v4  ;;  %v12679_v18 = vcombine.low %v12543_v17, %v8790_v39  ;;  %v5291_v17 = vsel %vm12050_vm4, %v9514_v46, %v5290_v48  ;;  %v9251_v39 = vld [vmem:[%s12039_s8 + $0x390] sm:$0xf]  ;;  %v1722_v43 = vrot.slane %v1720_v35, 4  ;;  %v9258_v0 = vld [vmem:[%s12039_s8 + $0x3cc] sm:$0x7] }
  0x9c   : > { %10807 = vmatprep.subr.bf16.mxu0 %v11638_v5  ;;  %10424 = vmatpush3.bf16.msra.mxu1 %v11637_v54  ;;  %v11646_v54 = vld [vmem:[%s13959_s2 + $0x3e8] sm:$0xff]   ;;  %v9538_v4 = vcombine.low %v5291_v17, %v5294_v62  ;;  %v5584_v46 = vrot.slane %v9251_v39, 7  ;;  %v8703_v48 = vld [vmem:[%s12039_s8 + $0x250] sm:$0xc]  ;;  %v11661_v39 = vld [vmem:[%s13959_s2 + $0x120] sm:$0xff]  }
  0x9d   : > { %10425 = vmatprep.subr.bf16.mxu1 %v11639_v8  ;;  %10411 = vmatprep.mubr.bf16.mxu1 %v8892_v12  ;;  %v9539_v12 = vcombine.low %v5298_v61, %v5301_v7  ;;  %v9253_v62 = vld [vmem:[%s12039_s8 + $0x3a8] sm:$0x8]  ;;  %v9255_v61 = vld [vmem:[%s12039_s8 + $0x3b0] sm:$0x7]  ;;  %v9261_v52 = vld [vmem:[%s12039_s8 + $0x3e8] sm:$0x7] }
  0x9e   : > { %10792 = vmatmul.mubr.bf16.gmra.mrb[4].mxu0 %v9535_v20  ;;  %v5585_v55 = vsel %vm12059_vm5, %v9550_v51, %v5584_v46  ;;  %v5586_v45 = vrot.slane %v5584_v46, 4  ;;  %v9551_v6 = vrot.slane %v9253_v62, 11  ;;  %v11663_v62 = vld [vmem:[%s13959_s2 + $0x128] sm:$0xff]  }
  0x9f   : > { %10808 = vmatpush3.bf16.msra.mxu0 %v11638_v5  ;;  %10795 = vmatprep.mubr.bf16.mxu0 %v9536_v33  ;;  %v12702_v5 = vcombine.low %v12559_v38, %v8791_v50  ;;  %v5570_v38 = vrot.slane %v9245_v9, 7  ;;  %v8702_v33 = vld [vmem:[%s12039_s8 + $0x23c] sm:$0x3]  ;;  %v11656_v50 = vld [vmem:[%s13959_s2 + $0x408] sm:$0xff]   ;;  %v5594_v9 = vrot.slane %v9255_v61, 7 }
  0xa0   : > { %10809 = vmatprep.subr.bf16.mxu0 %v11640_v21  ;;  %10426 = vmatpush3.bf16.msra.mxu1 %v11639_v8  ;;  %v11651_v8 = vld [vmem:[%s13959_s2 + $0xf8] sm:$0xff]   ;;  %v8714_v61 = vld [vmem:[%s12039_s8 + $0x2ac] sm:$0x3] }
  0xa1   : > { %10427 = vmatprep.subr.bf16.mxu1 %v11643_v25  ;;  %v5571_v19 = vsel %vm12059_vm5, %v9548_v1, %v5570_v38  ;;  %v5572_v20 = vrot.slane %v5570_v38, 4 }
  0xa3   : > { %10810 = vmatpush3.bf16.msra.mxu0 %v11640_v21  ;;  %10412 = vmatmul.mubr.bf16.gmra.mrb[8].mxu1 %v8893_v34  ;;  %v9549_v21 = vrot.slane %v9247_v13, 11  ;;  %v8904_v34 = vrot.slane %v8700_v29, 10  ;;  %v11659_v13 = vld [vmem:[%s13959_s2 + $0x118] sm:$0xff]  }
  0xa4   : > { %10811 = vmatprep.subr.bf16.mxu0 %v11644_v37  ;;  %10428 = vmatpush3.bf16.msra.mxu1 %v11643_v25  ;;  %v5574_v25 = vsel %vm12059_vm5, %v5572_v20, %v5573_v11  ;;  %v8906_v20 = vrot.slane %v8706_v14, 10 }
  0xa5   : > { %10429 = vmatprep.subr.bf16.mxu1 %v11645_v41  ;;  %10415 = vmatprep.mubr.bf16.mxu1 %v12679_v18  ;;  %v9572_v27 = vcombine.low %v5571_v19, %v5574_v25  ;;  %v1721_v42 = vsel %vm12221_vm8, %v8904_v34, %v1720_v35  ;;  %v8708_v19 = vld [vmem:[%s12039_s8 + $0x274] sm:$0x3]  ;;  %v5601_v34 = vrot.slane %v9258_v0, 7  ;;  %v8711_v35 = vld [vmem:[%s12039_s8 + $0x290] sm:$0x3] }
  0xa6   : > { %10796 = vmatmul.mubr.bf16.gmra.mrb[8].mxu0 %v9537_v47  ;;  %v5587_v47 = vrot.slane %v9252_v40, 7  ;;  %v1737_v25 = vrot.slane %v8708_v19, 6  ;;  %v8715_v19 = vld [vmem:[%s12039_s8 + $0x2c0] sm:$0xc] }
  0xa7   : > { %10812 = vmatpush3.bf16.msra.mxu0 %v11644_v37  ;;  %10799 = vmatprep.mubr.bf16.mxu0 %v9538_v4  ;;  %v1723_v37 = vrot.slane %v8702_v33, 6  ;;  %v1729_v4 = vrot.slane %v1727_v56, 4  ;;  %v8710_v33 = vld [vmem:[%s12039_s8 + $0x28c] sm:$0xf] }
  0xa8   : > { %10813 = vmatprep.subr.bf16.mxu0 %v11646_v54  ;;  %10430 = vmatpush3.bf16.msra.mxu1 %v11645_v41  ;;  %v11655_v41 = vld [vmem:[%s13959_s2 + $0x108] sm:$0xff]  }
  0xa9   : > { %10431 = vmatprep.subr.bf16.mxu1 %v11649_v59  ;;  %v1724_v17 = vsel %vm12221_vm8, %v1722_v43, %v1723_v37  ;;  %v1741_v37 = vrot.slane %v8710_v33, 6 }
  0xaa   : > { %v8926_v57 = vcombine.low %v1721_v42, %v1724_v17  ;;  %v1744_v42 = vrot.slane %v8711_v35, 6 }
  0xab   : > { %10814 = vmatpush3.bf16.msra.mxu0 %v11646_v54  ;;  %10416 = vmatmul.mubr.bf16.gmra.mrb[12].mxu1 %v12702_v5  ;;  %v8905_v54 = vrot.slane %v8703_v48, 10  ;;  %v9259_v48 = vld [vmem:[%s12039_s8 + $0x3e0] sm:$0x8] }
  0xac   : > { %10815 = vmatprep.subr.bf16.mxu0 %v11650_v3  ;;  %10432 = vmatpush3.bf16.msra.mxu1 %v11649_v59  ;;  %v1730_v59 = vrot.slane %v8705_v53, 6  ;;  %v9553_v53 = vrot.slane %v9259_v48, 11  ;;  %v11669_v48 = vld [vmem:[%s12039_s8] sm:$0xff]  }
  0xad   : > { %10433 = vmatprep.subr.bf16.mxu1 %v11651_v8  ;;  %10435 = vmatprep.mubr.bf16.mxu1 %v12376_v44  ;;  %v5578_v44 = vsel %vm12059_vm5, %v9549_v21, %v5577_v23  ;;  %v1734_v21 = vrot.slane %v8707_v16, 6  ;;  %v9256_v23 = vld [vmem:[%s12039_s8 + $0x3c4] sm:$0x8] }
  0xae   : > { %10800 = vmatmul.mubr.bf16.gmra.mrb[12].mxu0 %v9539_v12  ;;  %v9573_v49 = vcombine.low %v5578_v44, %v5581_v31  ;;  %v1731_v1 = vsel %vm12221_vm8, %v1729_v4, %v1730_v59  ;;  %v8709_v31 = vld [vmem:[%s12039_s8 + $0x288] sm:$0xc] }
  0xaf   : > { %10816 = vmatpush3.bf16.msra.mxu0 %v11650_v3  ;;  %10819 = vmatprep.mubr.bf16.mxu0 %v9572_v27  ;;  %v1728_v3 = vsel %vm12221_vm8, %v8905_v54, %v1727_v56  ;;  %v9552_v27 = vrot.slane %v9256_v23, 11  ;;  %v1735_v29 = vsel %vm12221_vm8, %v8906_v20, %v1734_v21  ;;  %v1736_v30 = vrot.slane %v1734_v21, 4  ;;  %v11662_v56 = vld [vmem:[%s13959_s2 + $0x420] sm:$0xff]   ;;  %v11665_v20 = vld [vmem:[%s13959_s2 + $0x130] sm:$0xff]   ;;  %v8717_v23 = vld [vmem:[%s12039_s8 + $0x2c8] sm:$0x3] }
  0xb0   : > { %10817 = vmatprep.subr.bf16.mxu0 %v11652_v24  ;;  %10434 = vmatpush3.bf16.msra.mxu1 %v11651_v8  ;;  %v5591_v8 = vrot.slane %v9254_v2, 7  ;;  %v8927_v38 = vcombine.low %v1728_v3, %v1731_v1  ;;  %v8907_v36 = vrot.slane %v8709_v31, 10  ;;  %v11664_v2 = vld [vmem:[%s13959_s2 + $0x428] sm:$0xff]   ;;  %v9263_v1 = vld [vmem:[%s12039_s8 + $0x400] sm:$0xf]  ;;  %v11667_v31 = vld [vmem:[%s13959_s2 + $0x138] sm:$0xff]  }
  0xb1   : > { %10451 = vmatprep.subr.bf16.mxu1 %v11653_v26  ;;  %v1738_v40 = vsel %vm12221_vm8, %v1736_v30, %v1737_v25  ;;  %v8713_v3 = vld [vmem:[%s12039_s8 + $0x2a8] sm:$0xf]  ;;  %v5612_v14 = vrot.slane %v9263_v1, 7  ;;  %v8716_v21 = vld [vmem:[%s12039_s8 + $0x2c4] sm:$0xf] }
  0xb2   : > { %v5592_v11 = vsel %vm12059_vm5, %v9551_v6, %v5591_v8  ;;  %v5593_v12 = vrot.slane %v5591_v8, 4  ;;  %v8928_v43 = vcombine.low %v1735_v29, %v1738_v40  ;;  %v1742_v46 = vsel %vm12221_vm8, %v8907_v36, %v1741_v37  ;;  %v9262_v8 = vld [vmem:[%s12039_s8 + $0x3fc] sm:$0x8]  ;;  %v9265_v30 = vld [vmem:[%s12039_s8 + $0x418] sm:$0x8] }
  0xb3   : > { %10818 = vmatpush3.bf16.msra.mxu0 %v11652_v24  ;;  %10436 = vmatmul.mubr.bf16.vlgmr.msra.gmra.mrb[0].mxu1 %v12394_v58  ;;  %v5588_v58 = vsel %vm12059_vm5, %v5586_v45, %v5587_v47  ;;  %v1743_v47 = vrot.slane %v1741_v37, 4  ;;  %v5608_v45 = vrot.slane %v9261_v52, 7  ;;  %v5614_v0 = vrot.slane %v5612_v14, 4  ;;  %v9267_v36 = vld [vmem:[%s12039_s8 + $0x420] sm:$0x7] }
  0xb4   : > { %10835 = vmatprep.subr.bf16.mxu0 %v11654_v28  ;;  %10452 = vmatpush3.bf16.msra.mxu1 %v11653_v26  ;;  %v9574_v7 = vcombine.low %v5585_v55, %v5588_v58  ;;  %v5595_v24 = vsel %vm12059_vm5, %v5593_v12, %v5594_v9  ;;  %v9257_v26 = vld [vmem:[%s12039_s8 + $0x3c8] sm:$0xf]  ;;  %v8712_v58 = vld [vmem:[%s12039_s8 + $0x2a4] sm:$0xc]  ;;  %v1758_v29 = vrot.slane %v8717_v23, 6  ;;  %v9555_v37 = vrot.slane %v9265_v30, 11 }
  0xb5   : > { %10453 = vmatprep.subr.bf16.mxu1 %v11655_v41  ;;  %10439 = vmatprep.mubr.bf16.mxu1 %v8926_v57  ;;  %v5598_v44 = vrot.slane %v9257_v26, 7  ;;  %v1745_v55 = vsel %vm12221_vm8, %v1743_v47, %v1744_v42  ;;  %v8908_v6 = vrot.slane %v8712_v58, 10  ;;  %v11668_v47 = vld [vmem:[%s13959_s2 + $0x438] sm:$0xff]  }
  0xb6   : > { %10820 = vmatmul.mubr.bf16.vlgmr.msra.gmra.mrb[0].mxu0 %v9573_v49  ;;  %v9260_v49 = vld [vmem:[%s12039_s8 + $0x3e4] sm:$0xf]  ;;  %v8929_v57 = vcombine.low %v1742_v46, %v1745_v55  ;;  %v11671_v55 = vld [vmem:[%s12039_s8 + $0x1c] sm:$0xff]  }
  0xb7   : > { %10836 = vmatpush3.bf16.msra.mxu0 %v11654_v28  ;;  %10823 = vmatprep.mubr.bf16.mxu0 %v9574_v7  ;;  %v9575_v28 = vcombine.low %v5592_v11, %v5595_v24  ;;  %v5599_v51 = vsel %vm12059_vm5, %v9552_v27, %v5598_v44  ;;  %v5605_v54 = vrot.slane %v9260_v49, 7  ;;  %v1748_v7 = vrot.slane %v8713_v3, 6  ;;  %v11682_v58 = vld [vmem:[%s13959_s2 + $0x458] sm:$0xff]   ;;  %v11686_v3 = vld [vmem:[%s13959_s2 + $0x160] sm:$0xff]  }
  0xb8   : > { %10837 = vmatprep.subr.bf16.mxu0 %v11656_v50  ;;  %10454 = vmatpush3.bf16.msra.mxu1 %v11655_v41  ;;  %v5600_v41 = vrot.slane %v5598_v44, 4  ;;  %v9554_v11 = vrot.slane %v9262_v8, 11  ;;  %v8909_v24 = vrot.slane %v8715_v19, 10  ;;  %v1755_v27 = vrot.slane %v8716_v21, 6  ;;  %v9266_v44 = vld [vmem:[%s12039_s8 + $0x41c] sm:$0xf] }
  0xb9   : > { %10455 = vmatprep.subr.bf16.mxu1 %v11657_v60  ;;  %v5606_v59 = vsel %vm12059_vm5, %v9553_v53, %v5605_v54  ;;  %v1749_v12 = vsel %vm12221_vm8, %v8908_v6, %v1748_v7  ;;  %v5619_v40 = vrot.slane %v9266_v44, 7  ;;  %v11672_v53 = vld [vmem:[%s13959_s2 + $0x440] sm:$0xff]   ;;  %v8800_v6 = vld [vmem:[%s12039_s8 + $0x2b0] sm:$0xf]  ;;  %v11697_v30 = vld [vmem:[%s13959_s2 + $0x178] sm:$0xff]  }
  0xba   : > { %v5613_v26 = vsel %vm12059_vm5, %v9554_v11, %v5612_v14  ;;  %v1757_v35 = vrot.slane %v1755_v27, 4  ;;  %v11687_v8 = vld [vmem:[%s12039_s8 + $0x8c] sm:$0xff]  }
  0xbb   : > { %10838 = vmatpush3.bf16.msra.mxu0 %v11656_v50  ;;  %10440 = vmatmul.mubr.bf16.gmra.mrb[4].mxu1 %v8927_v38  ;;  %v5602_v50 = vsel %vm12059_vm5, %v5600_v41, %v5601_v34  ;;  %v9264_v38 = vld [vmem:[%s12039_s8 + $0x404] sm:$0x7]  ;;  %v1756_v34 = vsel %vm12221_vm8, %v8909_v24, %v1755_v27  ;;  %v5621_v46 = vrot.slane %v5619_v40, 4  ;;  %v11692_v11 = vld [vmem:[%s12039_s8 + $0xa8] sm:$0xff]  }
  0xbc   : > { %10839 = vmatprep.subr.bf16.mxu0 %v11658_v10  ;;  %10456 = vmatpush3.bf16.msra.mxu1 %v11657_v60  ;;  %v9576_v17 = vcombine.low %v5599_v51, %v5602_v50  ;;  %v5607_v60 = vrot.slane %v5605_v54, 4  ;;  %v5615_v16 = vrot.slane %v9264_v38, 7  ;;  %v5622_v51 = vrot.slane %v9267_v36, 7  ;;  %v11670_v50 = vld [vmem:[%s13959_s2 + $0x140] sm:$0xff]   ;;  %v11690_v38 = vld [vmem:[%s13959_s2 + $0x468] sm:$0xff]  }
  0xbd   : > { %10457 = vmatprep.subr.bf16.mxu1 %v11659_v13  ;;  %10443 = vmatprep.mubr.bf16.mxu1 %v8928_v43  ;;  %v1759_v41 = vsel %vm12221_vm8, %v1757_v35, %v1758_v29  ;;  %v5620_v43 = vsel %vm12059_vm5, %v9555_v37, %v5619_v40  ;;  %v11675_v54 = vld [vmem:[%s12039_s8 + $0x23c] sm:$0xff]   ;;  %v12933_v14 = vld [vmem:[%s12039_s8 + $0x2cc] sm:$0x1]  ;;  %v5916_v29 = vld [vmem:[%s12039_s8 + $0x10] sm:$0x1] }
  0xbe   : > { %10824 = vmatmul.mubr.bf16.gmra.mrb[4].mxu0 %v9575_v28  ;;  %v5609_v4 = vsel %vm12059_vm5, %v5607_v60, %v5608_v45  ;;  %v5616_v33 = vsel %vm12059_vm5, %v5614_v0, %v5615_v16  ;;  %v12859_v42 = vcombine.low %v1756_v34, %v1759_v41  ;;  %v5623_v49 = vsel %vm12059_vm5, %v5621_v46, %v5622_v51  ;;  %v11674_v45 = vld [vmem:[%s13959_s2 + $0x448] sm:$0xff]   ;;  %v11683_v60 = vld [vmem:[%s12039_s8 + $0x274] sm:$0xff]   ;;  %v5917_v34 = vld [vmem:[%s12039_s8 + $0x24] sm:$0xe] }
  0xbf   : > { %10840 = vmatpush3.bf16.msra.mxu0 %v11658_v10  ;;  %10827 = vmatprep.mubr.bf16.mxu0 %v9576_v17  ;;  %v9577_v9 = vcombine.low %v5606_v59, %v5609_v4  ;;  %v1751_v10 = vrot.slane %v8714_v61, 6  ;;  %v9579_v52 = vcombine.low %v5620_v43, %v5623_v49  ;;  %v11673_v17 = vld [vmem:[%s13959_s2 + $0x148] sm:$0xff]   ;;  %v11681_v59 = vld [vmem:[%s13959_s2 + $0x158] sm:$0xff]   ;;  %v11685_v4 = vld [vmem:[%s12039_s8 + $0x290] sm:$0xff]   ;;  %v9621_v40 = vrot.slane %v5917_v34, 9 }
  0xc0   : > { %10841 = vmatprep.subr.bf16.mxu0 %v11660_v32  ;;  %10458 = vmatpush3.bf16.msra.mxu1 %v11659_v13  ;;  %v1750_v13 = vrot.slane %v1748_v7, 4  ;;  %v12908_v61 = vld [vmem:[%s12039_s8 + $0x2ac] sm:$0xf]  ;;  %v11688_v7 = vld [vmem:[%s13959_s2 + $0x460] sm:$0xff]   ;;  %v5914_v0 = vld [vmem:[%s12039_s8 + $0x8] sm:$0xe] }
  0xc1   : > { %10459 = vmatprep.subr.bf16.mxu1 %v11661_v39  ;;  %v2558_v1 = vrot.slane %v12908_v61, 5  ;;  %v8801_v16 = vld [vmem:[%s12039_s8 + $0x2cc] sm:$0xf]  ;;  %v9620_v44 = vrot.slane %v5914_v0, 9  ;;  %v5918_v35 = vld [vmem:[%s12039_s8 + $0x28] sm:$0xf] }
  0xc2   : > { %v1752_v25 = vsel %vm12221_vm8, %v1750_v13, %v1751_v10  ;;  %v12919_v10 = vcombine.low %v12908_v61, %v8800_v6  ;;  %v12930_v13 = vld [vmem:[%s12039_s8 + $0x2c8] sm:$0xf]  ;;  %v5915_v27 = vld [vmem:[%s12039_s8 + $0xc] sm:$0xf]  ;;  %v6325_v51 = vrot.slane %v5918_v35, 5  ;;  %v11698_v41 = vld [vmem:[%s13959_s2 + $0x478] sm:$0xff]  }
  0xc3   : > { %10842 = vmatpush3.bf16.msra.mxu0 %v11660_v32  ;;  %10444 = vmatmul.mubr.bf16.gmra.mrb[8].mxu1 %v8929_v57  ;;  %v11666_v32 = vld [vmem:[%s13959_s2 + $0x430] sm:$0xff]   ;;  %v12844_v28 = vcombine.low %v1749_v12, %v1752_v25  ;;  %v11677_v57 = vld [vmem:[%s12039_s8 + $0x258] sm:$0xff]   ;;  %v12927_v12 = vld [vmem:[%s12039_s8 + $0x2c4] sm:$0xe]  ;;  %v12939_v19 = vrot.slane %v2558_v1, 4  ;;  %v2565_v23 = vrot.slane %v12930_v13, 5  ;;  %v12947_v24 = vcombine.low %v12930_v13, %v8801_v16 }
  0xc4   : > { %10843 = vmatprep.subr.bf16.mxu0 %v11662_v56  ;;  %10460 = vmatpush3.bf16.msra.mxu1 %v11661_v39  ;;  %v9578_v39 = vcombine.low %v5613_v26, %v5616_v33  ;;  %v9007_v21 = vrot.slane %v12927_v12, 9  ;;  %v11696_v25 = vld [vmem:[%s13959_s2 + $0x470] sm:$0xff]   ;;  %v11695_v26 = vld [vmem:[%s12039_s8 + $0xc4] sm:$0xff]   ;;  %v6321_v33 = vrot.slane %v5916_v29, 5  ;;  %v5923_v0 = vld [vmem:[%s12039_s8 + $0x5c] sm:$0xe] }
  0xc5   : > { %10461 = vmatprep.subr.bf16.mxu1 %v11663_v62  ;;  %10447 = vmatprep.mubr.bf16.mxu1 %v12844_v28  ;;  %v9623_v35 = vrot.slane %v5923_v0, 9  ;;  %v11709_v0 = vld [vmem:[%s13959_s2 + $0x1a8] sm:$0xff]  }
  0xc6   : > { %10828 = vmatmul.mubr.bf16.gmra.mrb[8].mxu0 %v9577_v9  ;;  %v11689_v9 = vld [vmem:[%s13959_s2 + $0x168] sm:$0xff]  }
  0xc7   : > { %10844 = vmatpush3.bf16.msra.mxu0 %v11662_v56  ;;  %10831 = vmatprep.mubr.bf16.mxu0 %v9578_v39  ;;  %v11678_v56 = vld [vmem:[%s13959_s2 + $0x150] sm:$0xff]   ;;  %v5919_v39 = vld [vmem:[%s12039_s8 + $0x2c] sm:$0x1] }
  0xc8   : > { %10845 = vmatprep.subr.bf16.mxu0 %v11664_v2  ;;  %10462 = vmatpush3.bf16.msra.mxu1 %v11663_v62  ;;  %v11679_v62 = vld [vmem:[%s12039_s8 + $0x54] sm:$0xff]   ;;  %v6328_v43 = vrot.slane %v5919_v39, 5 }
  0xc9   : > { %10463 = vmatprep.subr.bf16.mxu1 %v11665_v20  ;;  %v11704_v39 = vld [vmem:[%s13959_s2 + $0x490] sm:$0xff]  }
  0xcb   : > { %10846 = vmatpush3.bf16.msra.mxu0 %v11664_v2  ;;  %10448 = vmatmul.mubr.bf16.gmra.mrb[12].mxu1 %v12859_v42  ;;  %v11684_v2 = vld [vmem:[%s12039_s8 + $0x70] sm:$0xff]  }
  0xcc   : > { %10847 = vmatprep.subr.bf16.mxu0 %v11666_v32  ;;  %10464 = vmatpush3.bf16.msra.mxu1 %v11665_v20  ;;  %v11694_v20 = vld [vmem:[%s13959_s2 + $0x170] sm:$0xff]  }
  0xcd   : > { %10465 = vmatprep.subr.bf16.mxu1 %v11667_v31  ;;  %10467 = vmatprep.mubr.bf16.mxu1 %v12679_v18  ;;  %v11676_v18 = vld [vmem:[%s12039_s8 + $0x38] sm:$0xff]  }
  0xce   : > { %10832 = vmatmul.mubr.bf16.gmra.mrb[12].mxu0 %v9579_v52  ;;  %v8718_v52 = vld [vmem:[%s12039_s8 + $0x2dc] sm:$0xc] }
  0xcf   : > { %10848 = vmatpush3.bf16.msra.mxu0 %v11666_v32  ;;  %10851 = vmatprep.mubr.bf16.mxu0 %v11669_v48  ;;  %v2568_v32 = vrot.slane %v12933_v14, 5  ;;  %v6327_v48 = vrot.slane %v6325_v51, 4 }
  0xd0   : > { %10849 = vmatprep.subr.bf16.mxu0 %v11668_v47  ;;  %10466 = vmatpush3.bf16.msra.mxu1 %v11667_v31  ;;  %v6318_v31 = vrot.slane %v5915_v27, 5 }
  0xd1   : > { %10483 = vmatprep.subr.bf16.mxu1 %v11670_v50 }
  0xd2   : > { %v6319_v36 = vsel %vm12050_vm4, %v9620_v44, %v6318_v31  ;;  %v6320_v37 = vrot.slane %v6318_v31, 4  ;;  %v11703_v44 = vld [vmem:[%s13959_s2 + $0x190] sm:$0xff]   ;;  %v5924_v31 = vld [vmem:[%s12039_s8 + $0x60] sm:$0xf] }
  0xd3   : > { %10850 = vmatpush3.bf16.msra.mxu0 %v11668_v47  ;;  %10468 = vmatmul.mubr.bf16.vlgmr.msra.gmra.mrb[0].mxu1 %v12702_v5  ;;  %v11680_v5 = vld [vmem:[%s13959_s2 + $0x450] sm:$0xff]   ;;  %v11699_v47 = vld [vmem:[%s13959_s2 + $0x180] sm:$0xff]  }
  0xd4   : > { %10867 = vmatprep.subr.bf16.mxu0 %v11672_v53  ;;  %10484 = vmatpush3.bf16.msra.mxu1 %v11670_v50  ;;  %v6322_v46 = vsel %vm12050_vm4, %v6320_v37, %v6321_v33  ;;  %v11700_v50 = vld [vmem:[%s13959_s2 + $0x480] sm:$0xff]  }
  0xd5   : > { %10471 = vmatprep.mubr.bf16.mxu1 %v11675_v54  ;;  %10485 = vmatprep.subr.bf16.mxu1 %v11673_v17  ;;  %v9644_v49 = vcombine.low %v6319_v36, %v6322_v46  ;;  %v11701_v54 = vld [vmem:[%s13959_s2 + $0x188] sm:$0xff]   ;;  %v5925_v33 = vld [vmem:[%s12039_s8 + $0x64] sm:$0x1]  ;;  %v6339_v36 = vrot.slane %v5924_v31, 5  ;;  %v11705_v46 = vld [vmem:[%s13959_s2 + $0x198] sm:$0xff]  }
  0xd6   : > { %10852 = vmatmul.mubr.bf16.vlgmr.msra.gmra.mrb[0].mxu0 %v11671_v55  ;;  %v8720_v55 = vld [vmem:[%s12039_s8 + $0x2e4] sm:$0x3]  ;;  %v6342_v37 = vrot.slane %v5925_v33, 5 }
  0xd7   : > { %10868 = vmatpush3.bf16.msra.mxu0 %v11672_v53  ;;  %10855 = vmatprep.mubr.bf16.mxu0 %v11676_v18  ;;  %v6329_v53 = vsel %vm12050_vm4, %v6327_v48, %v6328_v43  ;;  %v8970_v18 = vrot.slane %v8718_v52, 10  ;;  %v6341_v43 = vrot.slane %v6339_v36, 4  ;;  %v8725_v48 = vld [vmem:[%s12039_s8 + $0x318] sm:$0xf] }
  0xd8   : > { %10869 = vmatprep.subr.bf16.mxu0 %v11674_v45  ;;  %10486 = vmatpush3.bf16.msra.mxu1 %v11673_v17  ;;  %v8719_v17 = vld [vmem:[%s12039_s8 + $0x2e0] sm:$0xf] }
  0xd9   : > { %10487 = vmatprep.subr.bf16.mxu1 %v11678_v56 }
  0xdb   : > { %10870 = vmatpush3.bf16.msra.mxu0 %v11674_v45  ;;  %10472 = vmatmul.mubr.bf16.gmra.mrb[4].mxu1 %v11677_v57  ;;  %v2260_v45 = vrot.slane %v8719_v17, 6  ;;  %v5920_v57 = vld [vmem:[%s12039_s8 + $0x40] sm:$0xe]  ;;  %v13032_v17 = vrot.slane %v2565_v23, 4 }
  0xdc   : > { %10871 = vmatprep.subr.bf16.mxu0 %v11680_v5  ;;  %10488 = vmatpush3.bf16.msra.mxu1 %v11678_v56  ;;  %v2263_v56 = vrot.slane %v8720_v55, 6 }
  0xdd   : > { %10489 = vmatprep.subr.bf16.mxu1 %v11681_v59  ;;  %10475 = vmatprep.mubr.bf16.mxu1 %v11683_v60  ;;  %v9622_v60 = vrot.slane %v5920_v57, 9  ;;  %v11706_v57 = vld [vmem:[%s13959_s2 + $0x498] sm:$0xff]   ;;  %v2569_v13 = vsel %vm12050_vm4, %v13032_v17, %v2568_v32  ;;  %v11716_v32 = vld [vmem:[%s13959_s2 + $0x4c0] sm:$0xff]  }
  0xde   : > { %10856 = vmatmul.mubr.bf16.gmra.mrb[4].mxu0 %v11679_v62 }
  0xdf   : > { %10872 = vmatpush3.bf16.msra.mxu0 %v11680_v5  ;;  %10859 = vmatprep.mubr.bf16.mxu0 %v11684_v2  ;;  %v5921_v5 = vld [vmem:[%s12039_s8 + $0x44] sm:$0xf]  ;;  %v8721_v2 = vld [vmem:[%s12039_s8 + $0x2f8] sm:$0xc] }
  0xe0   : > { %10873 = vmatprep.subr.bf16.mxu0 %v11682_v58  ;;  %10490 = vmatpush3.bf16.msra.mxu1 %v11681_v59  ;;  %v5922_v59 = vld [vmem:[%s12039_s8 + $0x48] sm:$0x1]  ;;  %v6332_v62 = vrot.slane %v5921_v5, 5 }
  0xe1   : > { %10491 = vmatprep.subr.bf16.mxu1 %v11686_v3  ;;  %v6335_v6 = vrot.slane %v5922_v59, 5 }
  0xe3   : > { %10874 = vmatpush3.bf16.msra.mxu0 %v11682_v58  ;;  %10476 = vmatmul.mubr.bf16.gmra.mrb[8].mxu1 %v11685_v4  ;;  %v2262_v4 = vrot.slane %v2260_v45, 4 }
  0xe4   : > { %10875 = vmatprep.subr.bf16.mxu0 %v11688_v7  ;;  %10492 = vmatpush3.bf16.msra.mxu1 %v11686_v3  ;;  %v2261_v3 = vsel %vm12221_vm8, %v8970_v18, %v2260_v45  ;;  %v5927_v18 = vld [vmem:[%s12039_s8 + $0x7c] sm:$0xf]  ;;  %v5928_v45 = vld [vmem:[%s12039_s8 + $0x80] sm:$0x1] }
  0xe5   : > { %10493 = vmatprep.subr.bf16.mxu1 %v11689_v9  ;;  %10479 = vmatprep.mubr.bf16.mxu1 %v12919_v10 }
  0xe6   : > { %10860 = vmatmul.mubr.bf16.gmra.mrb[8].mxu0 %v11687_v8  ;;  %v8723_v8 = vld [vmem:[%s12039_s8 + $0x300] sm:$0x3] }
  0xe7   : > { %10876 = vmatpush3.bf16.msra.mxu0 %v11688_v7  ;;  %10863 = vmatprep.mubr.bf16.mxu0 %v11692_v11  ;;  %v8722_v7 = vld [vmem:[%s12039_s8 + $0x2fc] sm:$0xf]  ;;  %v8971_v11 = vrot.slane %v8721_v2, 10  ;;  %v8727_v2 = vld [vmem:[%s12039_s8 + $0x330] sm:$0xc] }
  0xe8   : > { %10877 = vmatprep.subr.bf16.mxu0 %v11690_v38  ;;  %10494 = vmatpush3.bf16.msra.mxu1 %v11689_v9  ;;  %v6333_v9 = vsel %vm12050_vm4, %v9622_v60, %v6332_v62  ;;  %v2267_v16 = vrot.slane %v8722_v7, 6  ;;  %v6346_v60 = vrot.slane %v5927_v18, 5 }
  0xe9   : > { %10495 = vmatprep.subr.bf16.mxu1 %v11694_v20 }
  0xea   : > { %v2268_v29 = vsel %vm12221_vm8, %v8971_v11, %v2267_v16  ;;  %v11708_v11 = vld [vmem:[%s13959_s2 + $0x4a0] sm:$0xff]  }
  0xeb   : > { %10878 = vmatpush3.bf16.msra.mxu0 %v11690_v38  ;;  %10480 = vmatmul.mubr.bf16.gmra.mrb[12].mxu1 %v12947_v24  ;;  %v6334_v38 = vrot.slane %v6332_v62, 4  ;;  %v6349_v62 = vrot.slane %v5928_v45, 5 }
  0xec   : > { %10879 = vmatprep.subr.bf16.mxu0 %v11696_v25  ;;  %10496 = vmatpush3.bf16.msra.mxu1 %v11694_v20  ;;  %v11702_v20 = vld [vmem:[%s13959_s2 + $0x488] sm:$0xff]  }
  0xed   : > { %10497 = vmatprep.subr.bf16.mxu1 %v11697_v30  ;;  %10499 = vmatprep.mubr.bf16.mxu1 %v12844_v28  ;;  %v6326_v28 = vsel %vm12050_vm4, %v9621_v40, %v6325_v51  ;;  %v6336_v27 = vsel %vm12050_vm4, %v6334_v38, %v6335_v6  ;;  %v11707_v6 = vld [vmem:[%s13959_s2 + $0x1a0] sm:$0xff]  }
  0xee   : > { %10864 = vmatmul.mubr.bf16.gmra.mrb[12].mxu0 %v11695_v26  ;;  %v9645_v58 = vcombine.low %v6326_v28, %v6329_v53  ;;  %v2270_v26 = vrot.slane %v8723_v8, 6  ;;  %v9646_v34 = vcombine.low %v6333_v9, %v6336_v27  ;;  %v2274_v28 = vrot.slane %v8725_v48, 6  ;;  %v5932_v48 = vld [vmem:[%s12039_s8 + $0xb0] sm:$0xe] }
  0xef   : > { %10880 = vmatpush3.bf16.msra.mxu0 %v11696_v25  ;;  %10883 = vmatprep.mubr.bf16.mxu0 %v9644_v49  ;;  %v2264_v25 = vsel %vm12221_vm8, %v2262_v4, %v2263_v56  ;;  %v8726_v49 = vld [vmem:[%s12039_s8 + $0x31c] sm:$0x3]  ;;  %v8973_v4 = vrot.slane %v8727_v2, 10  ;;  %v6348_v9 = vrot.slane %v6346_v60, 4 }
  0xf0   : > { %10881 = vmatprep.subr.bf16.mxu0 %v11698_v41  ;;  %10498 = vmatpush3.bf16.msra.mxu1 %v11697_v30  ;;  %v2269_v30 = vrot.slane %v2267_v16, 4  ;;  %v2277_v53 = vrot.slane %v8726_v49, 6  ;;  %v2276_v59 = vrot.slane %v2274_v28, 4  ;;  %v11711_v49 = vld [vmem:[%s13959_s2 + $0x1b0] sm:$0xff]  }
  0xf1   : > { %10515 = vmatprep.subr.bf16.mxu1 %v11699_v47 }
  0xf2   : > { %v2271_v40 = vsel %vm12221_vm8, %v2269_v30, %v2270_v26  ;;  %v2278_v7 = vsel %vm12221_vm8, %v2276_v59, %v2277_v53  ;;  %v5930_v26 = vld [vmem:[%s12039_s8 + $0x98] sm:$0xf]  ;;  %v5931_v30 = vld [vmem:[%s12039_s8 + $0x9c] sm:$0x1] }
  0xf3   : > { %10882 = vmatpush3.bf16.msra.mxu0 %v11698_v41  ;;  %10500 = vmatmul.mubr.bf16.vlgmr.msra.gmra.mrb[0].mxu1 %v12859_v42  ;;  %v8992_v42 = vcombine.low %v2261_v3, %v2264_v25  ;;  %v8993_v51 = vcombine.low %v2268_v29, %v2271_v40  ;;  %v6340_v41 = vsel %vm12050_vm4, %v9623_v35, %v6339_v36  ;;  %v8729_v3 = vld [vmem:[%s12039_s8 + $0x338] sm:$0x3]  ;;  %v5929_v25 = vld [vmem:[%s12039_s8 + $0x94] sm:$0xe]  ;;  %v6353_v33 = vrot.slane %v5930_v26, 5  ;;  %v11710_v40 = vld [vmem:[%s13959_s2 + $0x4a8] sm:$0xff]  }
  0xf4   : > { %10899 = vmatprep.subr.bf16.mxu0 %v11700_v50  ;;  %10516 = vmatpush3.bf16.msra.mxu1 %v11699_v47  ;;  %v8724_v47 = vld [vmem:[%s12039_s8 + $0x314] sm:$0xc]  ;;  %v5934_v53 = vld [vmem:[%s12039_s8 + $0xb8] sm:$0x1]  ;;  %v5937_v26 = vld [vmem:[%s12039_s8 + $0xd4] sm:$0x1] }
  0xf5   : > { %10517 = vmatprep.subr.bf16.mxu1 %v11701_v54  ;;  %10503 = vmatprep.mubr.bf16.mxu1 %v8992_v42  ;;  %v8972_v52 = vrot.slane %v8724_v47, 10  ;;  %v6350_v42 = vsel %vm12050_vm4, %v6348_v9, %v6349_v62  ;;  %v6363_v59 = vrot.slane %v5934_v53, 5 }
  0xf6   : > { %10884 = vmatmul.mubr.bf16.vlgmr.msra.gmra.mrb[0].mxu0 %v9645_v58  ;;  %v8728_v58 = vld [vmem:[%s12039_s8 + $0x334] sm:$0xf] }
  0xf7   : > { %10900 = vmatpush3.bf16.msra.mxu0 %v11700_v50  ;;  %10887 = vmatprep.mubr.bf16.mxu0 %v9646_v34  ;;  %v6343_v50 = vsel %vm12050_vm4, %v6341_v43, %v6342_v37  ;;  %v2275_v5 = vsel %vm12221_vm8, %v8972_v52, %v2274_v28  ;;  %v2281_v38 = vrot.slane %v8728_v58, 6  ;;  %v6356_v34 = vrot.slane %v5931_v30, 5  ;;  %v8732_v43 = vld [vmem:[%s12039_s8 + $0x354] sm:$0x3] }
  0xf8   : > { %10901 = vmatprep.subr.bf16.mxu0 %v11702_v20  ;;  %10518 = vmatpush3.bf16.msra.mxu1 %v11701_v54  ;;  %v5926_v54 = vld [vmem:[%s12039_s8 + $0x78] sm:$0xe]  ;;  %v9647_v55 = vcombine.low %v6340_v41, %v6343_v50  ;;  %v8994_v16 = vcombine.low %v2275_v5, %v2278_v7  ;;  %v8731_v41 = vld [vmem:[%s12039_s8 + $0x350] sm:$0xf]  ;;  %v2291_v52 = vrot.slane %v8732_v43, 6  ;;  %v6370_v30 = vrot.slane %v5937_v26, 5 }
  0xf9   : > { %10519 = vmatprep.subr.bf16.mxu1 %v11703_v44  ;;  %v9624_v56 = vrot.slane %v5926_v54, 9  ;;  %v2282_v27 = vsel %vm12221_vm8, %v8973_v4, %v2281_v38  ;;  %v2283_v29 = vrot.slane %v2281_v38, 4  ;;  %v2288_v47 = vrot.slane %v8731_v41, 6  ;;  %v5933_v28 = vld [vmem:[%s12039_s8 + $0xb4] sm:$0xf] }
  0xfa   : > { %v9626_v54 = vrot.slane %v5932_v48, 9  ;;  %v8734_v5 = vld [vmem:[%s12039_s8 + $0x36c] sm:$0xf]  ;;  %v11712_v58 = vld [vmem:[%s13959_s2 + $0x4b0] sm:$0xff]  }
  0xfb   : > { %10902 = vmatpush3.bf16.msra.mxu0 %v11702_v20  ;;  %10504 = vmatmul.mubr.bf16.gmra.mrb[4].mxu1 %v8993_v51  ;;  %v6347_v8 = vsel %vm12050_vm4, %v9624_v56, %v6346_v60  ;;  %v2284_v20 = vrot.slane %v8729_v3, 6  ;;  %v8730_v51 = vld [vmem:[%s12039_s8 + $0x34c] sm:$0xc]  ;;  %v2290_v45 = vrot.slane %v2288_v47, 4  ;;  %v6360_v56 = vrot.slane %v5933_v28, 5 }
  0xfc   : > { %10903 = vmatprep.subr.bf16.mxu0 %v11704_v39  ;;  %10520 = vmatpush3.bf16.msra.mxu1 %v11703_v44  ;;  %v9625_v44 = vrot.slane %v5929_v25, 9  ;;  %v9648_v31 = vcombine.low %v6347_v8, %v6350_v42  ;;  %v8735_v60 = vld [vmem:[%s12039_s8 + $0x370] sm:$0x3]  ;;  %v2295_v2 = vrot.slane %v8734_v5, 6  ;;  %v5962_v43 = vld [vmem:[%s12039_s8 + $0x10] sm:$0xc] }
  0xfd   : > { %10521 = vmatprep.subr.bf16.mxu1 %v11705_v46  ;;  %10507 = vmatprep.mubr.bf16.mxu1 %v8994_v16  ;;  %v2285_v35 = vsel %vm12221_vm8, %v2283_v29, %v2284_v20  ;;  %v2292_v3 = vsel %vm12221_vm8, %v2290_v45, %v2291_v52  ;;  %v6361_v4 = vsel %vm12050_vm4, %v9626_v54, %v6360_v56  ;;  %v2298_v7 = vrot.slane %v8735_v60, 6  ;;  %v5936_v16 = vld [vmem:[%s12039_s8 + $0xd0] sm:$0xf]  ;;  %v11713_v20 = vld [vmem:[%s13959_s2 + $0x1b8] sm:$0xff]   ;;  %v11717_v5 = vld [vmem:[%s13959_s2 + $0x1c8] sm:$0xff]  }
  0xfe   : > { %10888 = vmatmul.mubr.bf16.gmra.mrb[4].mxu0 %v9647_v55  ;;  %v8995_v36 = vcombine.low %v2282_v27, %v2285_v35  ;;  %v6354_v37 = vsel %vm12050_vm4, %v9625_v44, %v6353_v33  ;;  %v2297_v38 = vrot.slane %v2295_v2, 4  ;;  %v11714_v44 = vld [vmem:[%s13959_s2 + $0x4b8] sm:$0xff]   ;;  %v11715_v35 = vld [vmem:[%s13959_s2 + $0x1c0] sm:$0xff]   ;;  %v5966_v28 = vld [vmem:[%s12039_s8 + $0x30] sm:$0xf] }
  0xff   : > { %10904 = vmatpush3.bf16.msra.mxu0 %v11704_v39  ;;  %10891 = vmatprep.mubr.bf16.mxu0 %v9648_v31  ;;  %v6355_v39 = vrot.slane %v6353_v33, 4  ;;  %v6647_v54 = vrot.slane %v5966_v28, 6  ;;  %v11718_v60 = vld [vmem:[%s13959_s2 + $0x4c8] sm:$0xff]  }
 0x100   : > { %10905 = vmatprep.subr.bf16.mxu0 %v11706_v57  ;;  %10522 = vmatpush3.bf16.msra.mxu1 %v11705_v46  ;;  %v8974_v46 = vrot.slane %v8730_v51, 10  ;;  %v2299_v29 = vsel %vm12221_vm8, %v2297_v38, %v2298_v7  ;;  %v5968_v7 = vld [vmem:[%s12039_s8 + $0x48] sm:$0xc] }
 0x101   : > { %10523 = vmatprep.subr.bf16.mxu1 %v11707_v6  ;;  %v6357_v50 = vsel %vm12050_vm4, %v6355_v39, %v6356_v34  ;;  %v2566_v39 = vsel %vm12050_vm4, %v9007_v21, %v2565_v23  ;;  %v5964_v21 = vld [vmem:[%s12039_s8 + $0x18] sm:$0x3]  ;;  %v9660_v23 = vrot.slane %v5962_v43, 10  ;;  %v5973_v43 = vld [vmem:[%s12039_s8 + $0x6c] sm:$0x3] }
 0x102   : > { %v9649_v55 = vcombine.low %v6354_v37, %v6357_v50  ;;  %v2289_v18 = vsel %vm12221_vm8, %v8974_v46, %v2288_v47  ;;  %v8762_v37 = vld [vmem:[%s12039_s8 + $0x2b0] sm:$0x1]  ;;  %v5963_v46 = vld [vmem:[%s12039_s8 + $0x14] sm:$0xf]  ;;  %v5965_v50 = vld [vmem:[%s12039_s8 + $0x2c] sm:$0xc] }
 0x103   : > { %10906 = vmatpush3.bf16.msra.mxu0 %v11706_v57  ;;  %10508 = vmatmul.mubr.bf16.gmra.mrb[8].mxu1 %v8995_v36  ;;  %v8733_v57 = vld [vmem:[%s12039_s8 + $0x368] sm:$0xc]  ;;  %v8996_v8 = vcombine.low %v2289_v18, %v2292_v3  ;;  %v2561_v41 = vrot.slane %v8762_v37, 5  ;;  %v6640_v47 = vrot.slane %v5963_v46, 6  ;;  %v9661_v53 = vrot.slane %v5965_v50, 10  ;;  %v11720_v46 = vld [vmem:[%s13959_s2 + $0x4d0] sm:$0xff]  }
 0x104   : > { %10907 = vmatprep.subr.bf16.mxu0 %v11708_v11  ;;  %10524 = vmatpush3.bf16.msra.mxu1 %v11707_v6  ;;  %v8975_v62 = vrot.slane %v8733_v57, 10  ;;  %v6362_v6 = vrot.slane %v6360_v56, 4  ;;  %v8760_v36 = vld [vmem:[%s12039_s8 + $0x2a8] sm:$0xe]  ;;  %v6649_v57 = vrot.slane %v6647_v54, 4 }
 0x105   : > { %10525 = vmatprep.subr.bf16.mxu1 %v11709_v0  ;;  %10511 = vmatprep.mubr.bf16.mxu1 %v8996_v8  ;;  %v9006_v51 = vrot.slane %v8760_v36, 9  ;;  %v2562_v14 = vsel %vm12050_vm4, %v12939_v19, %v2561_v41  ;;  %v6641_v52 = vsel %vm12221_vm8, %v9660_v23, %v6640_v47  ;;  %v6642_v61 = vrot.slane %v6640_v47, 4  ;;  %v5969_v8 = vld [vmem:[%s12039_s8 + $0x4c] sm:$0xf]  ;;  %v5971_v36 = vld [vmem:[%s12039_s8 + $0x64] sm:$0xc] }
 0x106   : > { %10892 = vmatmul.mubr.bf16.gmra.mrb[8].mxu0 %v9649_v55  ;;  %v2296_v9 = vsel %vm12221_vm8, %v8975_v62, %v2295_v2  ;;  %v6364_v25 = vsel %vm12050_vm4, %v6362_v6, %v6363_v59  ;;  %v9031_v19 = vcombine.low %v2566_v39, %v2569_v13  ;;  %v6648_v56 = vsel %vm12221_vm8, %v9661_v53, %v6647_v54  ;;  %v8766_v59 = vld [vmem:[%s12039_s8 + $0x2e0] sm:$0xe]  ;;  %v13159_v62 = vld [vmem:[%s12039_s8 + $0x2e4] sm:$0xf]  ;;  %v8768_v2 = vld [vmem:[%s12039_s8 + $0x2e8] sm:$0x1] }
 0x107   : > { %10908 = vmatpush3.bf16.msra.mxu0 %v11708_v11  ;;  %v5935_v11 = vld [vmem:[%s12039_s8 + $0xcc] sm:$0xe]  ;;  %v9650_v27 = vcombine.low %v6361_v4, %v6364_v25  ;;  %v8997_v31 = vcombine.low %v2296_v9, %v2299_v29  ;;  %v2559_v48 = vsel %vm12050_vm4, %v9006_v51, %v2558_v1  ;;  %v5967_v1 = vld [vmem:[%s12039_s8 + $0x34] sm:$0x3]  ;;  %v2572_v4 = vrot.slane %v13159_v62, 5  ;;  %v11721_v47 = vld [vmem:[%s13959_s2 + $0x1d8] sm:$0xff]  }
 0x108   : > { %10909 = vmatprep.subr.bf16.mxu0 %v11710_v40  ;;  %10526 = vmatpush3.bf16.msra.mxu1 %v11709_v0  ;;  %v9627_v42 = vrot.slane %v5935_v11, 9  ;;  %v6367_v0 = vrot.slane %v5936_v16, 5  ;;  %v9030_v17 = vcombine.low %v2559_v48, %v2562_v14  ;;  %v6650_v55 = vrot.slane %v5967_v1, 6  ;;  %v11719_v9 = vld [vmem:[%s13959_s2 + $0x1d0] sm:$0xff]   ;;  %v8769_v25 = vld [vmem:[%s12039_s8 + $0x2fc] sm:$0xe] }
 0x109   : > { %10527 = vmatprep.subr.bf16.mxu1 %v11711_v49  ;;  %10895 = vmatprep.mubr.bf16.mxu0 %v9650_v27  ;;  %v2575_v6 = vrot.slane %v8768_v2, 5  ;;  %v5970_v11 = vld [vmem:[%s12039_s8 + $0x50] sm:$0x3]  ;;  %v9662_v16 = vrot.slane %v5968_v7, 10  ;;  %v13175_v27 = vld [vmem:[%s12039_s8 + $0x300] sm:$0xf] }
 0x10a   : > { %v6368_v33 = vsel %vm12050_vm4, %v9627_v42, %v6367_v0  ;;  %v6369_v34 = vrot.slane %v6367_v0, 4  ;;  %v6651_v3 = vsel %vm12221_vm8, %v6649_v57, %v6650_v55  ;;  %v2574_v42 = vrot.slane %v2572_v4, 4  ;;  %v8771_v29 = vld [vmem:[%s12039_s8 + $0x304] sm:$0x1]  ;;  %v5972_v41 = vld [vmem:[%s12039_s8 + $0x68] sm:$0xf] }
 0x10b   : > { %10910 = vmatpush3.bf16.msra.mxu0 %v11710_v40  ;;  %10512 = vmatmul.mubr.bf16.gmra.mrb[12].mxu1 %v8997_v31  ;;  %v9685_v38 = vcombine.low %v6648_v56, %v6651_v3  ;;  %v6657_v0 = vrot.slane %v5970_v11, 6  ;;  %v9009_v31 = vrot.slane %v8769_v25, 9  ;;  %v6664_v23 = vrot.slane %v5973_v43, 6  ;;  %v5974_v54 = vld [vmem:[%s12039_s8 + $0x80] sm:$0xc] }
 0x10c   : > { %10911 = vmatprep.subr.bf16.mxu0 %v11712_v58  ;;  %10528 = vmatpush3.bf16.msra.mxu1 %v11711_v49  ;;  %v6371_v40 = vsel %vm12050_vm4, %v6369_v34, %v6370_v30  ;;  %v6643_v49 = vrot.slane %v5964_v21, 6  ;;  %v2576_v34 = vsel %vm12050_vm4, %v2574_v42, %v2575_v6  ;;  %v6661_v21 = vrot.slane %v5972_v41, 6  ;;  %v11723_v57 = vld [vmem:[%s13959_s2 + $0x1e0] sm:$0xff]   ;;  %v8777_v6 = vld [vmem:[%s12039_s8 + $0x33c] sm:$0x1] }
 0x10d   : > { %10529 = vmatprep.subr.bf16.mxu1 %v11713_v20  ;;  %v9651_v12 = vcombine.low %v6368_v33, %v6371_v40  ;;  %10531 = vmatprep.mubr.bf16.mxu1 %v9030_v17  ;;  %v2579_v33 = vrot.slane %v13175_v27, 5  ;;  %v8772_v17 = vld [vmem:[%s12039_s8 + $0x318] sm:$0xe]  ;;  %v9664_v56 = vrot.slane %v5974_v54, 10  ;;  %v11724_v3 = vld [vmem:[%s13959_s2 + $0x4e0] sm:$0xff]   ;;  %v2596_v25 = vrot.slane %v8777_v6, 5 }
 0x10e   : > { %v6644_v18 = vsel %vm12221_vm8, %v6642_v61, %v6643_v49  ;;  %v6663_v50 = vrot.slane %v6661_v21, 4  ;;  %v8774_v61 = vld [vmem:[%s12039_s8 + $0x320] sm:$0x1]  ;;  %v9010_v1 = vrot.slane %v8772_v17, 9  ;;  %v8778_v41 = vld [vmem:[%s12039_s8 + $0x350] sm:$0xe] }
 0x10f   : > { %10912 = vmatpush3.bf16.msra.mxu0 %v11712_v58  ;;  %v9684_v45 = vcombine.low %v6641_v52, %v6644_v18  ;;  %v9008_v58 = vrot.slane %v8766_v59, 9  ;;  %v2580_v40 = vsel %vm12050_vm4, %v9009_v31, %v2579_v33  ;;  %v2581_v51 = vrot.slane %v2579_v33, 4  ;;  %v13205_v52 = vld [vmem:[%s12039_s8 + $0x31c] sm:$0xf]  ;;  %v5975_v18 = vld [vmem:[%s12039_s8 + $0x84] sm:$0xf] }
 0x110   : > { %10913 = vmatprep.subr.bf16.mxu0 %v11714_v44  ;;  %10896 = vmatmul.mubr.bf16.gmra.mrb[12].mxu0 %v9651_v12  ;;  %v9663_v12 = vrot.slane %v5971_v36, 10  ;;  %v6665_v28 = vsel %vm12221_vm8, %v6663_v50, %v6664_v23  ;;  %v2586_v53 = vrot.slane %v13205_v52, 5  ;;  %v5978_v42 = vld [vmem:[%s12039_s8 + $0xa0] sm:$0xf]  ;;  %v5979_v31 = vld [vmem:[%s12039_s8 + $0xa4] sm:$0x3] }
 0x111   : > { %10530 = vmatpush3.bf16.msra.mxu1 %v11713_v20  ;;  %10915 = vmatprep.mubr.bf16.mxu0 %v9684_v45  ;;  %v6654_v20 = vrot.slane %v5969_v8, 6  ;;  %v2573_v26 = vsel %vm12050_vm4, %v9008_v58, %v2572_v4  ;;  %v5976_v45 = vld [vmem:[%s12039_s8 + $0x88] sm:$0x3]  ;;  %v8775_v58 = vld [vmem:[%s12039_s8 + $0x334] sm:$0xe]  ;;  %v6678_v36 = vrot.slane %v5979_v31, 6 }
 0x112   : > { %10547 = vmatprep.subr.bf16.mxu1 %v11715_v35  ;;  %v9032_v37 = vcombine.low %v2573_v26, %v2576_v34  ;;  %v6662_v49 = vsel %vm12221_vm8, %v9663_v12, %v6661_v21  ;;  %v2588_v59 = vrot.slane %v2586_v53, 4  ;;  %v6671_v2 = vrot.slane %v5976_v45, 6  ;;  %v13224_v4 = vld [vmem:[%s12039_s8 + $0x338] sm:$0xf]  ;;  %v11725_v8 = vld [vmem:[%s13959_s2 + $0x1e8] sm:$0xff]   ;;  %v11734_v31 = vld [vmem:[%s13959_s2 + $0x500] sm:$0xff]  }
 0x113   : > { %10914 = vmatpush3.bf16.msra.mxu0 %v11714_v44  ;;  %v6655_v30 = vsel %vm12221_vm8, %v9662_v16, %v6654_v20  ;;  %v6656_v44 = vrot.slane %v6654_v20, 4  ;;  %v9687_v55 = vcombine.low %v6662_v49, %v6665_v28  ;;  %v9011_v7 = vrot.slane %v8775_v58, 9  ;;  %v5977_v26 = vld [vmem:[%s12039_s8 + $0x9c] sm:$0xc]  ;;  %v13251_v43 = vld [vmem:[%s12039_s8 + $0x354] sm:$0xf] }
 0x114   : > { %10931 = vmatprep.subr.bf16.mxu0 %v11716_v32  ;;  %10532 = vmatmul.mubr.bf16.vlgmr.msra.gmra.mrb[0].mxu1 %v9031_v19  ;;  %v2589_v19 = vrot.slane %v8774_v61, 5  ;;  %v2593_v16 = vrot.slane %v13224_v4, 5  ;;  %v9665_v33 = vrot.slane %v5977_v26, 10  ;;  %v9012_v12 = vrot.slane %v8778_v41, 9  ;;  %v5980_v23 = vld [vmem:[%s12039_s8 + $0xb8] sm:$0xc] }
 0x115   : > { %10548 = vmatpush3.bf16.msra.mxu1 %v11715_v35  ;;  %v2582_v35 = vrot.slane %v8771_v29, 5  ;;  %v6658_v39 = vsel %vm12221_vm8, %v6656_v44, %v6657_v0  ;;  %10535 = vmatprep.mubr.bf16.mxu1 %v9032_v37  ;;  %v11726_v0 = vld [vmem:[%s13959_s2 + $0x4e8] sm:$0xff]   ;;  %v2600_v21 = vrot.slane %v13251_v43, 5  ;;  %v5981_v49 = vld [vmem:[%s12039_s8 + $0xbc] sm:$0xf] }
 0x116   : > { %10549 = vmatprep.subr.bf16.mxu1 %v11717_v5  ;;  %v9686_v13 = vcombine.low %v6655_v30, %v6658_v39  ;;  %v2594_v30 = vsel %vm12050_vm4, %v9011_v7, %v2593_v16  ;;  %v2595_v44 = vrot.slane %v2593_v16, 4  ;;  %v5982_v50 = vld [vmem:[%s12039_s8 + $0xc0] sm:$0x3]  ;;  %v5983_v6 = vld [vmem:[%s12039_s8 + $0xd4] sm:$0xc] }
 0x117   : > { %v2583_v48 = vsel %vm12050_vm4, %v2581_v51, %v2582_v35  ;;  %v6675_v35 = vrot.slane %v5978_v42, 6  ;;  %v2601_v61 = vsel %vm12050_vm4, %v9012_v12, %v2600_v21  ;;  %v2602_v28 = vrot.slane %v2600_v21, 4  ;;  %v5984_v7 = vld [vmem:[%s12039_s8 + $0xd8] sm:$0xf]  ;;  %v8804_v41 = vld [vmem:[%s12039_s8 + $0x320] sm:$0xf] }
 0x118   : > { %10916 = vmatmul.mubr.bf16.vlgmr.msra.gmra.mrb[0].mxu0 %v9685_v38  ;;  %v9033_v14 = vcombine.low %v2580_v40, %v2583_v48  ;;  %v2597_v37 = vsel %vm12050_vm4, %v2595_v44, %v2596_v25  ;;  %v6685_v54 = vrot.slane %v5982_v50, 6  ;;  %v6689_v16 = vrot.slane %v5984_v7, 6  ;;  %v11732_v44 = vld [vmem:[%s13959_s2 + $0x200] sm:$0xff]   ;;  %v11741_v21 = vld [vmem:[%s12039_s8 + $0x24c] sm:$0xff]  }
 0x119   : > { %10932 = vmatpush3.bf16.msra.mxu0 %v11716_v32  ;;  %10550 = vmatpush3.bf16.msra.mxu1 %v11717_v5  ;;  %v11722_v32 = vld [vmem:[%s13959_s2 + $0x4d8] sm:$0xff]   ;;  %v2587_v5 = vsel %vm12050_vm4, %v9010_v1, %v2586_v53  ;;  %v9035_v39 = vcombine.low %v2594_v30, %v2597_v37  ;;  %v6676_v40 = vsel %vm12221_vm8, %v9665_v33, %v6675_v35  ;;  %v6677_v51 = vrot.slane %v6675_v35, 4  ;;  %v8781_v53 = vld [vmem:[%s12039_s8 + $0x36c] sm:$0xe]  ;;  %v8802_v35 = vld [vmem:[%s12039_s8 + $0x2e8] sm:$0xf] }
 0x11a   : > { %10933 = vmatprep.subr.bf16.mxu0 %v11718_v60  ;;  %10551 = vmatprep.subr.bf16.mxu1 %v11719_v9  ;;  %v6682_v1 = vrot.slane %v5981_v49, 6  ;;  %v11731_v30 = vld [vmem:[%s12039_s8 + $0x1f8] sm:$0xff]   ;;  %v9062_v37 = vcombine.low %v13159_v62, %v8802_v35  ;;  %v11740_v62 = vld [vmem:[%s13959_s2 + $0x210] sm:$0xff]   ;;  %v9064_v12 = vcombine.low %v13205_v52, %v8804_v41  ;;  %v11748_v52 = vld [vmem:[%s13959_s2 + $0x220] sm:$0xff]  }
 0x11b   : > { %10919 = vmatprep.mubr.bf16.mxu0 %v9686_v13  ;;  %v8780_v13 = vld [vmem:[%s12039_s8 + $0x358] sm:$0x1]  ;;  %v6679_v48 = vsel %vm12221_vm8, %v6677_v51, %v6678_v36  ;;  %v8803_v51 = vld [vmem:[%s12039_s8 + $0x304] sm:$0xf] }
 0x11c   : > { %10536 = vmatmul.mubr.bf16.gmra.mrb[4].mxu1 %v9033_v14  ;;  %v2603_v14 = vrot.slane %v8780_v13, 5  ;;  %v9689_v17 = vcombine.low %v6676_v40, %v6679_v48  ;;  %v11733_v36 = vld [vmem:[%s12039_s8 + $0x214] sm:$0xff]   ;;  %v11736_v40 = vld [vmem:[%s13959_s2 + $0x508] sm:$0xff]   ;;  %v11750_v49 = vld [vmem:[%s13959_s2 + $0x520] sm:$0xff]  }
 0x11d   : > { %10934 = vmatpush3.bf16.msra.mxu0 %v11718_v60  ;;  %10552 = vmatpush3.bf16.msra.mxu1 %v11719_v9  ;;  %v6668_v60 = vrot.slane %v5975_v18, 6  ;;  %v2590_v9 = vsel %vm12050_vm4, %v2588_v59, %v2589_v19  ;;  %v13270_v19 = vld [vmem:[%s12039_s8 + $0x370] sm:$0xf]  ;;  %v9013_v18 = vrot.slane %v8781_v53, 9  ;;  %v6684_v59 = vrot.slane %v6682_v1, 4  ;;  %v11743_v13 = vld [vmem:[%s13959_s2 + $0x218] sm:$0xff]  }
 0x11e   : > { %10935 = vmatprep.subr.bf16.mxu0 %v11720_v46  ;;  %10553 = vmatprep.subr.bf16.mxu1 %v11721_v47  ;;  %v9034_v20 = vcombine.low %v2587_v5, %v2590_v9  ;;  %v2607_v45 = vrot.slane %v13270_v19, 5  ;;  %v8806_v48 = vld [vmem:[%s12039_s8 + $0x358] sm:$0xf]  ;;  %v11749_v50 = vld [vmem:[%s12039_s8 + $0x284] sm:$0xff]   ;;  %v9077_v53 = vld [vmem:[%s12039_s8 + $0xac] sm:$0xf] }
 0x11f   : > { %v6669_v38 = vsel %vm12221_vm8, %v9664_v56, %v6668_v60  ;;  %v6670_v11 = vrot.slane %v6668_v60, 4  ;;  %v11729_v56 = vld [vmem:[%s13959_s2 + $0x1f8] sm:$0xff]   ;;  %v6686_v9 = vsel %vm12221_vm8, %v6684_v59, %v6685_v54  ;;  %v9078_v54 = vld [vmem:[%s12039_s8 + $0xb0] sm:$0x7] }
 0x120   : > { %10920 = vmatmul.mubr.bf16.gmra.mrb[4].mxu0 %v9687_v55  ;;  %10539 = vmatprep.mubr.bf16.mxu1 %v9034_v20  ;;  %v8783_v55 = vld [vmem:[%s12039_s8 + $0x374] sm:$0x1]  ;;  %v2608_v58 = vsel %vm12050_vm4, %v9013_v18, %v2607_v45  ;;  %v3316_v18 = vrot.slane %v9077_v53, 7  ;;  %v11763_v53 = vld [vmem:[%s13959_s2 + $0x248] sm:$0xff]  }
 0x121   : > { %10936 = vmatpush3.bf16.msra.mxu0 %v11720_v46  ;;  %10554 = vmatpush3.bf16.msra.mxu1 %v11721_v47  ;;  %v6672_v29 = vsel %vm12221_vm8, %v6670_v11, %v6671_v2  ;;  %v11727_v46 = vld [vmem:[%s13959_s2 + $0x1f0] sm:$0xff]   ;;  %v2610_v60 = vrot.slane %v8783_v55, 5  ;;  %v9667_v11 = vrot.slane %v5983_v6, 10 }
 0x122   : > { %10937 = vmatprep.subr.bf16.mxu0 %v11722_v32  ;;  %10555 = vmatprep.subr.bf16.mxu1 %v11723_v57  ;;  %v9688_v34 = vcombine.low %v6669_v38, %v6672_v29  ;;  %v11728_v47 = vld [vmem:[%s13959_s2 + $0x4f0] sm:$0xff]   ;;  %v5985_v38 = vld [vmem:[%s12039_s8 + $0xdc] sm:$0x3]  ;;  %v6691_v29 = vrot.slane %v6689_v16, 4 }
 0x123   : > { %v6692_v26 = vrot.slane %v5985_v38, 6  ;;  %v11756_v59 = vld [vmem:[%s13959_s2 + $0x230] sm:$0xff]  }
 0x124   : > { %10923 = vmatprep.mubr.bf16.mxu0 %v9688_v34  ;;  %10540 = vmatmul.mubr.bf16.gmra.mrb[8].mxu1 %v9035_v39  ;;  %v11735_v39 = vld [vmem:[%s13959_s2 + $0x208] sm:$0xff]   ;;  %v11758_v6 = vld [vmem:[%s13959_s2 + $0x530] sm:$0xff]  }
 0x125   : > { %10938 = vmatpush3.bf16.msra.mxu0 %v11722_v32  ;;  %10556 = vmatpush3.bf16.msra.mxu1 %v11723_v57  ;;  %v9666_v32 = vrot.slane %v5980_v23, 10  ;;  %v2604_v57 = vsel %vm12050_vm4, %v2602_v28, %v2603_v14  ;;  %v6693_v33 = vsel %vm12221_vm8, %v6691_v29, %v6692_v26  ;;  %v11746_v23 = vld [vmem:[%s12039_s8 + $0x268] sm:$0xff]   ;;  %v8807_v28 = vld [vmem:[%s12039_s8 + $0x374] sm:$0xf]  ;;  %v11757_v26 = vld [vmem:[%s12039_s8 + $0x2bc] sm:$0xff]  }
 0x126   : > { %10939 = vmatprep.subr.bf16.mxu0 %v11724_v3  ;;  %10557 = vmatprep.subr.bf16.mxu1 %v11725_v8  ;;  %v9036_v2 = vcombine.low %v2601_v61, %v2604_v57  ;;  %v11754_v61 = vld [vmem:[%s12039_s8 + $0x2a0] sm:$0xff]   ;;  %v5988_v57 = vld [vmem:[%s12039_s8 + $0x210] sm:$0x3] }
 0x127   : > { %v6683_v5 = vsel %vm12221_vm8, %v9666_v32, %v6682_v1  ;;  %v11751_v32 = vld [vmem:[%s13959_s2 + $0x228] sm:$0xff]  }
 0x128   : > { %10924 = vmatmul.mubr.bf16.gmra.mrb[8].mxu0 %v9689_v17  ;;  %10543 = vmatprep.mubr.bf16.mxu1 %v9036_v2  ;;  %v9690_v20 = vcombine.low %v6683_v5, %v6686_v9  ;;  %v9066_v17 = vcombine.low %v13251_v43, %v8806_v48  ;;  %v9076_v1 = vld [vmem:[%s12039_s8 + $0xa8] sm:$0x8]  ;;  %v3319_v43 = vrot.slane %v9078_v54, 7  ;;  %v9081_v9 = vld [vmem:[%s12039_s8 + $0xcc] sm:$0x7] }
 0x129   : > { %10940 = vmatpush3.bf16.msra.mxu0 %v11724_v3  ;;  %10558 = vmatpush3.bf16.msra.mxu1 %v11725_v8  ;;  %v2609_v3 = vrot.slane %v2607_v45, 4  ;;  %v11730_v8 = vld [vmem:[%s13959_s2 + $0x4f8] sm:$0xff]   ;;  %v9268_v55 = vrot.slane %v9076_v1, 11  ;;  %v5986_v45 = vld [vmem:[%s12039_s8 + $0x208] sm:$0xc]  ;;  %v3326_v29 = vrot.slane %v9081_v9, 7 }
 0x12a   : > { %10941 = vmatprep.subr.bf16.mxu0 %v11726_v0  ;;  %10559 = vmatprep.subr.bf16.mxu1 %v11727_v46  ;;  %v9732_v5 = vrot.slane %v5986_v45, 10  ;;  %v9086_v1 = vld [vmem:[%s12039_s8 + $0x100] sm:$0xf] }
 0x12b   : > { %v2611_v25 = vsel %vm12050_vm4, %v2609_v3, %v2610_v60  ;;  %10927 = vmatprep.mubr.bf16.mxu0 %v9690_v20  ;;  %v3318_v60 = vrot.slane %v3316_v18, 4  ;;  %v9079_v3 = vld [vmem:[%s12039_s8 + $0xc4] sm:$0x8]  ;;  %v3317_v7 = vsel %vm12059_vm5, %v9268_v55, %v3316_v18  ;;  %v9087_v55 = vld [vmem:[%s12039_s8 + $0x104] sm:$0x7]  ;;  %v3337_v45 = vrot.slane %v9086_v1, 7 }
 0x12c   : > { %v9037_v42 = vcombine.low %v2608_v58, %v2611_v25  ;;  %v7223_v58 = vrot.slane %v5988_v57, 6  ;;  %v9269_v38 = vrot.slane %v9079_v3, 11  ;;  %v5996_v3 = vld [vmem:[%s12039_s8 + $0x260] sm:$0xf] }
 0x12d   : > { %10942 = vmatpush3.bf16.msra.mxu0 %v11726_v0  ;;  %10560 = vmatpush3.bf16.msra.mxu1 %v11727_v46  ;;  %v6690_v0 = vsel %vm12221_vm8, %v9667_v11, %v6689_v16  ;;  %v9063_v46 = vcombine.low %v13175_v27, %v8803_v51  ;;  %v11744_v27 = vld [vmem:[%s13959_s2 + $0x518] sm:$0xff]   ;;  %v9067_v11 = vcombine.low %v13270_v19, %v8807_v28 }
 0x12e   : > { %10943 = vmatprep.subr.bf16.mxu0 %v11728_v47  ;;  %10561 = vmatprep.subr.bf16.mxu1 %v11729_v56  ;;  %v9691_v34 = vcombine.low %v6690_v0, %v6693_v33  ;;  %v3320_v16 = vsel %vm12059_vm5, %v3318_v60, %v3319_v43  ;;  %v9085_v28 = vld [vmem:[%s12039_s8 + $0xfc] sm:$0x8] }
 0x12f   : > { %10544 = vmatmul.mubr.bf16.gmra.mrb[12].mxu1 %v9037_v42  ;;  %v11759_v42 = vld [vmem:[%s13959_s2 + $0x238] sm:$0xff]   ;;  %v9292_v19 = vcombine.low %v3317_v7, %v3320_v16  ;;  %v9271_v18 = vrot.slane %v9085_v28, 11 }
 0x130   : > { %10563 = vmatprep.mubr.bf16.mxu1 %v12919_v10  ;;  %10928 = vmatmul.mubr.bf16.gmra.mrb[12].mxu0 %v9691_v34  ;;  %v11738_v10 = vld [vmem:[%s12039_s8 + $0x230] sm:$0xff]   ;;  %v5991_v34 = vld [vmem:[%s12039_s8 + $0x22c] sm:$0x3] }
 0x131   : > { %10944 = vmatpush3.bf16.msra.mxu0 %v11728_v47  ;;  %10562 = vmatpush3.bf16.msra.mxu1 %v11729_v56  ;;  %v8805_v47 = vld [vmem:[%s12039_s8 + $0x33c] sm:$0xf]  ;;  %v5987_v56 = vld [vmem:[%s12039_s8 + $0x20c] sm:$0xf]  ;;  %v3338_v7 = vsel %vm12059_vm5, %v9271_v18, %v3337_v45 }
 0x132   : > { %10945 = vmatprep.subr.bf16.mxu0 %v11730_v8  ;;  %10579 = vmatprep.subr.bf16.mxu1 %v11732_v44  ;;  %v9065_v14 = vcombine.low %v13224_v4, %v8805_v47  ;;  %v11752_v4 = vld [vmem:[%s13959_s2 + $0x528] sm:$0xff]   ;;  %v7220_v2 = vrot.slane %v5987_v56, 6 }
 0x133   : > { %10947 = vmatprep.mubr.bf16.mxu0 %v11731_v30  ;;  %v5989_v30 = vld [vmem:[%s12039_s8 + $0x224] sm:$0xc] }
 0x134   : > { %v7222_v20 = vrot.slane %v7220_v2, 4  ;;  %v7221_v0 = vsel %vm12221_vm8, %v9732_v5, %v7220_v2  ;;  %v9733_v35 = vrot.slane %v5989_v30, 10  ;;  %v3340_v5 = vrot.slane %v9087_v55, 7  ;;  %v9088_v30 = vld [vmem:[%s12039_s8 + $0x118] sm:$0x8] }
 0x135   : > { %10946 = vmatpush3.bf16.msra.mxu0 %v11730_v8  ;;  %v9080_v8 = vld [vmem:[%s12039_s8 + $0xc8] sm:$0xf]  ;;  %v3339_v2 = vrot.slane %v3337_v45, 4 }
 0x136   : > { %10963 = vmatprep.subr.bf16.mxu0 %v11734_v31  ;;  %v3323_v25 = vrot.slane %v9080_v8, 7  ;;  %v5997_v8 = vld [vmem:[%s12039_s8 + $0x264] sm:$0x3] }
 0x137   : > { %10564 = vmatmul.mubr.bf16.vlgmr.msra.gmra.mrb[0].mxu1 %v12947_v24  ;;  %v11742_v24 = vld [vmem:[%s13959_s2 + $0x510] sm:$0xff]  }
 0x138   : > { %10580 = vmatpush3.bf16.msra.mxu1 %v11732_v44  ;;  %10567 = vmatprep.mubr.bf16.mxu1 %v9062_v37  ;;  %v5990_v44 = vld [vmem:[%s12039_s8 + $0x228] sm:$0xf]  ;;  %v3325_v33 = vrot.slane %v3323_v25, 4 }
 0x139   : > { %10581 = vmatprep.subr.bf16.mxu1 %v11735_v39  ;;  %10948 = vmatmul.mubr.bf16.vlgmr.msra.gmra.mrb[0].mxu0 %v11733_v36  ;;  %v11760_v36 = vld [vmem:[%s13959_s2 + $0x538] sm:$0xff]   ;;  %v7227_v37 = vrot.slane %v5990_v44, 6 }
 0x13a   : > { %10964 = vmatpush3.bf16.msra.mxu0 %v11734_v31  ;;  %10951 = vmatprep.mubr.bf16.mxu0 %v11738_v10  ;;  %v7224_v31 = vsel %vm12221_vm8, %v7222_v20, %v7223_v58  ;;  %v3324_v10 = vsel %vm12059_vm5, %v9269_v38, %v3323_v25  ;;  %v3327_v51 = vsel %vm12059_vm5, %v3325_v33, %v3326_v29  ;;  %v5995_v58 = vld [vmem:[%s12039_s8 + $0x25c] sm:$0xc]  ;;  %v7241_v38 = vrot.slane %v5996_v3, 6  ;;  %v11766_v29 = vld [vmem:[%s13959_s2 + $0x550] sm:$0xff]   ;;  %v9090_v33 = vld [vmem:[%s12039_s8 + $0x120] sm:$0x7] }
 0x13b   : > { %10965 = vmatprep.subr.bf16.mxu0 %v11736_v40  ;;  %v7229_v41 = vrot.slane %v7227_v37, 4  ;;  %v7228_v47 = vsel %vm12221_vm8, %v9733_v35, %v7227_v37  ;;  %v9735_v9 = vrot.slane %v5995_v58, 10  ;;  %v3341_v20 = vsel %vm12059_vm5, %v3339_v2, %v3340_v5  ;;  %v9089_v44 = vld [vmem:[%s12039_s8 + $0x11c] sm:$0xf]  ;;  %v11771_v2 = vld [vmem:[%s13959_s2 + $0x268] sm:$0xff]  }
 0x13c   : > { %10582 = vmatpush3.bf16.msra.mxu1 %v11735_v39  ;;  %v7230_v39 = vrot.slane %v5991_v34, 6  ;;  %v7244_v25 = vrot.slane %v5997_v8, 6  ;;  %v9272_v34 = vrot.slane %v9088_v30, 11  ;;  %v3344_v35 = vrot.slane %v9089_v44, 7  ;;  %v9094_v58 = vld [vmem:[%s12039_s8 + $0x150] sm:$0x8] }
 0x13d   : > { %10583 = vmatprep.subr.bf16.mxu1 %v11740_v62  ;;  %v3347_v37 = vrot.slane %v9090_v33, 7  ;;  %v9095_v3 = vld [vmem:[%s12039_s8 + $0x154] sm:$0xf]  ;;  %v9097_v44 = vld [vmem:[%s12039_s8 + $0x16c] sm:$0x8] }
 0x13e   : > { %10966 = vmatpush3.bf16.msra.mxu0 %v11736_v40  ;;  %v9756_v40 = vcombine.low %v7221_v0, %v7224_v31  ;;  %v9295_v0 = vcombine.low %v3338_v7, %v3341_v20  ;;  %v9274_v7 = vrot.slane %v9094_v58, 11  ;;  %v3358_v8 = vrot.slane %v9095_v3, 7  ;;  %v6005_v20 = vld [vmem:[%s12039_s8 + $0x2b4] sm:$0xf] }
 0x13f   : > { %10568 = vmatmul.mubr.bf16.gmra.mrb[4].mxu1 %v9063_v46  ;;  %10967 = vmatprep.subr.bf16.mxu0 %v11742_v24  ;;  %v9082_v46 = vld [vmem:[%s12039_s8 + $0xe0] sm:$0x8]  ;;  %v7262_v30 = vrot.slane %v6005_v20, 6  ;;  %v9099_v33 = vld [vmem:[%s12039_s8 + $0x174] sm:$0x7]  ;;  %v11781_v20 = vld [vmem:[%s13959_s2 + $0x288] sm:$0xff]  }
 0x140   : > { %10584 = vmatpush3.bf16.msra.mxu1 %v11740_v62  ;;  %10571 = vmatprep.mubr.bf16.mxu1 %v9064_v12  ;;  %v11761_v62 = vld [vmem:[%s13959_s2 + $0x240] sm:$0xff]   ;;  %v9270_v12 = vrot.slane %v9082_v46, 11 }
 0x141   : > { %10585 = vmatprep.subr.bf16.mxu1 %v11743_v13  ;;  %10952 = vmatmul.mubr.bf16.gmra.mrb[4].mxu0 %v11741_v21 }
 0x142   : > { %10968 = vmatpush3.bf16.msra.mxu0 %v11742_v24  ;;  %10955 = vmatprep.mubr.bf16.mxu0 %v11746_v23  ;;  %v9083_v24 = vld [vmem:[%s12039_s8 + $0xe4] sm:$0xf]  ;;  %v9293_v23 = vcombine.low %v3324_v10, %v3327_v51  ;;  %v11767_v51 = vld [vmem:[%s13959_s2 + $0x258] sm:$0xff]  }
 0x143   : > { %10969 = vmatprep.subr.bf16.mxu0 %v11744_v27  ;;  %v3330_v21 = vrot.slane %v9083_v24, 7 }
 0x144   : > { %10586 = vmatpush3.bf16.msra.mxu1 %v11743_v13  ;;  %v9084_v13 = vld [vmem:[%s12039_s8 + $0xe8] sm:$0x7] }
 0x145   : > { %10587 = vmatprep.subr.bf16.mxu1 %v11748_v52  ;;  %v3333_v48 = vrot.slane %v9084_v13, 7  ;;  %v9091_v13 = vld [vmem:[%s12039_s8 + $0x134] sm:$0x8] }
 0x146   : > { %10970 = vmatpush3.bf16.msra.mxu0 %v11744_v27  ;;  %v5992_v27 = vld [vmem:[%s12039_s8 + $0x240] sm:$0xc] }
 0x147   : > { %10572 = vmatmul.mubr.bf16.gmra.mrb[8].mxu1 %v9065_v14  ;;  %10971 = vmatprep.subr.bf16.mxu0 %v11750_v49  ;;  %v5993_v14 = vld [vmem:[%s12039_s8 + $0x244] sm:$0xf] }
 0x148   : > { %10588 = vmatpush3.bf16.msra.mxu1 %v11748_v52  ;;  %10575 = vmatprep.mubr.bf16.mxu1 %v9066_v17  ;;  %v11762_v52 = vld [vmem:[%s13959_s2 + $0x540] sm:$0xff]   ;;  %v3331_v17 = vsel %vm12059_vm5, %v9270_v12, %v3330_v21 }
 0x149   : > { %10589 = vmatprep.subr.bf16.mxu1 %v11751_v32  ;;  %10956 = vmatmul.mubr.bf16.gmra.mrb[8].mxu0 %v11749_v50  ;;  %v9734_v50 = vrot.slane %v5992_v27, 10  ;;  %v9092_v27 = vld [vmem:[%s12039_s8 + $0x138] sm:$0xf] }
 0x14a   : > { %10972 = vmatpush3.bf16.msra.mxu0 %v11750_v49  ;;  %10959 = vmatprep.mubr.bf16.mxu0 %v11754_v61  ;;  %v5994_v49 = vld [vmem:[%s12039_s8 + $0x248] sm:$0x3]  ;;  %v3332_v61 = vrot.slane %v3330_v21, 4  ;;  %v11768_v21 = vld [vmem:[%s13959_s2 + $0x558] sm:$0xff]  }
 0x14b   : > { %10973 = vmatprep.subr.bf16.mxu0 %v11752_v4  ;;  %v7237_v54 = vrot.slane %v5994_v49, 6  ;;  %v3351_v49 = vrot.slane %v9092_v27, 7 }
 0x14c   : > { %10590 = vmatpush3.bf16.msra.mxu1 %v11751_v32  ;;  %v7231_v32 = vsel %vm12221_vm8, %v7229_v41, %v7230_v39  ;;  %v3334_v43 = vsel %vm12059_vm5, %v3332_v61, %v3333_v48  ;;  %v5999_v39 = vld [vmem:[%s12039_s8 + $0x27c] sm:$0xf]  ;;  %v3346_v41 = vrot.slane %v3344_v35, 4  ;;  %v6001_v61 = vld [vmem:[%s12039_s8 + $0x294] sm:$0xc] }
 0x14d   : > { %10591 = vmatprep.subr.bf16.mxu1 %v11756_v59  ;;  %v9294_v60 = vcombine.low %v3331_v17, %v3334_v43  ;;  %v7248_v46 = vrot.slane %v5999_v39, 6  ;;  %v11769_v17 = vld [vmem:[%s13959_s2 + $0x260] sm:$0xff]   ;;  %v9737_v55 = vrot.slane %v6001_v61, 10  ;;  %v9148_v61 = vld [vmem:[%s12039_s8 + $0xb0] sm:$0xe] }
 0x14e   : > { %10974 = vmatpush3.bf16.msra.mxu0 %v11752_v4  ;;  %v7234_v4 = vrot.slane %v5993_v14, 6 }
 0x14f   : > { %10576 = vmatmul.mubr.bf16.gmra.mrb[12].mxu1 %v9067_v11  ;;  %10975 = vmatprep.subr.bf16.mxu0 %v11758_v6  ;;  %v11764_v11 = vld [vmem:[%s13959_s2 + $0x548] sm:$0xff]   ;;  %v7250_v14 = vrot.slane %v7248_v46, 4 }
 0x150   : > { %10592 = vmatpush3.bf16.msra.mxu1 %v11756_v59  ;;  %10595 = vmatprep.mubr.bf16.mxu1 %v9292_v19  ;;  %v7235_v56 = vsel %vm12221_vm8, %v9734_v50, %v7234_v4  ;;  %v7236_v57 = vrot.slane %v7234_v4, 4  ;;  %v9757_v59 = vcombine.low %v7228_v47, %v7231_v32  ;;  %v7242_v19 = vsel %vm12221_vm8, %v9735_v9, %v7241_v38  ;;  %v6002_v4 = vld [vmem:[%s12039_s8 + $0x298] sm:$0xf]  ;;  %v6004_v9 = vld [vmem:[%s12039_s8 + $0x2b0] sm:$0xc] }
 0x151   : > { %10593 = vmatprep.subr.bf16.mxu1 %v11759_v42  ;;  %10960 = vmatmul.mubr.bf16.gmra.mrb[12].mxu0 %v11757_v26  ;;  %v11765_v26 = vld [vmem:[%s13959_s2 + $0x250] sm:$0xff]   ;;  %v9273_v47 = vrot.slane %v9091_v13, 11  ;;  %v7255_v45 = vrot.slane %v6002_v4, 6 }
 0x152   : > { %10976 = vmatpush3.bf16.msra.mxu0 %v11758_v6  ;;  %10979 = vmatprep.mubr.bf16.mxu0 %v9756_v40  ;;  %v7238_v6 = vsel %vm12221_vm8, %v7236_v57, %v7237_v54  ;;  %v6000_v40 = vld [vmem:[%s12039_s8 + $0x280] sm:$0x3]  ;;  %v6003_v54 = vld [vmem:[%s12039_s8 + $0x29c] sm:$0x3]  ;;  %v9149_v4 = vld [vmem:[%s12039_s8 + $0xb4] sm:$0xf] }
 0x153   : > { %10977 = vmatprep.subr.bf16.mxu0 %v11760_v36  ;;  %v9758_v16 = vcombine.low %v7235_v56, %v7238_v6  ;;  %v7251_v24 = vrot.slane %v6000_v40, 6  ;;  %v3352_v1 = vsel %vm12059_vm5, %v9273_v47, %v3351_v49  ;;  %v7258_v43 = vrot.slane %v6003_v54, 6  ;;  %v11770_v56 = vld [vmem:[%s13959_s2 + $0x560] sm:$0xff]   ;;  %v9096_v6 = vld [vmem:[%s12039_s8 + $0x158] sm:$0x7] }
 0x154   : > { %10594 = vmatpush3.bf16.msra.mxu1 %v11759_v42  ;;  %v7243_v42 = vrot.slane %v7241_v38, 4  ;;  %v7264_v40 = vrot.slane %v7262_v30, 4  ;;  %v3638_v54 = vrot.slane %v9149_v4, 5 }
 0x155   : > { %10611 = vmatprep.subr.bf16.mxu1 %v11761_v62  ;;  %v7252_v28 = vsel %vm12221_vm8, %v7250_v14, %v7251_v24  ;;  %v6008_v24 = vld [vmem:[%s12039_s8 + $0x2d0] sm:$0xf] }
 0x156   : > { %10978 = vmatpush3.bf16.msra.mxu0 %v11760_v36  ;;  %v7245_v31 = vsel %vm12221_vm8, %v7243_v42, %v7244_v25  ;;  %v5998_v36 = vld [vmem:[%s12039_s8 + $0x278] sm:$0xc]  ;;  %v6006_v25 = vld [vmem:[%s12039_s8 + $0x2b8] sm:$0x3]  ;;  %v7269_v27 = vrot.slane %v6008_v24, 6 }
 0x157   : > { %10596 = vmatmul.mubr.bf16.vlgmr.msra.gmra.mrb[0].mxu1 %v9293_v23  ;;  %10995 = vmatprep.subr.bf16.mxu0 %v11762_v52  ;;  %v9736_v10 = vrot.slane %v5998_v36, 10  ;;  %v9759_v12 = vcombine.low %v7242_v19, %v7245_v31  ;;  %v9093_v23 = vld [vmem:[%s12039_s8 + $0x13c] sm:$0x7]  ;;  %v9098_v19 = vld [vmem:[%s12039_s8 + $0x170] sm:$0xf]  ;;  %v7265_v31 = vrot.slane %v6006_v25, 6 }
 0x158   : > { %10612 = vmatpush3.bf16.msra.mxu1 %v11761_v62  ;;  %10599 = vmatprep.mubr.bf16.mxu1 %v9294_v60  ;;  %v3345_v62 = vsel %vm12059_vm5, %v9272_v34, %v3344_v35  ;;  %v3354_v32 = vrot.slane %v9093_v23, 7  ;;  %v7257_v60 = vrot.slane %v7255_v45, 4  ;;  %v9275_v34 = vrot.slane %v9097_v44, 11  ;;  %v11773_v36 = vld [vmem:[%s13959_s2 + $0x270] sm:$0xff]  }
 0x159   : > { %10613 = vmatprep.subr.bf16.mxu1 %v11763_v53  ;;  %10980 = vmatmul.mubr.bf16.vlgmr.msra.gmra.mrb[0].mxu0 %v9757_v59  ;;  %v7249_v48 = vsel %vm12221_vm8, %v9736_v10, %v7248_v46  ;;  %v7256_v59 = vsel %vm12221_vm8, %v9737_v55, %v7255_v45  ;;  %v3365_v35 = vrot.slane %v9098_v19, 7  ;;  %v3368_v10 = vrot.slane %v9099_v33, 7  ;;  %v6007_v46 = vld [vmem:[%s12039_s8 + $0x2cc] sm:$0xc]  ;;  %v11777_v45 = vld [vmem:[%s12039_s8 + $0x3f0] sm:$0xff]  }
 0x15a   : > { %10996 = vmatpush3.bf16.msra.mxu0 %v11762_v52  ;;  %10983 = vmatprep.mubr.bf16.mxu0 %v9758_v16  ;;  %v3348_v52 = vsel %vm12059_vm5, %v3346_v41, %v3347_v37  ;;  %v9760_v18 = vcombine.low %v7249_v48, %v7252_v28  ;;  %v7259_v38 = vsel %vm12221_vm8, %v7257_v60, %v7258_v43  ;;  %v3361_v16 = vrot.slane %v9096_v6, 7  ;;  %v11774_v48 = vld [vmem:[%s13959_s2 + $0x570] sm:$0xff]   ;;  %v9151_v43 = vld [vmem:[%s12039_s8 + $0xcc] sm:$0xe]  ;;  %v11778_v6 = vld [vmem:[%s13959_s2 + $0x280] sm:$0xff]  }
 0x15b   : > { %10997 = vmatprep.subr.bf16.mxu0 %v11764_v11  ;;  %v9296_v50 = vcombine.low %v3345_v62, %v3348_v52  ;;  %v9761_v42 = vcombine.low %v7256_v59, %v7259_v38  ;;  %v3366_v62 = vsel %vm12059_vm5, %v9275_v34, %v3365_v35  ;;  %v3367_v41 = vrot.slane %v3365_v35, 4  ;;  %v9153_v59 = vld [vmem:[%s12039_s8 + $0xd4] sm:$0x1]  ;;  %v11779_v38 = vld [vmem:[%s12039_s8 + $0x40c] sm:$0xff]   ;;  %v9157_v33 = vld [vmem:[%s12039_s8 + $0x104] sm:$0xe] }
 0x15c   : > { %10614 = vmatpush3.bf16.msra.mxu1 %v11763_v53  ;;  %v3353_v53 = vrot.slane %v3351_v49, 4  ;;  %v7266_v13 = vsel %vm12221_vm8, %v7264_v40, %v7265_v31  ;;  %v9309_v60 = vrot.slane %v9151_v43, 9  ;;  %v3648_v58 = vrot.slane %v9153_v59, 5  ;;  %v11783_v31 = vld [vmem:[%s12039_s8 + $0x428] sm:$0xff]   ;;  %v11790_v43 = vld [vmem:[%s13959_s2 + $0x2a0] sm:$0xff]  }
 0x15d   : > { %10615 = vmatprep.subr.bf16.mxu1 %v11765_v26  ;;  %v3369_v47 = vsel %vm12059_vm5, %v3367_v41, %v3368_v10  ;;  %v11791_v59 = vld [vmem:[%s12039_s8 + $0x47c] sm:$0xff]  }
 0x15e   : > { %10998 = vmatpush3.bf16.msra.mxu0 %v11764_v11  ;;  %v3355_v57 = vsel %vm12059_vm5, %v3353_v53, %v3354_v32  ;;  %v11772_v11 = vld [vmem:[%s13959_s2 + $0x568] sm:$0xff]   ;;  %v9299_v14 = vcombine.low %v3366_v62, %v3369_v47  ;;  %v11775_v32 = vld [vmem:[%s13959_s2 + $0x278] sm:$0xff]   ;;  %v9308_v53 = vrot.slane %v9148_v61, 9  ;;  %v11784_v62 = vld [vmem:[%s13959_s2 + $0x290] sm:$0xff]  }
 0x15f   : > { %10600 = vmatmul.mubr.bf16.gmra.mrb[4].mxu1 %v9295_v0  ;;  %10999 = vmatprep.subr.bf16.mxu0 %v11766_v29  ;;  %v9297_v5 = vcombine.low %v3352_v1, %v3355_v57  ;;  %v3359_v0 = vsel %vm12059_vm5, %v9274_v7, %v3358_v8  ;;  %v9150_v1 = vld [vmem:[%s12039_s8 + $0xb8] sm:$0x1]  ;;  %v3640_v57 = vrot.slane %v3638_v54, 4  ;;  %v9163_v61 = vld [vmem:[%s12039_s8 + $0x13c] sm:$0xe] }
 0x160   : > { %10616 = vmatpush3.bf16.msra.mxu1 %v11765_v26  ;;  %10603 = vmatprep.mubr.bf16.mxu1 %v9296_v50  ;;  %v9738_v26 = vrot.slane %v6004_v9, 10  ;;  %v7271_v50 = vrot.slane %v7269_v27, 4  ;;  %v11788_v47 = vld [vmem:[%s13959_s2 + $0x598] sm:$0xff]  }
 0x161   : > { %10617 = vmatprep.subr.bf16.mxu1 %v11767_v51  ;;  %10984 = vmatmul.mubr.bf16.gmra.mrb[4].mxu0 %v9759_v12  ;;  %v6009_v12 = vld [vmem:[%s12039_s8 + $0x2d4] sm:$0x3] }
 0x162   : > { %11000 = vmatpush3.bf16.msra.mxu0 %v11766_v29  ;;  %10987 = vmatprep.mubr.bf16.mxu0 %v9760_v18  ;;  %v3360_v29 = vrot.slane %v3358_v8, 4  ;;  %v7263_v39 = vsel %vm12221_vm8, %v9738_v26, %v7262_v30  ;;  %v7272_v52 = vrot.slane %v6009_v12, 6  ;;  %v3641_v18 = vrot.slane %v9150_v1, 5  ;;  %v11782_v26 = vld [vmem:[%s13959_s2 + $0x588] sm:$0xff]   ;;  %v11786_v12 = vld [vmem:[%s13959_s2 + $0x590] sm:$0xff]  }
 0x163   : > { %11001 = vmatprep.subr.bf16.mxu0 %v11768_v21  ;;  %v9762_v23 = vcombine.low %v7263_v39, %v7266_v13  ;;  %v9311_v39 = vrot.slane %v9157_v33, 9  ;;  %v11785_v13 = vld [vmem:[%s12039_s8 + $0x444] sm:$0xff]   ;;  %v9164_v1 = vld [vmem:[%s12039_s8 + $0x140] sm:$0xf]  ;;  %v11796_v33 = vld [vmem:[%s13959_s2 + $0x2b0] sm:$0xff]  }
 0x164   : > { %10618 = vmatpush3.bf16.msra.mxu1 %v11767_v51  ;;  %v3362_v37 = vsel %vm12059_vm5, %v3360_v29, %v3361_v16  ;;  %v7273_v28 = vsel %vm12221_vm8, %v7271_v50, %v7272_v52  ;;  %v3642_v3 = vsel %vm12050_vm4, %v3640_v57, %v3641_v18  ;;  %v9156_v29 = vld [vmem:[%s12039_s8 + $0xf0] sm:$0x1]  ;;  %v9160_v52 = vld [vmem:[%s12039_s8 + $0x120] sm:$0xe] }
 0x165   : > { %10619 = vmatprep.subr.bf16.mxu1 %v11769_v17  ;;  %v9298_v51 = vcombine.low %v3359_v0, %v3362_v37  ;;  %v9155_v0 = vld [vmem:[%s12039_s8 + $0xec] sm:$0xf]  ;;  %v3655_v19 = vrot.slane %v9156_v29, 5  ;;  %v9171_v29 = vld [vmem:[%s12039_s8 + $0x17c] sm:$0x1] }
 0x166   : > { %11002 = vmatpush3.bf16.msra.mxu0 %v11768_v21  ;;  %v9739_v21 = vrot.slane %v6007_v46, 10  ;;  %v3652_v44 = vrot.slane %v9155_v0, 5  ;;  %v9159_v37 = vld [vmem:[%s12039_s8 + $0x10c] sm:$0x1]  ;;  %v9170_v0 = vld [vmem:[%s12039_s8 + $0x178] sm:$0xf] }
 0x167   : > { %10604 = vmatmul.mubr.bf16.gmra.mrb[8].mxu1 %v9297_v5  ;;  %11003 = vmatprep.subr.bf16.mxu0 %v11770_v56  ;;  %v9152_v5 = vld [vmem:[%s12039_s8 + $0xd0] sm:$0xf]  ;;  %v3662_v10 = vrot.slane %v9159_v37, 5  ;;  %v11797_v37 = vld [vmem:[%s12039_s8 + $0x4b4] sm:$0xff]  }
 0x168   : > { %10620 = vmatpush3.bf16.msra.mxu1 %v11769_v17  ;;  %10607 = vmatprep.mubr.bf16.mxu1 %v9298_v51  ;;  %v7270_v49 = vsel %vm12221_vm8, %v9739_v21, %v7269_v27  ;;  %v11776_v17 = vld [vmem:[%s13959_s2 + $0x578] sm:$0xff]   ;;  %v3654_v35 = vrot.slane %v3652_v44, 4 }
 0x169   : > { %10621 = vmatprep.subr.bf16.mxu1 %v11771_v2  ;;  %10988 = vmatmul.mubr.bf16.gmra.mrb[8].mxu0 %v9761_v42  ;;  %v9763_v55 = vcombine.low %v7270_v49, %v7273_v28  ;;  %v9154_v42 = vld [vmem:[%s12039_s8 + $0xe8] sm:$0xe]  ;;  %v11787_v27 = vld [vmem:[%s13959_s2 + $0x298] sm:$0xff]   ;;  %v9312_v49 = vrot.slane %v9160_v52, 9 }
 0x16a   : > { %11004 = vmatpush3.bf16.msra.mxu0 %v11770_v56  ;;  %10991 = vmatprep.mubr.bf16.mxu0 %v9762_v23  ;;  %v3639_v56 = vsel %vm12050_vm4, %v9308_v53, %v3638_v54  ;;  %v9310_v30 = vrot.slane %v9154_v42, 9  ;;  %v3656_v51 = vsel %vm12050_vm4, %v3654_v35, %v3655_v19  ;;  %v9165_v53 = vld [vmem:[%s12039_s8 + $0x144] sm:$0x1]  ;;  %v9313_v54 = vrot.slane %v9163_v61, 9  ;;  %v9200_v61 = vld [vmem:[%s12039_s8 + $0xd4] sm:$0xf] }
 0x16b   : > { %11005 = vmatprep.subr.bf16.mxu0 %v11772_v11  ;;  %v9332_v7 = vcombine.low %v3639_v56, %v3642_v3  ;;  %v3676_v18 = vrot.slane %v9165_v53, 5  ;;  %v3690_v19 = vrot.slane %v9171_v29, 5  ;;  %v5944_v29 = vld [vmem:[%s12039_s8 + $0x430] sm:$0xe] }
 0x16c   : > { %10622 = vmatpush3.bf16.msra.mxu1 %v11771_v2  ;;  %v3645_v2 = vrot.slane %v9152_v5, 5  ;;  %v3653_v34 = vsel %vm12050_vm4, %v9310_v30, %v3652_v44  ;;  %v3687_v44 = vrot.slane %v9170_v0, 5 }
 0x16d   : > { %10623 = vmatprep.subr.bf16.mxu1 %v11773_v36  ;;  %v9334_v41 = vcombine.low %v3653_v34, %v3656_v51 }
 0x16e   : > { %11006 = vmatpush3.bf16.msra.mxu0 %v11772_v11  ;;  %v3646_v8 = vsel %vm12050_vm4, %v9309_v60, %v3645_v2  ;;  %v3647_v9 = vrot.slane %v3645_v2, 4  ;;  %v11780_v11 = vld [vmem:[%s13959_s2 + $0x580] sm:$0xff]  }
 0x16f   : > { %10608 = vmatmul.mubr.bf16.gmra.mrb[12].mxu1 %v9299_v14  ;;  %11007 = vmatprep.subr.bf16.mxu0 %v11774_v48  ;;  %v9162_v14 = vld [vmem:[%s12039_s8 + $0x128] sm:$0x1]  ;;  %v11792_v60 = vld [vmem:[%s13959_s2 + $0x5a0] sm:$0xff]  }
 0x170   : > { %10624 = vmatpush3.bf16.msra.mxu1 %v11773_v36  ;;  %10627 = vmatprep.mubr.bf16.mxu1 %v9332_v7  ;;  %v3649_v16 = vsel %vm12050_vm4, %v3647_v9, %v3648_v58  ;;  %v9158_v36 = vld [vmem:[%s12039_s8 + $0x108] sm:$0xf]  ;;  %v9166_v7 = vld [vmem:[%s12039_s8 + $0x158] sm:$0xe]  ;;  %v9168_v9 = vld [vmem:[%s12039_s8 + $0x160] sm:$0x1] }
 0x171   : > { %10625 = vmatprep.subr.bf16.mxu1 %v11775_v32  ;;  %10992 = vmatmul.mubr.bf16.gmra.mrb[12].mxu0 %v9763_v55  ;;  %v9333_v25 = vcombine.low %v3646_v8, %v3649_v16  ;;  %v3659_v40 = vrot.slane %v9158_v36, 5  ;;  %v3673_v55 = vrot.slane %v9164_v1, 5  ;;  %v11793_v58 = vld [vmem:[%s13959_s2 + $0x2a8] sm:$0xff]   ;;  %v9167_v8 = vld [vmem:[%s12039_s8 + $0x15c] sm:$0xf]  ;;  %v3683_v16 = vrot.slane %v9168_v9, 5 }
 0x172   : > { %11008 = vmatpush3.bf16.msra.mxu0 %v11774_v48  ;;  %11011 = vmatprep.mubr.bf16.mxu0 %v11777_v45  ;;  %v9161_v48 = vld [vmem:[%s12039_s8 + $0x124] sm:$0xf]  ;;  %v3689_v36 = vrot.slane %v3687_v44, 4  ;;  %v11802_v9 = vld [vmem:[%s13959_s2 + $0x5c8] sm:$0xff]  }
 0x173   : > { %11009 = vmatprep.subr.bf16.mxu0 %v11776_v17  ;;  %v3660_v46 = vsel %vm12050_vm4, %v9311_v39, %v3659_v40  ;;  %v3661_v24 = vrot.slane %v3659_v40, 4  ;;  %v3666_v50 = vrot.slane %v9161_v48, 5  ;;  %v3674_v57 = vsel %vm12050_vm4, %v9313_v54, %v3673_v55  ;;  %v11798_v39 = vld [vmem:[%s13959_s2 + $0x5b0] sm:$0xff]  }
 0x174   : > { %10626 = vmatpush3.bf16.msra.mxu1 %v11775_v32  ;;  %v3669_v32 = vrot.slane %v9162_v14, 5  ;;  %v3675_v5 = vrot.slane %v3673_v55, 4  ;;  %v3691_v40 = vsel %vm12050_vm4, %v3689_v36, %v3690_v19  ;;  %v3967_v55 = vrot.slane %v9200_v61, 7  ;;  %v11804_v61 = vld [vmem:[%s13959_s2 + $0x5d8] sm:$0xff]  }
 0x175   : > { %10643 = vmatprep.subr.bf16.mxu1 %v11778_v6  ;;  %v3663_v21 = vsel %vm12050_vm4, %v3661_v24, %v3662_v10  ;;  %v3667_v4 = vsel %vm12050_vm4, %v9312_v49, %v3666_v50  ;;  %v3668_v28 = vrot.slane %v3666_v50, 4  ;;  %v11799_v10 = vld [vmem:[%s13959_s2 + $0x2b8] sm:$0xff]  }
 0x176   : > { %11010 = vmatpush3.bf16.msra.mxu0 %v11776_v17  ;;  %v9335_v23 = vcombine.low %v3660_v46, %v3663_v21  ;;  %v11789_v17 = vld [vmem:[%s12039_s8 + $0x460] sm:$0xff]   ;;  %v3677_v2 = vsel %vm12050_vm4, %v3675_v5, %v3676_v18  ;;  %v9197_v46 = vld [vmem:[%s12039_s8 + $0xb8] sm:$0xf]  ;;  %v9198_v24 = vld [vmem:[%s12039_s8 + $0xbc] sm:$0x7] }
 0x177   : > { %11027 = vmatprep.subr.bf16.mxu0 %v11780_v11  ;;  %10628 = vmatmul.mubr.bf16.vlgmr.msra.gmra.mrb[0].mxu1 %v9333_v25  ;;  %v3670_v45 = vsel %vm12050_vm4, %v3668_v28, %v3669_v32  ;;  %v9337_v3 = vcombine.low %v3674_v57, %v3677_v2  ;;  %v9169_v25 = vld [vmem:[%s12039_s8 + $0x174] sm:$0xe]  ;;  %v5938_v21 = vld [vmem:[%s12039_s8 + $0x3f8] sm:$0xe]  ;;  %v9199_v32 = vld [vmem:[%s12039_s8 + $0xd0] sm:$0x8] }
 0x178   : > { %10644 = vmatpush3.bf16.msra.mxu1 %v11778_v6  ;;  %10631 = vmatprep.mubr.bf16.mxu1 %v9334_v41  ;;  %v9336_v56 = vcombine.low %v3667_v4, %v3670_v45  ;;  %v11794_v6 = vld [vmem:[%s13959_s2 + $0x5a8] sm:$0xff]   ;;  %v9315_v30 = vrot.slane %v9169_v25, 9  ;;  %v9196_v41 = vld [vmem:[%s12039_s8 + $0xb4] sm:$0x8]  ;;  %v9804_v52 = vrot.slane %v5938_v21, 9  ;;  %v9349_v28 = vrot.slane %v9199_v32, 11 }
 0x179   : > { %11012 = vmatmul.mubr.bf16.vlgmr.msra.gmra.mrb[0].mxu0 %v11779_v38  ;;  %10645 = vmatprep.subr.bf16.mxu1 %v11781_v20  ;;  %v9314_v38 = vrot.slane %v9166_v7, 9  ;;  %v9201_v4 = vld [vmem:[%s12039_s8 + $0xd8] sm:$0x7]  ;;  %v5941_v18 = vld [vmem:[%s12039_s8 + $0x414] sm:$0xe] }
 0x17a   : > { %11028 = vmatpush3.bf16.msra.mxu0 %v11780_v11  ;;  %11015 = vmatprep.mubr.bf16.mxu0 %v11783_v31  ;;  %v3680_v11 = vrot.slane %v9167_v8, 5  ;;  %v3688_v35 = vsel %vm12050_vm4, %v9315_v30, %v3687_v44  ;;  %v5942_v45 = vld [vmem:[%s12039_s8 + $0x418] sm:$0xf]  ;;  %v5943_v57 = vld [vmem:[%s12039_s8 + $0x41c] sm:$0x1]  ;;  %v9805_v5 = vrot.slane %v5941_v18, 9  ;;  %v3968_v2 = vsel %vm12059_vm5, %v9349_v28, %v3967_v55 }
 0x17b   : > { %11029 = vmatprep.subr.bf16.mxu0 %v11782_v26  ;;  %v9339_v51 = vcombine.low %v3688_v35, %v3691_v40  ;;  %v5945_v30 = vld [vmem:[%s12039_s8 + $0x434] sm:$0xf]  ;;  %v9206_v40 = vld [vmem:[%s12039_s8 + $0x10c] sm:$0xf]  ;;  %v5948_v21 = vld [vmem:[%s12039_s8 + $0x450] sm:$0xf] }
 0x17c   : > { %10646 = vmatpush3.bf16.msra.mxu1 %v11781_v20  ;;  %v11795_v20 = vld [vmem:[%s12039_s8 + $0x498] sm:$0xff]   ;;  %v3682_v42 = vrot.slane %v3680_v11, 4  ;;  %v7821_v32 = vrot.slane %v5948_v21, 5  ;;  %v9208_v28 = vld [vmem:[%s12039_s8 + $0x124] sm:$0x8] }
 0x17d   : > { %10647 = vmatprep.subr.bf16.mxu1 %v11784_v62  ;;  %v9210_v18 = vld [vmem:[%s12039_s8 + $0x12c] sm:$0x7] }
 0x17e   : > { %11030 = vmatpush3.bf16.msra.mxu0 %v11782_v26  ;;  %v3681_v26 = vsel %vm12050_vm4, %v9314_v38, %v3680_v11  ;;  %v3684_v31 = vsel %vm12050_vm4, %v3682_v42, %v3683_v16  ;;  %v9202_v11 = vld [vmem:[%s12039_s8 + $0xec] sm:$0x8]  ;;  %v9203_v16 = vld [vmem:[%s12039_s8 + $0xf0] sm:$0xf] }
 0x17f   : > { %11031 = vmatprep.subr.bf16.mxu0 %v11786_v12  ;;  %10632 = vmatmul.mubr.bf16.gmra.mrb[4].mxu1 %v9335_v23  ;;  %v9338_v34 = vcombine.low %v3681_v26, %v3684_v31  ;;  %v5939_v23 = vld [vmem:[%s12039_s8 + $0x3fc] sm:$0xf]  ;;  %v9350_v42 = vrot.slane %v9202_v11, 11  ;;  %v3974_v0 = vrot.slane %v9203_v16, 7  ;;  %v5946_v31 = vld [vmem:[%s12039_s8 + $0x438] sm:$0x1] }
 0x180   : > { %10648 = vmatpush3.bf16.msra.mxu1 %v11784_v62  ;;  %10635 = vmatprep.mubr.bf16.mxu1 %v9336_v56  ;;  %v11800_v62 = vld [vmem:[%s13959_s2 + $0x5b8] sm:$0xff]   ;;  %v7800_v49 = vrot.slane %v5939_v23, 5  ;;  %v3970_v56 = vrot.slane %v9201_v4, 7  ;;  %v9213_v11 = vld [vmem:[%s12039_s8 + $0x148] sm:$0x7] }
 0x181   : > { %11016 = vmatmul.mubr.bf16.gmra.mrb[4].mxu0 %v11785_v13  ;;  %10649 = vmatprep.subr.bf16.mxu1 %v11787_v27  ;;  %v9348_v13 = vrot.slane %v9196_v41, 11  ;;  %v3975_v35 = vsel %vm12059_vm5, %v9350_v42, %v3974_v0  ;;  %v3976_v36 = vrot.slane %v3974_v0, 4  ;;  %v5953_v42 = vld [vmem:[%s12039_s8 + $0x484] sm:$0xe] }
 0x182   : > { %11032 = vmatpush3.bf16.msra.mxu0 %v11786_v12  ;;  %11019 = vmatprep.mubr.bf16.mxu0 %v11789_v17  ;;  %v3960_v12 = vrot.slane %v9197_v46, 7  ;;  %v11801_v17 = vld [vmem:[%s13959_s2 + $0x5c0] sm:$0xff]   ;;  %v7801_v53 = vsel %vm12050_vm4, %v9804_v52, %v7800_v49  ;;  %v7802_v54 = vrot.slane %v7800_v49, 4  ;;  %v3981_v46 = vrot.slane %v9206_v40, 7 }
 0x183   : > { %11033 = vmatprep.subr.bf16.mxu0 %v11788_v47  ;;  %v11805_v0 = vld [vmem:[%s13959_s2 + $0x5e0] sm:$0xff]  }
 0x184   : > { %10650 = vmatpush3.bf16.msra.mxu1 %v11787_v27  ;;  %v3963_v27 = vrot.slane %v9198_v24, 7  ;;  %v3961_v48 = vsel %vm12059_vm5, %v9348_v13, %v3960_v12  ;;  %v3962_v14 = vrot.slane %v3960_v12, 4  ;;  %v5947_v12 = vld [vmem:[%s12039_s8 + $0x44c] sm:$0xe]  ;;  %v3983_v52 = vrot.slane %v3981_v46, 4 }
 0x185   : > { %10651 = vmatprep.subr.bf16.mxu1 %v11790_v43 }
 0x186   : > { %11034 = vmatpush3.bf16.msra.mxu0 %v11788_v47  ;;  %v5940_v47 = vld [vmem:[%s12039_s8 + $0x400] sm:$0x1]  ;;  %v3964_v1 = vsel %vm12059_vm5, %v3962_v14, %v3963_v27  ;;  %v11803_v14 = vld [vmem:[%s13959_s2 + $0x5d0] sm:$0xff]  }
 0x187   : > { %11035 = vmatprep.subr.bf16.mxu0 %v11792_v60  ;;  %10636 = vmatmul.mubr.bf16.gmra.mrb[8].mxu1 %v9337_v3  ;;  %v7803_v50 = vrot.slane %v5940_v47, 5  ;;  %v7810_v3 = vrot.slane %v5943_v57, 5  ;;  %v5950_v57 = vld [vmem:[%s12039_s8 + $0x468] sm:$0xe] }
 0x188   : > { %10652 = vmatpush3.bf16.msra.mxu1 %v11790_v43  ;;  %10639 = vmatprep.mubr.bf16.mxu1 %v9338_v34  ;;  %v9372_v43 = vcombine.low %v3961_v48, %v3964_v1  ;;  %v7814_v34 = vrot.slane %v5945_v30, 5  ;;  %v5949_v48 = vld [vmem:[%s12039_s8 + $0x454] sm:$0x1]  ;;  %v3998_v30 = vrot.slane %v9213_v11, 7 }
 0x189   : > { %11020 = vmatmul.mubr.bf16.gmra.mrb[8].mxu0 %v11791_v59  ;;  %10653 = vmatprep.subr.bf16.mxu1 %v11793_v58  ;;  %v7807_v59 = vrot.slane %v5942_v45, 5  ;;  %v9352_v45 = vrot.slane %v9208_v28, 11 }
 0x18a   : > { %11036 = vmatpush3.bf16.msra.mxu0 %v11792_v60  ;;  %11023 = vmatprep.mubr.bf16.mxu0 %v11795_v20  ;;  %v7804_v60 = vsel %vm12050_vm4, %v7802_v54, %v7803_v50  ;;  %v9204_v20 = vld [vmem:[%s12039_s8 + $0xf4] sm:$0x7]  ;;  %v9807_v50 = vrot.slane %v5947_v12, 9  ;;  %v7823_v54 = vrot.slane %v7821_v32, 4 }
 0x18b   : > { %11037 = vmatprep.subr.bf16.mxu0 %v11794_v6  ;;  %v7808_v7 = vsel %vm12050_vm4, %v9805_v5, %v7807_v59  ;;  %v7809_v8 = vrot.slane %v7807_v59, 4  ;;  %v3977_v19 = vrot.slane %v9204_v20, 7  ;;  %v5951_v5 = vld [vmem:[%s12039_s8 + $0x46c] sm:$0xf] }
 0x18c   : > { %10654 = vmatpush3.bf16.msra.mxu1 %v11793_v58  ;;  %v3969_v58 = vrot.slane %v3967_v55, 4  ;;  %v9209_v55 = vld [vmem:[%s12039_s8 + $0x128] sm:$0xf] }
 0x18d   : > { %10655 = vmatprep.subr.bf16.mxu1 %v11796_v33  ;;  %v7811_v26 = vsel %vm12050_vm4, %v7809_v8, %v7810_v3  ;;  %v3978_v24 = vsel %vm12059_vm5, %v3976_v36, %v3977_v19  ;;  %v9211_v3 = vld [vmem:[%s12039_s8 + $0x140] sm:$0x8]  ;;  %v5955_v19 = vld [vmem:[%s12039_s8 + $0x48c] sm:$0x1] }
 0x18e   : > { %11038 = vmatpush3.bf16.msra.mxu0 %v11794_v6  ;;  %v9828_v6 = vcombine.low %v7801_v53, %v7804_v60  ;;  %v3971_v38 = vsel %vm12059_vm5, %v3969_v58, %v3970_v56  ;;  %v9829_v44 = vcombine.low %v7808_v7, %v7811_v26  ;;  %v9374_v27 = vcombine.low %v3975_v35, %v3978_v24  ;;  %v5952_v60 = vld [vmem:[%s12039_s8 + $0x470] sm:$0x1] }
 0x18f   : > { %11039 = vmatprep.subr.bf16.mxu0 %v11798_v39  ;;  %10640 = vmatmul.mubr.bf16.gmra.mrb[12].mxu1 %v9339_v51  ;;  %v9373_v25 = vcombine.low %v3968_v2, %v3971_v38  ;;  %v7816_v51 = vrot.slane %v7814_v34, 4  ;;  %v7822_v53 = vsel %vm12050_vm4, %v9807_v50, %v7821_v32  ;;  %v3991_v56 = vrot.slane %v9210_v18, 7  ;;  %v9212_v38 = vld [vmem:[%s12039_s8 + $0x144] sm:$0xf]  ;;  %v11807_v18 = vld [vmem:[%s13959_s2 + $0x5f0] sm:$0xff]  }
 0x190   : > { %10656 = vmatpush3.bf16.msra.mxu1 %v11796_v33  ;;  %10659 = vmatprep.mubr.bf16.mxu1 %v9372_v43  ;;  %v9806_v33 = vrot.slane %v5944_v29, 9  ;;  %v3988_v43 = vrot.slane %v9209_v55, 7  ;;  %v9808_v2 = vrot.slane %v5950_v57, 9  ;;  %v7828_v58 = vrot.slane %v5951_v5, 5  ;;  %v5959_v55 = vld [vmem:[%s12039_s8 + $0x4bc] sm:$0xe] }
 0x191   : > { %11024 = vmatmul.mubr.bf16.gmra.mrb[12].mxu0 %v11797_v37  ;;  %10657 = vmatprep.subr.bf16.mxu1 %v11799_v10  ;;  %v7817_v37 = vrot.slane %v5946_v31, 5  ;;  %v3995_v26 = vrot.slane %v9212_v38, 7  ;;  %v9809_v31 = vrot.slane %v5953_v42, 9  ;;  %v7838_v40 = vrot.slane %v5955_v19, 5  ;;  %v5960_v5 = vld [vmem:[%s12039_s8 + $0x4c0] sm:$0xf] }
 0x192   : > { %11040 = vmatpush3.bf16.msra.mxu0 %v11798_v39  ;;  %11043 = vmatprep.mubr.bf16.mxu0 %v9828_v6  ;;  %v9205_v39 = vld [vmem:[%s12039_s8 + $0x108] sm:$0x8]  ;;  %v3989_v7 = vsel %vm12059_vm5, %v9352_v45, %v3988_v43  ;;  %v3990_v8 = vrot.slane %v3988_v43, 4  ;;  %v7829_v16 = vsel %vm12050_vm4, %v9808_v2, %v7828_v58  ;;  %v7830_v20 = vrot.slane %v7828_v58, 4  ;;  %v6011_v42 = vld [vmem:[%s12039_s8 + $0x404] sm:$0xf] }
 0x193   : > { %11041 = vmatprep.subr.bf16.mxu0 %v11800_v62  ;;  %v9351_v41 = vrot.slane %v9205_v39, 11  ;;  %v7818_v23 = vsel %vm12050_vm4, %v7816_v51, %v7817_v37  ;;  %v3997_v36 = vrot.slane %v3995_v26, 4  ;;  %v9811_v2 = vrot.slane %v5959_v55, 9 }
 0x194   : > { %10658 = vmatpush3.bf16.msra.mxu1 %v11799_v10  ;;  %v7815_v10 = vsel %vm12050_vm4, %v9806_v33, %v7814_v34  ;;  %v3992_v29 = vsel %vm12059_vm5, %v3990_v8, %v3991_v56  ;;  %v7849_v58 = vrot.slane %v5960_v5, 5  ;;  %v8122_v22 = vrot.slane %v6011_v42, 6 }
 0x195   : > { %11091 = vmatprep.subr.bf16.mxu1 %v11801_v17  ;;  %v3982_v47 = vsel %vm12059_vm5, %v9351_v41, %v3981_v46  ;;  %v9830_v49 = vcombine.low %v7815_v10, %v7818_v23  ;;  %v9376_v33 = vcombine.low %v3989_v7, %v3992_v29  ;;  %v11806_v10 = vld [vmem:[%s13959_s2 + $0x5e8] sm:$0xff]   ;;  %v3999_v51 = vsel %vm12059_vm5, %v3997_v36, %v3998_v30  ;;  %v9215_v41 = vld [vmem:[%s12039_s8 + $0x160] sm:$0xf]  ;;  %v9216_v46 = vld [vmem:[%s12039_s8 + $0x164] sm:$0x7] }
 0x196   : > { %11042 = vmatpush3.bf16.msra.mxu0 %v11800_v62  ;;  %v9207_v62 = vld [vmem:[%s12039_s8 + $0x110] sm:$0x7]  ;;  %v5957_v23 = vld [vmem:[%s12039_s8 + $0x4a4] sm:$0xf]  ;;  %v7850_v38 = vsel %vm12050_vm4, %v9811_v2, %v7849_v58  ;;  %v7851_v11 = vrot.slane %v7849_v58, 4  ;;  %v8124_v15 = vrot.slane %v8122_v22, 4 }
 0x197   : > { %11059 = vmatprep.subr.bf16.mxu0 %v11801_v17  ;;  %10660 = vmatmul.mubr.bf16.vlgmr.msra.gmra.mrb[0].mxu1 %v9373_v25  ;;  %v3984_v13 = vrot.slane %v9207_v62, 7  ;;  %v9353_v25 = vrot.slane %v9211_v3, 11  ;;  %v9214_v62 = vld [vmem:[%s12039_s8 + $0x15c] sm:$0x8]  ;;  %v6019_v2 = vld [vmem:[%s12039_s8 + $0x454] sm:$0xc] }
 0x198   : > { %11099 = vmatpush3.bf16.msra.mxu1 %v11801_v17  ;;  %10663 = vmatprep.mubr.bf16.mxu1 %v9374_v27  ;;  %v9354_v21 = vrot.slane %v9214_v62, 11  ;;  %v5956_v27 = vld [vmem:[%s12039_s8 + $0x4a0] sm:$0xe]  ;;  %v6015_v62 = vld [vmem:[%s12039_s8 + $0x424] sm:$0x3] }
 0x199   : > { %11044 = vmatmul.mubr.bf16.vlgmr.msra.gmra.mrb[0].mxu0 %v9829_v44  ;;  %11092 = vmatprep.subr.bf16.mxu1 %v11802_v9  ;;  %v3985_v4 = vsel %vm12059_vm5, %v3983_v52, %v3984_v13  ;;  %v5954_v44 = vld [vmem:[%s12039_s8 + $0x488] sm:$0xf]  ;;  %v3996_v35 = vsel %vm12059_vm5, %v9353_v25, %v3995_v26  ;;  %v4005_v52 = vrot.slane %v9216_v46, 7  ;;  %v11808_v26 = vld [vmem:[%s13959_s2 + $0x5f8] sm:$0xff]  }
 0x19a   : > { %11060 = vmatpush3.bf16.msra.mxu0 %v11801_v17  ;;  %v7824_v17 = vrot.slane %v5949_v48, 5  ;;  %11047 = vmatprep.mubr.bf16.mxu0 %v9830_v49  ;;  %v9375_v1 = vcombine.low %v3982_v47, %v3985_v4  ;;  %v7835_v39 = vrot.slane %v5954_v44, 5  ;;  %v9377_v24 = vcombine.low %v3996_v35, %v3999_v51  ;;  %v5958_v48 = vld [vmem:[%s12039_s8 + $0x4a8] sm:$0x1]  ;;  %v6024_v35 = vld [vmem:[%s12039_s8 + $0x478] sm:$0x3] }
 0x19b   : > { %11061 = vmatprep.subr.bf16.mxu0 %v11802_v9  ;;  %v4002_v47 = vrot.slane %v9215_v41, 7  ;;  %v7842_v49 = vrot.slane %v5957_v23, 5  ;;  %v7845_v32 = vrot.slane %v5958_v48, 5  ;;  %v6014_v51 = vld [vmem:[%s12039_s8 + $0x420] sm:$0xf] }
 0x19c   : > { %11100 = vmatpush3.bf16.msra.mxu1 %v11802_v9  ;;  %v7825_v59 = vsel %vm12050_vm4, %v7823_v54, %v7824_v17  ;;  %v7836_v13 = vsel %vm12050_vm4, %v9809_v31, %v7835_v39  ;;  %v7837_v12 = vrot.slane %v7835_v39, 4  ;;  %v9217_v17 = vld [vmem:[%s12039_s8 + $0x178] sm:$0x8]  ;;  %v9219_v54 = vld [vmem:[%s12039_s8 + $0x180] sm:$0x7] }
 0x19d   : > { %11093 = vmatprep.subr.bf16.mxu1 %v11803_v14  ;;  %v9831_v6 = vcombine.low %v7822_v53, %v7825_v59  ;;  %v4003_v28 = vsel %vm12059_vm5, %v9354_v21, %v4002_v47  ;;  %v7844_v45 = vrot.slane %v7842_v49, 4  ;;  %v9355_v43 = vrot.slane %v9217_v17, 11  ;;  %v6022_v31 = vld [vmem:[%s12039_s8 + $0x470] sm:$0xc]  ;;  %v6013_v39 = vld [vmem:[%s12039_s8 + $0x41c] sm:$0xc] }
 0x19e   : > { %11062 = vmatpush3.bf16.msra.mxu0 %v11802_v9  ;;  %v7831_v9 = vrot.slane %v5952_v60, 5  ;;  %v7839_v50 = vsel %vm12050_vm4, %v7837_v12, %v7838_v40  ;;  %v4012_v57 = vrot.slane %v9219_v54, 7  ;;  %v5961_v60 = vld [vmem:[%s12039_s8 + $0x4c4] sm:$0x1]  ;;  %v9848_v36 = vrot.slane %v6022_v31, 10 }
 0x19f   : > { %11063 = vmatprep.subr.bf16.mxu0 %v11803_v14  ;;  %10664 = vmatmul.mubr.bf16.gmra.mrb[4].mxu1 %v9375_v1  ;;  %v9833_v4 = vcombine.low %v7836_v13, %v7839_v50  ;;  %v4004_v1 = vrot.slane %v4002_v47, 4  ;;  %v8129_v13 = vrot.slane %v6014_v51, 6  ;;  %v6025_v12 = vld [vmem:[%s12039_s8 + $0x48c] sm:$0xc]  ;;  %v6026_v23 = vld [vmem:[%s12039_s8 + $0x490] sm:$0xf] }
 0x1a0   : > { %11101 = vmatpush3.bf16.msra.mxu1 %v11803_v14  ;;  %v7832_v34 = vsel %vm12050_vm4, %v7830_v20, %v7831_v9  ;;  %10667 = vmatprep.mubr.bf16.mxu1 %v9376_v33  ;;  %v6010_v20 = vld [vmem:[%s12039_s8 + $0x400] sm:$0xc]  ;;  %v6023_v33 = vld [vmem:[%s12039_s8 + $0x474] sm:$0xf]  ;;  %v6017_v17 = vld [vmem:[%s12039_s8 + $0x43c] sm:$0xf] }
 0x1a1   : > { %11094 = vmatprep.subr.bf16.mxu1 %v11804_v61  ;;  %11048 = vmatmul.mubr.bf16.gmra.mrb[4].mxu0 %v9831_v6  ;;  %v9832_v37 = vcombine.low %v7829_v16, %v7832_v34  ;;  %v4006_v59 = vsel %vm12059_vm5, %v4004_v1, %v4005_v52  ;;  %v7846_v6 = vsel %vm12050_vm4, %v7844_v45, %v7845_v32  ;;  %v7852_v16 = vrot.slane %v5961_v60, 5  ;;  %v6027_v47 = vld [vmem:[%s12039_s8 + $0x494] sm:$0x3]  ;;  %v6016_v32 = vld [vmem:[%s12039_s8 + $0x438] sm:$0xc] }
 0x1a2   : > { %11064 = vmatpush3.bf16.msra.mxu0 %v11803_v14  ;;  %v9810_v14 = vrot.slane %v5956_v27, 9  ;;  %v9378_v3 = vcombine.low %v4003_v28, %v4006_v59  ;;  %v9844_v29 = vrot.slane %v6010_v20, 10  ;;  %v8132_v27 = vrot.slane %v6015_v62, 6  ;;  %v6018_v1 = vld [vmem:[%s12039_s8 + $0x440] sm:$0x3] }
 0x1a3   : > { %11065 = vmatprep.subr.bf16.mxu0 %v11804_v61  ;;  %11051 = vmatprep.mubr.bf16.mxu0 %v9832_v37  ;;  %v7853_v44 = vsel %vm12050_vm4, %v7851_v11, %v7852_v16  ;;  %v8150_v37 = vrot.slane %v6023_v33, 6  ;;  %v9849_v52 = vrot.slane %v6025_v12, 10  ;;  %v8131_v50 = vrot.slane %v8129_v13, 4  ;;  %v6028_v45 = vld [vmem:[%s12039_s8 + $0x4a8] sm:$0xc] }
 0x1a4   : > { %11102 = vmatpush3.bf16.msra.mxu1 %v11804_v61  ;;  %v7843_v53 = vsel %vm12050_vm4, %v9810_v14, %v7842_v49  ;;  %v9835_v34 = vcombine.low %v7850_v38, %v7853_v44  ;;  %v8123_v40 = vsel %vm12221_vm8, %v9844_v29, %v8122_v22  ;;  %v8160_v28 = vrot.slane %v6027_v47, 6  ;;  %v6030_v59 = vld [vmem:[%s12039_s8 + $0x4b0] sm:$0x3]  ;;  %v6021_v38 = vld [vmem:[%s12039_s8 + $0x45c] sm:$0x3] }
 0x1a5   : > { %11095 = vmatprep.subr.bf16.mxu1 %v11805_v0  ;;  %v9834_v9 = vcombine.low %v7843_v53, %v7846_v6  ;;  %v8151_v41 = vsel %vm12221_vm8, %v9848_v36, %v8150_v37  ;;  %v8152_v46 = vrot.slane %v8150_v37, 4  ;;  %v9846_v53 = vrot.slane %v6016_v32, 10  ;;  %v6031_v20 = vld [vmem:[%s12039_s8 + $0x4c4] sm:$0xc]  ;;  %v6032_v29 = vld [vmem:[%s12039_s8 + $0x4c8] sm:$0xf] }
 0x1a6   : > { %11066 = vmatpush3.bf16.msra.mxu0 %v11804_v61  ;;  %v9218_v61 = vld [vmem:[%s12039_s8 + $0x17c] sm:$0xf]  ;;  %v8133_v54 = vsel %vm12221_vm8, %v8131_v50, %v8132_v27  ;;  %v8136_v55 = vrot.slane %v6017_v17, 6  ;;  %v9850_v60 = vrot.slane %v6028_v45, 10  ;;  %v9847_v11 = vrot.slane %v6019_v2, 10 }
 0x1a7   : > { %11067 = vmatprep.subr.bf16.mxu0 %v11805_v0  ;;  %10668 = vmatmul.mubr.bf16.gmra.mrb[8].mxu1 %v9377_v24  ;;  %v4009_v56 = vrot.slane %v9218_v61, 7  ;;  %v9845_v24 = vrot.slane %v6013_v39, 10  ;;  %v8146_v31 = vrot.slane %v6021_v38, 6 }
 0x1a8   : > { %11103 = vmatpush3.bf16.msra.mxu1 %v11805_v0  ;;  %10671 = vmatprep.mubr.bf16.mxu1 %v9378_v3  ;;  %v8137_v58 = vsel %vm12221_vm8, %v9846_v53, %v8136_v55  ;;  %v8138_v3 = vrot.slane %v8136_v55, 4 }
 0x1a9   : > { %11096 = vmatprep.subr.bf16.mxu1 %v11806_v10  ;;  %11052 = vmatmul.mubr.bf16.gmra.mrb[8].mxu0 %v9833_v4  ;;  %v4010_v7 = vsel %vm12059_vm5, %v9355_v43, %v4009_v56  ;;  %v4011_v8 = vrot.slane %v4009_v56, 4  ;;  %v8130_v49 = vsel %vm12221_vm8, %v9845_v24, %v8129_v13  ;;  %v8157_v4 = vrot.slane %v6026_v23, 6  ;;  %v6029_v43 = vld [vmem:[%s12039_s8 + $0x4ac] sm:$0xf] }
 0x1aa   : > { %11068 = vmatpush3.bf16.msra.mxu0 %v11805_v0  ;;  %v6012_v0 = vld [vmem:[%s12039_s8 + $0x408] sm:$0x3]  ;;  %11055 = vmatprep.mubr.bf16.mxu0 %v9834_v9  ;;  %v9869_v56 = vcombine.low %v8130_v49, %v8133_v54  ;;  %v8164_v6 = vrot.slane %v6029_v43, 6 }
 0x1ab   : > { %11069 = vmatprep.subr.bf16.mxu0 %v11806_v10  ;;  %v4013_v25 = vsel %vm12059_vm5, %v4011_v8, %v4012_v57  ;;  %v8125_v19 = vrot.slane %v6012_v0, 6  ;;  %v8158_v57 = vsel %vm12221_vm8, %v9849_v52, %v8157_v4  ;;  %v8159_v5 = vrot.slane %v8157_v4, 4  ;;  %v6020_v8 = vld [vmem:[%s12039_s8 + $0x458] sm:$0xf] }
 0x1ac   : > { %11104 = vmatpush3.bf16.msra.mxu1 %v11806_v10  ;;  %v9379_v30 = vcombine.low %v4010_v7, %v4013_v25  ;;  %v8167_v7 = vrot.slane %v6030_v59, 6  ;;  %v8143_v16 = vrot.slane %v6020_v8, 6  ;;  %v8165_v42 = vsel %vm12221_vm8, %v9850_v60, %v8164_v6 }
 0x1ad   : > { %11097 = vmatprep.subr.bf16.mxu1 %v11807_v18  ;;  %v8126_v21 = vsel %vm12221_vm8, %v8124_v15, %v8125_v19  ;;  %v8161_v9 = vsel %vm12221_vm8, %v8159_v5, %v8160_v28  ;;  %v8166_v0 = vrot.slane %v8164_v6, 4 }
 0x1ae   : > { %11070 = vmatpush3.bf16.msra.mxu0 %v11806_v10  ;;  %v8153_v10 = vrot.slane %v6024_v35, 6  ;;  %v9868_v48 = vcombine.low %v8123_v40, %v8126_v21  ;;  %v9873_v25 = vcombine.low %v8158_v57, %v8161_v9  ;;  %v8144_v22 = vsel %vm12221_vm8, %v9847_v11, %v8143_v16 }
 0x1af   : > { %11071 = vmatprep.subr.bf16.mxu0 %v11807_v18  ;;  %10672 = vmatmul.mubr.bf16.gmra.mrb[12].mxu1 %v9379_v30  ;;  %v6033_v30 = vld [vmem:[%s12039_s8 + $0x4cc] sm:$0x3]  ;;  %v8145_v19 = vrot.slane %v8143_v16, 4  ;;  %v8168_v33 = vsel %vm12221_vm8, %v8166_v0, %v8167_v7  ;;  %v8171_v35 = vrot.slane %v6032_v29, 6  ;;  %s298_s8 = scalar_select %p297_p13, %s11891_s19, 1 }
 0x1b0   : > { %11105 = vmatpush3.bf16.msra.mxu1 %v11807_v18  ;;  %v8154_v14 = vsel %vm12221_vm8, %v8152_v46, %v8153_v10  ;;  %v8174_v36 = vrot.slane %v6033_v30, 6  ;;  %v9874_v37 = vcombine.low %v8165_v42, %v8168_v33  ;;  %s8492_s19 = sshll.u32 %s13854_s9, 4  ;;  %s13895_s19 = int_to_ptr.vmem [resolvable:$true] %s8492_s19 }
 0x1b1   : > { %11056 = vmatmul.mubr.bf16.gmra.mrb[12].mxu0 %v9835_v34  ;;  %11098 = vmatprep.subr.bf16.mxu1 %v11808_v26  ;;  %v9872_v61 = vcombine.low %v8151_v41, %v8154_v14  ;;  %v9851_v34 = vrot.slane %v6031_v20, 10  ;;  %v8147_v39 = vsel %vm12221_vm8, %v8145_v19, %v8146_v31  ;;  %v8173_v15 = vrot.slane %v8171_v35, 4  ;;  %s299_s6 = scalar_lea.vmem %s13960_s3, %s298_s8  ;;  %s13905_s8 = scalar_lea.sflag [#allocation4], %s270_s27 }
 0x1b2   : > { %11072 = vmatpush3.bf16.msra.mxu0 %v11807_v18  ;;  %11075 = vmatprep.mubr.bf16.mxu0 %v9868_v48  ;;  %v8139_v18 = vrot.slane %v6018_v1, 6  ;;  %v9871_v10 = vcombine.low %v8144_v22, %v8147_v39  ;;  %s11809_s30 = scalar_lea.vmem %s13895_s19, 2048 }
 0x1b3   : > { %11073 = vmatprep.subr.bf16.mxu0 %v11808_v26  ;;  %11083 = vmatprep.mubr.bf16.mxu1 %v9872_v61  ;;  %v8172_v40 = vsel %vm12221_vm8, %v9851_v34, %v8171_v35  ;;  %v8175_v51 = vsel %vm12221_vm8, %v8173_v15, %v8174_v36  ;;  %p11810_p0 = scmp.ne.s32.totalorder %s13895_s19, %s11809_s30 }
 0x1b4   : > { %11106 = vmatpush3.bf16.msra.mxu1 %v11808_v26  ;;  %v9875_v62 = vcombine.low %v8172_v40, %v8175_v51 }
 0x1b5   : > { %p11811_p1 = pnand %p11810_p0, %p11984_p3 }
 0x1b6   : > { %11074 = vmatpush3.bf16.msra.mxu0 %v11808_v26  ;;  %v8140_v26 = vsel %vm12221_vm8, %v8138_v3, %v8139_v18 }
 0x1b7   : > { %v9870_v44 = vcombine.low %v8137_v58, %v8140_v26  ;;  %11084 = vmatmul.mubr.bf16.vlgmr.msra.gmra.mrb[16].mxu1 %v9873_v25  ;;  %v13849_v58 = vld [vmem:[%s299_s6] ss:$0 sm:$0xff]  ;;  %p11812_p2 = pneg %p11811_p1  ;;  %s11813_s6 = sshll.u32 %s11905_s5, 4  ;;  %s11814_s6 = int_to_ptr.vmem [resolvable:$false] %s11813_s6 }
 0x1b8   : > { %11087 = vmatprep.mubr.bf16.mxu1 %v9874_v37  ;;  %s11815_s13 = scalar_lea.vmem %s11814_s6, 4096  ;;  %p11816_p4 = scmp.lt.s32.totalorder %s13895_s19, %s11814_s6 }
 0x1b9   : > { %11076 = vmatmul.mubr.bf16.vlgmr.msra.gmra.mrb[0].mxu0 %v9869_v56  ;;  %p11817_p5 = scmp.lt.s32.totalorder %s11815_s13, %s11809_s30 }
 0x1ba   : > { %11079 = vmatprep.mubr.bf16.mxu0 %v9870_v44 }
 0x1bb   : > { %p11818_p6 = por %p11817_p5, %p11816_p4 }
 0x1bd   : > { %p11819_p7 = pnand %p11818_p6, %p11812_p2 }
 0x1bf   : > { %11088 = vmatmul.mubr.bf16.gmra.mrb[20].mxu1 %v9875_v62 }
 0x1c1   : > { %11080 = vmatmul.mubr.bf16.gmra.mrb[4].mxu0 %v9871_v10 }
 0x26a   : > { %v10661_v41 = vpop.f32.mrb[0].mxu1 }
 0x26b   : > { %v4161_v46 = vpop.f32.mrb[1].mxu1 }
 0x26c   : > { %v10662_v24 = vpop.f32.mrb[2].mxu1 }
 0x26d   : > { %v4164_v13 = vpop.f32.mrb[3].mxu1 }
 0x272   : > { %v13831_v12 = vpop.f32.mrb[4].mxu1 }
 0x273   : > { %v13833_v21 = vpop.f32.mrb[5].mxu1 }
 0x274   : > { %v13835_v27 = vpop.f32.mrb[6].mxu1 }
 0x275   : > { %v13837_v23 = vpop.f32.mrb[7].mxu1 }
 0x27a   : > { %v10669_v47 = vpop.f32.mrb[8].mxu1 }
 0x27b   : > { %v4193_v52 = vpop.f32.mrb[9].mxu1 }
 0x27c   : > { %v10670_v63 = vpop.f32.mrb[10].mxu1  ;;  %v11053_v48 = vpop.f32.mrb[8].mxu0 }
 0x27d   : > { %v4196_v14 = vpop.f32.mrb[11].mxu1  ;;  %v11115_v49 = vadd.f32 %v11053_v48, %v10669_v47  ;;  %v8033_v50 = vpop.f32.mrb[9].mxu0 }
 0x27e   : > { %v11117_v32 = vadd.f32 %v8033_v50, %v4193_v52  ;;  %v11054_v17 = vpop.f32.mrb[10].mxu0 }
 0x27f   : > { %v11119_v61 = vadd.f32 %v11054_v17, %v10670_v63  ;;  %v8036_v4 = vpop.f32.mrb[11].mxu0 }
 0x280   : > { %v11121_v28 = vadd.f32 %v8036_v4, %v4196_v14 }
 0x282   : > { %v10673_v1 = vpop.f32.mrb[12].mxu1 }
 0x283   : > { %v4209_v53 = vpop.f32.mrb[13].mxu1 }
 0x284   : > { %v11057_v54 = vpop.f32.mrb[12].mxu0  ;;  %v10674_v55 = vpop.f32.mrb[14].mxu1 }
 0x285   : > { %v11123_v18 = vadd.f32 %v11057_v54, %v10673_v1  ;;  %v8049_v45 = vpop.f32.mrb[13].mxu0  ;;  %v4212_v43 = vpop.f32.mrb[15].mxu1 }
 0x286   : > { %v11125_v56 = vadd.f32 %v8049_v45, %v4209_v53  ;;  %v11058_v57 = vpop.f32.mrb[14].mxu0 }
 0x287   : > { %v11127_v5 = vadd.f32 %v11058_v57, %v10674_v55  ;;  %v8052_v59 = vpop.f32.mrb[15].mxu0 }
 0x288   : > { %v13841_v60 = vadd.f32 %v8052_v59, %v4212_v43 }
 0x28a   : > { %v11085_v6 = vpop.f32.mrb[16].mxu1 }
 0x28b   : > { %v11116_v8 = vadd.f32 %v11115_v49, %v11085_v6  ;;  %v8355_v38 = vpop.f32.mrb[17].mxu1 }
 0x28c   : > { %v11077_v2 = vpop.f32.mrb[0].mxu0  ;;  %v11118_v20 = vadd.f32 %v11117_v32, %v8355_v38  ;;  %v11086_v26 = vpop.f32.mrb[18].mxu1 }
 0x28d   : > { %v11107_v3 = vadd.f32 %v11077_v2, %v10661_v41  ;;  %v8323_v7 = vpop.f32.mrb[1].mxu0  ;;  %v8454_v0 = vadd.f32 %v11116_v8, %v13849_v58  ;;  %v11120_v30 = vadd.f32 %v11119_v61, %v11086_v26  ;;  %v8358_v22 = vpop.f32.mrb[19].mxu1 }
 0x28e   : > { %v11108_v9 = vadd.f32 %v8323_v7, %v4161_v46  ;;  %v11078_v11 = vpop.f32.mrb[2].mxu0  ;;  %v8452_v19 = vadd.f32 %v11118_v20, %v13849_v58  ;;  %v11122_v33 = vadd.f32 %v11121_v28, %v8358_v22 }
 0x28f   : > { %v8446_v16 = vadd.f32 %v11107_v3, %v13849_v58  ;;  %v11109_v25 = vadd.f32 %v11078_v11, %v10662_v24  ;;  %v8326_v42 = vpop.f32.mrb[3].mxu0  ;;  %8470 = vst [vmem:[%s13854_s9 + $0x50] sm:$0xff] %v8454_v0  ;;  %v8455_v34 = vadd.f32 %v11120_v30, %v13849_v58 }
 0x290   : > { %v8444_v29 = vadd.f32 %v11108_v9, %v13849_v58  ;;  %v11110_v44 = vadd.f32 %v8326_v42, %v4164_v13  ;;  %8468 = vst [vmem:[%s13854_s9 + $0x40] sm:$0xff] %v8452_v19  ;;  %v8453_v36 = vadd.f32 %v11122_v33, %v13849_v58 }
 0x291   : > { %8462 = vst [vmem:[%s13854_s9 + $0x10] sm:$0xff] %v8446_v16  ;;  %v8447_v31 = vadd.f32 %v11109_v25, %v13849_v58  ;;  %8471 = vst [vmem:[%s13854_s9 + $0x58] sm:$0xff] %v8455_v34 }
 0x292   : > { %8460 = vst [vmem:[%s13854_s9] sm:$0xff] %v8444_v29  ;;  %v8445_v35 = vadd.f32 %v11110_v44, %v13849_v58  ;;  %8469 = vst [vmem:[%s13854_s9 + $0x48] sm:$0xff] %v8453_v36  ;;  %v11089_v40 = vpop.f32.mrb[20].mxu1 }
 0x293   : > { %8463 = vst [vmem:[%s13854_s9 + $0x18] sm:$0xff] %v8447_v31  ;;  %v11124_v10 = vadd.f32 %v11123_v18, %v11089_v40  ;;  %v8371_v62 = vpop.f32.mrb[21].mxu1 }
 0x294   : > { %8461 = vst [vmem:[%s13854_s9 + $0x8] sm:$0xff] %v8445_v35  ;;  %v11081_v37 = vpop.f32.mrb[4].mxu0  ;;  %v11126_v24 = vadd.f32 %v11125_v56, %v8371_v62  ;;  %v11090_v47 = vpop.f32.mrb[22].mxu1 }
 0x295   : > { %v11111_v39 = vadd.f32 %v11081_v37, %v13831_v12  ;;  %v8339_v15 = vpop.f32.mrb[5].mxu0  ;;  %v8458_v12 = vadd.f32 %v11124_v10, %v13849_v58  ;;  %v8374_v14 = vpop.f32.mrb[23].mxu1 }
 0x296   : > { %v11112_v51 = vadd.f32 %v8339_v15, %v13833_v21  ;;  %v11082_v41 = vpop.f32.mrb[6].mxu0  ;;  %v11128_v21 = vadd.f32 %v11127_v5, %v11090_v47  ;;  %v11130_v50 = vadd.f32 %v13841_v60, %v8374_v14 }
 0x297   : > { %v8450_v46 = vadd.f32 %v11111_v39, %v13849_v58  ;;  %v11113_v13 = vadd.f32 %v11082_v41, %v13835_v27  ;;  %v8342_v52 = vpop.f32.mrb[7].mxu0  ;;  %v8456_v27 = vadd.f32 %v11126_v24, %v13849_v58  ;;  %8474 = vst [vmem:[%s13854_s9 + $0x70] sm:$0xff] %v8458_v12 }
 0x298   : > { %v8448_v63 = vadd.f32 %v11112_v51, %v13849_v58  ;;  %v11114_v48 = vadd.f32 %v8342_v52, %v13837_v23  ;;  %v8459_v32 = vadd.f32 %v11128_v21, %v13849_v58  ;;  %v8457_v23 = vadd.f32 %v11130_v50, %v13849_v58 }
 0x299   : > { %8466 = vst [vmem:[%s13854_s9 + $0x30] sm:$0xff] %v8450_v46  ;;  %v8451_v49 = vadd.f32 %v11113_v13, %v13849_v58  ;;  %8472 = vst [vmem:[%s13854_s9 + $0x60] sm:$0xff] %v8456_v27 }
 0x29a   : > { %8464 = vst [vmem:[%s13854_s9 + $0x20] sm:$0xff] %v8448_v63  ;;  %v8449_v17 = vadd.f32 %v11114_v48, %v13849_v58  ;;  %8475 = vst [vmem:[%s13854_s9 + $0x78] sm:$0xff] %v8459_v32 }
 0x29b   : > { %8467 = vst [vmem:[%s13854_s9 + $0x38] sm:$0xff] %v8451_v49  ;;  %8473 = vst [vmem:[%s13854_s9 + $0x68] sm:$0xff] %v8457_v23 }
 0x29c   : > { %8465 = vst [vmem:[%s13854_s9 + $0x28] sm:$0xff] %v8449_v17 }
 0x29d   : > { %11822 = shalt.err (!%p11819_p7)
}
 0x29e   : > { %s11823_s27 = scalar_lea.hbm %s13893_s24, 2048  ;;  %s11827_s11 = scalar_lea.hbm %s13961_s4, 8192 }
 0x29f   : > { %p11824_p9 = scmp.ne.s32.totalorder %s13893_s24, %s11823_s27  ;;  %p11828_p12 = scmp.lt.u32.totalorder %s13893_s24, %s13961_s4 }
 0x2a0   : > { %p11829_p13 = scmp.lt.u32.totalorder %s11827_s11, %s11823_s27  ;;  %p11831_p1 = scmp.lt.u32.totalorder %s11823_s27, %s13893_s24 }
 0x2a1   : > { %p11825_p10 = pnand %p11824_p9, %p11984_p3 }
 0x2a2   : > { %p11830_p0 = por %p11829_p13, %p11828_p12 }
 0x2a3   : > { %p11826_p11 = pneg %p11825_p10 }
 0x2a4   : > { %p11832_p2 = por %p11831_p1, %p11830_p0 }
 0x2a6   : > { %p11833_p4 = pnand %p11832_p2, %p11826_p11 }
 0x2a8   : > { %11836 = shalt.err (!%p11833_p4)
}
 0x2a9   : > { %s11906_s14 = smov 128   ;;  %s11907_s23 = smov 8  }
 0x2aa   : > { %11492 = dma.vmem_to_hbm [thread:$0]  (%p11984_p3), %s13895_s19, 2048, %s13893_s24, %s13905_s8, %s11906_s14, %s11906_s14, %s11907_s23  }
 0x2ab PF: > { %p11498_p5 = scmp.ge.s32.totalorder %s11903_s22, 2  ;;  %s8507_s30 = sand.u32 1, %s11875_s15  }
 0x2ac   : > { %s8508_s5 = scalar_lea.sflag [#allocation4], %s8507_s30 }
 0x2ad   : > { %p11495_p6 = pnand %p11498_p5, %p11993_p8 }
 0x2af   : > { %11870 = dma.done.wait (!%p11495_p6), %s8508_s5, 2048  }
 0x2b0   : > { %11872 = vsyncadd (!%p11495_p6), %s8508_s5, 4294965248  ;;  %s17_s22 = sadd.s32 1, %s11903_s22   ;;  %s13970_s15 = smov %s11879_s16 }
 0x2b1   : > { %p14_p7 = scmp.ge.s32.totalorder %s17_s22, 6   ;;  %s13971_s16 = smov %s11883_s17 }
 0x2b2   : > { %s13972_s17 = smov %s12002_s7  ;;  %s13973_s18 = smov %s11895_s20 }
 0x2b3   : > { %s13974_s19 = smov %s11899_s21  ;;  %s13975_s20 = smov %s13978_s25 }
 0x2b4   : > { %s13976_s21 = smov %s13982_s26  ;;  %16 = sbr.rel (!%p14_p7) target bundleno = 5 (0x5), region = 114 }
 0x2bb   :  { %8513 = vsyncpa [#allocation4], 1 }
 0x2bc   :  { %8515 = vsyncpa [#allocation4 + $0x1], 1 }

</bundles_post_ra>
